<compile_context>
chip_gen: v6e
topology: v6e:2x2x1
jax: 0.10.0
libtpu: 0.0.40
codegen_flags: <defaults>
</compile_context>

<pallas_src>
import functools

import jax
import jax.numpy as jnp
from jax.experimental import pallas as pl
from jax.experimental.pallas import tpu as pltpu

BN_EPS = 1e-5
WOFF = 8   # sublane-aligned column offset of the "interior" in padded scratch


def _basic_block_kernel(x_ref, w1_ref, s1_ref, b1_ref, w2_ref, s2_ref, b2_ref,
                        caw1_ref, caw2_ref, paw_ref,
                        o_ref,
                        xpad_ref, avgpad_ref, maxpad_ref,
                        *, H, W, C, Cp):
    # ---- zero the padded scratch buffers (borders must be 0 every step) ----
    xpad_ref[...] = jnp.zeros_like(xpad_ref)
    avgpad_ref[...] = jnp.zeros_like(avgpad_ref)
    maxpad_ref[...] = jnp.zeros_like(maxpad_ref)

    x = x_ref[...]                                   # (H, W, C)

    # conv1 input: write real channels into the Cp-wide zeroed scratch.
    xpad_ref[1:H + 1, WOFF:WOFF + W, :C] = x

    def conv3x3_bn(w_ref, s_ref, b_ref, relu):
        # 3 MXU dots with K = 3*Cp: kw taps are concatenated along the
        # contraction (lane) axis at 128-aligned offsets.
        acc = jnp.zeros((H * W, Cp), jnp.float32)
        for kh in range(3):
            parts = [xpad_ref[kh:kh + H, WOFF - 1 + kw:WOFF - 1 + kw + W, :]
                     for kw in range(3)]
            patch = jnp.concatenate(parts, axis=-1).reshape(H * W, 3 * Cp)
            acc = acc + jnp.dot(patch, w_ref[kh],
                                preferred_element_type=jnp.float32)
        out = acc * s_ref[...] + b_ref[...]          # folded BN (padded lanes->0)
        if relu:
            out = jnp.maximum(out, 0.0)
        return out                                   # (H*W, Cp)

    # ---- conv1 + BN1 + ReLU, conv2 + BN2 (conv2 input stays in VMEM) -------
    h1 = conv3x3_bn(w1_ref, s1_ref, b1_ref, relu=True)
    xpad_ref[1:H + 1, WOFF:WOFF + W, :] = h1.reshape(H, W, Cp)
    h2 = conv3x3_bn(w2_ref, s2_ref, b2_ref, relu=False)   # (H*W, Cp)

    # ---- ChannelAttention (global avg pool -> 1x1 -> ReLU -> 1x1 ->
    #      Hardswish -> sigmoid -> channel scale) ----------------------------
    pooled = jnp.mean(h2, axis=0, keepdims=True)           # (1, Cp)
    y = jnp.maximum(jnp.dot(pooled, caw1_ref[...],
                            preferred_element_type=jnp.float32), 0.0)
    y = jnp.dot(y, caw2_ref[...], preferred_element_type=jnp.float32)
    y = y * jnp.clip(y + 3.0, 0.0, 6.0) * (1.0 / 6.0)       # Hardswish
    att = jax.nn.sigmoid(y)                                 # (1, Cp)
    xca = h2 * att                                          # (H*W, Cp); pad lanes 0
    xca3 = xca.reshape(H, W, Cp)

    # ---- PositionAttention: per-pixel channel mean / max (mask pad lanes) --
    lane = jax.lax.broadcasted_iota(jnp.int32, (H, W, Cp), 2)
    avg3 = jnp.sum(xca3, axis=-1, keepdims=True) * (1.0 / C)            # (H,W,1)
    mx3 = jnp.max(jnp.where(lane < C, xca3, -jnp.inf), axis=-1, keepdims=True)
    avgpad_ref[3:3 + H, WOFF:WOFF + W, :] = avg3
    maxpad_ref[3:3 + H, WOFF:WOFF + W, :] = mx3

    # ---- 7x7 conv (2 -> 1 channel, weights read as scalars from SMEM) ------
    conv = jnp.zeros((H, W, 1), jnp.float32)
    for kh in range(7):
        for kw in range(7):
            wa = paw_ref[(kh * 7 + kw) * 2]        # avg-channel tap weight
            wm = paw_ref[(kh * 7 + kw) * 2 + 1]    # max-channel tap weight
            conv = conv + avgpad_ref[kh:kh + H,
                                     WOFF - 3 + kw:WOFF - 3 + kw + W, :] * wa
            conv = conv + maxpad_ref[kh:kh + H,
                                     WOFF - 3 + kw:WOFF - 3 + kw + W, :] * wm
    gate = jax.nn.sigmoid(conv)                             # (H, W, 1)

    # ---- spatial gate * xca + identity, final ReLU --------------------------
    out = jnp.maximum(xca3[:, :, :C] * gate + x, 0.0)
    o_ref[...] = out


def basic_block_forward(x, p):
    N, H, W, C = x.shape
    Cp = ((C + 127) // 128) * 128          # lane-padded channel width (VMEM only)
    Cr = p["ca_w1"].shape[1]

    # Fold BatchNorm running stats into per-channel scale/bias (inference).
    s1 = p["bn1_gamma"] / jnp.sqrt(p["bn1_var"] + BN_EPS)
    b1 = p["bn1_beta"] - p["bn1_mean"] * s1
    s2 = p["bn2_gamma"] / jnp.sqrt(p["bn2_var"] + BN_EPS)
    b2 = p["bn2_beta"] - p["bn2_mean"] * s2

    def pad_conv_w(w):                      # (3,3,C,C) -> (3, 3*Cp, Cp)
        wp = jnp.zeros((3, 3, Cp, Cp), jnp.float32).at[:, :, :C, :C].set(w)
        return wp.reshape(3, 3 * Cp, Cp)

    def pad_vec(v):                         # (C,) -> (1, Cp)
        return jnp.zeros((1, Cp), jnp.float32).at[0, :C].set(v)

    w1p, w2p = pad_conv_w(p["w1"]), pad_conv_w(p["w2"])
    s1p, b1p = pad_vec(s1), pad_vec(b1)
    s2p, b2p = pad_vec(s2), pad_vec(b2)
    caw1p = jnp.zeros((Cp, Cr), jnp.float32).at[:C, :].set(p["ca_w1"])
    caw2p = jnp.zeros((Cr, Cp), jnp.float32).at[:, :C].set(p["ca_w2"])
    paw = p["pa_w"].reshape(-1)             # (98,) row-major (kh, kw, c)

    kernel = functools.partial(_basic_block_kernel, H=H, W=W, C=C, Cp=Cp)

    return pl.pallas_call(
        kernel,
        out_shape=jax.ShapeDtypeStruct((N, H, W, C), jnp.float32),
        grid=(N,),
        in_specs=[
            pl.BlockSpec((None, H, W, C), lambda n: (n, 0, 0, 0)),      # x
            pl.BlockSpec((3, 3 * Cp, Cp), lambda n: (0, 0, 0)),         # w1
            pl.BlockSpec((1, Cp), lambda n: (0, 0)),                    # s1
            pl.BlockSpec((1, Cp), lambda n: (0, 0)),                    # b1
            pl.BlockSpec((3, 3 * Cp, Cp), lambda n: (0, 0, 0)),         # w2
            pl.BlockSpec((1, Cp), lambda n: (0, 0)),                    # s2
            pl.BlockSpec((1, Cp), lambda n: (0, 0)),                    # b2
            pl.BlockSpec((Cp, Cr), lambda n: (0, 0)),                   # ca_w1
            pl.BlockSpec((Cr, Cp), lambda n: (0, 0)),                   # ca_w2
            pl.BlockSpec(memory_space=pltpu.MemorySpace.SMEM),          # pa_w
        ],
        out_specs=pl.BlockSpec((None, H, W, C), lambda n: (n, 0, 0, 0)),
        scratch_shapes=[
            pltpu.VMEM((H + 2, W + 16, Cp), jnp.float32),   # padded conv input
            pltpu.VMEM((H + 6, W + 16, 1), jnp.float32),    # padded avg map
            pltpu.VMEM((H + 6, W + 16, 1), jnp.float32),    # padded max map
        ],
        compiler_params=pltpu.CompilerParams(
            dimension_semantics=("parallel",)),
    )(x, w1p, s1p, b1p, w2p, s2p, b2p, caw1p, caw2p, paw)


# ---------------------------------------------------------------------------
# Pure-JAX reference (correctness check).
# ---------------------------------------------------------------------------
def reference_forward(x, p):
    def conv(inp, w, pad):
        return jax.lax.conv_general_dilated(
            inp, w, window_strides=(1, 1), padding=[(pad, pad), (pad, pad)],
            dimension_numbers=("NHWC", "HWIO", "NHWC"))

    s1 = p["bn1_gamma"] / jnp.sqrt(p["bn1_var"] + BN_EPS)
    b1 = p["bn1_beta"] - p["bn1_mean"] * s1
    s2 = p["bn2_gamma"] / jnp.sqrt(p["bn2_var"] + BN_EPS)
    b2 = p["bn2_beta"] - p["bn2_mean"] * s2

    out = jnp.maximum(conv(x, p["w1"], 1) * s1 + b1, 0.0)
    out = conv(out, p["w2"], 1) * s2 + b2
    # ChannelAttention
    pooled = jnp.mean(out, axis=(1, 2))
    y = jnp.maximum(pooled @ p["ca_w1"], 0.0) @ p["ca_w2"]
    y = y * jnp.clip(y + 3.0, 0.0, 6.0) / 6.0
    out = out * jax.nn.sigmoid(y)[:, None, None, :]
    # PositionAttention
    sp = jnp.concatenate([jnp.mean(out, -1, keepdims=True),
                          jnp.max(out, -1, keepdims=True)], axis=-1)
    gate = jax.nn.sigmoid(conv(sp, p["pa_w"][..., None], 3))
    out = out * gate + x
    return jnp.maximum(out, 0.0)


if __name__ == "__main__":
    N, H, W, C = 2, 8, 8, 32          # inplanes = planes = 32, stride = 1
    reduction = 16
    Cr = C // reduction

    keys = jax.random.split(jax.random.PRNGKey(0), 16)
    x = jax.random.normal(keys[0], (N, H, W, C), jnp.float32)

    params = {
        "w1": jax.random.normal(keys[1], (3, 3, C, C), jnp.float32) * 0.1,
        "w2": jax.random.normal(keys[2], (3, 3, C, C), jnp.float32) * 0.1,
        "bn1_gamma": 1.0 + 0.1 * jax.random.normal(keys[3], (C,), jnp.float32),
        "bn1_beta": 0.1 * jax.random.normal(keys[4], (C,), jnp.float32),
        "bn1_mean": 0.05 * jax.random.normal(keys[5], (C,), jnp.float32),
        "bn1_var": 1.0 + 0.1 * jnp.abs(jax.random.normal(keys[6], (C,), jnp.float32)),
        "bn2_gamma": 1.0 + 0.1 * jax.random.normal(keys[7], (C,), jnp.float32),
        "bn2_beta": 0.1 * jax.random.normal(keys[8], (C,), jnp.float32),
        "bn2_mean": 0.05 * jax.random.normal(keys[9], (C,), jnp.float32),
        "bn2_var": 1.0 + 0.1 * jnp.abs(jax.random.normal(keys[10], (C,), jnp.float32)),
        "ca_w1": jax.random.normal(keys[11], (C, Cr), jnp.float32) * 0.2,
        "ca_w2": jax.random.normal(keys[12], (Cr, C), jnp.float32) * 0.2,
        "pa_w": jax.random.normal(keys[13], (7, 7, 2), jnp.float32) * 0.1,
    }

    out = basic_block_forward(x, params)
    out = jax.block_until_ready(out)

    ref = jax.block_until_ready(reference_forward(x, params))
    assert out.shape == (N, H, W, C)
    max_err = float(jnp.max(jnp.abs(out - ref)))
    assert max_err < 5e-4, f"mismatch vs reference, max_err={max_err}"

    print("KERNEL_OK")
</pallas_src>

<mosaic_0001>
module attributes {stable_mosaic.version = 11 : i64} {
  func.func @_basic_block_kernel(%arg0: i32, %arg1: memref<1x8x8x32xf32, #tpu.memory_space<vmem>>, %arg2: memref<3x384x128xf32, #tpu.memory_space<vmem>>, %arg3: memref<1x128xf32, #tpu.memory_space<vmem>>, %arg4: memref<1x128xf32, #tpu.memory_space<vmem>>, %arg5: memref<3x384x128xf32, #tpu.memory_space<vmem>>, %arg6: memref<1x128xf32, #tpu.memory_space<vmem>>, %arg7: memref<1x128xf32, #tpu.memory_space<vmem>>, %arg8: memref<128x2xf32, #tpu.memory_space<vmem>>, %arg9: memref<2x128xf32, #tpu.memory_space<vmem>>, %arg10: memref<98xf32, #tpu.memory_space<smem>>, %arg11: memref<1x8x8x32xf32, #tpu.memory_space<vmem>>, %arg12: memref<10x24x128xf32, #tpu.memory_space<vmem>>, %arg13: memref<14x24x1xf32, #tpu.memory_space<vmem>>, %arg14: memref<14x24x1xf32, #tpu.memory_space<vmem>>) attributes {dimension_semantics = [#tpu.dimension_semantics<parallel>], iteration_bounds = array<i64: 2>, scalar_prefetch = 0 : i64, scratch_operands = 3 : i64, tpu.core_type = #tpu.core_type<tc>, window_params = [{transform_indices = @transform_0, window_bounds = array<i64: 1, 8, 8, 32>}, {pipeline_mode = #tpu.pipeline_mode<synchronous>, transform_indices = @transform_1, window_bounds = array<i64: 3, 384, 128>}, {pipeline_mode = #tpu.pipeline_mode<synchronous>, transform_indices = @transform_2, window_bounds = array<i64: 1, 128>}, {pipeline_mode = #tpu.pipeline_mode<synchronous>, transform_indices = @transform_3, window_bounds = array<i64: 1, 128>}, {pipeline_mode = #tpu.pipeline_mode<synchronous>, transform_indices = @transform_4, window_bounds = array<i64: 3, 384, 128>}, {pipeline_mode = #tpu.pipeline_mode<synchronous>, transform_indices = @transform_5, window_bounds = array<i64: 1, 128>}, {pipeline_mode = #tpu.pipeline_mode<synchronous>, transform_indices = @transform_6, window_bounds = array<i64: 1, 128>}, {pipeline_mode = #tpu.pipeline_mode<synchronous>, transform_indices = @transform_7, window_bounds = array<i64: 128, 2>}, {pipeline_mode = #tpu.pipeline_mode<synchronous>, transform_indices = @transform_8, window_bounds = array<i64: 2, 128>}, {transform_indices = @transform_9, window_bounds = array<i64: 98>}, {transform_indices = @transform_10, window_bounds = array<i64: 1, 8, 8, 32>}]} {
    %cst = arith.constant 0.000000e+00 : f32
    %0 = vector.broadcast %cst : f32 to vector<10x24x128xf32>
    %c0 = arith.constant 0 : index
    %c0_0 = arith.constant 0 : index
    %c0_1 = arith.constant 0 : index
    %1 = vector.load %arg12[%c0, %c0_0, %c0_1] : memref<10x24x128xf32, #tpu.memory_space<vmem>>, vector<10x24x128xf32>
    tpu.vector_store %arg12[%c0, %c0_0, %c0_1], %0 {strides = array<i32>} : memref<10x24x128xf32, #tpu.memory_space<vmem>>, vector<10x24x128xf32>,
    %cst_2 = arith.constant 0.000000e+00 : f32
    %2 = vector.broadcast %cst_2 : f32 to vector<14x24x1xf32>
    %c0_3 = arith.constant 0 : index
    %c0_4 = arith.constant 0 : index
    %c0_5 = arith.constant 0 : index
    %3 = vector.load %arg13[%c0_3, %c0_4, %c0_5] : memref<14x24x1xf32, #tpu.memory_space<vmem>>, vector<14x24x1xf32>
    tpu.vector_store %arg13[%c0_3, %c0_4, %c0_5], %2 {strides = array<i32>} : memref<14x24x1xf32, #tpu.memory_space<vmem>>, vector<14x24x1xf32>,
    %cst_6 = arith.constant 0.000000e+00 : f32
    %4 = vector.broadcast %cst_6 : f32 to vector<14x24x1xf32>
    %c0_7 = arith.constant 0 : index
    %c0_8 = arith.constant 0 : index
    %c0_9 = arith.constant 0 : index
    %5 = vector.load %arg14[%c0_7, %c0_8, %c0_9] : memref<14x24x1xf32, #tpu.memory_space<vmem>>, vector<14x24x1xf32>
    tpu.vector_store %arg14[%c0_7, %c0_8, %c0_9], %4 {strides = array<i32>} : memref<14x24x1xf32, #tpu.memory_space<vmem>>, vector<14x24x1xf32>,
    %c0_10 = arith.constant 0 : index
    %c0_11 = arith.constant 0 : index
    %c0_12 = arith.constant 0 : index
    %c0_13 = arith.constant 0 : index
    %6 = vector.load %arg1[%c0_10, %c0_11, %c0_12, %c0_13] : memref<1x8x8x32xf32, #tpu.memory_space<vmem>>, vector<1x8x8x32xf32>
    %7 = vector.shape_cast %6 : vector<1x8x8x32xf32> to vector<8x8x32xf32>
    %c1 = arith.constant 1 : index
    %c8 = arith.constant 8 : index
    %c0_14 = arith.constant 0 : index
    %8 = vector.load %arg12[%c1, %c8, %c0_14] : memref<10x24x128xf32, #tpu.memory_space<vmem>>, vector<8x8x32xf32>
    tpu.vector_store %arg12[%c1, %c8, %c0_14], %7 {strides = array<i32>} : memref<10x24x128xf32, #tpu.memory_space<vmem>>, vector<8x8x32xf32>,
    %cst_15 = arith.constant 0.000000e+00 : f32
    %9 = vector.broadcast %cst_15 : f32 to vector<64x128xf32>
    %c0_16 = arith.constant 0 : index
    %c7 = arith.constant 7 : index
    %c0_17 = arith.constant 0 : index
    %10 = vector.load %arg12[%c0_16, %c7, %c0_17] : memref<10x24x128xf32, #tpu.memory_space<vmem>>, vector<8x8x128xf32>
    %c0_18 = arith.constant 0 : index
    %c8_19 = arith.constant 8 : index
    %c0_20 = arith.constant 0 : index
    %11 = vector.load %arg12[%c0_18, %c8_19, %c0_20] : memref<10x24x128xf32, #tpu.memory_space<vmem>>, vector<8x8x128xf32>
    %c0_21 = arith.constant 0 : index
    %c9 = arith.constant 9 : index
    %c0_22 = arith.constant 0 : index
    %12 = vector.load %arg12[%c0_21, %c9, %c0_22] : memref<10x24x128xf32, #tpu.memory_space<vmem>>, vector<8x8x128xf32>
    %13 = tpu.concatenate %10, %11, %12 in 2 : vector<8x8x128xf32>, vector<8x8x128xf32>, vector<8x8x128xf32> -> vector<8x8x384xf32>
    %14 = vector.shape_cast %13 : vector<8x8x384xf32> to vector<64x384xf32>
    %c0_23 = arith.constant 0 : index
    %c0_24 = arith.constant 0 : index
    %c0_25 = arith.constant 0 : index
    %15 = vector.load %arg2[%c0_23, %c0_24, %c0_25] : memref<3x384x128xf32, #tpu.memory_space<vmem>>, vector<1x384x128xf32>
    %16 = vector.shape_cast %15 : vector<1x384x128xf32> to vector<384x128xf32>
    %cst_26 = arith.constant dense<0.000000e+00> : vector<64x128xf32>
    %17 = tpu.matmul %14, %16, %cst_26 {dimension_numbers = #tpu.dot_dimension_numbers<[1], [0], [0], [1], [0, 0, 1, 1], [], []>} : vector<64x384xf32>, vector<384x128xf32>, vector<64x128xf32> -> vector<64x128xf32>
    %18 = arith.addf %9, %17 : vector<64x128xf32>
    %c1_27 = arith.constant 1 : index
    %c7_28 = arith.constant 7 : index
    %c0_29 = arith.constant 0 : index
    %19 = vector.load %arg12[%c1_27, %c7_28, %c0_29] : memref<10x24x128xf32, #tpu.memory_space<vmem>>, vector<8x8x128xf32>
    %c1_30 = arith.constant 1 : index
    %c8_31 = arith.constant 8 : index
    %c0_32 = arith.constant 0 : index
    %20 = vector.load %arg12[%c1_30, %c8_31, %c0_32] : memref<10x24x128xf32, #tpu.memory_space<vmem>>, vector<8x8x128xf32>
    %c1_33 = arith.constant 1 : index
    %c9_34 = arith.constant 9 : index
    %c0_35 = arith.constant 0 : index
    %21 = vector.load %arg12[%c1_33, %c9_34, %c0_35] : memref<10x24x128xf32, #tpu.memory_space<vmem>>, vector<8x8x128xf32>
    %22 = tpu.concatenate %19, %20, %21 in 2 : vector<8x8x128xf32>, vector<8x8x128xf32>, vector<8x8x128xf32> -> vector<8x8x384xf32>
    %23 = vector.shape_cast %22 : vector<8x8x384xf32> to vector<64x384xf32>
    %c1_36 = arith.constant 1 : index
    %c0_37 = arith.constant 0 : index
    %c0_38 = arith.constant 0 : index
    %24 = vector.load %arg2[%c1_36, %c0_37, %c0_38] : memref<3x384x128xf32, #tpu.memory_space<vmem>>, vector<1x384x128xf32>
    %25 = vector.shape_cast %24 : vector<1x384x128xf32> to vector<384x128xf32>
    %cst_39 = arith.constant dense<0.000000e+00> : vector<64x128xf32>
    %26 = tpu.matmul %23, %25, %cst_39 {dimension_numbers = #tpu.dot_dimension_numbers<[1], [0], [0], [1], [0, 0, 1, 1], [], []>} : vector<64x384xf32>, vector<384x128xf32>, vector<64x128xf32> -> vector<64x128xf32>
    %27 = arith.addf %18, %26 : vector<64x128xf32>
    %c2 = arith.constant 2 : index
    %c7_40 = arith.constant 7 : index
    %c0_41 = arith.constant 0 : index
    %28 = vector.load %arg12[%c2, %c7_40, %c0_41] : memref<10x24x128xf32, #tpu.memory_space<vmem>>, vector<8x8x128xf32>
    %c2_42 = arith.constant 2 : index
    %c8_43 = arith.constant 8 : index
    %c0_44 = arith.constant 0 : index
    %29 = vector.load %arg12[%c2_42, %c8_43, %c0_44] : memref<10x24x128xf32, #tpu.memory_space<vmem>>, vector<8x8x128xf32>
    %c2_45 = arith.constant 2 : index
    %c9_46 = arith.constant 9 : index
    %c0_47 = arith.constant 0 : index
    %30 = vector.load %arg12[%c2_45, %c9_46, %c0_47] : memref<10x24x128xf32, #tpu.memory_space<vmem>>, vector<8x8x128xf32>
    %31 = tpu.concatenate %28, %29, %30 in 2 : vector<8x8x128xf32>, vector<8x8x128xf32>, vector<8x8x128xf32> -> vector<8x8x384xf32>
    %32 = vector.shape_cast %31 : vector<8x8x384xf32> to vector<64x384xf32>
    %c2_48 = arith.constant 2 : index
    %c0_49 = arith.constant 0 : index
    %c0_50 = arith.constant 0 : index
    %33 = vector.load %arg2[%c2_48, %c0_49, %c0_50] : memref<3x384x128xf32, #tpu.memory_space<vmem>>, vector<1x384x128xf32>
    %34 = vector.shape_cast %33 : vector<1x384x128xf32> to vector<384x128xf32>
    %cst_51 = arith.constant dense<0.000000e+00> : vector<64x128xf32>
    %35 = tpu.matmul %32, %34, %cst_51 {dimension_numbers = #tpu.dot_dimension_numbers<[1], [0], [0], [1], [0, 0, 1, 1], [], []>} : vector<64x384xf32>, vector<384x128xf32>, vector<64x128xf32> -> vector<64x128xf32>
    %36 = arith.addf %27, %35 : vector<64x128xf32>
    %c0_52 = arith.constant 0 : index
    %c0_53 = arith.constant 0 : index
    %37 = vector.load %arg3[%c0_52, %c0_53] : memref<1x128xf32, #tpu.memory_space<vmem>>, vector<1x128xf32>
    %38 = vector.broadcast %37 : vector<1x128xf32> to vector<64x128xf32>
    %39 = arith.mulf %36, %38 : vector<64x128xf32>
    %c0_54 = arith.constant 0 : index
    %c0_55 = arith.constant 0 : index
    %40 = vector.load %arg4[%c0_54, %c0_55] : memref<1x128xf32, #tpu.memory_space<vmem>>, vector<1x128xf32>
    %41 = vector.broadcast %40 : vector<1x128xf32> to vector<64x128xf32>
    %42 = arith.addf %39, %41 : vector<64x128xf32>
    %cst_56 = arith.constant 0.000000e+00 : f32
    %43 = vector.broadcast %cst_56 : f32 to vector<64x128xf32>
    %44 = arith.maximumf %42, %43 : vector<64x128xf32>
    %45 = vector.shape_cast %44 : vector<64x128xf32> to vector<8x8x128xf32>
    %c1_57 = arith.constant 1 : index
    %c8_58 = arith.constant 8 : index
    %c0_59 = arith.constant 0 : index
    %46 = vector.load %arg12[%c1_57, %c8_58, %c0_59] : memref<10x24x128xf32, #tpu.memory_space<vmem>>, vector<8x8x128xf32>
    tpu.vector_store %arg12[%c1_57, %c8_58, %c0_59], %45 {strides = array<i32>} : memref<10x24x128xf32, #tpu.memory_space<vmem>>, vector<8x8x128xf32>,
    %cst_60 = arith.constant 0.000000e+00 : f32
    %47 = vector.broadcast %cst_60 : f32 to vector<64x128xf32>
    %c0_61 = arith.constant 0 : index
    %c7_62 = arith.constant 7 : index
    %c0_63 = arith.constant 0 : index
    %48 = vector.load %arg12[%c0_61, %c7_62, %c0_63] : memref<10x24x128xf32, #tpu.memory_space<vmem>>, vector<8x8x128xf32>
    %c0_64 = arith.constant 0 : index
    %c8_65 = arith.constant 8 : index
    %c0_66 = arith.constant 0 : index
    %49 = vector.load %arg12[%c0_64, %c8_65, %c0_66] : memref<10x24x128xf32, #tpu.memory_space<vmem>>, vector<8x8x128xf32>
    %c0_67 = arith.constant 0 : index
    %c9_68 = arith.constant 9 : index
    %c0_69 = arith.constant 0 : index
    %50 = vector.load %arg12[%c0_67, %c9_68, %c0_69] : memref<10x24x128xf32, #tpu.memory_space<vmem>>, vector<8x8x128xf32>
    %51 = tpu.concatenate %48, %49, %50 in 2 : vector<8x8x128xf32>, vector<8x8x128xf32>, vector<8x8x128xf32> -> vector<8x8x384xf32>
    %52 = vector.shape_cast %51 : vector<8x8x384xf32> to vector<64x384xf32>
    %c0_70 = arith.constant 0 : index
    %c0_71 = arith.constant 0 : index
    %c0_72 = arith.constant 0 : index
    %53 = vector.load %arg5[%c0_70, %c0_71, %c0_72] : memref<3x384x128xf32, #tpu.memory_space<vmem>>, vector<1x384x128xf32>
    %54 = vector.shape_cast %53 : vector<1x384x128xf32> to vector<384x128xf32>
    %cst_73 = arith.constant dense<0.000000e+00> : vector<64x128xf32>
    %55 = tpu.matmul %52, %54, %cst_73 {dimension_numbers = #tpu.dot_dimension_numbers<[1], [0], [0], [1], [0, 0, 1, 1], [], []>} : vector<64x384xf32>, vector<384x128xf32>, vector<64x128xf32> -> vector<64x128xf32>
    %56 = arith.addf %47, %55 : vector<64x128xf32>
    %c1_74 = arith.constant 1 : index
    %c7_75 = arith.constant 7 : index
    %c0_76 = arith.constant 0 : index
    %57 = vector.load %arg12[%c1_74, %c7_75, %c0_76] : memref<10x24x128xf32, #tpu.memory_space<vmem>>, vector<8x8x128xf32>
    %c1_77 = arith.constant 1 : index
    %c8_78 = arith.constant 8 : index
    %c0_79 = arith.constant 0 : index
    %58 = vector.load %arg12[%c1_77, %c8_78, %c0_79] : memref<10x24x128xf32, #tpu.memory_space<vmem>>, vector<8x8x128xf32>
    %c1_80 = arith.constant 1 : index
    %c9_81 = arith.constant 9 : index
    %c0_82 = arith.constant 0 : index
    %59 = vector.load %arg12[%c1_80, %c9_81, %c0_82] : memref<10x24x128xf32, #tpu.memory_space<vmem>>, vector<8x8x128xf32>
    %60 = tpu.concatenate %57, %58, %59 in 2 : vector<8x8x128xf32>, vector<8x8x128xf32>, vector<8x8x128xf32> -> vector<8x8x384xf32>
    %61 = vector.shape_cast %60 : vector<8x8x384xf32> to vector<64x384xf32>
    %c1_83 = arith.constant 1 : index
    %c0_84 = arith.constant 0 : index
    %c0_85 = arith.constant 0 : index
    %62 = vector.load %arg5[%c1_83, %c0_84, %c0_85] : memref<3x384x128xf32, #tpu.memory_space<vmem>>, vector<1x384x128xf32>
    %63 = vector.shape_cast %62 : vector<1x384x128xf32> to vector<384x128xf32>
    %cst_86 = arith.constant dense<0.000000e+00> : vector<64x128xf32>
    %64 = tpu.matmul %61, %63, %cst_86 {dimension_numbers = #tpu.dot_dimension_numbers<[1], [0], [0], [1], [0, 0, 1, 1], [], []>} : vector<64x384xf32>, vector<384x128xf32>, vector<64x128xf32> -> vector<64x128xf32>
    %65 = arith.addf %56, %64 : vector<64x128xf32>
    %c2_87 = arith.constant 2 : index
    %c7_88 = arith.constant 7 : index
    %c0_89 = arith.constant 0 : index
    %66 = vector.load %arg12[%c2_87, %c7_88, %c0_89] : memref<10x24x128xf32, #tpu.memory_space<vmem>>, vector<8x8x128xf32>
    %c2_90 = arith.constant 2 : index
    %c8_91 = arith.constant 8 : index
    %c0_92 = arith.constant 0 : index
    %67 = vector.load %arg12[%c2_90, %c8_91, %c0_92] : memref<10x24x128xf32, #tpu.memory_space<vmem>>, vector<8x8x128xf32>
    %c2_93 = arith.constant 2 : index
    %c9_94 = arith.constant 9 : index
    %c0_95 = arith.constant 0 : index
    %68 = vector.load %arg12[%c2_93, %c9_94, %c0_95] : memref<10x24x128xf32, #tpu.memory_space<vmem>>, vector<8x8x128xf32>
    %69 = tpu.concatenate %66, %67, %68 in 2 : vector<8x8x128xf32>, vector<8x8x128xf32>, vector<8x8x128xf32> -> vector<8x8x384xf32>
    %70 = vector.shape_cast %69 : vector<8x8x384xf32> to vector<64x384xf32>
    %c2_96 = arith.constant 2 : index
    %c0_97 = arith.constant 0 : index
    %c0_98 = arith.constant 0 : index
    %71 = vector.load %arg5[%c2_96, %c0_97, %c0_98] : memref<3x384x128xf32, #tpu.memory_space<vmem>>, vector<1x384x128xf32>
    %72 = vector.shape_cast %71 : vector<1x384x128xf32> to vector<384x128xf32>
    %cst_99 = arith.constant dense<0.000000e+00> : vector<64x128xf32>
    %73 = tpu.matmul %70, %72, %cst_99 {dimension_numbers = #tpu.dot_dimension_numbers<[1], [0], [0], [1], [0, 0, 1, 1], [], []>} : vector<64x384xf32>, vector<384x128xf32>, vector<64x128xf32> -> vector<64x128xf32>
    %74 = arith.addf %65, %73 : vector<64x128xf32>
    %c0_100 = arith.constant 0 : index
    %c0_101 = arith.constant 0 : index
    %75 = vector.load %arg6[%c0_100, %c0_101] : memref<1x128xf32, #tpu.memory_space<vmem>>, vector<1x128xf32>
    %76 = vector.broadcast %75 : vector<1x128xf32> to vector<64x128xf32>
    %77 = arith.mulf %74, %76 : vector<64x128xf32>
    %c0_102 = arith.constant 0 : index
    %c0_103 = arith.constant 0 : index
    %78 = vector.load %arg7[%c0_102, %c0_103] : memref<1x128xf32, #tpu.memory_space<vmem>>, vector<1x128xf32>
    %79 = vector.broadcast %78 : vector<1x128xf32> to vector<64x128xf32>
    %80 = arith.addf %77, %79 : vector<64x128xf32>
    %cst_104 = arith.constant dense<0.000000e+00> : vector<128xf32>
    %81 = vector.multi_reduction <add>, %80, %cst_104 [0] : vector<64x128xf32> to vector<128xf32>
    %82 = vector.shape_cast %81 : vector<128xf32> to vector<1x128xf32>
    %cst_105 = arith.constant 6.400000e+01 : f32
    %83 = vector.broadcast %cst_105 : f32 to vector<1x128xf32>
    %84 = arith.divf %82, %83 : vector<1x128xf32>
    %c0_106 = arith.constant 0 : index
    %c0_107 = arith.constant 0 : index
    %85 = vector.load %arg8[%c0_106, %c0_107] : memref<128x2xf32, #tpu.memory_space<vmem>>, vector<128x2xf32>
    %cst_108 = arith.constant dense<0.000000e+00> : vector<1x2xf32>
    %86 = tpu.matmul %84, %85, %cst_108 {dimension_numbers = #tpu.dot_dimension_numbers<[1], [0], [0], [1], [0, 0, 1, 1], [], []>} : vector<1x128xf32>, vector<128x2xf32>, vector<1x2xf32> -> vector<1x2xf32>
    %cst_109 = arith.constant 0.000000e+00 : f32
    %87 = vector.broadcast %cst_109 : f32 to vector<1x2xf32>
    %88 = arith.maximumf %86, %87 : vector<1x2xf32>
    %c0_110 = arith.constant 0 : index
    %c0_111 = arith.constant 0 : index
    %89 = vector.load %arg9[%c0_110, %c0_111] : memref<2x128xf32, #tpu.memory_space<vmem>>, vector<2x128xf32>
    %cst_112 = arith.constant dense<0.000000e+00> : vector<1x128xf32>
    %90 = tpu.matmul %88, %89, %cst_112 {dimension_numbers = #tpu.dot_dimension_numbers<[1], [0], [0], [1], [0, 0, 1, 1], [], []>} : vector<1x2xf32>, vector<2x128xf32>, vector<1x128xf32> -> vector<1x128xf32>
    %cst_113 = arith.constant 3.000000e+00 : f32
    %91 = vector.broadcast %cst_113 : f32 to vector<1x128xf32>
    %92 = arith.addf %90, %91 : vector<1x128xf32>
    %cst_114 = arith.constant 0.000000e+00 : f32
    %cst_115 = arith.constant 6.000000e+00 : f32
    %93 = vector.broadcast %cst_114 : f32 to vector<1x128xf32>
    %94 = arith.maximumf %93, %92 : vector<1x128xf32>
    %95 = vector.broadcast %cst_115 : f32 to vector<1x128xf32>
    %96 = arith.minimumf %95, %94 : vector<1x128xf32>
    %97 = arith.mulf %90, %96 : vector<1x128xf32>
    %cst_116 = arith.constant 0.166666672 : f32
    %98 = vector.broadcast %cst_116 : f32 to vector<1x128xf32>
    %99 = arith.mulf %97, %98 : vector<1x128xf32>
    %100 = arith.negf %99 : vector<1x128xf32>
    %101 = math.exp %100 : vector<1x128xf32>
    %cst_117 = arith.constant 1.000000e+00 : f32
    %102 = vector.broadcast %cst_117 : f32 to vector<1x128xf32>
    %103 = arith.addf %102, %101 : vector<1x128xf32>
    %104 = arith.divf %102, %103 : vector<1x128xf32>
    %105 = vector.broadcast %104 : vector<1x128xf32> to vector<64x128xf32>
    %106 = arith.mulf %80, %105 : vector<64x128xf32>
    %107 = vector.shape_cast %106 : vector<64x128xf32> to vector<8x8x128xf32>
    %108 = tpu.iota {dimensions = array<i32: 2>} : vector<8x8x128xi32>
    %cst_118 = arith.constant dense<0.000000e+00> : vector<8x8xf32>
    %109 = vector.multi_reduction <add>, %107, %cst_118 [2] : vector<8x8x128xf32> to vector<8x8xf32>
    %110 = vector.shape_cast %109 : vector<8x8xf32> to vector<8x8x1xf32>
    %cst_119 = arith.constant 3.125000e-02 : f32
    %111 = vector.broadcast %cst_119 : f32 to vector<8x8x1xf32>
    %112 = arith.mulf %110, %111 : vector<8x8x1xf32>
    %c32_i32 = arith.constant 32 : i32
    %113 = vector.broadcast %c32_i32 : i32 to vector<8x8x128xi32>
    %114 = arith.cmpi slt, %108, %113 : vector<8x8x128xi32>
    %cst_120 = arith.constant 0xFF800000 : f32
    %115 = vector.broadcast %cst_120 : f32 to vector<8x8x128xf32>
    %116 = arith.select %114, %107, %115 : vector<8x8x128xi1>, vector<8x8x128xf32>
    %cst_121 = arith.constant dense<0xFF800000> : vector<8x8xf32>
    %117 = vector.multi_reduction <maximumf>, %116, %cst_121 [2] : vector<8x8x128xf32> to vector<8x8xf32>
    %118 = vector.shape_cast %117 : vector<8x8xf32> to vector<8x8x1xf32>
    %c3 = arith.constant 3 : index
    %c8_122 = arith.constant 8 : index
    %c0_123 = arith.constant 0 : index
    %119 = vector.load %arg13[%c3, %c8_122, %c0_123] : memref<14x24x1xf32, #tpu.memory_space<vmem>>, vector<8x8x1xf32>
    tpu.vector_store %arg13[%c3, %c8_122, %c0_123], %112 {strides = array<i32>} : memref<14x24x1xf32, #tpu.memory_space<vmem>>, vector<8x8x1xf32>,
    %c3_124 = arith.constant 3 : index
    %c8_125 = arith.constant 8 : index
    %c0_126 = arith.constant 0 : index
    %120 = vector.load %arg14[%c3_124, %c8_125, %c0_126] : memref<14x24x1xf32, #tpu.memory_space<vmem>>, vector<8x8x1xf32>
    tpu.vector_store %arg14[%c3_124, %c8_125, %c0_126], %118 {strides = array<i32>} : memref<14x24x1xf32, #tpu.memory_space<vmem>>, vector<8x8x1xf32>,
    %cst_127 = arith.constant 0.000000e+00 : f32
    %121 = vector.broadcast %cst_127 : f32 to vector<8x8x1xf32>
    %c0_128 = arith.constant 0 : index
    %122 = memref.load %arg10[%c0_128] : memref<98xf32, #tpu.memory_space<smem>>
    %c1_129 = arith.constant 1 : index
    %123 = memref.load %arg10[%c1_129] : memref<98xf32, #tpu.memory_space<smem>>
    %c0_130 = arith.constant 0 : index
    %c5 = arith.constant 5 : index
    %c0_131 = arith.constant 0 : index
    %124 = vector.load %arg13[%c0_130, %c5, %c0_131] : memref<14x24x1xf32, #tpu.memory_space<vmem>>, vector<8x8x1xf32>
    %125 = vector.broadcast %122 : f32 to vector<8x8x1xf32>
    %126 = arith.mulf %124, %125 : vector<8x8x1xf32>
    %127 = arith.addf %121, %126 : vector<8x8x1xf32>
    %c0_132 = arith.constant 0 : index
    %c5_133 = arith.constant 5 : index
    %c0_134 = arith.constant 0 : index
    %128 = vector.load %arg14[%c0_132, %c5_133, %c0_134] : memref<14x24x1xf32, #tpu.memory_space<vmem>>, vector<8x8x1xf32>
    %129 = vector.broadcast %123 : f32 to vector<8x8x1xf32>
    %130 = arith.mulf %128, %129 : vector<8x8x1xf32>
    %131 = arith.addf %127, %130 : vector<8x8x1xf32>
    %c2_135 = arith.constant 2 : index
    %132 = memref.load %arg10[%c2_135] : memref<98xf32, #tpu.memory_space<smem>>
    %c3_136 = arith.constant 3 : index
    %133 = memref.load %arg10[%c3_136] : memref<98xf32, #tpu.memory_space<smem>>
    %c0_137 = arith.constant 0 : index
    %c6 = arith.constant 6 : index
    %c0_138 = arith.constant 0 : index
    %134 = vector.load %arg13[%c0_137, %c6, %c0_138] : memref<14x24x1xf32, #tpu.memory_space<vmem>>, vector<8x8x1xf32>
    %135 = vector.broadcast %132 : f32 to vector<8x8x1xf32>
    %136 = arith.mulf %134, %135 : vector<8x8x1xf32>
    %137 = arith.addf %131, %136 : vector<8x8x1xf32>
    %c0_139 = arith.constant 0 : index
    %c6_140 = arith.constant 6 : index
    %c0_141 = arith.constant 0 : index
    %138 = vector.load %arg14[%c0_139, %c6_140, %c0_141] : memref<14x24x1xf32, #tpu.memory_space<vmem>>, vector<8x8x1xf32>
    %139 = vector.broadcast %133 : f32 to vector<8x8x1xf32>
    %140 = arith.mulf %138, %139 : vector<8x8x1xf32>
    %141 = arith.addf %137, %140 : vector<8x8x1xf32>
    %c4 = arith.constant 4 : index
    %142 = memref.load %arg10[%c4] : memref<98xf32, #tpu.memory_space<smem>>
    %c5_142 = arith.constant 5 : index
    %143 = memref.load %arg10[%c5_142] : memref<98xf32, #tpu.memory_space<smem>>
    %c0_143 = arith.constant 0 : index
    %c7_144 = arith.constant 7 : index
    %c0_145 = arith.constant 0 : index
    %144 = vector.load %arg13[%c0_143, %c7_144, %c0_145] : memref<14x24x1xf32, #tpu.memory_space<vmem>>, vector<8x8x1xf32>
    %145 = vector.broadcast %142 : f32 to vector<8x8x1xf32>
    %146 = arith.mulf %144, %145 : vector<8x8x1xf32>
    %147 = arith.addf %141, %146 : vector<8x8x1xf32>
    %c0_146 = arith.constant 0 : index
    %c7_147 = arith.constant 7 : index
    %c0_148 = arith.constant 0 : index
    %148 = vector.load %arg14[%c0_146, %c7_147, %c0_148] : memref<14x24x1xf32, #tpu.memory_space<vmem>>, vector<8x8x1xf32>
    %149 = vector.broadcast %143 : f32 to vector<8x8x1xf32>
    %150 = arith.mulf %148, %149 : vector<8x8x1xf32>
    %151 = arith.addf %147, %150 : vector<8x8x1xf32>
    %c6_149 = arith.constant 6 : index
    %152 = memref.load %arg10[%c6_149] : memref<98xf32, #tpu.memory_space<smem>>
    %c7_150 = arith.constant 7 : index
    %153 = memref.load %arg10[%c7_150] : memref<98xf32, #tpu.memory_space<smem>>
    %c0_151 = arith.constant 0 : index
    %c8_152 = arith.constant 8 : index
    %c0_153 = arith.constant 0 : index
    %154 = vector.load %arg13[%c0_151, %c8_152, %c0_153] : memref<14x24x1xf32, #tpu.memory_space<vmem>>, vector<8x8x1xf32>
    %155 = vector.broadcast %152 : f32 to vector<8x8x1xf32>
    %156 = arith.mulf %154, %155 : vector<8x8x1xf32>
    %157 = arith.addf %151, %156 : vector<8x8x1xf32>
    %c0_154 = arith.constant 0 : index
    %c8_155 = arith.constant 8 : index
    %c0_156 = arith.constant 0 : index
    %158 = vector.load %arg14[%c0_154, %c8_155, %c0_156] : memref<14x24x1xf32, #tpu.memory_space<vmem>>, vector<8x8x1xf32>
    %159 = vector.broadcast %153 : f32 to vector<8x8x1xf32>
    %160 = arith.mulf %158, %159 : vector<8x8x1xf32>
    %161 = arith.addf %157, %160 : vector<8x8x1xf32>
    %c8_157 = arith.constant 8 : index
    %162 = memref.load %arg10[%c8_157] : memref<98xf32, #tpu.memory_space<smem>>
    %c9_158 = arith.constant 9 : index
    %163 = memref.load %arg10[%c9_158] : memref<98xf32, #tpu.memory_space<smem>>
    %c0_159 = arith.constant 0 : index
    %c9_160 = arith.constant 9 : index
    %c0_161 = arith.constant 0 : index
    %164 = vector.load %arg13[%c0_159, %c9_160, %c0_161] : memref<14x24x1xf32, #tpu.memory_space<vmem>>, vector<8x8x1xf32>
    %165 = vector.broadcast %162 : f32 to vector<8x8x1xf32>
    %166 = arith.mulf %164, %165 : vector<8x8x1xf32>
    %167 = arith.addf %161, %166 : vector<8x8x1xf32>
    %c0_162 = arith.constant 0 : index
    %c9_163 = arith.constant 9 : index
    %c0_164 = arith.constant 0 : index
    %168 = vector.load %arg14[%c0_162, %c9_163, %c0_164] : memref<14x24x1xf32, #tpu.memory_space<vmem>>, vector<8x8x1xf32>
    %169 = vector.broadcast %163 : f32 to vector<8x8x1xf32>
    %170 = arith.mulf %168, %169 : vector<8x8x1xf32>
    %171 = arith.addf %167, %170 : vector<8x8x1xf32>
    %c10 = arith.constant 10 : index
    %172 = memref.load %arg10[%c10] : memref<98xf32, #tpu.memory_space<smem>>
    %c11 = arith.constant 11 : index
    %173 = memref.load %arg10[%c11] : memref<98xf32, #tpu.memory_space<smem>>
    %c0_165 = arith.constant 0 : index
    %c10_166 = arith.constant 10 : index
    %c0_167 = arith.constant 0 : index
    %174 = vector.load %arg13[%c0_165, %c10_166, %c0_167] : memref<14x24x1xf32, #tpu.memory_space<vmem>>, vector<8x8x1xf32>
    %175 = vector.broadcast %172 : f32 to vector<8x8x1xf32>
    %176 = arith.mulf %174, %175 : vector<8x8x1xf32>
    %177 = arith.addf %171, %176 : vector<8x8x1xf32>
    %c0_168 = arith.constant 0 : index
    %c10_169 = arith.constant 10 : index
    %c0_170 = arith.constant 0 : index
    %178 = vector.load %arg14[%c0_168, %c10_169, %c0_170] : memref<14x24x1xf32, #tpu.memory_space<vmem>>, vector<8x8x1xf32>
    %179 = vector.broadcast %173 : f32 to vector<8x8x1xf32>
    %180 = arith.mulf %178, %179 : vector<8x8x1xf32>
    %181 = arith.addf %177, %180 : vector<8x8x1xf32>
    %c12 = arith.constant 12 : index
    %182 = memref.load %arg10[%c12] : memref<98xf32, #tpu.memory_space<smem>>
    %c13 = arith.constant 13 : index
    %183 = memref.load %arg10[%c13] : memref<98xf32, #tpu.memory_space<smem>>
    %c0_171 = arith.constant 0 : index
    %c11_172 = arith.constant 11 : index
    %c0_173 = arith.constant 0 : index
    %184 = vector.load %arg13[%c0_171, %c11_172, %c0_173] : memref<14x24x1xf32, #tpu.memory_space<vmem>>, vector<8x8x1xf32>
    %185 = vector.broadcast %182 : f32 to vector<8x8x1xf32>
    %186 = arith.mulf %184, %185 : vector<8x8x1xf32>
    %187 = arith.addf %181, %186 : vector<8x8x1xf32>
    %c0_174 = arith.constant 0 : index
    %c11_175 = arith.constant 11 : index
    %c0_176 = arith.constant 0 : index
    %188 = vector.load %arg14[%c0_174, %c11_175, %c0_176] : memref<14x24x1xf32, #tpu.memory_space<vmem>>, vector<8x8x1xf32>
    %189 = vector.broadcast %183 : f32 to vector<8x8x1xf32>
    %190 = arith.mulf %188, %189 : vector<8x8x1xf32>
    %191 = arith.addf %187, %190 : vector<8x8x1xf32>
    %c14 = arith.constant 14 : index
    %192 = memref.load %arg10[%c14] : memref<98xf32, #tpu.memory_space<smem>>
    %c15 = arith.constant 15 : index
    %193 = memref.load %arg10[%c15] : memref<98xf32, #tpu.memory_space<smem>>
    %c1_177 = arith.constant 1 : index
    %c5_178 = arith.constant 5 : index
    %c0_179 = arith.constant 0 : index
    %194 = vector.load %arg13[%c1_177, %c5_178, %c0_179] : memref<14x24x1xf32, #tpu.memory_space<vmem>>, vector<8x8x1xf32>
    %195 = vector.broadcast %192 : f32 to vector<8x8x1xf32>
    %196 = arith.mulf %194, %195 : vector<8x8x1xf32>
    %197 = arith.addf %191, %196 : vector<8x8x1xf32>
    %c1_180 = arith.constant 1 : index
    %c5_181 = arith.constant 5 : index
    %c0_182 = arith.constant 0 : index
    %198 = vector.load %arg14[%c1_180, %c5_181, %c0_182] : memref<14x24x1xf32, #tpu.memory_space<vmem>>, vector<8x8x1xf32>
    %199 = vector.broadcast %193 : f32 to vector<8x8x1xf32>
    %200 = arith.mulf %198, %199 : vector<8x8x1xf32>
    %201 = arith.addf %197, %200 : vector<8x8x1xf32>
    %c16 = arith.constant 16 : index
    %202 = memref.load %arg10[%c16] : memref<98xf32, #tpu.memory_space<smem>>
    %c17 = arith.constant 17 : index
    %203 = memref.load %arg10[%c17] : memref<98xf32, #tpu.memory_space<smem>>
    %c1_183 = arith.constant 1 : index
    %c6_184 = arith.constant 6 : index
    %c0_185 = arith.constant 0 : index
    %204 = vector.load %arg13[%c1_183, %c6_184, %c0_185] : memref<14x24x1xf32, #tpu.memory_space<vmem>>, vector<8x8x1xf32>
    %205 = vector.broadcast %202 : f32 to vector<8x8x1xf32>
    %206 = arith.mulf %204, %205 : vector<8x8x1xf32>
    %207 = arith.addf %201, %206 : vector<8x8x1xf32>
    %c1_186 = arith.constant 1 : index
    %c6_187 = arith.constant 6 : index
    %c0_188 = arith.constant 0 : index
    %208 = vector.load %arg14[%c1_186, %c6_187, %c0_188] : memref<14x24x1xf32, #tpu.memory_space<vmem>>, vector<8x8x1xf32>
    %209 = vector.broadcast %203 : f32 to vector<8x8x1xf32>
    %210 = arith.mulf %208, %209 : vector<8x8x1xf32>
    %211 = arith.addf %207, %210 : vector<8x8x1xf32>
    %c18 = arith.constant 18 : index
    %212 = memref.load %arg10[%c18] : memref<98xf32, #tpu.memory_space<smem>>
    %c19 = arith.constant 19 : index
    %213 = memref.load %arg10[%c19] : memref<98xf32, #tpu.memory_space<smem>>
    %c1_189 = arith.constant 1 : index
    %c7_190 = arith.constant 7 : index
    %c0_191 = arith.constant 0 : index
    %214 = vector.load %arg13[%c1_189, %c7_190, %c0_191] : memref<14x24x1xf32, #tpu.memory_space<vmem>>, vector<8x8x1xf32>
    %215 = vector.broadcast %212 : f32 to vector<8x8x1xf32>
    %216 = arith.mulf %214, %215 : vector<8x8x1xf32>
    %217 = arith.addf %211, %216 : vector<8x8x1xf32>
    %c1_192 = arith.constant 1 : index
    %c7_193 = arith.constant 7 : index
    %c0_194 = arith.constant 0 : index
    %218 = vector.load %arg14[%c1_192, %c7_193, %c0_194] : memref<14x24x1xf32, #tpu.memory_space<vmem>>, vector<8x8x1xf32>
    %219 = vector.broadcast %213 : f32 to vector<8x8x1xf32>
    %220 = arith.mulf %218, %219 : vector<8x8x1xf32>
    %221 = arith.addf %217, %220 : vector<8x8x1xf32>
    %c20 = arith.constant 20 : index
    %222 = memref.load %arg10[%c20] : memref<98xf32, #tpu.memory_space<smem>>
    %c21 = arith.constant 21 : index
    %223 = memref.load %arg10[%c21] : memref<98xf32, #tpu.memory_space<smem>>
    %c1_195 = arith.constant 1 : index
    %c8_196 = arith.constant 8 : index
    %c0_197 = arith.constant 0 : index
    %224 = vector.load %arg13[%c1_195, %c8_196, %c0_197] : memref<14x24x1xf32, #tpu.memory_space<vmem>>, vector<8x8x1xf32>
    %225 = vector.broadcast %222 : f32 to vector<8x8x1xf32>
    %226 = arith.mulf %224, %225 : vector<8x8x1xf32>
    %227 = arith.addf %221, %226 : vector<8x8x1xf32>
    %c1_198 = arith.constant 1 : index
    %c8_199 = arith.constant 8 : index
    %c0_200 = arith.constant 0 : index
    %228 = vector.load %arg14[%c1_198, %c8_199, %c0_200] : memref<14x24x1xf32, #tpu.memory_space<vmem>>, vector<8x8x1xf32>
    %229 = vector.broadcast %223 : f32 to vector<8x8x1xf32>
    %230 = arith.mulf %228, %229 : vector<8x8x1xf32>
    %231 = arith.addf %227, %230 : vector<8x8x1xf32>
    %c22 = arith.constant 22 : index
    %232 = memref.load %arg10[%c22] : memref<98xf32, #tpu.memory_space<smem>>
    %c23 = arith.constant 23 : index
    %233 = memref.load %arg10[%c23] : memref<98xf32, #tpu.memory_space<smem>>
    %c1_201 = arith.constant 1 : index
    %c9_202 = arith.constant 9 : index
    %c0_203 = arith.constant 0 : index
    %234 = vector.load %arg13[%c1_201, %c9_202, %c0_203] : memref<14x24x1xf32, #tpu.memory_space<vmem>>, vector<8x8x1xf32>
    %235 = vector.broadcast %232 : f32 to vector<8x8x1xf32>
    %236 = arith.mulf %234, %235 : vector<8x8x1xf32>
    %237 = arith.addf %231, %236 : vector<8x8x1xf32>
    %c1_204 = arith.constant 1 : index
    %c9_205 = arith.constant 9 : index
    %c0_206 = arith.constant 0 : index
    %238 = vector.load %arg14[%c1_204, %c9_205, %c0_206] : memref<14x24x1xf32, #tpu.memory_space<vmem>>, vector<8x8x1xf32>
    %239 = vector.broadcast %233 : f32 to vector<8x8x1xf32>
    %240 = arith.mulf %238, %239 : vector<8x8x1xf32>
    %241 = arith.addf %237, %240 : vector<8x8x1xf32>
    %c24 = arith.constant 24 : index
    %242 = memref.load %arg10[%c24] : memref<98xf32, #tpu.memory_space<smem>>
    %c25 = arith.constant 25 : index
    %243 = memref.load %arg10[%c25] : memref<98xf32, #tpu.memory_space<smem>>
    %c1_207 = arith.constant 1 : index
    %c10_208 = arith.constant 10 : index
    %c0_209 = arith.constant 0 : index
    %244 = vector.load %arg13[%c1_207, %c10_208, %c0_209] : memref<14x24x1xf32, #tpu.memory_space<vmem>>, vector<8x8x1xf32>
    %245 = vector.broadcast %242 : f32 to vector<8x8x1xf32>
    %246 = arith.mulf %244, %245 : vector<8x8x1xf32>
    %247 = arith.addf %241, %246 : vector<8x8x1xf32>
    %c1_210 = arith.constant 1 : index
    %c10_211 = arith.constant 10 : index
    %c0_212 = arith.constant 0 : index
    %248 = vector.load %arg14[%c1_210, %c10_211, %c0_212] : memref<14x24x1xf32, #tpu.memory_space<vmem>>, vector<8x8x1xf32>
    %249 = vector.broadcast %243 : f32 to vector<8x8x1xf32>
    %250 = arith.mulf %248, %249 : vector<8x8x1xf32>
    %251 = arith.addf %247, %250 : vector<8x8x1xf32>
    %c26 = arith.constant 26 : index
    %252 = memref.load %arg10[%c26] : memref<98xf32, #tpu.memory_space<smem>>
    %c27 = arith.constant 27 : index
    %253 = memref.load %arg10[%c27] : memref<98xf32, #tpu.memory_space<smem>>
    %c1_213 = arith.constant 1 : index
    %c11_214 = arith.constant 11 : index
    %c0_215 = arith.constant 0 : index
    %254 = vector.load %arg13[%c1_213, %c11_214, %c0_215] : memref<14x24x1xf32, #tpu.memory_space<vmem>>, vector<8x8x1xf32>
    %255 = vector.broadcast %252 : f32 to vector<8x8x1xf32>
    %256 = arith.mulf %254, %255 : vector<8x8x1xf32>
    %257 = arith.addf %251, %256 : vector<8x8x1xf32>
    %c1_216 = arith.constant 1 : index
    %c11_217 = arith.constant 11 : index
    %c0_218 = arith.constant 0 : index
    %258 = vector.load %arg14[%c1_216, %c11_217, %c0_218] : memref<14x24x1xf32, #tpu.memory_space<vmem>>, vector<8x8x1xf32>
    %259 = vector.broadcast %253 : f32 to vector<8x8x1xf32>
    %260 = arith.mulf %258, %259 : vector<8x8x1xf32>
    %261 = arith.addf %257, %260 : vector<8x8x1xf32>
    %c28 = arith.constant 28 : index
    %262 = memref.load %arg10[%c28] : memref<98xf32, #tpu.memory_space<smem>>
    %c29 = arith.constant 29 : index
    %263 = memref.load %arg10[%c29] : memref<98xf32, #tpu.memory_space<smem>>
    %c2_219 = arith.constant 2 : index
    %c5_220 = arith.constant 5 : index
    %c0_221 = arith.constant 0 : index
    %264 = vector.load %arg13[%c2_219, %c5_220, %c0_221] : memref<14x24x1xf32, #tpu.memory_space<vmem>>, vector<8x8x1xf32>
    %265 = vector.broadcast %262 : f32 to vector<8x8x1xf32>
    %266 = arith.mulf %264, %265 : vector<8x8x1xf32>
    %267 = arith.addf %261, %266 : vector<8x8x1xf32>
    %c2_222 = arith.constant 2 : index
    %c5_223 = arith.constant 5 : index
    %c0_224 = arith.constant 0 : index
    %268 = vector.load %arg14[%c2_222, %c5_223, %c0_224] : memref<14x24x1xf32, #tpu.memory_space<vmem>>, vector<8x8x1xf32>
    %269 = vector.broadcast %263 : f32 to vector<8x8x1xf32>
    %270 = arith.mulf %268, %269 : vector<8x8x1xf32>
    %271 = arith.addf %267, %270 : vector<8x8x1xf32>
    %c30 = arith.constant 30 : index
    %272 = memref.load %arg10[%c30] : memref<98xf32, #tpu.memory_space<smem>>
    %c31 = arith.constant 31 : index
    %273 = memref.load %arg10[%c31] : memref<98xf32, #tpu.memory_space<smem>>
    %c2_225 = arith.constant 2 : index
    %c6_226 = arith.constant 6 : index
    %c0_227 = arith.constant 0 : index
    %274 = vector.load %arg13[%c2_225, %c6_226, %c0_227] : memref<14x24x1xf32, #tpu.memory_space<vmem>>, vector<8x8x1xf32>
    %275 = vector.broadcast %272 : f32 to vector<8x8x1xf32>
    %276 = arith.mulf %274, %275 : vector<8x8x1xf32>
    %277 = arith.addf %271, %276 : vector<8x8x1xf32>
    %c2_228 = arith.constant 2 : index
    %c6_229 = arith.constant 6 : index
    %c0_230 = arith.constant 0 : index
    %278 = vector.load %arg14[%c2_228, %c6_229, %c0_230] : memref<14x24x1xf32, #tpu.memory_space<vmem>>, vector<8x8x1xf32>
    %279 = vector.broadcast %273 : f32 to vector<8x8x1xf32>
    %280 = arith.mulf %278, %279 : vector<8x8x1xf32>
    %281 = arith.addf %277, %280 : vector<8x8x1xf32>
    %c32 = arith.constant 32 : index
    %282 = memref.load %arg10[%c32] : memref<98xf32, #tpu.memory_space<smem>>
    %c33 = arith.constant 33 : index
    %283 = memref.load %arg10[%c33] : memref<98xf32, #tpu.memory_space<smem>>
    %c2_231 = arith.constant 2 : index
    %c7_232 = arith.constant 7 : index
    %c0_233 = arith.constant 0 : index
    %284 = vector.load %arg13[%c2_231, %c7_232, %c0_233] : memref<14x24x1xf32, #tpu.memory_space<vmem>>, vector<8x8x1xf32>
    %285 = vector.broadcast %282 : f32 to vector<8x8x1xf32>
    %286 = arith.mulf %284, %285 : vector<8x8x1xf32>
    %287 = arith.addf %281, %286 : vector<8x8x1xf32>
    %c2_234 = arith.constant 2 : index
    %c7_235 = arith.constant 7 : index
    %c0_236 = arith.constant 0 : index
    %288 = vector.load %arg14[%c2_234, %c7_235, %c0_236] : memref<14x24x1xf32, #tpu.memory_space<vmem>>, vector<8x8x1xf32>
    %289 = vector.broadcast %283 : f32 to vector<8x8x1xf32>
    %290 = arith.mulf %288, %289 : vector<8x8x1xf32>
    %291 = arith.addf %287, %290 : vector<8x8x1xf32>
    %c34 = arith.constant 34 : index
    %292 = memref.load %arg10[%c34] : memref<98xf32, #tpu.memory_space<smem>>
    %c35 = arith.constant 35 : index
    %293 = memref.load %arg10[%c35] : memref<98xf32, #tpu.memory_space<smem>>
    %c2_237 = arith.constant 2 : index
    %c8_238 = arith.constant 8 : index
    %c0_239 = arith.constant 0 : index
    %294 = vector.load %arg13[%c2_237, %c8_238, %c0_239] : memref<14x24x1xf32, #tpu.memory_space<vmem>>, vector<8x8x1xf32>
    %295 = vector.broadcast %292 : f32 to vector<8x8x1xf32>
    %296 = arith.mulf %294, %295 : vector<8x8x1xf32>
    %297 = arith.addf %291, %296 : vector<8x8x1xf32>
    %c2_240 = arith.constant 2 : index
    %c8_241 = arith.constant 8 : index
    %c0_242 = arith.constant 0 : index
    %298 = vector.load %arg14[%c2_240, %c8_241, %c0_242] : memref<14x24x1xf32, #tpu.memory_space<vmem>>, vector<8x8x1xf32>
    %299 = vector.broadcast %293 : f32 to vector<8x8x1xf32>
    %300 = arith.mulf %298, %299 : vector<8x8x1xf32>
    %301 = arith.addf %297, %300 : vector<8x8x1xf32>
    %c36 = arith.constant 36 : index
    %302 = memref.load %arg10[%c36] : memref<98xf32, #tpu.memory_space<smem>>
    %c37 = arith.constant 37 : index
    %303 = memref.load %arg10[%c37] : memref<98xf32, #tpu.memory_space<smem>>
    %c2_243 = arith.constant 2 : index
    %c9_244 = arith.constant 9 : index
    %c0_245 = arith.constant 0 : index
    %304 = vector.load %arg13[%c2_243, %c9_244, %c0_245] : memref<14x24x1xf32, #tpu.memory_space<vmem>>, vector<8x8x1xf32>
    %305 = vector.broadcast %302 : f32 to vector<8x8x1xf32>
    %306 = arith.mulf %304, %305 : vector<8x8x1xf32>
    %307 = arith.addf %301, %306 : vector<8x8x1xf32>
    %c2_246 = arith.constant 2 : index
    %c9_247 = arith.constant 9 : index
    %c0_248 = arith.constant 0 : index
    %308 = vector.load %arg14[%c2_246, %c9_247, %c0_248] : memref<14x24x1xf32, #tpu.memory_space<vmem>>, vector<8x8x1xf32>
    %309 = vector.broadcast %303 : f32 to vector<8x8x1xf32>
    %310 = arith.mulf %308, %309 : vector<8x8x1xf32>
    %311 = arith.addf %307, %310 : vector<8x8x1xf32>
    %c38 = arith.constant 38 : index
    %312 = memref.load %arg10[%c38] : memref<98xf32, #tpu.memory_space<smem>>
    %c39 = arith.constant 39 : index
    %313 = memref.load %arg10[%c39] : memref<98xf32, #tpu.memory_space<smem>>
    %c2_249 = arith.constant 2 : index
    %c10_250 = arith.constant 10 : index
    %c0_251 = arith.constant 0 : index
    %314 = vector.load %arg13[%c2_249, %c10_250, %c0_251] : memref<14x24x1xf32, #tpu.memory_space<vmem>>, vector<8x8x1xf32>
    %315 = vector.broadcast %312 : f32 to vector<8x8x1xf32>
    %316 = arith.mulf %314, %315 : vector<8x8x1xf32>
    %317 = arith.addf %311, %316 : vector<8x8x1xf32>
    %c2_252 = arith.constant 2 : index
    %c10_253 = arith.constant 10 : index
    %c0_254 = arith.constant 0 : index
    %318 = vector.load %arg14[%c2_252, %c10_253, %c0_254] : memref<14x24x1xf32, #tpu.memory_space<vmem>>, vector<8x8x1xf32>
    %319 = vector.broadcast %313 : f32 to vector<8x8x1xf32>
    %320 = arith.mulf %318, %319 : vector<8x8x1xf32>
    %321 = arith.addf %317, %320 : vector<8x8x1xf32>
    %c40 = arith.constant 40 : index
    %322 = memref.load %arg10[%c40] : memref<98xf32, #tpu.memory_space<smem>>
    %c41 = arith.constant 41 : index
    %323 = memref.load %arg10[%c41] : memref<98xf32, #tpu.memory_space<smem>>
    %c2_255 = arith.constant 2 : index
    %c11_256 = arith.constant 11 : index
    %c0_257 = arith.constant 0 : index
    %324 = vector.load %arg13[%c2_255, %c11_256, %c0_257] : memref<14x24x1xf32, #tpu.memory_space<vmem>>, vector<8x8x1xf32>
    %325 = vector.broadcast %322 : f32 to vector<8x8x1xf32>
    %326 = arith.mulf %324, %325 : vector<8x8x1xf32>
    %327 = arith.addf %321, %326 : vector<8x8x1xf32>
    %c2_258 = arith.constant 2 : index
    %c11_259 = arith.constant 11 : index
    %c0_260 = arith.constant 0 : index
    %328 = vector.load %arg14[%c2_258, %c11_259, %c0_260] : memref<14x24x1xf32, #tpu.memory_space<vmem>>, vector<8x8x1xf32>
    %329 = vector.broadcast %323 : f32 to vector<8x8x1xf32>
    %330 = arith.mulf %328, %329 : vector<8x8x1xf32>
    %331 = arith.addf %327, %330 : vector<8x8x1xf32>
    %c42 = arith.constant 42 : index
    %332 = memref.load %arg10[%c42] : memref<98xf32, #tpu.memory_space<smem>>
    %c43 = arith.constant 43 : index
    %333 = memref.load %arg10[%c43] : memref<98xf32, #tpu.memory_space<smem>>
    %c3_261 = arith.constant 3 : index
    %c5_262 = arith.constant 5 : index
    %c0_263 = arith.constant 0 : index
    %334 = vector.load %arg13[%c3_261, %c5_262, %c0_263] : memref<14x24x1xf32, #tpu.memory_space<vmem>>, vector<8x8x1xf32>
    %335 = vector.broadcast %332 : f32 to vector<8x8x1xf32>
    %336 = arith.mulf %334, %335 : vector<8x8x1xf32>
    %337 = arith.addf %331, %336 : vector<8x8x1xf32>
    %c3_264 = arith.constant 3 : index
    %c5_265 = arith.constant 5 : index
    %c0_266 = arith.constant 0 : index
    %338 = vector.load %arg14[%c3_264, %c5_265, %c0_266] : memref<14x24x1xf32, #tpu.memory_space<vmem>>, vector<8x8x1xf32>
    %339 = vector.broadcast %333 : f32 to vector<8x8x1xf32>
    %340 = arith.mulf %338, %339 : vector<8x8x1xf32>
    %341 = arith.addf %337, %340 : vector<8x8x1xf32>
    %c44 = arith.constant 44 : index
    %342 = memref.load %arg10[%c44] : memref<98xf32, #tpu.memory_space<smem>>
    %c45 = arith.constant 45 : index
    %343 = memref.load %arg10[%c45] : memref<98xf32, #tpu.memory_space<smem>>
    %c3_267 = arith.constant 3 : index
    %c6_268 = arith.constant 6 : index
    %c0_269 = arith.constant 0 : index
    %344 = vector.load %arg13[%c3_267, %c6_268, %c0_269] : memref<14x24x1xf32, #tpu.memory_space<vmem>>, vector<8x8x1xf32>
    %345 = vector.broadcast %342 : f32 to vector<8x8x1xf32>
    %346 = arith.mulf %344, %345 : vector<8x8x1xf32>
    %347 = arith.addf %341, %346 : vector<8x8x1xf32>
    %c3_270 = arith.constant 3 : index
    %c6_271 = arith.constant 6 : index
    %c0_272 = arith.constant 0 : index
    %348 = vector.load %arg14[%c3_270, %c6_271, %c0_272] : memref<14x24x1xf32, #tpu.memory_space<vmem>>, vector<8x8x1xf32>
    %349 = vector.broadcast %343 : f32 to vector<8x8x1xf32>
    %350 = arith.mulf %348, %349 : vector<8x8x1xf32>
    %351 = arith.addf %347, %350 : vector<8x8x1xf32>
    %c46 = arith.constant 46 : index
    %352 = memref.load %arg10[%c46] : memref<98xf32, #tpu.memory_space<smem>>
    %c47 = arith.constant 47 : index
    %353 = memref.load %arg10[%c47] : memref<98xf32, #tpu.memory_space<smem>>
    %c3_273 = arith.constant 3 : index
    %c7_274 = arith.constant 7 : index
    %c0_275 = arith.constant 0 : index
    %354 = vector.load %arg13[%c3_273, %c7_274, %c0_275] : memref<14x24x1xf32, #tpu.memory_space<vmem>>, vector<8x8x1xf32>
    %355 = vector.broadcast %352 : f32 to vector<8x8x1xf32>
    %356 = arith.mulf %354, %355 : vector<8x8x1xf32>
    %357 = arith.addf %351, %356 : vector<8x8x1xf32>
    %c3_276 = arith.constant 3 : index
    %c7_277 = arith.constant 7 : index
    %c0_278 = arith.constant 0 : index
    %358 = vector.load %arg14[%c3_276, %c7_277, %c0_278] : memref<14x24x1xf32, #tpu.memory_space<vmem>>, vector<8x8x1xf32>
    %359 = vector.broadcast %353 : f32 to vector<8x8x1xf32>
    %360 = arith.mulf %358, %359 : vector<8x8x1xf32>
    %361 = arith.addf %357, %360 : vector<8x8x1xf32>
    %c48 = arith.constant 48 : index
    %362 = memref.load %arg10[%c48] : memref<98xf32, #tpu.memory_space<smem>>
    %c49 = arith.constant 49 : index
    %363 = memref.load %arg10[%c49] : memref<98xf32, #tpu.memory_space<smem>>
    %c3_279 = arith.constant 3 : index
    %c8_280 = arith.constant 8 : index
    %c0_281 = arith.constant 0 : index
    %364 = vector.load %arg13[%c3_279, %c8_280, %c0_281] : memref<14x24x1xf32, #tpu.memory_space<vmem>>, vector<8x8x1xf32>
    %365 = vector.broadcast %362 : f32 to vector<8x8x1xf32>
    %366 = arith.mulf %364, %365 : vector<8x8x1xf32>
    %367 = arith.addf %361, %366 : vector<8x8x1xf32>
    %c3_282 = arith.constant 3 : index
    %c8_283 = arith.constant 8 : index
    %c0_284 = arith.constant 0 : index
    %368 = vector.load %arg14[%c3_282, %c8_283, %c0_284] : memref<14x24x1xf32, #tpu.memory_space<vmem>>, vector<8x8x1xf32>
    %369 = vector.broadcast %363 : f32 to vector<8x8x1xf32>
    %370 = arith.mulf %368, %369 : vector<8x8x1xf32>
    %371 = arith.addf %367, %370 : vector<8x8x1xf32>
    %c50 = arith.constant 50 : index
    %372 = memref.load %arg10[%c50] : memref<98xf32, #tpu.memory_space<smem>>
    %c51 = arith.constant 51 : index
    %373 = memref.load %arg10[%c51] : memref<98xf32, #tpu.memory_space<smem>>
    %c3_285 = arith.constant 3 : index
    %c9_286 = arith.constant 9 : index
    %c0_287 = arith.constant 0 : index
    %374 = vector.load %arg13[%c3_285, %c9_286, %c0_287] : memref<14x24x1xf32, #tpu.memory_space<vmem>>, vector<8x8x1xf32>
    %375 = vector.broadcast %372 : f32 to vector<8x8x1xf32>
    %376 = arith.mulf %374, %375 : vector<8x8x1xf32>
    %377 = arith.addf %371, %376 : vector<8x8x1xf32>
    %c3_288 = arith.constant 3 : index
    %c9_289 = arith.constant 9 : index
    %c0_290 = arith.constant 0 : index
    %378 = vector.load %arg14[%c3_288, %c9_289, %c0_290] : memref<14x24x1xf32, #tpu.memory_space<vmem>>, vector<8x8x1xf32>
    %379 = vector.broadcast %373 : f32 to vector<8x8x1xf32>
    %380 = arith.mulf %378, %379 : vector<8x8x1xf32>
    %381 = arith.addf %377, %380 : vector<8x8x1xf32>
    %c52 = arith.constant 52 : index
    %382 = memref.load %arg10[%c52] : memref<98xf32, #tpu.memory_space<smem>>
    %c53 = arith.constant 53 : index
    %383 = memref.load %arg10[%c53] : memref<98xf32, #tpu.memory_space<smem>>
    %c3_291 = arith.constant 3 : index
    %c10_292 = arith.constant 10 : index
    %c0_293 = arith.constant 0 : index
    %384 = vector.load %arg13[%c3_291, %c10_292, %c0_293] : memref<14x24x1xf32, #tpu.memory_space<vmem>>, vector<8x8x1xf32>
    %385 = vector.broadcast %382 : f32 to vector<8x8x1xf32>
    %386 = arith.mulf %384, %385 : vector<8x8x1xf32>
    %387 = arith.addf %381, %386 : vector<8x8x1xf32>
    %c3_294 = arith.constant 3 : index
    %c10_295 = arith.constant 10 : index
    %c0_296 = arith.constant 0 : index
    %388 = vector.load %arg14[%c3_294, %c10_295, %c0_296] : memref<14x24x1xf32, #tpu.memory_space<vmem>>, vector<8x8x1xf32>
    %389 = vector.broadcast %383 : f32 to vector<8x8x1xf32>
    %390 = arith.mulf %388, %389 : vector<8x8x1xf32>
    %391 = arith.addf %387, %390 : vector<8x8x1xf32>
    %c54 = arith.constant 54 : index
    %392 = memref.load %arg10[%c54] : memref<98xf32, #tpu.memory_space<smem>>
    %c55 = arith.constant 55 : index
    %393 = memref.load %arg10[%c55] : memref<98xf32, #tpu.memory_space<smem>>
    %c3_297 = arith.constant 3 : index
    %c11_298 = arith.constant 11 : index
    %c0_299 = arith.constant 0 : index
    %394 = vector.load %arg13[%c3_297, %c11_298, %c0_299] : memref<14x24x1xf32, #tpu.memory_space<vmem>>, vector<8x8x1xf32>
    %395 = vector.broadcast %392 : f32 to vector<8x8x1xf32>
    %396 = arith.mulf %394, %395 : vector<8x8x1xf32>
    %397 = arith.addf %391, %396 : vector<8x8x1xf32>
    %c3_300 = arith.constant 3 : index
    %c11_301 = arith.constant 11 : index
    %c0_302 = arith.constant 0 : index
    %398 = vector.load %arg14[%c3_300, %c11_301, %c0_302] : memref<14x24x1xf32, #tpu.memory_space<vmem>>, vector<8x8x1xf32>
    %399 = vector.broadcast %393 : f32 to vector<8x8x1xf32>
    %400 = arith.mulf %398, %399 : vector<8x8x1xf32>
    %401 = arith.addf %397, %400 : vector<8x8x1xf32>
    %c56 = arith.constant 56 : index
    %402 = memref.load %arg10[%c56] : memref<98xf32, #tpu.memory_space<smem>>
    %c57 = arith.constant 57 : index
    %403 = memref.load %arg10[%c57] : memref<98xf32, #tpu.memory_space<smem>>
    %c4_303 = arith.constant 4 : index
    %c5_304 = arith.constant 5 : index
    %c0_305 = arith.constant 0 : index
    %404 = vector.load %arg13[%c4_303, %c5_304, %c0_305] : memref<14x24x1xf32, #tpu.memory_space<vmem>>, vector<8x8x1xf32>
    %405 = vector.broadcast %402 : f32 to vector<8x8x1xf32>
    %406 = arith.mulf %404, %405 : vector<8x8x1xf32>
    %407 = arith.addf %401, %406 : vector<8x8x1xf32>
    %c4_306 = arith.constant 4 : index
    %c5_307 = arith.constant 5 : index
    %c0_308 = arith.constant 0 : index
    %408 = vector.load %arg14[%c4_306, %c5_307, %c0_308] : memref<14x24x1xf32, #tpu.memory_space<vmem>>, vector<8x8x1xf32>
    %409 = vector.broadcast %403 : f32 to vector<8x8x1xf32>
    %410 = arith.mulf %408, %409 : vector<8x8x1xf32>
    %411 = arith.addf %407, %410 : vector<8x8x1xf32>
    %c58 = arith.constant 58 : index
    %412 = memref.load %arg10[%c58] : memref<98xf32, #tpu.memory_space<smem>>
    %c59 = arith.constant 59 : index
    %413 = memref.load %arg10[%c59] : memref<98xf32, #tpu.memory_space<smem>>
    %c4_309 = arith.constant 4 : index
    %c6_310 = arith.constant 6 : index
    %c0_311 = arith.constant 0 : index
    %414 = vector.load %arg13[%c4_309, %c6_310, %c0_311] : memref<14x24x1xf32, #tpu.memory_space<vmem>>, vector<8x8x1xf32>
    %415 = vector.broadcast %412 : f32 to vector<8x8x1xf32>
    %416 = arith.mulf %414, %415 : vector<8x8x1xf32>
    %417 = arith.addf %411, %416 : vector<8x8x1xf32>
    %c4_312 = arith.constant 4 : index
    %c6_313 = arith.constant 6 : index
    %c0_314 = arith.constant 0 : index
    %418 = vector.load %arg14[%c4_312, %c6_313, %c0_314] : memref<14x24x1xf32, #tpu.memory_space<vmem>>, vector<8x8x1xf32>
    %419 = vector.broadcast %413 : f32 to vector<8x8x1xf32>
    %420 = arith.mulf %418, %419 : vector<8x8x1xf32>
    %421 = arith.addf %417, %420 : vector<8x8x1xf32>
    %c60 = arith.constant 60 : index
    %422 = memref.load %arg10[%c60] : memref<98xf32, #tpu.memory_space<smem>>
    %c61 = arith.constant 61 : index
    %423 = memref.load %arg10[%c61] : memref<98xf32, #tpu.memory_space<smem>>
    %c4_315 = arith.constant 4 : index
    %c7_316 = arith.constant 7 : index
    %c0_317 = arith.constant 0 : index
    %424 = vector.load %arg13[%c4_315, %c7_316, %c0_317] : memref<14x24x1xf32, #tpu.memory_space<vmem>>, vector<8x8x1xf32>
    %425 = vector.broadcast %422 : f32 to vector<8x8x1xf32>
    %426 = arith.mulf %424, %425 : vector<8x8x1xf32>
    %427 = arith.addf %421, %426 : vector<8x8x1xf32>
    %c4_318 = arith.constant 4 : index
    %c7_319 = arith.constant 7 : index
    %c0_320 = arith.constant 0 : index
    %428 = vector.load %arg14[%c4_318, %c7_319, %c0_320] : memref<14x24x1xf32, #tpu.memory_space<vmem>>, vector<8x8x1xf32>
    %429 = vector.broadcast %423 : f32 to vector<8x8x1xf32>
    %430 = arith.mulf %428, %429 : vector<8x8x1xf32>
    %431 = arith.addf %427, %430 : vector<8x8x1xf32>
    %c62 = arith.constant 62 : index
    %432 = memref.load %arg10[%c62] : memref<98xf32, #tpu.memory_space<smem>>
    %c63 = arith.constant 63 : index
    %433 = memref.load %arg10[%c63] : memref<98xf32, #tpu.memory_space<smem>>
    %c4_321 = arith.constant 4 : index
    %c8_322 = arith.constant 8 : index
    %c0_323 = arith.constant 0 : index
    %434 = vector.load %arg13[%c4_321, %c8_322, %c0_323] : memref<14x24x1xf32, #tpu.memory_space<vmem>>, vector<8x8x1xf32>
    %435 = vector.broadcast %432 : f32 to vector<8x8x1xf32>
    %436 = arith.mulf %434, %435 : vector<8x8x1xf32>
    %437 = arith.addf %431, %436 : vector<8x8x1xf32>
    %c4_324 = arith.constant 4 : index
    %c8_325 = arith.constant 8 : index
    %c0_326 = arith.constant 0 : index
    %438 = vector.load %arg14[%c4_324, %c8_325, %c0_326] : memref<14x24x1xf32, #tpu.memory_space<vmem>>, vector<8x8x1xf32>
    %439 = vector.broadcast %433 : f32 to vector<8x8x1xf32>
    %440 = arith.mulf %438, %439 : vector<8x8x1xf32>
    %441 = arith.addf %437, %440 : vector<8x8x1xf32>
    %c64 = arith.constant 64 : index
    %442 = memref.load %arg10[%c64] : memref<98xf32, #tpu.memory_space<smem>>
    %c65 = arith.constant 65 : index
    %443 = memref.load %arg10[%c65] : memref<98xf32, #tpu.memory_space<smem>>
    %c4_327 = arith.constant 4 : index
    %c9_328 = arith.constant 9 : index
    %c0_329 = arith.constant 0 : index
    %444 = vector.load %arg13[%c4_327, %c9_328, %c0_329] : memref<14x24x1xf32, #tpu.memory_space<vmem>>, vector<8x8x1xf32>
    %445 = vector.broadcast %442 : f32 to vector<8x8x1xf32>
    %446 = arith.mulf %444, %445 : vector<8x8x1xf32>
    %447 = arith.addf %441, %446 : vector<8x8x1xf32>
    %c4_330 = arith.constant 4 : index
    %c9_331 = arith.constant 9 : index
    %c0_332 = arith.constant 0 : index
    %448 = vector.load %arg14[%c4_330, %c9_331, %c0_332] : memref<14x24x1xf32, #tpu.memory_space<vmem>>, vector<8x8x1xf32>
    %449 = vector.broadcast %443 : f32 to vector<8x8x1xf32>
    %450 = arith.mulf %448, %449 : vector<8x8x1xf32>
    %451 = arith.addf %447, %450 : vector<8x8x1xf32>
    %c66 = arith.constant 66 : index
    %452 = memref.load %arg10[%c66] : memref<98xf32, #tpu.memory_space<smem>>
    %c67 = arith.constant 67 : index
    %453 = memref.load %arg10[%c67] : memref<98xf32, #tpu.memory_space<smem>>
    %c4_333 = arith.constant 4 : index
    %c10_334 = arith.constant 10 : index
    %c0_335 = arith.constant 0 : index
    %454 = vector.load %arg13[%c4_333, %c10_334, %c0_335] : memref<14x24x1xf32, #tpu.memory_space<vmem>>, vector<8x8x1xf32>
    %455 = vector.broadcast %452 : f32 to vector<8x8x1xf32>
    %456 = arith.mulf %454, %455 : vector<8x8x1xf32>
    %457 = arith.addf %451, %456 : vector<8x8x1xf32>
    %c4_336 = arith.constant 4 : index
    %c10_337 = arith.constant 10 : index
    %c0_338 = arith.constant 0 : index
    %458 = vector.load %arg14[%c4_336, %c10_337, %c0_338] : memref<14x24x1xf32, #tpu.memory_space<vmem>>, vector<8x8x1xf32>
    %459 = vector.broadcast %453 : f32 to vector<8x8x1xf32>
    %460 = arith.mulf %458, %459 : vector<8x8x1xf32>
    %461 = arith.addf %457, %460 : vector<8x8x1xf32>
    %c68 = arith.constant 68 : index
    %462 = memref.load %arg10[%c68] : memref<98xf32, #tpu.memory_space<smem>>
    %c69 = arith.constant 69 : index
    %463 = memref.load %arg10[%c69] : memref<98xf32, #tpu.memory_space<smem>>
    %c4_339 = arith.constant 4 : index
    %c11_340 = arith.constant 11 : index
    %c0_341 = arith.constant 0 : index
    %464 = vector.load %arg13[%c4_339, %c11_340, %c0_341] : memref<14x24x1xf32, #tpu.memory_space<vmem>>, vector<8x8x1xf32>
    %465 = vector.broadcast %462 : f32 to vector<8x8x1xf32>
    %466 = arith.mulf %464, %465 : vector<8x8x1xf32>
    %467 = arith.addf %461, %466 : vector<8x8x1xf32>
    %c4_342 = arith.constant 4 : index
    %c11_343 = arith.constant 11 : index
    %c0_344 = arith.constant 0 : index
    %468 = vector.load %arg14[%c4_342, %c11_343, %c0_344] : memref<14x24x1xf32, #tpu.memory_space<vmem>>, vector<8x8x1xf32>
    %469 = vector.broadcast %463 : f32 to vector<8x8x1xf32>
    %470 = arith.mulf %468, %469 : vector<8x8x1xf32>
    %471 = arith.addf %467, %470 : vector<8x8x1xf32>
    %c70 = arith.constant 70 : index
    %472 = memref.load %arg10[%c70] : memref<98xf32, #tpu.memory_space<smem>>
    %c71 = arith.constant 71 : index
    %473 = memref.load %arg10[%c71] : memref<98xf32, #tpu.memory_space<smem>>
    %c5_345 = arith.constant 5 : index
    %c5_346 = arith.constant 5 : index
    %c0_347 = arith.constant 0 : index
    %474 = vector.load %arg13[%c5_345, %c5_346, %c0_347] : memref<14x24x1xf32, #tpu.memory_space<vmem>>, vector<8x8x1xf32>
    %475 = vector.broadcast %472 : f32 to vector<8x8x1xf32>
    %476 = arith.mulf %474, %475 : vector<8x8x1xf32>
    %477 = arith.addf %471, %476 : vector<8x8x1xf32>
    %c5_348 = arith.constant 5 : index
    %c5_349 = arith.constant 5 : index
    %c0_350 = arith.constant 0 : index
    %478 = vector.load %arg14[%c5_348, %c5_349, %c0_350] : memref<14x24x1xf32, #tpu.memory_space<vmem>>, vector<8x8x1xf32>
    %479 = vector.broadcast %473 : f32 to vector<8x8x1xf32>
    %480 = arith.mulf %478, %479 : vector<8x8x1xf32>
    %481 = arith.addf %477, %480 : vector<8x8x1xf32>
    %c72 = arith.constant 72 : index
    %482 = memref.load %arg10[%c72] : memref<98xf32, #tpu.memory_space<smem>>
    %c73 = arith.constant 73 : index
    %483 = memref.load %arg10[%c73] : memref<98xf32, #tpu.memory_space<smem>>
    %c5_351 = arith.constant 5 : index
    %c6_352 = arith.constant 6 : index
    %c0_353 = arith.constant 0 : index
    %484 = vector.load %arg13[%c5_351, %c6_352, %c0_353] : memref<14x24x1xf32, #tpu.memory_space<vmem>>, vector<8x8x1xf32>
    %485 = vector.broadcast %482 : f32 to vector<8x8x1xf32>
    %486 = arith.mulf %484, %485 : vector<8x8x1xf32>
    %487 = arith.addf %481, %486 : vector<8x8x1xf32>
    %c5_354 = arith.constant 5 : index
    %c6_355 = arith.constant 6 : index
    %c0_356 = arith.constant 0 : index
    %488 = vector.load %arg14[%c5_354, %c6_355, %c0_356] : memref<14x24x1xf32, #tpu.memory_space<vmem>>, vector<8x8x1xf32>
    %489 = vector.broadcast %483 : f32 to vector<8x8x1xf32>
    %490 = arith.mulf %488, %489 : vector<8x8x1xf32>
    %491 = arith.addf %487, %490 : vector<8x8x1xf32>
    %c74 = arith.constant 74 : index
    %492 = memref.load %arg10[%c74] : memref<98xf32, #tpu.memory_space<smem>>
    %c75 = arith.constant 75 : index
    %493 = memref.load %arg10[%c75] : memref<98xf32, #tpu.memory_space<smem>>
    %c5_357 = arith.constant 5 : index
    %c7_358 = arith.constant 7 : index
    %c0_359 = arith.constant 0 : index
    %494 = vector.load %arg13[%c5_357, %c7_358, %c0_359] : memref<14x24x1xf32, #tpu.memory_space<vmem>>, vector<8x8x1xf32>
    %495 = vector.broadcast %492 : f32 to vector<8x8x1xf32>
    %496 = arith.mulf %494, %495 : vector<8x8x1xf32>
    %497 = arith.addf %491, %496 : vector<8x8x1xf32>
    %c5_360 = arith.constant 5 : index
    %c7_361 = arith.constant 7 : index
    %c0_362 = arith.constant 0 : index
    %498 = vector.load %arg14[%c5_360, %c7_361, %c0_362] : memref<14x24x1xf32, #tpu.memory_space<vmem>>, vector<8x8x1xf32>
    %499 = vector.broadcast %493 : f32 to vector<8x8x1xf32>
    %500 = arith.mulf %498, %499 : vector<8x8x1xf32>
    %501 = arith.addf %497, %500 : vector<8x8x1xf32>
    %c76 = arith.constant 76 : index
    %502 = memref.load %arg10[%c76] : memref<98xf32, #tpu.memory_space<smem>>
    %c77 = arith.constant 77 : index
    %503 = memref.load %arg10[%c77] : memref<98xf32, #tpu.memory_space<smem>>
    %c5_363 = arith.constant 5 : index
    %c8_364 = arith.constant 8 : index
    %c0_365 = arith.constant 0 : index
    %504 = vector.load %arg13[%c5_363, %c8_364, %c0_365] : memref<14x24x1xf32, #tpu.memory_space<vmem>>, vector<8x8x1xf32>
    %505 = vector.broadcast %502 : f32 to vector<8x8x1xf32>
    %506 = arith.mulf %504, %505 : vector<8x8x1xf32>
    %507 = arith.addf %501, %506 : vector<8x8x1xf32>
    %c5_366 = arith.constant 5 : index
    %c8_367 = arith.constant 8 : index
    %c0_368 = arith.constant 0 : index
    %508 = vector.load %arg14[%c5_366, %c8_367, %c0_368] : memref<14x24x1xf32, #tpu.memory_space<vmem>>, vector<8x8x1xf32>
    %509 = vector.broadcast %503 : f32 to vector<8x8x1xf32>
    %510 = arith.mulf %508, %509 : vector<8x8x1xf32>
    %511 = arith.addf %507, %510 : vector<8x8x1xf32>
    %c78 = arith.constant 78 : index
    %512 = memref.load %arg10[%c78] : memref<98xf32, #tpu.memory_space<smem>>
    %c79 = arith.constant 79 : index
    %513 = memref.load %arg10[%c79] : memref<98xf32, #tpu.memory_space<smem>>
    %c5_369 = arith.constant 5 : index
    %c9_370 = arith.constant 9 : index
    %c0_371 = arith.constant 0 : index
    %514 = vector.load %arg13[%c5_369, %c9_370, %c0_371] : memref<14x24x1xf32, #tpu.memory_space<vmem>>, vector<8x8x1xf32>
    %515 = vector.broadcast %512 : f32 to vector<8x8x1xf32>
    %516 = arith.mulf %514, %515 : vector<8x8x1xf32>
    %517 = arith.addf %511, %516 : vector<8x8x1xf32>
    %c5_372 = arith.constant 5 : index
    %c9_373 = arith.constant 9 : index
    %c0_374 = arith.constant 0 : index
    %518 = vector.load %arg14[%c5_372, %c9_373, %c0_374] : memref<14x24x1xf32, #tpu.memory_space<vmem>>, vector<8x8x1xf32>
    %519 = vector.broadcast %513 : f32 to vector<8x8x1xf32>
    %520 = arith.mulf %518, %519 : vector<8x8x1xf32>
    %521 = arith.addf %517, %520 : vector<8x8x1xf32>
    %c80 = arith.constant 80 : index
    %522 = memref.load %arg10[%c80] : memref<98xf32, #tpu.memory_space<smem>>
    %c81 = arith.constant 81 : index
    %523 = memref.load %arg10[%c81] : memref<98xf32, #tpu.memory_space<smem>>
    %c5_375 = arith.constant 5 : index
    %c10_376 = arith.constant 10 : index
    %c0_377 = arith.constant 0 : index
    %524 = vector.load %arg13[%c5_375, %c10_376, %c0_377] : memref<14x24x1xf32, #tpu.memory_space<vmem>>, vector<8x8x1xf32>
    %525 = vector.broadcast %522 : f32 to vector<8x8x1xf32>
    %526 = arith.mulf %524, %525 : vector<8x8x1xf32>
    %527 = arith.addf %521, %526 : vector<8x8x1xf32>
    %c5_378 = arith.constant 5 : index
    %c10_379 = arith.constant 10 : index
    %c0_380 = arith.constant 0 : index
    %528 = vector.load %arg14[%c5_378, %c10_379, %c0_380] : memref<14x24x1xf32, #tpu.memory_space<vmem>>, vector<8x8x1xf32>
    %529 = vector.broadcast %523 : f32 to vector<8x8x1xf32>
    %530 = arith.mulf %528, %529 : vector<8x8x1xf32>
    %531 = arith.addf %527, %530 : vector<8x8x1xf32>
    %c82 = arith.constant 82 : index
    %532 = memref.load %arg10[%c82] : memref<98xf32, #tpu.memory_space<smem>>
    %c83 = arith.constant 83 : index
    %533 = memref.load %arg10[%c83] : memref<98xf32, #tpu.memory_space<smem>>
    %c5_381 = arith.constant 5 : index
    %c11_382 = arith.constant 11 : index
    %c0_383 = arith.constant 0 : index
    %534 = vector.load %arg13[%c5_381, %c11_382, %c0_383] : memref<14x24x1xf32, #tpu.memory_space<vmem>>, vector<8x8x1xf32>
    %535 = vector.broadcast %532 : f32 to vector<8x8x1xf32>
    %536 = arith.mulf %534, %535 : vector<8x8x1xf32>
    %537 = arith.addf %531, %536 : vector<8x8x1xf32>
    %c5_384 = arith.constant 5 : index
    %c11_385 = arith.constant 11 : index
    %c0_386 = arith.constant 0 : index
    %538 = vector.load %arg14[%c5_384, %c11_385, %c0_386] : memref<14x24x1xf32, #tpu.memory_space<vmem>>, vector<8x8x1xf32>
    %539 = vector.broadcast %533 : f32 to vector<8x8x1xf32>
    %540 = arith.mulf %538, %539 : vector<8x8x1xf32>
    %541 = arith.addf %537, %540 : vector<8x8x1xf32>
    %c84 = arith.constant 84 : index
    %542 = memref.load %arg10[%c84] : memref<98xf32, #tpu.memory_space<smem>>
    %c85 = arith.constant 85 : index
    %543 = memref.load %arg10[%c85] : memref<98xf32, #tpu.memory_space<smem>>
    %c6_387 = arith.constant 6 : index
    %c5_388 = arith.constant 5 : index
    %c0_389 = arith.constant 0 : index
    %544 = vector.load %arg13[%c6_387, %c5_388, %c0_389] : memref<14x24x1xf32, #tpu.memory_space<vmem>>, vector<8x8x1xf32>
    %545 = vector.broadcast %542 : f32 to vector<8x8x1xf32>
    %546 = arith.mulf %544, %545 : vector<8x8x1xf32>
    %547 = arith.addf %541, %546 : vector<8x8x1xf32>
    %c6_390 = arith.constant 6 : index
    %c5_391 = arith.constant 5 : index
    %c0_392 = arith.constant 0 : index
    %548 = vector.load %arg14[%c6_390, %c5_391, %c0_392] : memref<14x24x1xf32, #tpu.memory_space<vmem>>, vector<8x8x1xf32>
    %549 = vector.broadcast %543 : f32 to vector<8x8x1xf32>
    %550 = arith.mulf %548, %549 : vector<8x8x1xf32>
    %551 = arith.addf %547, %550 : vector<8x8x1xf32>
    %c86 = arith.constant 86 : index
    %552 = memref.load %arg10[%c86] : memref<98xf32, #tpu.memory_space<smem>>
    %c87 = arith.constant 87 : index
    %553 = memref.load %arg10[%c87] : memref<98xf32, #tpu.memory_space<smem>>
    %c6_393 = arith.constant 6 : index
    %c6_394 = arith.constant 6 : index
    %c0_395 = arith.constant 0 : index
    %554 = vector.load %arg13[%c6_393, %c6_394, %c0_395] : memref<14x24x1xf32, #tpu.memory_space<vmem>>, vector<8x8x1xf32>
    %555 = vector.broadcast %552 : f32 to vector<8x8x1xf32>
    %556 = arith.mulf %554, %555 : vector<8x8x1xf32>
    %557 = arith.addf %551, %556 : vector<8x8x1xf32>
    %c6_396 = arith.constant 6 : index
    %c6_397 = arith.constant 6 : index
    %c0_398 = arith.constant 0 : index
    %558 = vector.load %arg14[%c6_396, %c6_397, %c0_398] : memref<14x24x1xf32, #tpu.memory_space<vmem>>, vector<8x8x1xf32>
    %559 = vector.broadcast %553 : f32 to vector<8x8x1xf32>
    %560 = arith.mulf %558, %559 : vector<8x8x1xf32>
    %561 = arith.addf %557, %560 : vector<8x8x1xf32>
    %c88 = arith.constant 88 : index
    %562 = memref.load %arg10[%c88] : memref<98xf32, #tpu.memory_space<smem>>
    %c89 = arith.constant 89 : index
    %563 = memref.load %arg10[%c89] : memref<98xf32, #tpu.memory_space<smem>>
    %c6_399 = arith.constant 6 : index
    %c7_400 = arith.constant 7 : index
    %c0_401 = arith.constant 0 : index
    %564 = vector.load %arg13[%c6_399, %c7_400, %c0_401] : memref<14x24x1xf32, #tpu.memory_space<vmem>>, vector<8x8x1xf32>
    %565 = vector.broadcast %562 : f32 to vector<8x8x1xf32>
    %566 = arith.mulf %564, %565 : vector<8x8x1xf32>
    %567 = arith.addf %561, %566 : vector<8x8x1xf32>
    %c6_402 = arith.constant 6 : index
    %c7_403 = arith.constant 7 : index
    %c0_404 = arith.constant 0 : index
    %568 = vector.load %arg14[%c6_402, %c7_403, %c0_404] : memref<14x24x1xf32, #tpu.memory_space<vmem>>, vector<8x8x1xf32>
    %569 = vector.broadcast %563 : f32 to vector<8x8x1xf32>
    %570 = arith.mulf %568, %569 : vector<8x8x1xf32>
    %571 = arith.addf %567, %570 : vector<8x8x1xf32>
    %c90 = arith.constant 90 : index
    %572 = memref.load %arg10[%c90] : memref<98xf32, #tpu.memory_space<smem>>
    %c91 = arith.constant 91 : index
    %573 = memref.load %arg10[%c91] : memref<98xf32, #tpu.memory_space<smem>>
    %c6_405 = arith.constant 6 : index
    %c8_406 = arith.constant 8 : index
    %c0_407 = arith.constant 0 : index
    %574 = vector.load %arg13[%c6_405, %c8_406, %c0_407] : memref<14x24x1xf32, #tpu.memory_space<vmem>>, vector<8x8x1xf32>
    %575 = vector.broadcast %572 : f32 to vector<8x8x1xf32>
    %576 = arith.mulf %574, %575 : vector<8x8x1xf32>
    %577 = arith.addf %571, %576 : vector<8x8x1xf32>
    %c6_408 = arith.constant 6 : index
    %c8_409 = arith.constant 8 : index
    %c0_410 = arith.constant 0 : index
    %578 = vector.load %arg14[%c6_408, %c8_409, %c0_410] : memref<14x24x1xf32, #tpu.memory_space<vmem>>, vector<8x8x1xf32>
    %579 = vector.broadcast %573 : f32 to vector<8x8x1xf32>
    %580 = arith.mulf %578, %579 : vector<8x8x1xf32>
    %581 = arith.addf %577, %580 : vector<8x8x1xf32>
    %c92 = arith.constant 92 : index
    %582 = memref.load %arg10[%c92] : memref<98xf32, #tpu.memory_space<smem>>
    %c93 = arith.constant 93 : index
    %583 = memref.load %arg10[%c93] : memref<98xf32, #tpu.memory_space<smem>>
    %c6_411 = arith.constant 6 : index
    %c9_412 = arith.constant 9 : index
    %c0_413 = arith.constant 0 : index
    %584 = vector.load %arg13[%c6_411, %c9_412, %c0_413] : memref<14x24x1xf32, #tpu.memory_space<vmem>>, vector<8x8x1xf32>
    %585 = vector.broadcast %582 : f32 to vector<8x8x1xf32>
    %586 = arith.mulf %584, %585 : vector<8x8x1xf32>
    %587 = arith.addf %581, %586 : vector<8x8x1xf32>
    %c6_414 = arith.constant 6 : index
    %c9_415 = arith.constant 9 : index
    %c0_416 = arith.constant 0 : index
    %588 = vector.load %arg14[%c6_414, %c9_415, %c0_416] : memref<14x24x1xf32, #tpu.memory_space<vmem>>, vector<8x8x1xf32>
    %589 = vector.broadcast %583 : f32 to vector<8x8x1xf32>
    %590 = arith.mulf %588, %589 : vector<8x8x1xf32>
    %591 = arith.addf %587, %590 : vector<8x8x1xf32>
    %c94 = arith.constant 94 : index
    %592 = memref.load %arg10[%c94] : memref<98xf32, #tpu.memory_space<smem>>
    %c95 = arith.constant 95 : index
    %593 = memref.load %arg10[%c95] : memref<98xf32, #tpu.memory_space<smem>>
    %c6_417 = arith.constant 6 : index
    %c10_418 = arith.constant 10 : index
    %c0_419 = arith.constant 0 : index
    %594 = vector.load %arg13[%c6_417, %c10_418, %c0_419] : memref<14x24x1xf32, #tpu.memory_space<vmem>>, vector<8x8x1xf32>
    %595 = vector.broadcast %592 : f32 to vector<8x8x1xf32>
    %596 = arith.mulf %594, %595 : vector<8x8x1xf32>
    %597 = arith.addf %591, %596 : vector<8x8x1xf32>
    %c6_420 = arith.constant 6 : index
    %c10_421 = arith.constant 10 : index
    %c0_422 = arith.constant 0 : index
    %598 = vector.load %arg14[%c6_420, %c10_421, %c0_422] : memref<14x24x1xf32, #tpu.memory_space<vmem>>, vector<8x8x1xf32>
    %599 = vector.broadcast %593 : f32 to vector<8x8x1xf32>
    %600 = arith.mulf %598, %599 : vector<8x8x1xf32>
    %601 = arith.addf %597, %600 : vector<8x8x1xf32>
    %c96 = arith.constant 96 : index
    %602 = memref.load %arg10[%c96] : memref<98xf32, #tpu.memory_space<smem>>
    %c97 = arith.constant 97 : index
    %603 = memref.load %arg10[%c97] : memref<98xf32, #tpu.memory_space<smem>>
    %c6_423 = arith.constant 6 : index
    %c11_424 = arith.constant 11 : index
    %c0_425 = arith.constant 0 : index
    %604 = vector.load %arg13[%c6_423, %c11_424, %c0_425] : memref<14x24x1xf32, #tpu.memory_space<vmem>>, vector<8x8x1xf32>
    %605 = vector.broadcast %602 : f32 to vector<8x8x1xf32>
    %606 = arith.mulf %604, %605 : vector<8x8x1xf32>
    %607 = arith.addf %601, %606 : vector<8x8x1xf32>
    %c6_426 = arith.constant 6 : index
    %c11_427 = arith.constant 11 : index
    %c0_428 = arith.constant 0 : index
    %608 = vector.load %arg14[%c6_426, %c11_427, %c0_428] : memref<14x24x1xf32, #tpu.memory_space<vmem>>, vector<8x8x1xf32>
    %609 = vector.broadcast %603 : f32 to vector<8x8x1xf32>
    %610 = arith.mulf %608, %609 : vector<8x8x1xf32>
    %611 = arith.addf %607, %610 : vector<8x8x1xf32>
    %612 = arith.negf %611 : vector<8x8x1xf32>
    %613 = math.exp %612 : vector<8x8x1xf32>
    %cst_429 = arith.constant 1.000000e+00 : f32
    %614 = vector.broadcast %cst_429 : f32 to vector<8x8x1xf32>
    %615 = arith.addf %614, %613 : vector<8x8x1xf32>
    %616 = arith.divf %614, %615 : vector<8x8x1xf32>
    %617 = vector.extract_strided_slice %107 {offsets = [0, 0, 0], sizes = [8, 8, 32], strides = [1, 1, 1]} : vector<8x8x128xf32> to vector<8x8x32xf32>
    %618 = vector.broadcast %616 : vector<8x8x1xf32> to vector<8x8x32xf32>
    %619 = arith.mulf %617, %618 : vector<8x8x32xf32>
    %620 = arith.addf %619, %7 : vector<8x8x32xf32>
    %cst_430 = arith.constant 0.000000e+00 : f32
    %621 = vector.broadcast %cst_430 : f32 to vector<8x8x32xf32>
    %622 = arith.maximumf %620, %621 : vector<8x8x32xf32>
    %c0_431 = arith.constant 0 : index
    %c0_432 = arith.constant 0 : index
    %c0_433 = arith.constant 0 : index
    %c0_434 = arith.constant 0 : index
    %623 = vector.load %arg11[%c0_431, %c0_432, %c0_433, %c0_434] : memref<1x8x8x32xf32, #tpu.memory_space<vmem>>, vector<1x8x8x32xf32>
    %624 = vector.shape_cast %623 : vector<1x8x8x32xf32> to vector<8x8x32xf32>
    %625 = vector.shape_cast %622 : vector<8x8x32xf32> to vector<1x8x8x32xf32>
    tpu.vector_store %arg11[%c0_431, %c0_432, %c0_433, %c0_434], %625 {strides = array<i32>} : memref<1x8x8x32xf32, #tpu.memory_space<vmem>>, vector<1x8x8x32xf32>,
    return
  }
  func.func @transform_0(%arg0: i32) -> (i32, i32, i32, i32) {
    %c0_i32 = arith.constant 0 : i32
    %c0_i32_0 = arith.constant 0 : i32
    %c0_i32_1 = arith.constant 0 : i32
    %c0_i32_2 = arith.constant 0 : i32
    return %arg0, %c0_i32, %c0_i32_0, %c0_i32_1 : i32, i32, i32, i32
  }
  func.func @transform_1(%arg0: i32) -> (i32, i32, i32) {
    %c0_i32 = arith.constant 0 : i32
    %c0_i32_0 = arith.constant 0 : i32
    %c0_i32_1 = arith.constant 0 : i32
    %c0_i32_2 = arith.constant 0 : i32
    return %c0_i32, %c0_i32_0, %c0_i32_1 : i32, i32, i32
  }
  func.func @transform_2(%arg0: i32) -> (i32, i32) {
    %c0_i32 = arith.constant 0 : i32
    %c0_i32_0 = arith.constant 0 : i32
    %c0_i32_1 = arith.constant 0 : i32
    return %c0_i32, %c0_i32_0 : i32, i32
  }
  func.func @transform_3(%arg0: i32) -> (i32, i32) {
    %c0_i32 = arith.constant 0 : i32
    %c0_i32_0 = arith.constant 0 : i32
    %c0_i32_1 = arith.constant 0 : i32
    return %c0_i32, %c0_i32_0 : i32, i32
  }
  func.func @transform_4(%arg0: i32) -> (i32, i32, i32) {
    %c0_i32 = arith.constant 0 : i32
    %c0_i32_0 = arith.constant 0 : i32
    %c0_i32_1 = arith.constant 0 : i32
    %c0_i32_2 = arith.constant 0 : i32
    return %c0_i32, %c0_i32_0, %c0_i32_1 : i32, i32, i32
  }
  func.func @transform_5(%arg0: i32) -> (i32, i32) {
    %c0_i32 = arith.constant 0 : i32
    %c0_i32_0 = arith.constant 0 : i32
    %c0_i32_1 = arith.constant 0 : i32
    return %c0_i32, %c0_i32_0 : i32, i32
  }
  func.func @transform_6(%arg0: i32) -> (i32, i32) {
    %c0_i32 = arith.constant 0 : i32
    %c0_i32_0 = arith.constant 0 : i32
    %c0_i32_1 = arith.constant 0 : i32
    return %c0_i32, %c0_i32_0 : i32, i32
  }
  func.func @transform_7(%arg0: i32) -> (i32, i32) {
    %c0_i32 = arith.constant 0 : i32
    %c0_i32_0 = arith.constant 0 : i32
    %c0_i32_1 = arith.constant 0 : i32
    return %c0_i32, %c0_i32_0 : i32, i32
  }
  func.func @transform_8(%arg0: i32) -> (i32, i32) {
    %c0_i32 = arith.constant 0 : i32
    %c0_i32_0 = arith.constant 0 : i32
    %c0_i32_1 = arith.constant 0 : i32
    return %c0_i32, %c0_i32_0 : i32, i32
  }
  func.func @transform_9(%arg0: i32) -> i32 {
    %c0_i32 = arith.constant 0 : i32
    %c0_i32_0 = arith.constant 0 : i32
    return %c0_i32 : i32
  }
  func.func @transform_10(%arg0: i32) -> (i32, i32, i32, i32) {
    %c0_i32 = arith.constant 0 : i32
    %c0_i32_0 = arith.constant 0 : i32
    %c0_i32_1 = arith.constant 0 : i32
    %c0_i32_2 = arith.constant 0 : i32
    return %arg0, %c0_i32, %c0_i32_0, %c0_i32_1 : i32, i32, i32, i32
  }
}

</mosaic_0001>

<bundles_post_ra>
// kernel: tpu_custom_call.1
= control target key start
LH: loop header
LB: loop body
LE: loop exit
PB: predicated region body
PF: predicated region fallthrough
CT: control target
= control target key end

     0   :  { %s10833_s0 = inlined_call_operand.vmem [shape: f32[2,8,8,32], index: 0, kind: input, shape index: {}]   ;;  %s10834_s1 = inlined_call_operand.hbm [shape: f32[3,384,128], index: 1, kind: input, shape index: {}]   ;;  %s10835_s2 = inlined_call_operand.vmem [shape: f32[1,128], index: 2, kind: input, shape index: {}]   ;;  %s10836_s3 = inlined_call_operand.vmem [shape: f32[1,128], index: 3, kind: input, shape index: {}]   ;;  %s10837_s4 = inlined_call_operand.hbm [shape: f32[3,384,128], index: 4, kind: input, shape index: {}]   ;;  %s10838_s5 = inlined_call_operand.vmem [shape: f32[1,128], index: 5, kind: input, shape index: {}]   ;;  %s10839_s6 = inlined_call_operand.vmem [shape: f32[1,128], index: 6, kind: input, shape index: {}]   ;;  %s10840_s7 = inlined_call_operand.vmem [shape: f32[128,2], index: 7, kind: input, shape index: {}]   ;;  %s10841_s8 = inlined_call_operand.vmem [shape: f32[2,128], index: 8, kind: input, shape index: {}]   ;;  %s10842_s9 = inlined_call_operand.vmem [shape: f32[98], index: 9, kind: input, shape index: {}]   ;;  %s10843_s10 = inlined_call_operand.hbm [shape: f32[2,8,8,32], index: 10, kind: output, shape index: {}]  }
   0x1   :  { %11116 = sst [smem:[#allocation360_spill]] %s10833_s0 }
   0x2   :  { %11117 = sst [smem:[#allocation361_spill]] %s10834_s1 }
   0x3   :  { %11118 = sst [smem:[#allocation362_spill]] %s10835_s2 }
   0x4   :  { %11119 = sst [smem:[#allocation363_spill]] %s10836_s3 }
   0x5   :  { %11120 = sst [smem:[#allocation364_spill]] %s10837_s4 }
   0x6   :  { %11121 = sst [smem:[#allocation365_spill]] %s10838_s5 }
   0x7   :  { %11122 = sst [smem:[#allocation366_spill]] %s10839_s6 }
   0x8   :  { %11123 = sst [smem:[#allocation367_spill]] %s10840_s7 }
   0x9   :  { %11124 = sst [smem:[#allocation368_spill]] %s10841_s8 }
   0xa   :  { %11125 = sst [smem:[#allocation369_spill]] %s10842_s9 }
   0xb   :  { %11126 = sst [smem:[#allocation370_spill]] %s10843_s10 }
   0xc   :  { %15 = vsyncpa [#allocation6], 0 }
   0xd   :  { %16 = vsyncpa [#allocation10], 0 }
   0xe   :  { %17 = vsyncpa [#allocation8], 0 }
   0xf   :  { %18 = vsyncpa [#allocation7], 0 }
  0x10   :  { %20 = vsyncpa [#allocation7 + $0x1], 0  ;;  %s6643_s13 = smov 0   ;;  %s6645_s14 = smov 0  }
  0x11   :  { %s6647_s15 = smov 0   ;;  %s6649_s16 = smov 0  }
  0x12 LB: > { %11127 = sst [smem:[#allocation17_spill]] %s6563_s13  ;;  %s6664_s17 = sadd.s32 4294967295, %s6575_s16   ;;  %s6575_s16 = sphi %s6649_s16, %s12183_s16   ;;  %s6571_s15 = sphi %s6647_s15, %s12186_s15   ;;  %s6567_s14 = sphi %s6645_s14, %s12185_s14   ;;  %s6563_s13 = sphi %s6643_s13, %s12184_s13  }
  0x13   : > { %11128 = sst [smem:[#allocation18_spill]] %s6567_s14  ;;  %s5385_s18 = sadd.s32 4294967294, %s6575_s16  }
  0x14   : > { %11129 = sst [smem:[#allocation19_spill]] %s6571_s15  ;;  %s6668_s19 = sadd.s32 1, %s6575_s16  }
  0x15   : > { %11130 = sst [smem:[#allocation20_spill]] %s6575_s16  ;;  %s248_s20 = sadd.s32 1, %s6571_s15 }
  0x16   : > { %11131 = sst [smem:[#allocation21_spill]] %s6664_s17  ;;  %s245_s21 = ssub.s32 %s6575_s16, %s6668_s19 }
  0x17   : > { %11132 = sst [smem:[#allocation22_spill]] %s6668_s19  ;;  %p258_p0 = scmp.ne.s32.totalorder %s6571_s15, %s6567_s14 }
  0x18   : > { %p246_p1 = scmp.eq.s32.totalorder %s245_s21, 0  ;;  %p259_p2 = scmp.eq.s32.totalorder %s6664_s17, 1 }
  0x19   : > { %p264_p3 = scmp.ne.s32.totalorder %s6567_s14, %s6563_s13  ;;  %p265_p4 = scmp.eq.s32.totalorder %s5385_s18, 1 }
  0x1a   : > { %s6679_s22 = scalar_select %p246_p1, %s6571_s15, %s248_s20  }
  0x1b   : > { %p6681_p5 = por %p259_p2, %p258_p0  ;;  %p6685_p6 = por %p265_p4, %p264_p3 }
  0x1c   : > { %11133 = sst [smem:[#allocation23_spill]] %s6679_s22  ;;  %p5386_p7 = scmp.ge.s32.totalorder %s6575_s16, 1 }
  0x1d   : > { %s11134_s23 = scalar_select %p6681_p5, 1, 0 }
  0x1e   : > { %s11136_s24 = scalar_select %p6685_p6, 1, 0 }
  0x1f   : > { %11135 = sst [smem:[#allocation24_spill]] %s11134_s23  ;;  %p272_p8 = scmp.lt.s32.totalorder %s6575_s16, 3 }
  0x20   : > { %11137 = sst [smem:[#allocation25_spill]] %s11136_s24  ;;  %p10844_p9 = scmp.eq.s32.totalorder %s6664_s17, 0 }
  0x21   : > { %p6692_p10 = pnand %p5386_p7, %p272_p8  ;;  %s6577_s26 = smov [#allocation5]  }
  0x22   : > { %s284_s27 = sshll.u32 %s6577_s26, 4  ;;  %s6578_s29 = smov [#allocation9]   ;;  %s285_s27 = int_to_ptr.vmem [resolvable:$true] %s284_s27 }
  0x23   : > { %p6334_p11 = pneg %p6692_p10  ;;  %s303_s30 = sshll.u32 %s6578_s29, 4  ;;  %s304_s30 = int_to_ptr.vmem [resolvable:$true] %s303_s30 }
  0x24   : > { %s11140_s9 = sld [smem:[#allocation369_spill]]  ;;  %s6447_s20 = scalar_lea.vmem %s285_s27, 18432 }
  0x25   : > { %p6700_p12 = pnand %p10844_p9, %p6334_p11  ;;  %p6448_p0 = scmp.ne.s32.totalorder %s285_s27, %s6447_s20 }
  0x26   : > { %p6455_p3 = scmp.lt.s32.totalorder %s285_s27, %s285_s27  ;;  %p6456_p4 = scmp.lt.s32.totalorder %s6447_s20, %s6447_s20 }
  0x27   : > { %p6438_p13 = pneg %p6700_p12 }
  0x28   : > { %p6457_p7 = por %p6456_p4, %p6455_p3 }
  0x29   : > { %p6450_p1 = pnand %p6448_p0, %p6438_p13 }
  0x2a   : > { %s329_s18 = sshll.u32 %s11140_s9, 4  ;;  %s6707_s18 = int_to_ptr.vmem [resolvable:$true] %s329_s18 }
  0x2b   : > { %p6451_p2 = pneg %p6450_p1 }
  0x2d   : > { %p6458_p8 = pnand %p6457_p7, %p6451_p2 }
  0x2f   : > { %6461 = shalt.err (!%p6458_p8)
}
  0x30   : > { %s6579_s21 = smov 128   ;;  %s6580_s26 = smov 8  }
  0x31   : > { %s11141_s1 = sld [smem:[#allocation361_spill]]  ;;  %s6473_s12 = scalar_lea.vmem %s304_s30, 18432 }
  0x32   : > { %p6474_p11 = scmp.ne.s32.totalorder %s304_s30, %s6473_s12  ;;  %p6481_p9 = scmp.lt.s32.totalorder %s304_s30, %s304_s30 }
  0x33   : > { %p6482_p6 = scmp.lt.s32.totalorder %s6473_s12, %s6473_s12 }
  0x34   : > { %p6476_p0 = pnand %p6474_p11, %p6438_p13 }
  0x35   : > { %p6483_p3 = por %p6482_p6, %p6481_p9 }
  0x36   : > { %p6477_p1 = pneg %p6476_p0 }
  0x37   : > { %6337 = dma.hbm_to_vmem [thread:$0]  (!%p6700_p12), %s11141_s1, 18432, %s285_s27, [#allocation6], %s6579_s21, %s6579_s21, %s6580_s26  }
  0x38   : > { %p6484_p2 = pnand %p6483_p3, %p6477_p1 }
  0x3a   : > { %6487 = shalt.err (!%p6484_p2)
}
  0x3b   : > { %s11142_s4 = sld [smem:[#allocation364_spill]]  ;;  %s6488_s27 = scalar_lea.vmem %s6707_s18, 16 }
  0x3c   : > { %p6489_p4 = scmp.ne.s32.totalorder %s6707_s18, %s6488_s27  ;;  %p6496_p6 = scmp.lt.s32.totalorder %s6707_s18, %s6707_s18 }
  0x3d   : > { %p6497_p9 = scmp.lt.s32.totalorder %s6488_s27, %s6488_s27 }
  0x3e   : > { %p6491_p7 = pnand %p6489_p4, %p6438_p13 }
  0x3f   : > { %p6498_p11 = por %p6497_p9, %p6496_p6 }
  0x40   : > { %p6492_p8 = pneg %p6491_p7 }
  0x41   : > { %6340 = dma.hbm_to_vmem [thread:$0]  (!%p6700_p12), %s11142_s4, 18432, %s304_s30, [#allocation10], %s6579_s21, %s6579_s21, %s6580_s26  }
  0x42   : > { %p6499_p0 = pnand %p6498_p11, %p6492_p8 }
  0x44   : > { %6502 = shalt.err (!%p6499_p0)
}
  0x45   : > { %s6581_s29 = smov [#allocation11]   ;;  %350 = sbr.rel (%p6692_p10) target bundleno = 1977 (0x7b9), region = 60 }
  0x46   : > { %6343 = dma.vmem_to_smem (!%p6700_p12), %s6707_s18, 16, %s6581_s29, [#allocation8]  }
  0x4a   : > { %p11143_p1 = scmp.eq.s32.totalorder %s6664_s17, 0 }
  0x4c   : > { %6546 = dma.done.wait (%p11143_p1), [#allocation6], 18432   ;;  %p11144_p13 = pmov %p11143_p1 }
  0x4d   : > { %p11145_p3 = pmov %p11143_p1 }
  0x4e   : > { %6548 = vsyncadd (%p11144_p13), [#allocation6], 4294948864 }
  0x4f   : > { %6550 = dma.done.wait (%p11145_p3), [#allocation10], 18432   ;;  %p11146_p2 = pmov %p11143_p1 }
  0x50   : > { %p11147_p4 = pmov %p11143_p1 }
  0x51   : > { %6552 = vsyncadd (%p11146_p2), [#allocation10], 4294948864 }
  0x52   : > { %6554 = dma.done.wait (%p11147_p4), [#allocation8], 16   ;;  %p11148_p12 = pmov %p11143_p1 }
  0x54   : > { %6556 = vsyncadd (%p11148_p12), [#allocation8], 4294967280 }
  0x55   : > { %364 = sfence }
  0x56   : > { %v663_v0 = vld [vmem:[#allocation5 + $0x278] sm:$0xff]  ;;  %v662_v3 = vld [vmem:[#allocation5 + $0x270] sm:$0xff]  ;;  %p397_p10 = scmp.lt.s32.totalorder %s6664_s17, 1  ;;  %v6582_v6 = vmov 0.0   ;;  %v661_v7 = vld [vmem:[#allocation5 + $0x268] sm:$0xff]  ;;  %s11149_s0 = sld [smem:[#allocation360_spill]] }
  0x57   : > { %v647_v1 = vld [vmem:[#allocation5 + $0x1f8] sm:$0xff]  ;;  %5517 = vmatprep.subr.mxu0 %v663_v0  ;;  %v646_v4 = vld [vmem:[#allocation5 + $0x1f0] sm:$0xff]  ;;  %406 = vst [vmem:[#allocation2 + $0x20] sm:$0xff] %v6582_v6  ;;  %402 = vst [vmem:[#allocation2] sm:$0xff] %v6582_v6  ;;  %vm526_vm0 = vcmask 261120   ;;  %s11160_s2 = sld [smem:[#allocation362_spill]] }
  0x58   : > { %v679_v2 = vld [vmem:[#allocation5 + $0x2f8] sm:$0xff]  ;;  %v678_v5 = vld [vmem:[#allocation5 + $0x2f0] sm:$0xff]  ;;  %403 = vst [vmem:[#allocation2 + $0x8] sm:$0xff] %v6582_v6  ;;  %404 = vst [vmem:[#allocation2 + $0x10] sm:$0xff] %v6582_v6  ;;  %5518 = vmatpush3.msra.mxu0 %v647_v1  ;;  %s398_s9 = scalar_select %p397_p10, %s6664_s17, 1  ;;  %vm6583_vm1 = vmmov 0  }
  0x59   : > { %6016 = vmatprep.subr.mxu1 %v679_v2  ;;  %405 = vst [vmem:[#allocation2 + $0x18] sm:$0xff] %v6582_v6  ;;  %407 = vst [vmem:[#allocation2 + $0x28] sm:$0xff] %v6582_v6  ;;  %v677_v8 = vld [vmem:[#allocation5 + $0x2e8] sm:$0xff]  ;;  %5519 = vmatprep.subr.mxu0 %v662_v3  ;;  %v660_v10 = vld [vmem:[#allocation5 + $0x260] sm:$0xff]  ;;  %s11161_s3 = sld [smem:[#allocation363_spill]]  ;;  %vm2431_vm2 = vcmask 1041408  }
  0x5a   : > { %408 = vst [vmem:[#allocation2 + $0x30] sm:$0xff] %v6582_v6  ;;  %409 = vst [vmem:[#allocation2 + $0x38] sm:$0xff] %v6582_v6  ;;  %6017 = vmatpush3.msra.mxu1 %v679_v2  ;;  %v645_v9 = vld [vmem:[#allocation5 + $0x1e8] sm:$0xff]  ;;  %5520 = vmatpush3.msra.mxu0 %v646_v4  ;;  %v676_v11 = vld [vmem:[#allocation5 + $0x2e0] sm:$0xff]  ;;  %s5515_s25 = sshll.u32 %s398_s9, 6  ;;  %s11165_s7 = sld [smem:[#allocation367_spill]] }
  0x5b   : > { %410 = vst [vmem:[#allocation2 + $0x40] sm:$0xff] %v6582_v6  ;;  %411 = vst [vmem:[#allocation2 + $0x48] sm:$0xff] %v6582_v6  ;;  %6018 = vmatprep.subr.mxu1 %v678_v5  ;;  %5521 = vmatprep.subr.mxu0 %v661_v7  ;;  %v644_v12 = vld [vmem:[#allocation5 + $0x1e0] sm:$0xff]  ;;  %v659_v13 = vld [vmem:[#allocation5 + $0x258] sm:$0xff]  ;;  %s11166_s8 = sld [smem:[#allocation368_spill]]  ;;  %vm2427_vm3 = vcmask 15360  }
  0x5c   : > { %412 = vst [vmem:[#allocation2 + $0x50] sm:$0xff] %v6582_v6  ;;  %413 = vst [vmem:[#allocation2 + $0x58] sm:$0xff] %v6582_v6  ;;  %6019 = vmatpush3.msra.mxu1 %v678_v5  ;;  %5522 = vmatpush3.msra.mxu0 %v645_v9  ;;  %v675_v14 = vld [vmem:[#allocation5 + $0x2d8] sm:$0xff]  ;;  %v658_v16 = vld [vmem:[#allocation5 + $0x250] sm:$0xff]  ;;  %s6788_s18 = scalar_lea.vmem %s11149_s0, %s5515_s25  ;;  %s11168_s5 = sld [smem:[#allocation365_spill]]  ;;  %vm432_vm4 = vcmask 7168  }
  0x5d   : > { %414 = vst [vmem:[#allocation2 + $0x60] sm:$0xff] %v6582_v6  ;;  %415 = vst [vmem:[#allocation2 + $0x68] sm:$0xff] %v6582_v6  ;;  %6020 = vmatprep.subr.mxu1 %v677_v8  ;;  %5523 = vmatprep.subr.mxu0 %v660_v10  ;;  %v643_v15 = vld [vmem:[#allocation5 + $0x1d8] sm:$0xff]  ;;  %v674_v17 = vld [vmem:[#allocation5 + $0x2d0] sm:$0xff]  ;;  %s11169_s6 = sld [smem:[#allocation366_spill]] }
  0x5e   : > { %416 = vst [vmem:[#allocation2 + $0x70] sm:$0xff] %v6582_v6  ;;  %417 = vst [vmem:[#allocation2 + $0x78] sm:$0xff] %v6582_v6  ;;  %6021 = vmatpush3.msra.mxu1 %v677_v8  ;;  %5524 = vmatpush3.msra.mxu0 %v644_v12  ;;  %v642_v18 = vld [vmem:[#allocation5 + $0x1d0] sm:$0xff]  ;;  %v657_v19 = vld [vmem:[#allocation5 + $0x248] sm:$0xff]  ;;  %s2597_s29 = sld [smem:[#allocation11]] }
  0x5f   : > { %418 = vst [vmem:[#allocation2 + $0x80] sm:$0xff] %v6582_v6  ;;  %419 = vst [vmem:[#allocation2 + $0x88] sm:$0xff] %v6582_v6  ;;  %6022 = vmatprep.subr.mxu1 %v676_v11  ;;  %5525 = vmatprep.subr.mxu0 %v659_v13  ;;  %v673_v20 = vld [vmem:[#allocation5 + $0x2c8] sm:$0xff]  ;;  %v656_v22 = vld [vmem:[#allocation5 + $0x240] sm:$0xff]  ;;  %s5405_s9 = sld [smem:[#allocation11 + $0x1]] }
  0x60   : > { %420 = vst [vmem:[#allocation2 + $0x90] sm:$0xff] %v6582_v6  ;;  %421 = vst [vmem:[#allocation2 + $0x98] sm:$0xff] %v6582_v6  ;;  %6023 = vmatpush3.msra.mxu1 %v676_v11  ;;  %5526 = vmatpush3.msra.mxu0 %v643_v15  ;;  %v641_v21 = vld [vmem:[#allocation5 + $0x1c8] sm:$0xff]  ;;  %v672_v23 = vld [vmem:[#allocation5 + $0x2c0] sm:$0xff]  ;;  %s5406_s25 = sld [smem:[#allocation11 + $0x2]] }
  0x61   : > { %422 = vst [vmem:[#allocation2 + $0xa0] sm:$0xff] %v6582_v6  ;;  %423 = vst [vmem:[#allocation2 + $0xa8] sm:$0xff] %v6582_v6  ;;  %6024 = vmatprep.subr.mxu1 %v675_v14  ;;  %5527 = vmatprep.subr.mxu0 %v658_v16  ;;  %v640_v24 = vld [vmem:[#allocation5 + $0x1c0] sm:$0xff]  ;;  %v655_v25 = vld [vmem:[#allocation5 + $0x238] sm:$0xff]  ;;  %s5407_s28 = sld [smem:[#allocation11 + $0x3]] }
  0x62   : > { %424 = vst [vmem:[#allocation2 + $0xb0] sm:$0xff] %v6582_v6  ;;  %425 = vst [vmem:[#allocation2 + $0xb8] sm:$0xff] %v6582_v6  ;;  %6025 = vmatpush3.msra.mxu1 %v675_v14  ;;  %5528 = vmatpush3.msra.mxu0 %v642_v18  ;;  %v671_v26 = vld [vmem:[#allocation5 + $0x2b8] sm:$0xff]  ;;  %v6791_v28 = vld [vmem:[%s6788_s18] sm:$0xff]  ;;  %s5408_s30 = sld [smem:[#allocation11 + $0x4]] }
  0x63   : > { %426 = vst [vmem:[#allocation2 + $0xc0] sm:$0xff] %v6582_v6  ;;  %427 = vst [vmem:[#allocation2 + $0xc8] sm:$0xff] %v6582_v6  ;;  %6026 = vmatprep.subr.mxu1 %v674_v17  ;;  %5529 = vmatprep.subr.mxu0 %v657_v19  ;;  %v639_v27 = vld [vmem:[#allocation5 + $0x1b8] sm:$0xff]  ;;  %v654_v29 = vld [vmem:[#allocation5 + $0x230] sm:$0xff]  ;;  %s5410_s21 = sld [smem:[#allocation11 + $0x6]] }
  0x64   : > { %428 = vst [vmem:[#allocation2 + $0xd0] sm:$0xff] %v6582_v6  ;;  %429 = vst [vmem:[#allocation2 + $0xd8] sm:$0xff] %v6582_v6  ;;  %6027 = vmatpush3.msra.mxu1 %v674_v17  ;;  %5530 = vmatpush3.msra.mxu0 %v641_v21  ;;  %v670_v30 = vld [vmem:[#allocation5 + $0x2b0] sm:$0xff]  ;;  %v6796_v32 = vld [vmem:[%s6788_s18 + $0x8] sm:$0xff]  ;;  %s5411_s26 = sld [smem:[#allocation11 + $0x7]] }
  0x65   : > { %430 = vst [vmem:[#allocation2 + $0xe0] sm:$0xff] %v6582_v6  ;;  %431 = vst [vmem:[#allocation2 + $0xe8] sm:$0xff] %v6582_v6  ;;  %6028 = vmatprep.subr.mxu1 %v673_v20  ;;  %5531 = vmatprep.subr.mxu0 %v656_v22  ;;  %v638_v31 = vld [vmem:[#allocation5 + $0x1b0] sm:$0xff]  ;;  %v653_v33 = vld [vmem:[#allocation5 + $0x228] sm:$0xff]  ;;  %s5412_s11 = sld [smem:[#allocation11 + $0x8]] }
  0x66   : > { %6029 = vmatpush3.msra.mxu1 %v673_v20  ;;  %11150 = vst [vmem:[#allocation26_spill] sm:$0xff] %v6791_v28  ;;  %5532 = vmatpush3.msra.mxu0 %v640_v24  ;;  %527 = vst.msk [vmem:[#allocation2 + $0x20] sm:$0xff] %vm526_vm0, %v6791_v28  ;;  %v669_v34 = vld [vmem:[#allocation5 + $0x2a8] sm:$0xff]  ;;  %v652_v36 = vld [vmem:[#allocation5 + $0x220] sm:$0xff]  ;;  %s5413_s12 = sld [smem:[#allocation11 + $0x9]] }
  0x67   : > { %6030 = vmatprep.subr.mxu1 %v672_v23  ;;  %5533 = vmatprep.subr.mxu0 %v655_v25  ;;  %11151 = vst [vmem:[#allocation27_spill] sm:$0xff] %v6796_v32  ;;  %528 = vst.msk [vmem:[#allocation2 + $0x38] sm:$0xff] %vm526_vm0, %v6796_v32  ;;  %v637_v35 = vld [vmem:[#allocation5 + $0x1a8] sm:$0xff]  ;;  %v668_v37 = vld [vmem:[#allocation5 + $0x2a0] sm:$0xff]  ;;  %s5414_s20 = sld [smem:[#allocation11 + $0xa]] }
  0x68   : > { %6031 = vmatpush3.msra.mxu1 %v672_v23  ;;  %5534 = vmatpush3.msra.mxu0 %v639_v27  ;;  %v6801_v38 = vld [vmem:[%s6788_s18 + $0x10] sm:$0xff]  ;;  %v651_v40 = vld [vmem:[#allocation5 + $0x218] sm:$0xff]  ;;  %v6806_v42 = vld [vmem:[%s6788_s18 + $0x18] sm:$0xff]  ;;  %s5415_s27 = sld [smem:[#allocation11 + $0xb]] }
  0x69   : > { %6032 = vmatprep.subr.mxu1 %v671_v26  ;;  %5535 = vmatprep.subr.mxu0 %v654_v29  ;;  %11152 = vst [vmem:[#allocation28_spill] sm:$0xff] %v6801_v38  ;;  %v636_v39 = vld [vmem:[#allocation5 + $0x1a0] sm:$0xff]  ;;  %529 = vst.msk [vmem:[#allocation2 + $0x50] sm:$0xff] %vm526_vm0, %v6801_v38  ;;  %v667_v41 = vld [vmem:[#allocation5 + $0x298] sm:$0xff]  ;;  %s5441_s0 = sld [smem:[#allocation11 + $0x25]] }
  0x6a   : > { %6033 = vmatpush3.msra.mxu1 %v671_v26  ;;  %5536 = vmatpush3.msra.mxu0 %v638_v31  ;;  %11153 = vst [vmem:[#allocation29_spill] sm:$0xff] %v6806_v42  ;;  %v635_v43 = vld [vmem:[#allocation5 + $0x198] sm:$0xff]  ;;  %530 = vst.msk [vmem:[#allocation2 + $0x68] sm:$0xff] %vm526_vm0, %v6806_v42  ;;  %v650_v44 = vld [vmem:[#allocation5 + $0x210] sm:$0xff]  ;;  %s7698_s1 = sld [smem:[#allocation11 + $0x29]] }
  0x6b   : > { %6034 = vmatprep.subr.mxu1 %v670_v30  ;;  %5537 = vmatprep.subr.mxu0 %v653_v33  ;;  %v666_v45 = vld [vmem:[#allocation5 + $0x290] sm:$0xff]  ;;  %v649_v47 = vld [vmem:[#allocation5 + $0x208] sm:$0xff]  ;;  %v648_v51 = vld [vmem:[#allocation5 + $0x200] sm:$0xff]  ;;  %s7712_s4 = sld [smem:[#allocation11 + $0x31]] }
  0x6c   : > { %6035 = vmatpush3.msra.mxu1 %v670_v30  ;;  %5538 = vmatpush3.msra.mxu0 %v637_v35  ;;  %v634_v46 = vld [vmem:[#allocation5 + $0x190] sm:$0xff]  ;;  %v665_v48 = vld [vmem:[#allocation5 + $0x288] sm:$0xff]  ;;  %v632_v53 = vld [vmem:[#allocation5 + $0x180] sm:$0xff]  ;;  %s7732_s22 = sld [smem:[#allocation11 + $0x39]] }
  0x6d   : > { %6036 = vmatprep.subr.mxu1 %v669_v34  ;;  %5539 = vmatprep.subr.mxu0 %v652_v36  ;;  %v6811_v49 = vld [vmem:[%s6788_s18 + $0x20] sm:$0xff]  ;;  %v633_v50 = vld [vmem:[#allocation5 + $0x188] sm:$0xff]  ;;  %v664_v54 = vld [vmem:[#allocation5 + $0x280] sm:$0xff]  ;;  %s7739_s15 = sld [smem:[#allocation11 + $0x3c]] }
  0x6e   : > { %6037 = vmatpush3.msra.mxu1 %v669_v34  ;;  %5540 = vmatpush3.msra.mxu0 %v636_v39  ;;  %11154 = vst [vmem:[#allocation30_spill] sm:$0xff] %v6811_v49  ;;  %531 = vst.msk [vmem:[#allocation2 + $0x80] sm:$0xff] %vm526_vm0, %v6811_v49  ;;  %v6815_v52 = vld [vmem:[#allocation2 + $0x20] sm:$0xff]  ;;  %v6818_v55 = vld [vmem:[%s6788_s18 + $0x28] sm:$0xff]  ;;  %s7743_s19 = sld [smem:[#allocation11 + $0x3d]] }
  0x6f   : > { %6038 = vmatprep.subr.mxu1 %v668_v37  ;;  %5541 = vmatprep.subr.mxu0 %v651_v40  ;;  %11155 = vst [vmem:[#allocation31_spill] sm:$0xff] %v6818_v55  ;;  %v6820_v56 = vld [vmem:[#allocation2 + $0x1f] sm:$0xff]  ;;  %532 = vst.msk [vmem:[#allocation2 + $0x98] sm:$0xff] %vm526_vm0, %v6818_v55  ;;  %v590_v57 = vld [vmem:[#allocation5 + $0xf8] sm:$0xff]  ;;  %s7746_s24 = sld [smem:[#allocation11 + $0x3e]] }
  0x70   : > { %6039 = vmatpush3.msra.mxu1 %v668_v37  ;;  %5542 = vmatpush3.msra.mxu0 %v635_v43  ;;  %v6825_v58 = vld [vmem:[#allocation2 + $0x21] sm:$0xff]  ;;  %v6828_v61 = vld [vmem:[#allocation2 + $0x39] sm:$0xff]  ;;  %v6831_v63 = vld [vmem:[%s6788_s18 + $0x30] sm:$0xff]  ;;  %s7753_s13 = sld [smem:[#allocation11 + $0x42]] }
  0x71   : > { %6040 = vmatprep.subr.mxu1 %v667_v41  ;;  %5543 = vmatprep.subr.mxu0 %v650_v44  ;;  %v574_v59 = vld [vmem:[#allocation5 + $0x78] sm:$0xff]  ;;  %v589_v62 = vld [vmem:[#allocation5 + $0xf0] sm:$0xff]  ;;  %11156 = vst [vmem:[#allocation32_spill] sm:$0xff] %v6831_v63  ;;  %v6834_v0 = vld [vmem:[#allocation2 + $0x38] sm:$0xff]  ;;  %s7757_s16 = sld [smem:[#allocation11 + $0x44]] }
  0x72   : > { %6041 = vmatpush3.msra.mxu1 %v667_v41  ;;  %5544 = vmatpush3.msra.mxu0 %v634_v46  ;;  %v606_v60 = vld [vmem:[#allocation5 + $0x178] sm:$0xff]  ;;  %533 = vst.msk [vmem:[#allocation2 + $0xb0] sm:$0xff] %vm526_vm0, %v6831_v63  ;;  %v573_v1 = vld [vmem:[#allocation5 + $0x70] sm:$0xff]  ;;  %v6839_v3 = vld [vmem:[#allocation2 + $0x37] sm:$0xff]  ;;  %s7760_s10 = sld [smem:[#allocation11 + $0x46]] }
  0x73   : > { %6042 = vmatprep.subr.mxu1 %v666_v45  ;;  %5545 = vmatprep.subr.mxu0 %v649_v47  ;;  %v605_v2 = vld [vmem:[#allocation5 + $0x170] sm:$0xff]  ;;  %v588_v4 = vld [vmem:[#allocation5 + $0xe8] sm:$0xff]  ;;  %v587_v9 = vld [vmem:[#allocation5 + $0xe0] sm:$0xff]  ;;  %s7767_s23 = sld [smem:[#allocation11 + $0x4a]] }
  0x74   : > { %6043 = vmatpush3.msra.mxu1 %v666_v45  ;;  %5546 = vmatpush3.msra.mxu0 %v633_v50  ;;  %v6842_v5 = vld [vmem:[%s6788_s18 + $0x38] sm:$0xff]  ;;  %v6848_v10 = vld [vmem:[#allocation2 + $0x50] sm:$0xff]  ;;  %v586_v14 = vld [vmem:[#allocation5 + $0xd8] sm:$0xff]  ;;  %s5409_s18 = sld [smem:[#allocation11 + $0x5]] }
  0x75   : > { %6044 = vmatprep.subr.mxu1 %v665_v48  ;;  %5547 = vmatprep.subr.mxu0 %v648_v51  ;;  %11157 = vst [vmem:[#allocation33_spill] sm:$0xff] %v6842_v5  ;;  %v572_v7 = vld [vmem:[#allocation5 + $0x68] sm:$0xff]  ;;  %534 = vst.msk [vmem:[#allocation2 + $0xc8] sm:$0xff] %vm526_vm0, %v6842_v5  ;;  %v571_v11 = vld [vmem:[#allocation5 + $0x60] sm:$0xff]  ;;  %s7771_s17 = sld [smem:[#allocation11 + $0x4c]] }
  0x76   : > { %6045 = vmatpush3.msra.mxu1 %v665_v48  ;;  %744 = vmatprep.mubr.f32.mxu0 %v6815_v52  ;;  %v604_v8 = vld [vmem:[#allocation5 + $0x168] sm:$0xff]  ;;  %v603_v12 = vld [vmem:[#allocation5 + $0x160] sm:$0xff]  ;;  %v570_v16 = vld [vmem:[#allocation5 + $0x58] sm:$0xff]  ;;  %s7774_s14 = sld [smem:[#allocation11 + $0x4e]] }
  0x77   : > { %5548 = vmatpush3.msra.mxu0 %v632_v53  ;;  %6046 = vmatprep.subr.mxu1 %v664_v54  ;;  %v6850_v13 = vld [vmem:[#allocation2 + $0x4f] sm:$0xff]  ;;  %v585_v19 = vld [vmem:[#allocation5 + $0xd0] sm:$0xff]  ;;  %v584_v24 = vld [vmem:[#allocation5 + $0xc8] sm:$0xff] }
  0x78   : > { %745 = vmatmul.mubr.f32.vlgmr.msra.gmra.mxu0 %v6820_v56  ;;  %6047 = vmatpush3.msra.mxu1 %v664_v54  ;;  %v6853_v15 = vld [vmem:[#allocation2 + $0x51] sm:$0xff]  ;;  %v602_v17 = vld [vmem:[#allocation5 + $0x158] sm:$0xff]  ;;  %v569_v21 = vld [vmem:[#allocation5 + $0x50] sm:$0xff] }
  0x79   : > { %5597 = vmatprep.subr.mxu0 %v590_v57  ;;  %6048 = vmatprep.mubr.f32.mxu1 %v6825_v58  ;;  %v6856_v18 = vld [vmem:[#allocation2 + $0x69] sm:$0xff]  ;;  %v601_v22 = vld [vmem:[#allocation5 + $0x150] sm:$0xff]  ;;  %v568_v25 = vld [vmem:[#allocation5 + $0x48] sm:$0xff]  ;;  %11219 = sst [smem:[#allocation81_spill]] %s7767_s23 }
  0x7a   : > { %5598 = vmatpush3.msra.mxu0 %v574_v59  ;;  %6060 = vmatprep.subr.mxu1 %v606_v60  ;;  %v6859_v20 = vld [vmem:[#allocation2 + $0x68] sm:$0xff]  ;;  %v600_v26 = vld [vmem:[#allocation5 + $0x148] sm:$0xff]  ;;  %v583_v27 = vld [vmem:[#allocation5 + $0xc0] sm:$0xff]  ;;  %s7781_s23 = sld [smem:[#allocation11 + $0x52]] }
  0x7b   : > { %6049 = vmatmul.mubr.f32.vlgmr.msra.gmra.mxu1 %v6828_v61  ;;  %5599 = vmatprep.subr.mxu0 %v589_v62  ;;  %v6862_v23 = vld [vmem:[#allocation2 + $0x67] sm:$0xff]  ;;  %v567_v30 = vld [vmem:[#allocation5 + $0x40] sm:$0xff]  ;;  %v6868_v33 = vld [vmem:[#allocation2 + $0x7f] sm:$0xff] }
  0x7c   : > { %6061 = vmatpush3.msra.mxu1 %v606_v60  ;;  %749 = vmatprep.mubr.f32.mxu0 %v6834_v0  ;;  %v6866_v29 = vld [vmem:[#allocation2 + $0x80] sm:$0xff]  ;;  %v599_v31 = vld [vmem:[#allocation5 + $0x140] sm:$0xff]  ;;  %v582_v34 = vld [vmem:[#allocation5 + $0xb8] sm:$0xff]  ;;  %11220 = sst [smem:[#allocation82_spill]] %s7774_s14 }
  0x7d   : > { %5600 = vmatpush3.msra.mxu0 %v573_v1  ;;  %6062 = vmatprep.subr.mxu1 %v605_v2  ;;  %v6871_v35 = vld [vmem:[#allocation2 + $0x81] sm:$0xff]  ;;  %v6874_v39 = vld [vmem:[#allocation2 + $0x99] sm:$0xff]  ;;  %v579_v50 = vld [vmem:[#allocation5 + $0xa0] sm:$0xff]  ;;  %s7785_s14 = sld [smem:[#allocation11 + $0x54]] }
  0x7e   : > { %750 = vmatmul.mubr.f32.gmra.mxu0 %v6839_v3  ;;  %5601 = vmatprep.subr.mxu0 %v588_v4  ;;  %v566_v36 = vld [vmem:[#allocation5 + $0x38] sm:$0xff]  ;;  %v581_v40 = vld [vmem:[#allocation5 + $0xb0] sm:$0xff]  ;;  %v6877_v41 = vld [vmem:[#allocation2 + $0x98] sm:$0xff] }
  0x7f   : > { %6063 = vmatpush3.msra.mxu1 %v605_v2  ;;  %5602 = vmatpush3.msra.mxu0 %v572_v7  ;;  %v598_v37 = vld [vmem:[#allocation5 + $0x138] sm:$0xff]  ;;  %v565_v43 = vld [vmem:[#allocation5 + $0x30] sm:$0xff]  ;;  %v6880_v45 = vld [vmem:[#allocation2 + $0x97] sm:$0xff] }
  0x80   : > { %6064 = vmatprep.subr.mxu1 %v604_v8  ;;  %5603 = vmatprep.subr.mxu0 %v587_v9  ;;  %v597_v44 = vld [vmem:[#allocation5 + $0x130] sm:$0xff]  ;;  %v580_v46 = vld [vmem:[#allocation5 + $0xa8] sm:$0xff]  ;;  %v6884_v51 = vld [vmem:[#allocation2 + $0xb0] sm:$0xff]  ;;  %11222 = sst [smem:[#allocation84_spill]] %s7781_s23 }
  0x81   : > { %6065 = vmatpush3.msra.mxu1 %v604_v8  ;;  %754 = vmatprep.mubr.f32.mxu0 %v6848_v10  ;;  %v564_v47 = vld [vmem:[#allocation5 + $0x28] sm:$0xff]  ;;  %v563_v53 = vld [vmem:[#allocation5 + $0x20] sm:$0xff]  ;;  %v578_v59 = vld [vmem:[#allocation5 + $0x98] sm:$0xff]  ;;  %s7793_s23 = sld [smem:[#allocation11 + $0x58]] }
  0x82   : > { %5604 = vmatpush3.msra.mxu0 %v571_v11  ;;  %6066 = vmatprep.subr.mxu1 %v603_v12  ;;  %v596_v48 = vld [vmem:[#allocation5 + $0x128] sm:$0xff]  ;;  %v595_v54 = vld [vmem:[#allocation5 + $0x120] sm:$0xff]  ;;  %v562_v62 = vld [vmem:[#allocation5 + $0x18] sm:$0xff] }
  0x83   : > { %755 = vmatmul.mubr.f32.gmra.mxu0 %v6850_v13  ;;  %5605 = vmatprep.subr.mxu0 %v586_v14  ;;  %v6886_v57 = vld [vmem:[#allocation2 + $0xaf] sm:$0xff]  ;;  %v577_v4 = vld [vmem:[#allocation5 + $0x90] sm:$0xff]  ;;  %v560_v14 = vld [vmem:[#allocation5 + $0x8] sm:$0xff] }
  0x84   : > { %6067 = vmatpush3.msra.mxu1 %v603_v12  ;;  %6051 = vmatprep.mubr.f32.mxu1 %v6853_v15  ;;  %v6889_v60 = vld [vmem:[#allocation2 + $0xb1] sm:$0xff]  ;;  %v594_v1 = vld [vmem:[#allocation5 + $0x118] sm:$0xff]  ;;  %v561_v8 = vld [vmem:[#allocation5 + $0x10] sm:$0xff] }
  0x85   : > { %5606 = vmatpush3.msra.mxu0 %v570_v16  ;;  %6068 = vmatprep.subr.mxu1 %v602_v17  ;;  %v6892_v2 = vld [vmem:[#allocation2 + $0xc9] sm:$0xff]  ;;  %v593_v9 = vld [vmem:[#allocation5 + $0x110] sm:$0xff]  ;;  %v576_v12 = vld [vmem:[#allocation5 + $0x88] sm:$0xff] }
  0x86   : > { %6052 = vmatmul.mubr.f32.gmra.mxu1 %v6856_v18  ;;  %5607 = vmatprep.subr.mxu0 %v585_v19  ;;  %v6895_v7 = vld [vmem:[#allocation2 + $0xc8] sm:$0xff]  ;;  %v592_v16 = vld [vmem:[#allocation5 + $0x108] sm:$0xff]  ;;  %v559_v19 = vld [vmem:[#allocation5] sm:$0xff] }
  0x87   : > { %6069 = vmatpush3.msra.mxu1 %v602_v17  ;;  %759 = vmatprep.mubr.f32.mxu0 %v6859_v20  ;;  %v6898_v11 = vld [vmem:[#allocation2 + $0xc7] sm:$0xff]  ;;  %v575_v17 = vld [vmem:[#allocation5 + $0x80] sm:$0xff] }
  0x88   : > { %5608 = vmatpush3.msra.mxu0 %v569_v21  ;;  %6070 = vmatprep.subr.mxu1 %v601_v22  ;;  %v591_v21 = vld [vmem:[#allocation5 + $0x100] sm:$0xff] }
  0x89   : > { %760 = vmatmul.mubr.f32.gmra.mxu0 %v6862_v23  ;;  %5609 = vmatprep.subr.mxu0 %v584_v24  ;;  %v1157_v24 = vld [vmem:[#allocation5 + $0x3f8] sm:$0xff] }
  0x8a   : > { %6071 = vmatpush3.msra.mxu1 %v601_v22  ;;  %5610 = vmatpush3.msra.mxu0 %v568_v25  ;;  %v535_v22 = vld [vmem:[#allocation2 + $0x7] sm:$0xff] }
  0x8b   : > { %6072 = vmatprep.subr.mxu1 %v600_v26  ;;  %5611 = vmatprep.subr.mxu0 %v583_v27  ;;  %v551_v25 = vld [vmem:[#allocation2 + $0x9] sm:$0xff] }
  0x8c   : > { %6073 = vmatpush3.msra.mxu1 %v600_v26  ;;  %764 = vmatprep.mubr.f32.mxu0 %v6866_v29  ;;  %v1141_v26 = vld [vmem:[#allocation5 + $0x378] sm:$0xff] }
  0x8d   : > { %5612 = vmatpush3.msra.mxu0 %v567_v30  ;;  %6074 = vmatprep.subr.mxu1 %v599_v31  ;;  %v1173_v27 = vld [vmem:[#allocation5 + $0x478] sm:$0xff]  ;;  %v1156_v30 = vld [vmem:[#allocation5 + $0x3f0] sm:$0xff] }
  0x8e   : > { %765 = vmatmul.mubr.f32.gmra.mxu0 %v6868_v33  ;;  %5613 = vmatprep.subr.mxu0 %v582_v34  ;;  %v1172_v34 = vld [vmem:[#allocation5 + $0x470] sm:$0xff] }
  0x8f   : > { %6075 = vmatpush3.msra.mxu1 %v599_v31  ;;  %6054 = vmatprep.mubr.f32.mxu1 %v6871_v35  ;;  %v1140_v31 = vld [vmem:[#allocation5 + $0x370] sm:$0xff] }
  0x90   : > { %5614 = vmatpush3.msra.mxu0 %v566_v36  ;;  %6076 = vmatprep.subr.mxu1 %v598_v37  ;;  %v1155_v36 = vld [vmem:[#allocation5 + $0x3e8] sm:$0xff] }
  0x91   : > { %6055 = vmatmul.mubr.f32.gmra.mxu1 %v6874_v39  ;;  %5615 = vmatprep.subr.mxu0 %v581_v40  ;;  %v1171_v40 = vld [vmem:[#allocation5 + $0x468] sm:$0xff] }
  0x92   : > { %6077 = vmatpush3.msra.mxu1 %v598_v37  ;;  %769 = vmatprep.mubr.f32.mxu0 %v6877_v41  ;;  %v1139_v37 = vld [vmem:[#allocation5 + $0x368] sm:$0xff] }
  0x93   : > { %5616 = vmatpush3.msra.mxu0 %v565_v43  ;;  %6078 = vmatprep.subr.mxu1 %v597_v44  ;;  %v1154_v43 = vld [vmem:[#allocation5 + $0x3e0] sm:$0xff] }
  0x94   : > { %770 = vmatmul.mubr.f32.gmra.mxu0 %v6880_v45  ;;  %5617 = vmatprep.subr.mxu0 %v580_v46  ;;  %v1170_v46 = vld [vmem:[#allocation5 + $0x460] sm:$0xff] }
  0x95   : > { %6079 = vmatpush3.msra.mxu1 %v597_v44  ;;  %5618 = vmatpush3.msra.mxu0 %v564_v47  ;;  %v1138_v44 = vld [vmem:[#allocation5 + $0x360] sm:$0xff]  ;;  %v1137_v47 = vld [vmem:[#allocation5 + $0x358] sm:$0xff] }
  0x96   : > { %6080 = vmatprep.subr.mxu1 %v596_v48  ;;  %5619 = vmatprep.subr.mxu0 %v579_v50  ;;  %v1168_v50 = vld [vmem:[#allocation5 + $0x450] sm:$0xff] }
  0x97   : > { %6081 = vmatpush3.msra.mxu1 %v596_v48  ;;  %774 = vmatprep.mubr.f32.mxu0 %v6884_v51  ;;  %v1152_v48 = vld [vmem:[#allocation5 + $0x3d0] sm:$0xff] }
  0x98   : > { %5620 = vmatpush3.msra.mxu0 %v563_v53  ;;  %6082 = vmatprep.subr.mxu1 %v595_v54  ;;  %v1151_v53 = vld [vmem:[#allocation5 + $0x3c8] sm:$0xff] }
  0x99   : > { %775 = vmatmul.mubr.f32.gmra.mxu0 %v6886_v57  ;;  %5621 = vmatprep.subr.mxu0 %v578_v59  ;;  %v1167_v59 = vld [vmem:[#allocation5 + $0x448] sm:$0xff] }
  0x9a   : > { %6083 = vmatpush3.msra.mxu1 %v595_v54  ;;  %6057 = vmatprep.mubr.f32.mxu1 %v6889_v60  ;;  %v1135_v54 = vld [vmem:[#allocation5 + $0x348] sm:$0xff] }
  0x9b   : > { %5622 = vmatpush3.msra.mxu0 %v562_v62  ;;  %6084 = vmatprep.subr.mxu1 %v594_v1  ;;  %v1150_v62 = vld [vmem:[#allocation5 + $0x3c0] sm:$0xff] }
  0x9c   : > { %6058 = vmatmul.mubr.f32.gmra.mxu1 %v6892_v2  ;;  %5623 = vmatprep.subr.mxu0 %v577_v4  ;;  %v1166_v4 = vld [vmem:[#allocation5 + $0x440] sm:$0xff] }
  0x9d   : > { %6085 = vmatpush3.msra.mxu1 %v594_v1  ;;  %779 = vmatprep.mubr.f32.mxu0 %v6895_v7  ;;  %v1134_v1 = vld [vmem:[#allocation5 + $0x340] sm:$0xff] }
  0x9e   : > { %5624 = vmatpush3.msra.mxu0 %v561_v8  ;;  %6086 = vmatprep.subr.mxu1 %v593_v9  ;;  %v1149_v8 = vld [vmem:[#allocation5 + $0x3b8] sm:$0xff] }
  0x9f   : > { %780 = vmatmul.mubr.f32.gmra.mxu0 %v6898_v11  ;;  %5625 = vmatprep.subr.mxu0 %v576_v12  ;;  %v1165_v12 = vld [vmem:[#allocation5 + $0x438] sm:$0xff] }
  0xa0   : > { %6087 = vmatpush3.msra.mxu1 %v593_v9  ;;  %5626 = vmatpush3.msra.mxu0 %v560_v14  ;;  %v1133_v9 = vld [vmem:[#allocation5 + $0x338] sm:$0xff]  ;;  %v1148_v14 = vld [vmem:[#allocation5 + $0x3b0] sm:$0xff] }
  0xa1   : > { %6088 = vmatprep.subr.mxu1 %v592_v16  ;;  %5627 = vmatprep.subr.mxu0 %v575_v17  ;;  %v1164_v17 = vld [vmem:[#allocation5 + $0x430] sm:$0xff] }
  0xa2   : > { %6089 = vmatpush3.msra.mxu1 %v592_v16  ;;  %5628 = vmatpush3.msra.mxu0 %v559_v19  ;;  %v1132_v16 = vld [vmem:[#allocation5 + $0x330] sm:$0xff]  ;;  %v1147_v19 = vld [vmem:[#allocation5 + $0x3a8] sm:$0xff] }
  0xa3   : > { %954 = vmatprep.mubr.f32.mxu0 %v6582_v6  ;;  %6090 = vmatprep.subr.mxu1 %v591_v21 }
  0xa4   : > { %955 = vmatmul.mubr.f32.vlgmr.msra.gmra.mxu0 %v535_v22  ;;  %6091 = vmatpush3.msra.mxu1 %v591_v21  ;;  %v1131_v21 = vld [vmem:[#allocation5 + $0x328] sm:$0xff] }
  0xa5   : > { %5677 = vmatprep.subr.mxu0 %v1157_v24  ;;  %6092 = vmatprep.mubr.f32.mxu1 %v551_v25  ;;  %v1163_v22 = vld [vmem:[#allocation5 + $0x428] sm:$0xff]  ;;  %v1146_v24 = vld [vmem:[#allocation5 + $0x3a0] sm:$0xff] }
  0xa6   : > { %5678 = vmatpush3.msra.mxu0 %v1141_v26  ;;  %6104 = vmatprep.subr.mxu1 %v1173_v27  ;;  %v1130_v25 = vld [vmem:[#allocation5 + $0x320] sm:$0xff] }
  0xa7   : > { %6093 = vmatmul.mubr.f32.vlgmr.msra.gmra.mxu1 %v6825_v58  ;;  %5679 = vmatprep.subr.mxu0 %v1156_v30  ;;  %v1153_v58 = vld [vmem:[#allocation5 + $0x3d8] sm:$0xff]  ;;  %v1162_v26 = vld [vmem:[#allocation5 + $0x420] sm:$0xff] }
  0xa8   : > { %6105 = vmatpush3.msra.mxu1 %v1173_v27  ;;  %959 = vmatprep.mubr.f32.mxu0 %v6815_v52  ;;  %v1169_v52 = vld [vmem:[#allocation5 + $0x458] sm:$0xff] }
  0xa9   : > { %5680 = vmatpush3.msra.mxu0 %v1140_v31  ;;  %6106 = vmatprep.subr.mxu1 %v1172_v34  ;;  %v1145_v27 = vld [vmem:[#allocation5 + $0x398] sm:$0xff] }
  0xaa   : > { %960 = vmatmul.mubr.f32.gmra.mxu0 %v6820_v56  ;;  %5681 = vmatprep.subr.mxu0 %v1155_v36  ;;  %v1136_v56 = vld [vmem:[#allocation5 + $0x350] sm:$0xff]  ;;  %v1129_v30 = vld [vmem:[#allocation5 + $0x318] sm:$0xff] }
  0xab   : > { %6107 = vmatpush3.msra.mxu1 %v1172_v34  ;;  %5682 = vmatpush3.msra.mxu0 %v1139_v37  ;;  %v1161_v31 = vld [vmem:[#allocation5 + $0x418] sm:$0xff]  ;;  %v1144_v34 = vld [vmem:[#allocation5 + $0x390] sm:$0xff] }
  0xac   : > { %6108 = vmatprep.subr.mxu1 %v1171_v40  ;;  %5683 = vmatprep.subr.mxu0 %v1154_v43  ;;  %v1128_v36 = vld [vmem:[#allocation5 + $0x310] sm:$0xff]  ;;  %v1127_v43 = vld [vmem:[#allocation5 + $0x308] sm:$0xff] }
  0xad   : > { %6109 = vmatpush3.msra.mxu1 %v1171_v40  ;;  %964 = vmatprep.mubr.f32.mxu0 %v6834_v0  ;;  %v1160_v37 = vld [vmem:[#allocation5 + $0x410] sm:$0xff]  ;;  %v1143_v40 = vld [vmem:[#allocation5 + $0x388] sm:$0xff] }
  0xae   : > { %5684 = vmatpush3.msra.mxu0 %v1138_v44  ;;  %6110 = vmatprep.subr.mxu1 %v1170_v46  ;;  %v1159_v44 = vld [vmem:[#allocation5 + $0x408] sm:$0xff] }
  0xaf   : > { %965 = vmatmul.mubr.f32.gmra.mxu0 %v6839_v3  ;;  %5685 = vmatprep.subr.mxu0 %v1153_v58  ;;  %v1126_v58 = vld [vmem:[#allocation5 + $0x300] sm:$0xff] }
  0xb0   : > { %6111 = vmatpush3.msra.mxu1 %v1170_v46  ;;  %5686 = vmatpush3.msra.mxu0 %v1137_v47  ;;  %v1142_v46 = vld [vmem:[#allocation5 + $0x380] sm:$0xff] }
  0xb1   : > { %6112 = vmatprep.subr.mxu1 %v1169_v52  ;;  %5687 = vmatprep.subr.mxu0 %v1152_v48  ;;  %v1158_v47 = vld [vmem:[#allocation5 + $0x400] sm:$0xff]  ;;  %v1576_v48 = vld [vmem:[#allocation9 + $0x2c8] sm:$0xff] }
  0xb2   : > { %6113 = vmatpush3.msra.mxu1 %v1169_v52  ;;  %969 = vmatprep.mubr.f32.mxu0 %v6848_v10  ;;  %v1559_v52 = vld [vmem:[#allocation9 + $0x240] sm:$0xff] }
  0xb3   : > { %6095 = vmatprep.mubr.f32.mxu1 %v6828_v61  ;;  %5688 = vmatpush3.msra.mxu0 %v1136_v56  ;;  %v1543_v56 = vld [vmem:[#allocation9 + $0x1c0] sm:$0xff] }
  0xb4   : > { %6114 = vmatprep.subr.mxu1 %v1168_v50  ;;  %970 = vmatmul.mubr.f32.gmra.mxu0 %v6850_v13 }
  0xb5   : > { %6096 = vmatmul.mubr.f32.gmra.mxu1 %v6853_v15  ;;  %5689 = vmatprep.subr.mxu0 %v1151_v53  ;;  %v1575_v53 = vld [vmem:[#allocation9 + $0x2c0] sm:$0xff] }
  0xb6   : > { %6115 = vmatpush3.msra.mxu1 %v1168_v50  ;;  %5690 = vmatpush3.msra.mxu0 %v1135_v54  ;;  %v1558_v50 = vld [vmem:[#allocation9 + $0x238] sm:$0xff] }
  0xb7   : > { %6116 = vmatprep.subr.mxu1 %v1167_v59  ;;  %5691 = vmatprep.subr.mxu0 %v1150_v62  ;;  %v1542_v54 = vld [vmem:[#allocation9 + $0x1b8] sm:$0xff] }
  0xb8   : > { %6117 = vmatpush3.msra.mxu1 %v1167_v59  ;;  %974 = vmatprep.mubr.f32.mxu0 %v6859_v20  ;;  %v1557_v59 = vld [vmem:[#allocation9 + $0x230] sm:$0xff]  ;;  %v1574_v62 = vld [vmem:[#allocation9 + $0x2b8] sm:$0xff] }
  0xb9   : > { %5692 = vmatpush3.msra.mxu0 %v1134_v1  ;;  %6118 = vmatprep.subr.mxu1 %v1166_v4  ;;  %v1541_v1 = vld [vmem:[#allocation9 + $0x1b0] sm:$0xff] }
  0xba   : > { %975 = vmatmul.mubr.f32.gmra.mxu0 %v6862_v23  ;;  %5693 = vmatprep.subr.mxu0 %v1149_v8  ;;  %v1573_v8 = vld [vmem:[#allocation9 + $0x2b0] sm:$0xff] }
  0xbb   : > { %6119 = vmatpush3.msra.mxu1 %v1166_v4  ;;  %5694 = vmatpush3.msra.mxu0 %v1133_v9  ;;  %v1556_v4 = vld [vmem:[#allocation9 + $0x228] sm:$0xff] }
  0xbc   : > { %6120 = vmatprep.subr.mxu1 %v1165_v12  ;;  %5695 = vmatprep.subr.mxu0 %v1148_v14  ;;  %v1540_v9 = vld [vmem:[#allocation9 + $0x1a8] sm:$0xff] }
  0xbd   : > { %6121 = vmatpush3.msra.mxu1 %v1165_v12  ;;  %979 = vmatprep.mubr.f32.mxu0 %v6866_v29  ;;  %v1555_v12 = vld [vmem:[#allocation9 + $0x220] sm:$0xff]  ;;  %v1572_v14 = vld [vmem:[#allocation9 + $0x2a8] sm:$0xff] }
  0xbe   : > { %6098 = vmatprep.mubr.f32.mxu1 %v6856_v18  ;;  %5696 = vmatpush3.msra.mxu0 %v1132_v16  ;;  %v1539_v16 = vld [vmem:[#allocation9 + $0x1a0] sm:$0xff] }
  0xbf   : > { %6122 = vmatprep.subr.mxu1 %v1164_v17  ;;  %980 = vmatmul.mubr.f32.gmra.mxu0 %v6868_v33 }
  0xc0   : > { %6099 = vmatmul.mubr.f32.gmra.mxu1 %v6871_v35  ;;  %5697 = vmatprep.subr.mxu0 %v1147_v19  ;;  %v1571_v19 = vld [vmem:[#allocation9 + $0x2a0] sm:$0xff] }
  0xc1   : > { %6123 = vmatpush3.msra.mxu1 %v1164_v17  ;;  %5698 = vmatpush3.msra.mxu0 %v1131_v21  ;;  %v1554_v17 = vld [vmem:[#allocation9 + $0x218] sm:$0xff] }
  0xc2   : > { %6124 = vmatprep.subr.mxu1 %v1163_v22  ;;  %5699 = vmatprep.subr.mxu0 %v1146_v24  ;;  %v1538_v21 = vld [vmem:[#allocation9 + $0x198] sm:$0xff] }
  0xc3   : > { %6125 = vmatpush3.msra.mxu1 %v1163_v22  ;;  %984 = vmatprep.mubr.f32.mxu0 %v6877_v41  ;;  %v1553_v22 = vld [vmem:[#allocation9 + $0x210] sm:$0xff]  ;;  %v1570_v24 = vld [vmem:[#allocation9 + $0x298] sm:$0xff] }
  0xc4   : > { %5700 = vmatpush3.msra.mxu0 %v1130_v25  ;;  %6126 = vmatprep.subr.mxu1 %v1162_v26  ;;  %v1537_v25 = vld [vmem:[#allocation9 + $0x190] sm:$0xff] }
  0xc5   : > { %985 = vmatmul.mubr.f32.gmra.mxu0 %v6880_v45  ;;  %5701 = vmatprep.subr.mxu0 %v1145_v27  ;;  %v1569_v27 = vld [vmem:[#allocation9 + $0x290] sm:$0xff] }
  0xc6   : > { %6127 = vmatpush3.msra.mxu1 %v1162_v26  ;;  %5702 = vmatpush3.msra.mxu0 %v1129_v30  ;;  %v1552_v26 = vld [vmem:[#allocation9 + $0x208] sm:$0xff] }
  0xc7   : > { %6128 = vmatprep.subr.mxu1 %v1161_v31  ;;  %5703 = vmatprep.subr.mxu0 %v1144_v34  ;;  %v1536_v30 = vld [vmem:[#allocation9 + $0x188] sm:$0xff] }
  0xc8   : > { %6129 = vmatpush3.msra.mxu1 %v1161_v31  ;;  %989 = vmatprep.mubr.f32.mxu0 %v6884_v51  ;;  %v1551_v31 = vld [vmem:[#allocation9 + $0x200] sm:$0xff]  ;;  %v1568_v34 = vld [vmem:[#allocation9 + $0x288] sm:$0xff] }
  0xc9   : > { %6101 = vmatprep.mubr.f32.mxu1 %v6874_v39  ;;  %5704 = vmatpush3.msra.mxu0 %v1128_v36  ;;  %v1535_v36 = vld [vmem:[#allocation9 + $0x180] sm:$0xff] }
  0xca   : > { %6130 = vmatprep.subr.mxu1 %v1160_v37  ;;  %990 = vmatmul.mubr.f32.gmra.mxu0 %v6886_v57 }
  0xcb   : > { %6102 = vmatmul.mubr.f32.gmra.mxu1 %v6889_v60  ;;  %5705 = vmatprep.subr.mxu0 %v1143_v40  ;;  %v1567_v40 = vld [vmem:[#allocation9 + $0x280] sm:$0xff] }
  0xcc   : > { %6131 = vmatpush3.msra.mxu1 %v1160_v37  ;;  %5706 = vmatpush3.msra.mxu0 %v1127_v43  ;;  %v1493_v37 = vld [vmem:[#allocation9 + $0xf8] sm:$0xff] }
  0xcd   : > { %6132 = vmatprep.subr.mxu1 %v1159_v44  ;;  %5707 = vmatprep.subr.mxu0 %v1142_v46  ;;  %v6946_v43 = vld [vmem:[#allocation9 + $0x178] sm:$0xff] }
  0xce   : > { %6133 = vmatpush3.msra.mxu1 %v1159_v44  ;;  %5708 = vmatpush3.msra.mxu0 %v1126_v58  ;;  %11158 = vst [vmem:[#allocation34_spill] sm:$0xff] %v6946_v43 }
  0xcf   : > { %1238 = vmatprep.mubr.f32.mxu0 %v6834_v0  ;;  %6134 = vmatprep.subr.mxu1 %v1158_v47  ;;  %v1108_v0 = vld [vmem:[#allocation2 + $0xdf] sm:$0xff] }
  0xd0   : > { %1239 = vmatmul.mubr.f32.vlgmr.msra.gmra.mxu0 %v6839_v3  ;;  %6135 = vmatpush3.msra.mxu1 %v1158_v47  ;;  %v1566_v3 = vld [vmem:[#allocation9 + $0x278] sm:$0xff] }
  0xd1   : > { %6136 = vmatprep.mubr.f32.mxu1 %v6828_v61  ;;  %1243 = vmatprep.mubr.f32.mxu0 %v6848_v10  ;;  %v1124_v61 = vld [vmem:[#allocation2 + $0xe1] sm:$0xff] }
  0xd2   : > { %6137 = vmatmul.mubr.f32.vlgmr.msra.gmra.mxu1 %v6853_v15  ;;  %v1550_v10 = vld [vmem:[#allocation9 + $0x1f8] sm:$0xff]  ;;  %5757 = vmatprep.subr.mxu0 %v1566_v3 }
  0xd3   : > { %6139 = vmatprep.mubr.f32.mxu1 %v6856_v18  ;;  %5758 = vmatpush3.msra.mxu0 %v1550_v10  ;;  %v1582_v15 = vld [vmem:[#allocation9 + $0x2f8] sm:$0xff]  ;;  %v1549_v18 = vld [vmem:[#allocation9 + $0x1f0] sm:$0xff] }
  0xd4   : > { %1244 = vmatmul.mubr.f32.gmra.mxu0 %v6850_v13  ;;  %v1565_v13 = vld [vmem:[#allocation9 + $0x270] sm:$0xff]  ;;  %6148 = vmatprep.subr.mxu1 %v1582_v15 }
  0xd5   : > { %1248 = vmatprep.mubr.f32.mxu0 %v6859_v20  ;;  %5759 = vmatprep.subr.mxu0 %v1565_v13  ;;  %v1564_v20 = vld [vmem:[#allocation9 + $0x268] sm:$0xff] }
  0xd6   : > { %6140 = vmatmul.mubr.f32.gmra.mxu1 %v6871_v35  ;;  %5760 = vmatpush3.msra.mxu0 %v1549_v18  ;;  %v1547_v35 = vld [vmem:[#allocation9 + $0x1e0] sm:$0xff] }
  0xd7   : > { %6142 = vmatprep.mubr.f32.mxu1 %v6874_v39  ;;  %6149 = vmatpush3.msra.mxu1 %v1582_v15  ;;  %v1562_v39 = vld [vmem:[#allocation9 + $0x258] sm:$0xff] }
  0xd8   : > { %1249 = vmatmul.mubr.f32.gmra.mxu0 %v6862_v23  ;;  %v1581_v23 = vld [vmem:[#allocation9 + $0x2f0] sm:$0xff]  ;;  %5761 = vmatprep.subr.mxu0 %v1564_v20 }
  0xd9   : > { %1253 = vmatprep.mubr.f32.mxu0 %v6866_v29  ;;  %v1548_v29 = vld [vmem:[#allocation9 + $0x1e8] sm:$0xff]  ;;  %6150 = vmatprep.subr.mxu1 %v1581_v23 }
  0xda   : > { %6143 = vmatmul.mubr.f32.gmra.mxu1 %v6889_v60  ;;  %5762 = vmatpush3.msra.mxu0 %v1548_v29  ;;  %v1545_v60 = vld [vmem:[#allocation9 + $0x1d0] sm:$0xff] }
  0xdb   : > { %6145 = vmatprep.mubr.f32.mxu1 %v6892_v2  ;;  %6151 = vmatpush3.msra.mxu1 %v1581_v23  ;;  %v1560_v2 = vld [vmem:[#allocation9 + $0x248] sm:$0xff] }
  0xdc   : > { %1254 = vmatmul.mubr.f32.gmra.mxu0 %v6868_v33  ;;  %v1580_v33 = vld [vmem:[#allocation9 + $0x2e8] sm:$0xff] }
  0xdd   : > { %1258 = vmatprep.mubr.f32.mxu0 %v6877_v41  ;;  %6152 = vmatprep.subr.mxu1 %v1580_v33  ;;  %v1579_v41 = vld [vmem:[#allocation9 + $0x2e0] sm:$0xff] }
  0xde   : > { %6146 = vmatmul.mubr.f32.gmra.mxu1 %v1124_v61 }
  0xdf   : > { %6153 = vmatpush3.msra.mxu1 %v1580_v33 }
  0xe0   : > { %1259 = vmatmul.mubr.f32.gmra.mxu0 %v6880_v45  ;;  %v1546_v45 = vld [vmem:[#allocation9 + $0x1d8] sm:$0xff]  ;;  %6154 = vmatprep.subr.mxu1 %v1579_v41 }
  0xe1   : > { %1263 = vmatprep.mubr.f32.mxu0 %v6884_v51  ;;  %v1561_v51 = vld [vmem:[#allocation9 + $0x250] sm:$0xff]  ;;  %6155 = vmatpush3.msra.mxu1 %v1579_v41 }
  0xe4   : > { %1264 = vmatmul.mubr.f32.gmra.mxu0 %v6886_v57  ;;  %v1578_v57 = vld [vmem:[#allocation9 + $0x2d8] sm:$0xff] }
  0xe5   : > { %1268 = vmatprep.mubr.f32.mxu0 %v6895_v7  ;;  %6156 = vmatprep.subr.mxu1 %v1578_v57  ;;  %v1577_v7 = vld [vmem:[#allocation9 + $0x2d0] sm:$0xff] }
  0xe6   : > { %6157 = vmatpush3.msra.mxu1 %v1578_v57 }
  0xe7   : > { %6158 = vmatprep.subr.mxu1 %v1577_v7 }
  0xe8   : > { %1269 = vmatmul.mubr.f32.gmra.mxu0 %v6898_v11  ;;  %v1544_v11 = vld [vmem:[#allocation9 + $0x1c8] sm:$0xff]  ;;  %6159 = vmatpush3.msra.mxu1 %v1577_v7 }
  0xe9   : > { %1273 = vmatprep.mubr.f32.mxu0 %v6582_v6  ;;  %v1563_v6 = vld [vmem:[#allocation9 + $0x260] sm:$0xff]  ;;  %6160 = vmatprep.subr.mxu1 %v1576_v48 }
  0xea   : > { %5763 = vmatprep.subr.mxu0 %v1563_v6  ;;  %6161 = vmatpush3.msra.mxu1 %v1576_v48 }
  0xeb   : > { %5764 = vmatpush3.msra.mxu0 %v1547_v35  ;;  %6162 = vmatprep.subr.mxu1 %v1575_v53 }
  0xec   : > { %1274 = vmatmul.mubr.f32.gmra.mxu0 %v1108_v0  ;;  %5765 = vmatprep.subr.mxu0 %v1562_v39 }
  0xed   : > { %5766 = vmatpush3.msra.mxu0 %v1546_v45  ;;  %6163 = vmatpush3.msra.mxu1 %v1575_v53 }
  0xee   : > { %5767 = vmatprep.subr.mxu0 %v1561_v51  ;;  %6164 = vmatprep.subr.mxu1 %v1574_v62 }
  0xef   : > { %5768 = vmatpush3.msra.mxu0 %v1545_v60  ;;  %6165 = vmatpush3.msra.mxu1 %v1574_v62 }
  0xf0   : > { %5769 = vmatprep.subr.mxu0 %v1560_v2  ;;  %6166 = vmatprep.subr.mxu1 %v1573_v8 }
  0xf1   : > { %5770 = vmatpush3.msra.mxu0 %v1544_v11  ;;  %6167 = vmatpush3.msra.mxu1 %v1573_v8 }
  0xf2   : > { %5771 = vmatprep.subr.mxu0 %v1559_v52  ;;  %6168 = vmatprep.subr.mxu1 %v1572_v14 }
  0xf3   : > { %5772 = vmatpush3.msra.mxu0 %v1543_v56  ;;  %6169 = vmatpush3.msra.mxu1 %v1572_v14 }
  0xf4   : > { %5773 = vmatprep.subr.mxu0 %v1558_v50  ;;  %6170 = vmatprep.subr.mxu1 %v1571_v19 }
  0xf5   : > { %5774 = vmatpush3.msra.mxu0 %v1542_v54  ;;  %6171 = vmatpush3.msra.mxu1 %v1571_v19 }
  0xf6   : > { %5775 = vmatprep.subr.mxu0 %v1557_v59  ;;  %6172 = vmatprep.subr.mxu1 %v1570_v24 }
  0xf7   : > { %5776 = vmatpush3.msra.mxu0 %v1541_v1  ;;  %6173 = vmatpush3.msra.mxu1 %v1570_v24 }
  0xf8   : > { %5777 = vmatprep.subr.mxu0 %v1556_v4  ;;  %6174 = vmatprep.subr.mxu1 %v1569_v27 }
  0xf9   : > { %5778 = vmatpush3.msra.mxu0 %v1540_v9  ;;  %6175 = vmatpush3.msra.mxu1 %v1569_v27 }
  0xfa   : > { %5779 = vmatprep.subr.mxu0 %v1555_v12  ;;  %6176 = vmatprep.subr.mxu1 %v1568_v34 }
  0xfb   : > { %5780 = vmatpush3.msra.mxu0 %v1539_v16  ;;  %6177 = vmatpush3.msra.mxu1 %v1568_v34 }
  0xfc   : > { %5781 = vmatprep.subr.mxu0 %v1554_v17  ;;  %6178 = vmatprep.subr.mxu1 %v1567_v40 }
  0xfd   : > { %5782 = vmatpush3.msra.mxu0 %v1538_v21  ;;  %6179 = vmatpush3.msra.mxu1 %v1567_v40 }
  0xfe   : > { %5783 = vmatprep.subr.mxu0 %v1553_v22  ;;  %6192 = vmatprep.subr.mxu1 %v6946_v43 }
  0xff   : > { %5784 = vmatpush3.msra.mxu0 %v1537_v25 }
 0x100   : > { %5785 = vmatprep.subr.mxu0 %v1552_v26 }
 0x101   : > { %5786 = vmatpush3.msra.mxu0 %v1536_v30 }
 0x102   : > { %5787 = vmatprep.subr.mxu0 %v1551_v31 }
 0x103   : > { %5788 = vmatpush3.msra.mxu0 %v1535_v36 }
 0x104   : > { %5837 = vmatprep.subr.mxu0 %v1493_v37 }
 0x138   : > { %v5549_v44 = vpop.f32.mrf.mxu0 }
 0x13a   : > { %v5550_v46 = vpop.f32.mrf.mxu0 }
 0x13b   : > { %v6050_v33 = vpop.f32.mrf.mxu1  ;;  %v5551_v24 = vadd.f32 %v5550_v46, %v5549_v44 }
 0x13d   : > { %v851_v41 = vpop.f32.mrf.mxu1 }
 0x13e   : > { %v5552_v58 = vpop.f32.mrf.mxu0  ;;  %v852_v31 = vadd.f32 %v5551_v24, %v851_v41 }
 0x140   : > { %v5553_v47 = vpop.f32.mrf.mxu0 }
 0x141   : > { %v5554_v34 = vadd.f32 %v5553_v47, %v5552_v58  ;;  %v6998_v58 = vld [vmem:[%s11160_s2] ss:$0 sm:$0xff]  ;;  %s7702_s2 = sld [smem:[#allocation11 + $0x2b]] }
 0x143   : > { %v5555_v61 = vpop.f32.mrf.mxu0  ;;  %v857_v49 = vadd.f32 %v6050_v33, %v5554_v34 }
 0x145   : > { %v5556_v0 = vpop.f32.mrf.mxu0 }
 0x146   : > { %v6053_v51 = vpop.f32.mrf.mxu1  ;;  %v5557_v5 = vadd.f32 %v5556_v0, %v5555_v61 }
 0x148   : > { %v861_v60 = vpop.f32.mrf.mxu1 }
 0x149   : > { %v5558_v3 = vpop.f32.mrf.mxu0  ;;  %v862_v43 = vadd.f32 %v5557_v5, %v861_v60 }
 0x14b   : > { %v5559_v10 = vpop.f32.mrf.mxu0 }
 0x14e   : > { %v6949_v13 = vpop.f32.mrf.mxu0 }
 0x150   : > { %v6951_v15 = vpop.f32.mrf.mxu0 }
 0x151   : > { %v6965_v7 = vpop.f32.mrf.mxu1 }
 0x153   : > { %v6967_v52 = vpop.f32.mrf.mxu1 }
 0x154   : > { %v6953_v18 = vpop.f32.mrf.mxu0 }
 0x156   : > { %v6955_v20 = vpop.f32.mrf.mxu0 }
 0x159   : > { %v6957_v23 = vpop.f32.mrf.mxu0 }
 0x15b   : > { %v6959_v29 = vpop.f32.mrf.mxu0 }
 0x15c   : > { %v6969_v56 = vpop.f32.mrf.mxu1 }
 0x15e   : > { %v6971_v54 = vpop.f32.mrf.mxu1 }
 0x15f   : > { %v6961_v6 = vpop.f32.mrf.mxu0 }
 0x161   : > { %v6963_v35 = vpop.f32.mrf.mxu0 }
 0x164   : > { %v5629_v39 = vpop.f32.mrf.mxu0 }
 0x166   : > { %v5630_v45 = vpop.f32.mrf.mxu0 }
 0x167   : > { %v6094_v59 = vpop.f32.mrf.mxu1  ;;  %v5631_v27 = vadd.f32 %v5630_v45, %v5629_v39  ;;  %v5560_v39 = vadd.f32 %v5559_v10, %v5558_v3 }
 0x169   : > { %v1061_v4 = vpop.f32.mrf.mxu1  ;;  %v957_v37 = vadd.f32 %v5631_v27, %v852_v31  ;;  %v867_v3 = vadd.f32 %v6053_v51, %v5560_v39 }
 0x16a   : > { %v5632_v57 = vpop.f32.mrf.mxu0 }
 0x16b   : > { %v1062_v46 = vadd.f32 %v1061_v4, %v957_v37 }
 0x16c   : > { %v5633_v2 = vpop.f32.mrf.mxu0 }
 0x16d   : > { %v5634_v40 = vadd.f32 %v5633_v2, %v5632_v57  ;;  %v5563_v57 = vadd.f32 %v6951_v15, %v6949_v13 }
 0x16f   : > { %v5635_v11 = vpop.f32.mrf.mxu0  ;;  %v962_v28 = vadd.f32 %v5634_v40, %v857_v49  ;;  %v872_v13 = vadd.f32 %v5563_v57, %v6967_v52 }
 0x171   : > { %v5636_v48 = vpop.f32.mrf.mxu0 }
 0x172   : > { %v5637_v38 = vadd.f32 %v5636_v48, %v5635_v11 }
 0x174   : > { %v5638_v50 = vpop.f32.mrf.mxu0  ;;  %v967_v45 = vadd.f32 %v5637_v38, %v862_v43 }
 0x175   : > { %v6973_v8 = vpop.f32.mrf.mxu1 }
 0x176   : > { %v5639_v53 = vpop.f32.mrf.mxu0 }
 0x177   : > { %v1071_v14 = vpop.f32.mrf.mxu1  ;;  %v5640_v0 = vadd.f32 %v5639_v53, %v5638_v50 }
 0x178   : > { %v1072_v11 = vadd.f32 %v1071_v14, %v967_v45 }
 0x179   : > { %v972_v43 = vadd.f32 %v5640_v0, %v867_v3  ;;  %v5572_v0 = vadd.f32 %v6963_v35, %v6961_v6 }
 0x17a   : > { %v5641_v62 = vpop.f32.mrf.mxu0 }
 0x17c   : > { %v5642_v1 = vpop.f32.mrf.mxu0 }
 0x17d   : > { %v5643_v53 = vadd.f32 %v5642_v1, %v5641_v62  ;;  %v1077_v62 = vadd.f32 %v6973_v8, %v972_v43  ;;  %v887_v43 = vadd.f32 %v6969_v56, %v5572_v0  ;;  %v1487_v0 = vld [vmem:[#allocation9 + $0xc8] sm:$0xff] }
 0x17f   : > { %v6975_v9 = vpop.f32.mrf.mxu0  ;;  %v977_v31 = vadd.f32 %v5643_v53, %v872_v13  ;;  %v1507_v13 = vld [vmem:[#allocation9 + $0x168] sm:$0xff] }
 0x180   : > { %v6979_v16 = vpop.f32.mrf.mxu1 }
 0x181   : > { %v6977_v12 = vpop.f32.mrf.mxu0 }
 0x182   : > { %v6985_v21 = vpop.f32.mrf.mxu1  ;;  %v5646_v1 = vadd.f32 %v6977_v12, %v6975_v9 }
 0x185   : > { %v6981_v17 = vpop.f32.mrf.mxu0 }
 0x187   : > { %v6983_v19 = vpop.f32.mrf.mxu0 }
 0x18a   : > { %v6987_v22 = vpop.f32.mrf.mxu0 }
 0x18b   : > { %v6989_v25 = vpop.f32.mrf.mxu1 }
 0x18c   : > { %11159 = vst [vmem:[#allocation35_spill] sm:$0xff] %v6989_v25  ;;  %v6991_v26 = vpop.f32.mrf.mxu0 }
 0x18d   : > { %v6993_v30 = vpop.f32.mrf.mxu1  ;;  %v5652_v3 = vadd.f32 %v6991_v26, %v6987_v22 }
 0x190   : > { %v5709_v36 = vpop.f32.mrf.mxu0 }
 0x192   : > { %v6138_v63 = vpop.f32.mrf.mxu1  ;;  %v5710_v55 = vpop.f32.mrf.mxu0 }
 0x193   : > { %v5711_v42 = vadd.f32 %v5710_v55, %v5709_v36  ;;  %v7003_v55 = vld [vmem:[%s11161_s3] ss:$0 sm:$0xff]  ;;  %v5569_v36 = vadd.f32 %v6959_v29, %v6957_v23  ;;  %v1477_v29 = vld [vmem:[#allocation9 + $0x78] sm:$0xff]  ;;  %s7705_s3 = sld [smem:[#allocation11 + $0x2d]] }
 0x194   : > { %v1345_v32 = vpop.f32.mrf.mxu1  ;;  %v5712_v44 = vpop.f32.mrf.mxu0 }
 0x195   : > { %v1346_v25 = vadd.f32 %v5711_v42, %v1345_v32  ;;  %v1067_v32 = vadd.f32 %v6094_v59, %v962_v28 }
 0x196   : > { %v5713_v47 = vpop.f32.mrf.mxu0  ;;  %v6141_v49 = vpop.f32.mrf.mxu1 }
 0x197   : > { %v1384_v41 = vadd.f32 %v1346_v25, %v1062_v46  ;;  %v5714_v61 = vadd.f32 %v5713_v47, %v5712_v44  ;;  %v5649_v44 = vadd.f32 %v6983_v19, %v6981_v17  ;;  %v1082_v47 = vadd.f32 %v6985_v21, %v977_v31  ;;  %v1492_v17 = vld [vmem:[#allocation9 + $0xf0] sm:$0xff] }
 0x198   : > { %v5715_v33 = vpop.f32.mrf.mxu0  ;;  %v1355_v48 = vpop.f32.mrf.mxu1 }
 0x199   : > { %v1399_v42 = vmul.f32 %v6998_v58, %v1384_v41  ;;  %v1351_v5 = vadd.f32 %v6138_v63, %v5714_v61  ;;  %v5566_v63 = vadd.f32 %v6955_v20, %v6953_v18  ;;  %v882_v61 = vadd.f32 %v5569_v36, %v6971_v54  ;;  %v1476_v54 = vld [vmem:[#allocation9 + $0x70] sm:$0xff]  ;;  %v1506_v36 = vld [vmem:[#allocation9 + $0x160] sm:$0xff] }
 0x19a   : > { %v5716_v10 = vpop.f32.mrf.mxu0  ;;  %v6144_v27 = vpop.f32.mrf.mxu1 }
 0x19b   : > { %v1414_v60 = vadd.f32 %v7003_v55, %v1399_v42  ;;  %v1385_v2 = vadd.f32 %v1351_v5, %v1067_v32  ;;  %v5717_v38 = vadd.f32 %v5716_v10, %v5715_v33  ;;  %v877_v34 = vadd.f32 %v6965_v7, %v5566_v63  ;;  %v11162_v63 = vld [vmem:[#allocation34_spill] sm:$0xff] }
 0x19c   : > { %v5718_v50 = vpop.f32.mrf.mxu0  ;;  %v1365_v46 = vpop.f32.mrf.mxu1  ;;  %v987_v6 = vadd.f32 %v5649_v44, %v882_v61 }
 0x19d   : > { %v7009_v4 = vmax.f32 %v1414_v60, 0.0  ;;  %v1400_v28 = vmul.f32 %v6998_v58, %v1385_v2  ;;  %v1356_v59 = vadd.f32 %v5717_v38, %v1355_v48  ;;  %v982_v12 = vadd.f32 %v5646_v1, %v877_v34  ;;  %v1491_v2 = vld [vmem:[#allocation9 + $0xe8] sm:$0xff]  ;;  %v1508_v38 = vld [vmem:[#allocation9 + $0x170] sm:$0xff]  ;;  %v1474_v1 = vld [vmem:[#allocation9 + $0x60] sm:$0xff] }
 0x19e   : > { %v5719_v51 = vpop.f32.mrf.mxu0  ;;  %v6147_v5 = vpop.f32.mrf.mxu1  ;;  %v1092_v56 = vadd.f32 %v6993_v30, %v987_v6  ;;  %v1489_v34 = vld [vmem:[#allocation9 + $0xd8] sm:$0xff]  ;;  %v1470_v6 = vld [vmem:[#allocation9 + $0x40] sm:$0xff] }
 0x19f   : > { %1430 = vst [vmem:[#allocation2 + $0x20] sm:$0xff] %v7009_v4  ;;  %v1415_v15 = vadd.f32 %v7003_v55, %v1400_v28  ;;  %v1386_v24 = vadd.f32 %v1356_v59, %v1072_v11  ;;  %v5720_v14 = vadd.f32 %v5719_v51, %v5718_v50  ;;  %1647 = vmatprep.mubr.f32.mxu0 %v7009_v4  ;;  %v1475_v50 = vld [vmem:[#allocation9 + $0x68] sm:$0xff]  ;;  %v1490_v28 = vld [vmem:[#allocation9 + $0xe0] sm:$0xff] }
 0x1a0   : > { %v5721_v25 = vpop.f32.mrf.mxu0  ;;  %v1087_v42 = vadd.f32 %v6979_v16, %v982_v12  ;;  %v1375_v59 = vpop.f32.mrf.mxu1 }
 0x1a1   : > { %v7021_v18 = vmax.f32 %v1415_v15, 0.0  ;;  %v1401_v20 = vmul.f32 %v6998_v58, %v1386_v24  ;;  %v1361_v52 = vadd.f32 %v6141_v49, %v5720_v14  ;;  %v992_v15 = vadd.f32 %v5652_v3, %v887_v43  ;;  %v1485_v3 = vld [vmem:[#allocation9 + $0xb8] sm:$0xff]  ;;  %v1468_v43 = vld [vmem:[#allocation9 + $0x30] sm:$0xff] }
 0x1a2   : > { %v5722_v37 = vpop.f32.mrf.mxu0 }
 0x1a3   : > { %1431 = vst [vmem:[#allocation2 + $0x38] sm:$0xff] %v7021_v18  ;;  %v1416_v8 = vadd.f32 %v7003_v55, %v1401_v20  ;;  %v1387_v40 = vadd.f32 %v1361_v52, %v1077_v62  ;;  %v5723_v9 = vadd.f32 %v5722_v37, %v5721_v25  ;;  %v1473_v37 = vld [vmem:[#allocation9 + $0x58] sm:$0xff] }
 0x1a4   : > { %v5724_v39 = vpop.f32.mrf.mxu0 }
 0x1a5   : > { %v7032_v41 = vmax.f32 %v1416_v8, 0.0  ;;  %v1402_v7 = vmul.f32 %v6998_v58, %v1387_v40  ;;  %v1366_v23 = vadd.f32 %v5723_v9, %v1365_v46  ;;  %v11163_v8 = vld [vmem:[#allocation35_spill] sm:$0xff]  ;;  %v1488_v46 = vld [vmem:[#allocation9 + $0xd0] sm:$0xff] }
 0x1a6   : > { %v5725_v45 = vpop.f32.mrf.mxu0  ;;  %v7038_v33 = vld [vmem:[#allocation2 + $0x21] sm:$0xff]  ;;  %v1097_v40 = vadd.f32 %v11163_v8, %v992_v15  ;;  %v1462_v8 = vld [vmem:[#allocation9] sm:$0xff] }
 0x1a7   : > { %v7040_v49 = vld [vmem:[#allocation2 + $0x1f] sm:$0xff]  ;;  %1432 = vst [vmem:[#allocation2 + $0x50] sm:$0xff] %v7032_v41  ;;  %v1417_v19 = vadd.f32 %v7003_v55, %v1402_v7  ;;  %v1388_v21 = vadd.f32 %v1366_v23, %v1082_v47  ;;  %v5726_v32 = vadd.f32 %v5725_v45, %v5724_v39  ;;  %6180 = vmatprep.mubr.f32.mxu1 %v7038_v33  ;;  %v1505_v39 = vld [vmem:[#allocation9 + $0x158] sm:$0xff] }
 0x1a8   : > { %1648 = vmatmul.mubr.f32.vlgmr.msra.gmra.mxu0 %v7040_v49  ;;  %v5727_v35 = vpop.f32.mrf.mxu0  ;;  %v1465_v15 = vld [vmem:[#allocation9 + $0x18] sm:$0xff] }
 0x1a9   : > { %5838 = vmatpush3.msra.mxu0 %v1477_v29  ;;  %1652 = vmatprep.mubr.f32.mxu0 %v7021_v18  ;;  %v7050_v10 = vmax.f32 %v1417_v19, 0.0  ;;  %v1403_v57 = vmul.f32 %v6998_v58, %v1388_v21  ;;  %v1371_v60 = vadd.f32 %v6144_v27, %v5726_v32  ;;  %v1472_v29 = vld [vmem:[#allocation9 + $0x50] sm:$0xff]  ;;  %v1471_v21 = vld [vmem:[#allocation9 + $0x48] sm:$0xff]  ;;  %v1486_v32 = vld [vmem:[#allocation9 + $0xc0] sm:$0xff] }
 0x1aa   : > { %5839 = vmatprep.subr.mxu0 %v1492_v17  ;;  %v5728_v16 = vpop.f32.mrf.mxu0  ;;  %v7054_v11 = vld [vmem:[#allocation2 + $0x39] sm:$0xff] }
 0x1ab   : > { %5840 = vmatpush3.msra.mxu0 %v1476_v54  ;;  %v7056_v48 = vld [vmem:[#allocation2 + $0x37] sm:$0xff]  ;;  %1433 = vst [vmem:[#allocation2 + $0x68] sm:$0xff] %v7050_v10  ;;  %v1418_v22 = vadd.f32 %v7003_v55, %v1403_v57  ;;  %v1389_v26 = vadd.f32 %v1371_v60, %v1087_v42  ;;  %v5729_v53 = vadd.f32 %v5728_v16, %v5727_v35  ;;  %v1504_v19 = vld [vmem:[#allocation9 + $0x150] sm:$0xff]  ;;  %v1469_v57 = vld [vmem:[#allocation9 + $0x38] sm:$0xff] }
 0x1ac   : > { %6181 = vmatmul.mubr.f32.vlgmr.msra.gmra.mxu1 %v7054_v11  ;;  %1653 = vmatmul.mubr.f32.gmra.mxu0 %v7056_v48  ;;  %v5730_v51 = vpop.f32.mrf.mxu0  ;;  %v1503_v42 = vld [vmem:[#allocation9 + $0x148] sm:$0xff]  ;;  %v1484_v60 = vld [vmem:[#allocation9 + $0xb0] sm:$0xff] }
 0x1ad   : > { %6193 = vmatpush3.msra.mxu1 %v11162_v63  ;;  %5841 = vmatprep.subr.mxu0 %v1491_v2  ;;  %v7064_v24 = vmax.f32 %v1418_v22, 0.0  ;;  %v1404_v14 = vmul.f32 %v6998_v58, %v1389_v26  ;;  %v1376_v62 = vadd.f32 %v5729_v53, %v1375_v59  ;;  %v1501_v2 = vld [vmem:[#allocation9 + $0x138] sm:$0xff]  ;;  %v1500_v22 = vld [vmem:[#allocation9 + $0x130] sm:$0xff]  ;;  %v1467_v26 = vld [vmem:[#allocation9 + $0x28] sm:$0xff] }
 0x1ae   : > { %6194 = vmatprep.subr.mxu1 %v1508_v38  ;;  %5842 = vmatpush3.msra.mxu0 %v1475_v50  ;;  %v5731_v25 = vpop.f32.mrf.mxu0  ;;  %v7067_v27 = vld [vmem:[#allocation2 + $0x51] sm:$0xff] }
 0x1af   : > { %6195 = vmatpush3.msra.mxu1 %v1508_v38  ;;  %5843 = vmatprep.subr.mxu0 %v1490_v28  ;;  %v7069_v30 = vld [vmem:[#allocation2 + $0x4f] sm:$0xff]  ;;  %1434 = vst [vmem:[#allocation2 + $0x80] sm:$0xff] %v7064_v24  ;;  %v1419_v31 = vadd.f32 %v7003_v55, %v1404_v14  ;;  %v1390_v20 = vadd.f32 %v1376_v62, %v1092_v56  ;;  %v1483_v50 = vld [vmem:[#allocation9 + $0xa8] sm:$0xff]  ;;  %v1480_v14 = vld [vmem:[#allocation9 + $0x90] sm:$0xff] }
 0x1b0   : > { %v5732_v52 = vadd.f32 %v5731_v25, %v5730_v51  ;;  %6196 = vmatprep.subr.mxu1 %v1507_v13  ;;  %1657 = vmatprep.mubr.f32.mxu0 %v7032_v41  ;;  %v1482_v53 = vld [vmem:[#allocation9 + $0xa0] sm:$0xff]  ;;  %v1499_v28 = vld [vmem:[#allocation9 + $0x128] sm:$0xff]  ;;  %v1481_v51 = vld [vmem:[#allocation9 + $0x98] sm:$0xff] }
 0x1b1   : > { %6183 = vmatprep.mubr.f32.mxu1 %v7067_v27  ;;  %5844 = vmatpush3.msra.mxu0 %v1474_v1  ;;  %v7076_v9 = vmax.f32 %v1419_v31, 0.0  ;;  %v1405_v12 = vmul.f32 %v6998_v58, %v1390_v20  ;;  %v1466_v59 = vld [vmem:[#allocation9 + $0x20] sm:$0xff]  ;;  %v1497_v62 = vld [vmem:[#allocation9 + $0x118] sm:$0xff]  ;;  %v1464_v25 = vld [vmem:[#allocation9 + $0x10] sm:$0xff] }
 0x1b2   : > { %v1381_v44 = vadd.f32 %v6147_v5, %v5732_v52  ;;  %6197 = vmatpush3.msra.mxu1 %v1507_v13  ;;  %1658 = vmatmul.mubr.f32.gmra.mxu0 %v7069_v30  ;;  %v7080_v47 = vld [vmem:[#allocation2 + $0x69] sm:$0xff]  ;;  %v1479_v20 = vld [vmem:[#allocation9 + $0x88] sm:$0xff]  ;;  %v1496_v52 = vld [vmem:[#allocation9 + $0x110] sm:$0xff] }
 0x1b3   : > { %5845 = vmatprep.subr.mxu0 %v1489_v34  ;;  %6198 = vmatprep.subr.mxu1 %v1506_v36  ;;  %1435 = vst [vmem:[#allocation2 + $0x98] sm:$0xff] %v7076_v9  ;;  %v1420_v7 = vadd.f32 %v7003_v55, %v1405_v12  ;;  %v7084_v61 = vld [vmem:[#allocation2 + $0x67] sm:$0xff]  ;;  %v1498_v13 = vld [vmem:[#allocation9 + $0x120] sm:$0xff]  ;;  %v1463_v34 = vld [vmem:[#allocation9 + $0x8] sm:$0xff] }
 0x1b4   : > { %v1391_v23 = vadd.f32 %v1381_v44, %v1097_v40  ;;  %5846 = vmatpush3.msra.mxu0 %v1473_v37  ;;  %6199 = vmatpush3.msra.mxu1 %v1506_v36  ;;  %v1478_v36 = vld [vmem:[#allocation9 + $0x80] sm:$0xff]  ;;  %v1495_v37 = vld [vmem:[#allocation9 + $0x108] sm:$0xff]  ;;  %v1438_v40 = vld [vmem:[#allocation2 + $0x7] sm:$0xff] }
 0x1b5   : > { %5847 = vmatprep.subr.mxu0 %v1488_v46  ;;  %6200 = vmatprep.subr.mxu1 %v1505_v39  ;;  %v7086_v45 = vmax.f32 %v1420_v7, 0.0  ;;  %v1494_v12 = vld [vmem:[#allocation9 + $0x100] sm:$0xff]  ;;  %v2059_v44 = vld [vmem:[#allocation9 + $0x3f8] sm:$0xff]  ;;  %v7125_v46 = vld [vmem:[#allocation2] sm:$0xff] }
 0x1b6   : > { %v1406_v17 = vmul.f32 %v6998_v58, %v1391_v23  ;;  %1662 = vmatprep.mubr.f32.mxu0 %v7050_v10  ;;  %6184 = vmatmul.mubr.f32.gmra.mxu1 %v7080_v47  ;;  %v7094_v58 = vld [vmem:[#allocation2 + $0x81] sm:$0xff]  ;;  %11164 = vst [vmem:[#allocation34_spill] sm:$0xff] %v7125_v46 }
 0x1b7   : > { %5848 = vmatpush3.msra.mxu0 %v1472_v29  ;;  %6201 = vmatpush3.msra.mxu1 %v1505_v39  ;;  %1436 = vst [vmem:[#allocation2 + $0xb0] sm:$0xff] %v7086_v45  ;;  %v7098_v5 = vld [vmem:[#allocation2 + $0x7f] sm:$0xff]  ;;  %v1454_v39 = vld [vmem:[#allocation2 + $0x9] sm:$0xff] }
 0x1b8   : > { %v1421_v54 = vadd.f32 %v7003_v55, %v1406_v17  ;;  %1663 = vmatmul.mubr.f32.gmra.mxu0 %v7084_v61  ;;  %5849 = vmatprep.subr.mxu0 %v1487_v0  ;;  %v1502_v55 = vld [vmem:[#allocation9 + $0x140] sm:$0xff]  ;;  %v2043_v7 = vld [vmem:[#allocation9 + $0x378] sm:$0xff]  ;;  %v2058_v23 = vld [vmem:[#allocation9 + $0x3f0] sm:$0xff] }
 0x1b9   : > { %6202 = vmatprep.subr.mxu1 %v1504_v19  ;;  %5850 = vmatpush3.msra.mxu0 %v1471_v21  ;;  %v2075_v29 = vld [vmem:[#allocation9 + $0x478] sm:$0xff]  ;;  %v2042_v0 = vld [vmem:[#allocation9 + $0x370] sm:$0xff]  ;;  %v2057_v17 = vld [vmem:[#allocation9 + $0x3e8] sm:$0xff] }
 0x1ba   : > { %v7096_v35 = vmax.f32 %v1421_v54, 0.0  ;;  %6203 = vmatpush3.msra.mxu1 %v1504_v19  ;;  %5851 = vmatprep.subr.mxu0 %v1486_v32  ;;  %v7104_v38 = vld [vmem:[#allocation2 + $0x99] sm:$0xff]  ;;  %v2040_v54 = vld [vmem:[#allocation9 + $0x360] sm:$0xff] }
 0x1bb   : > { %6204 = vmatprep.subr.mxu1 %v1503_v42  ;;  %1667 = vmatprep.mubr.f32.mxu0 %v7064_v24  ;;  %v7106_v16 = vld [vmem:[#allocation2 + $0x97] sm:$0xff]  ;;  %v2074_v19 = vld [vmem:[#allocation9 + $0x470] sm:$0xff] }
 0x1bc   : > { %1437 = vst [vmem:[#allocation2 + $0xc8] sm:$0xff] %v7096_v35  ;;  %6186 = vmatprep.mubr.f32.mxu1 %v7094_v58  ;;  %5852 = vmatpush3.msra.mxu0 %v1470_v6  ;;  %v2041_v21 = vld [vmem:[#allocation9 + $0x368] sm:$0xff]  ;;  %v2039_v6 = vld [vmem:[#allocation9 + $0x358] sm:$0xff] }
 0x1bd   : > { %6205 = vmatpush3.msra.mxu1 %v1503_v42  ;;  %1668 = vmatmul.mubr.f32.gmra.mxu0 %v7098_v5  ;;  %v2073_v32 = vld [vmem:[#allocation9 + $0x468] sm:$0xff]  ;;  %v2072_v42 = vld [vmem:[#allocation9 + $0x460] sm:$0xff] }
 0x1be   : > { %5853 = vmatprep.subr.mxu0 %v1485_v3  ;;  %6206 = vmatprep.subr.mxu1 %v1502_v55  ;;  %v7111_v56 = vld [vmem:[#allocation2 + $0xb1] sm:$0xff]  ;;  %v2071_v3 = vld [vmem:[#allocation9 + $0x458] sm:$0xff] }
 0x1bf   : > { %5854 = vmatpush3.msra.mxu0 %v1469_v57  ;;  %6207 = vmatpush3.msra.mxu1 %v1502_v55  ;;  %v7113_v63 = vld [vmem:[#allocation2 + $0xaf] sm:$0xff]  ;;  %v2038_v55 = vld [vmem:[#allocation9 + $0x350] sm:$0xff]  ;;  %v2053_v57 = vld [vmem:[#allocation9 + $0x3c8] sm:$0xff] }
 0x1c0   : > { %5855 = vmatprep.subr.mxu0 %v1484_v60  ;;  %6208 = vmatprep.subr.mxu1 %v1501_v2  ;;  %v2070_v60 = vld [vmem:[#allocation9 + $0x450] sm:$0xff] }
 0x1c1   : > { %1672 = vmatprep.mubr.f32.mxu0 %v7076_v9  ;;  %6187 = vmatmul.mubr.f32.gmra.mxu1 %v7104_v38 }
 0x1c2   : > { %5856 = vmatpush3.msra.mxu0 %v1468_v43  ;;  %6209 = vmatpush3.msra.mxu1 %v1501_v2  ;;  %v2037_v2 = vld [vmem:[#allocation9 + $0x348] sm:$0xff]  ;;  %v2052_v43 = vld [vmem:[#allocation9 + $0x3c0] sm:$0xff] }
 0x1c3   : > { %1673 = vmatmul.mubr.f32.gmra.mxu0 %v7106_v16  ;;  %5857 = vmatprep.subr.mxu0 %v1483_v50  ;;  %v7118_v1 = vld [vmem:[#allocation2 + $0xc9] sm:$0xff]  ;;  %v2069_v50 = vld [vmem:[#allocation9 + $0x448] sm:$0xff] }
 0x1c4   : > { %6210 = vmatprep.subr.mxu1 %v1500_v22  ;;  %5858 = vmatpush3.msra.mxu0 %v1467_v26  ;;  %v7120_v31 = vld [vmem:[#allocation2 + $0xc7] sm:$0xff] }
 0x1c5   : > { %6211 = vmatpush3.msra.mxu1 %v1500_v22  ;;  %5859 = vmatprep.subr.mxu0 %v1482_v53  ;;  %v2036_v22 = vld [vmem:[#allocation9 + $0x340] sm:$0xff]  ;;  %v2051_v26 = vld [vmem:[#allocation9 + $0x3b8] sm:$0xff] }
 0x1c6   : > { %6212 = vmatprep.subr.mxu1 %v1499_v28  ;;  %1677 = vmatprep.mubr.f32.mxu0 %v7086_v45  ;;  %v2068_v53 = vld [vmem:[#allocation9 + $0x440] sm:$0xff] }
 0x1c7   : > { %6189 = vmatprep.mubr.f32.mxu1 %v7111_v56  ;;  %5860 = vmatpush3.msra.mxu0 %v1466_v59  ;;  %v2050_v59 = vld [vmem:[#allocation9 + $0x3b0] sm:$0xff] }
 0x1c8   : > { %6213 = vmatpush3.msra.mxu1 %v1499_v28  ;;  %1678 = vmatmul.mubr.f32.gmra.mxu0 %v7113_v63  ;;  %v2035_v28 = vld [vmem:[#allocation9 + $0x338] sm:$0xff] }
 0x1c9   : > { %5861 = vmatprep.subr.mxu0 %v1481_v51  ;;  %6214 = vmatprep.subr.mxu1 %v1498_v13  ;;  %v2067_v51 = vld [vmem:[#allocation9 + $0x438] sm:$0xff] }
 0x1ca   : > { %5862 = vmatpush3.msra.mxu0 %v1465_v15  ;;  %6215 = vmatpush3.msra.mxu1 %v1498_v13  ;;  %v2034_v13 = vld [vmem:[#allocation9 + $0x330] sm:$0xff]  ;;  %v2049_v15 = vld [vmem:[#allocation9 + $0x3a8] sm:$0xff] }
 0x1cb   : > { %5863 = vmatprep.subr.mxu0 %v1480_v14  ;;  %6216 = vmatprep.subr.mxu1 %v1497_v62  ;;  %v2066_v14 = vld [vmem:[#allocation9 + $0x430] sm:$0xff] }
 0x1cc   : > { %1682 = vmatprep.mubr.f32.mxu0 %v7096_v35  ;;  %6190 = vmatmul.mubr.f32.gmra.mxu1 %v7118_v1 }
 0x1cd   : > { %5864 = vmatpush3.msra.mxu0 %v1464_v25  ;;  %6217 = vmatpush3.msra.mxu1 %v1497_v62  ;;  %v2033_v62 = vld [vmem:[#allocation9 + $0x328] sm:$0xff] }
 0x1ce   : > { %1683 = vmatmul.mubr.f32.gmra.mxu0 %v7120_v31  ;;  %5865 = vmatprep.subr.mxu0 %v1479_v20  ;;  %v2065_v25 = vld [vmem:[#allocation9 + $0x428] sm:$0xff]  ;;  %v2032_v20 = vld [vmem:[#allocation9 + $0x320] sm:$0xff] }
 0x1cf   : > { %6218 = vmatprep.subr.mxu1 %v1496_v52  ;;  %5866 = vmatpush3.msra.mxu0 %v1463_v34  ;;  %v2064_v34 = vld [vmem:[#allocation9 + $0x420] sm:$0xff] }
 0x1d0   : > { %6219 = vmatpush3.msra.mxu1 %v1496_v52  ;;  %5867 = vmatprep.subr.mxu0 %v1478_v36  ;;  %v2047_v52 = vld [vmem:[#allocation9 + $0x398] sm:$0xff] }
 0x1d1   : > { %6220 = vmatprep.subr.mxu1 %v1495_v37  ;;  %5868 = vmatpush3.msra.mxu0 %v1462_v8  ;;  %v2031_v36 = vld [vmem:[#allocation9 + $0x318] sm:$0xff] }
 0x1d2   : > { %1857 = vmatprep.mubr.f32.mxu0 %v7125_v46  ;;  %6221 = vmatpush3.msra.mxu1 %v1495_v37  ;;  %v2046_v37 = vld [vmem:[#allocation9 + $0x390] sm:$0xff]  ;;  %v2063_v8 = vld [vmem:[#allocation9 + $0x418] sm:$0xff] }
 0x1d3   : > { %1858 = vmatmul.mubr.f32.vlgmr.msra.gmra.mxu0 %v1438_v40  ;;  %6222 = vmatprep.subr.mxu1 %v1494_v12  ;;  %v2030_v40 = vld [vmem:[#allocation9 + $0x310] sm:$0xff] }
 0x1d4   : > { %5917 = vmatprep.subr.mxu0 %v2059_v44  ;;  %1862 = vmatprep.mubr.f32.mxu0 %v7009_v4  ;;  %v2056_v4 = vld [vmem:[#allocation9 + $0x3e0] sm:$0xff]  ;;  %v2062_v44 = vld [vmem:[#allocation9 + $0x410] sm:$0xff] }
 0x1d5   : > { %6223 = vmatpush3.msra.mxu1 %v1494_v12  ;;  %6224 = vmatprep.mubr.f32.mxu1 %v1454_v39  ;;  %v2045_v12 = vld [vmem:[#allocation9 + $0x388] sm:$0xff] }
 0x1d6   : > { %5918 = vmatpush3.msra.mxu0 %v2043_v7  ;;  %6225 = vmatmul.mubr.f32.vlgmr.msra.gmra.mxu1 %v7038_v33  ;;  %v2055_v33 = vld [vmem:[#allocation9 + $0x3d8] sm:$0xff]  ;;  %v2029_v39 = vld [vmem:[#allocation9 + $0x308] sm:$0xff]  ;;  %v2044_v7 = vld [vmem:[#allocation9 + $0x380] sm:$0xff] }
 0x1d7   : > { %5919 = vmatprep.subr.mxu0 %v2058_v23  ;;  %6236 = vmatprep.subr.mxu1 %v2075_v29  ;;  %v2061_v23 = vld [vmem:[#allocation9 + $0x408] sm:$0xff] }
 0x1d8   : > { %6227 = vmatprep.mubr.f32.mxu1 %v7054_v11  ;;  %5920 = vmatpush3.msra.mxu0 %v2042_v0  ;;  %v2060_v0 = vld [vmem:[#allocation9 + $0x400] sm:$0xff] }
 0x1d9   : > { %6237 = vmatpush3.msra.mxu1 %v2075_v29  ;;  %1863 = vmatmul.mubr.f32.gmra.mxu0 %v7040_v49  ;;  %v2054_v49 = vld [vmem:[#allocation9 + $0x3d0] sm:$0xff]  ;;  %v2028_v29 = vld [vmem:[#allocation9 + $0x300] sm:$0xff] }
 0x1da   : > { %5921 = vmatprep.subr.mxu0 %v2057_v17  ;;  %6238 = vmatprep.subr.mxu1 %v2074_v19 }
 0x1db   : > { %1867 = vmatprep.mubr.f32.mxu0 %v7021_v18  ;;  %5922 = vmatpush3.msra.mxu0 %v2041_v21 }
 0x1dc   : > { %6239 = vmatpush3.msra.mxu1 %v2074_v19  ;;  %5923 = vmatprep.subr.mxu0 %v2056_v4  ;;  %v2341_v19 = vld [vmem:[%s11165_s7 + $0x10] sm:$0xff]  ;;  %v2340_v4 = vld [vmem:[%s11165_s7 + $0x8] sm:$0xff] }
 0x1dd   : > { %6228 = vmatmul.mubr.f32.gmra.mxu1 %v7067_v27  ;;  %6240 = vmatprep.subr.mxu1 %v2073_v32 }
 0x1de   : > { %6230 = vmatprep.mubr.f32.mxu1 %v7080_v47  ;;  %5924 = vmatpush3.msra.mxu0 %v2040_v54  ;;  %v2339_v54 = vld [vmem:[%s11165_s7] sm:$0xff] }
 0x1df   : > { %6241 = vmatpush3.msra.mxu1 %v2073_v32  ;;  %1868 = vmatmul.mubr.f32.gmra.mxu0 %v7056_v48 }
 0x1e0   : > { %5925 = vmatprep.subr.mxu0 %v2055_v33  ;;  %6242 = vmatprep.subr.mxu1 %v2072_v42 }
 0x1e1   : > { %1872 = vmatprep.mubr.f32.mxu0 %v7032_v41  ;;  %5926 = vmatpush3.msra.mxu0 %v2039_v6  ;;  %v2426_v6 = vld [vmem:[%s11166_s8] sm:$0x3]  ;;  %s7729_s8 = sld [smem:[#allocation11 + $0x3a]] }
 0x1e2   : > { %6243 = vmatpush3.msra.mxu1 %v2072_v42  ;;  %5927 = vmatprep.subr.mxu0 %v2054_v49 }
 0x1e3   : > { %6231 = vmatmul.mubr.f32.gmra.mxu1 %v7094_v58  ;;  %6244 = vmatprep.subr.mxu1 %v2071_v3 }
 0x1e4   : > { %6233 = vmatprep.mubr.f32.mxu1 %v7104_v38  ;;  %5928 = vmatpush3.msra.mxu0 %v2038_v55 }
 0x1e5   : > { %6245 = vmatpush3.msra.mxu1 %v2071_v3  ;;  %1873 = vmatmul.mubr.f32.gmra.mxu0 %v7069_v30 }
 0x1e6   : > { %5929 = vmatprep.subr.mxu0 %v2053_v57  ;;  %6246 = vmatprep.subr.mxu1 %v2070_v60 }
 0x1e7   : > { %1877 = vmatprep.mubr.f32.mxu0 %v7050_v10  ;;  %5930 = vmatpush3.msra.mxu0 %v2037_v2 }
 0x1e8   : > { %6247 = vmatpush3.msra.mxu1 %v2070_v60  ;;  %5931 = vmatprep.subr.mxu0 %v2052_v43 }
 0x1e9   : > { %6234 = vmatmul.mubr.f32.gmra.mxu1 %v7111_v56  ;;  %6248 = vmatprep.subr.mxu1 %v2069_v50 }
 0x1ea   : > { %5932 = vmatpush3.msra.mxu0 %v2036_v22  ;;  %6249 = vmatpush3.msra.mxu1 %v2069_v50 }
 0x1eb   : > { %6268 = vmatprep.mubr.f32.mxu1 %v7054_v11  ;;  %1878 = vmatmul.mubr.f32.gmra.mxu0 %v7084_v61  ;;  %v2048_v11 = vld [vmem:[#allocation9 + $0x3a0] sm:$0xff] }
 0x1ec   : > { %5933 = vmatprep.subr.mxu0 %v2051_v26  ;;  %6250 = vmatprep.subr.mxu1 %v2068_v53 }
 0x1ed   : > { %1882 = vmatprep.mubr.f32.mxu0 %v7064_v24  ;;  %5934 = vmatpush3.msra.mxu0 %v2035_v28 }
 0x1ee   : > { %6251 = vmatpush3.msra.mxu1 %v2068_v53  ;;  %5935 = vmatprep.subr.mxu0 %v2050_v59 }
 0x1ef   : > { %6252 = vmatprep.subr.mxu1 %v2067_v51  ;;  %5936 = vmatpush3.msra.mxu0 %v2034_v13 }
 0x1f0   : > { %6253 = vmatpush3.msra.mxu1 %v2067_v51  ;;  %1883 = vmatmul.mubr.f32.gmra.mxu0 %v7098_v5 }
 0x1f1   : > { %5937 = vmatprep.subr.mxu0 %v2049_v15  ;;  %6254 = vmatprep.subr.mxu1 %v2066_v14 }
 0x1f2   : > { %1887 = vmatprep.mubr.f32.mxu0 %v7076_v9  ;;  %5938 = vmatpush3.msra.mxu0 %v2033_v62 }
 0x1f3   : > { %6255 = vmatpush3.msra.mxu1 %v2066_v14  ;;  %5939 = vmatprep.subr.mxu0 %v2048_v11 }
 0x1f4   : > { %6256 = vmatprep.subr.mxu1 %v2065_v25  ;;  %5940 = vmatpush3.msra.mxu0 %v2032_v20 }
 0x1f5   : > { %6257 = vmatpush3.msra.mxu1 %v2065_v25  ;;  %1888 = vmatmul.mubr.f32.gmra.mxu0 %v7106_v16 }
 0x1f6   : > { %5941 = vmatprep.subr.mxu0 %v2047_v52  ;;  %6258 = vmatprep.subr.mxu1 %v2064_v34 }
 0x1f7   : > { %1892 = vmatprep.mubr.f32.mxu0 %v7086_v45  ;;  %5942 = vmatpush3.msra.mxu0 %v2031_v36 }
 0x1f8   : > { %6259 = vmatpush3.msra.mxu1 %v2064_v34  ;;  %5943 = vmatprep.subr.mxu0 %v2046_v37 }
 0x1f9   : > { %6260 = vmatprep.subr.mxu1 %v2063_v8  ;;  %5944 = vmatpush3.msra.mxu0 %v2030_v40 }
 0x1fa   : > { %6261 = vmatpush3.msra.mxu1 %v2063_v8  ;;  %1893 = vmatmul.mubr.f32.gmra.mxu0 %v7113_v63 }
 0x1fb   : > { %5945 = vmatprep.subr.mxu0 %v2045_v12  ;;  %6262 = vmatprep.subr.mxu1 %v2062_v44 }
 0x1fc   : > { %5946 = vmatpush3.msra.mxu0 %v2029_v39  ;;  %2140 = vmatprep.mubr.f32.mxu0 %v7021_v18  ;;  %v2026_v18 = vld [vmem:[#allocation2 + $0xe1] sm:$0xff] }
 0x1fd   : > { %6263 = vmatpush3.msra.mxu1 %v2062_v44  ;;  %5947 = vmatprep.subr.mxu0 %v2044_v7 }
 0x1fe   : > { %6264 = vmatprep.subr.mxu1 %v2061_v23  ;;  %5948 = vmatpush3.msra.mxu0 %v2028_v29 }
 0x1ff   : > { %6265 = vmatpush3.msra.mxu1 %v2061_v23  ;;  %2141 = vmatmul.mubr.f32.vlgmr.msra.gmra.mxu0 %v7056_v48  ;;  %v2353_v48 = vld [vmem:[%s11165_s7 + $0x70] sm:$0xff] }
 0x200   : > { %6266 = vmatprep.subr.mxu1 %v2060_v0  ;;  %2145 = vmatprep.mubr.f32.mxu0 %v7032_v41  ;;  %v2010_v41 = vld [vmem:[#allocation2 + $0xdf] sm:$0xff] }
 0x201   : > { %6267 = vmatpush3.msra.mxu1 %v2060_v0  ;;  %6280 = vmatprep.subr.mxu0 %v7125_v46 }
 0x202   : > { %6269 = vmatmul.mubr.f32.vlgmr.msra.gmra.mxu1 %v7067_v27  ;;  %6315 = vmatprep.subr.mxu1 %v7125_v46  ;;  %v2351_v27 = vld [vmem:[%s11165_s7 + $0x60] sm:$0xff] }
 0x203   : > { %6271 = vmatprep.mubr.f32.mxu1 %v7080_v47  ;;  %2146 = vmatmul.mubr.f32.gmra.mxu0 %v7069_v30  ;;  %v2350_v30 = vld [vmem:[%s11165_s7 + $0x58] sm:$0xff]  ;;  %v2348_v47 = vld [vmem:[%s11165_s7 + $0x48] sm:$0xff] }
 0x204   : > { %2150 = vmatprep.mubr.f32.mxu0 %v7050_v10  ;;  %v2354_v10 = vld [vmem:[%s11165_s7 + $0x78] sm:$0xff]  ;;  %6316 = vmatpush3.msk.msra.mxu1 %vm2431_vm2, %v2426_v6 }
 0x205   : > { %6281 = vmatpush3.msra.mxu0 %v2354_v10 }
 0x206   : > { %6272 = vmatmul.mubr.f32.gmra.mxu1 %v7094_v58  ;;  %6282 = vmatprep.subr.mxu0 %v7125_v46  ;;  %v2346_v58 = vld [vmem:[%s11165_s7 + $0x38] sm:$0xff] }
 0x207   : > { %6274 = vmatprep.mubr.f32.mxu1 %v7104_v38  ;;  %2151 = vmatmul.mubr.f32.gmra.mxu0 %v7084_v61  ;;  %v2347_v61 = vld [vmem:[%s11165_s7 + $0x40] sm:$0xff] }
 0x208   : > { %2155 = vmatprep.mubr.f32.mxu0 %v7064_v24  ;;  %6283 = vmatpush3.msra.mxu0 %v2353_v48  ;;  %v2352_v24 = vld [vmem:[%s11165_s7 + $0x68] sm:$0xff] }
 0x209   : > { %6284 = vmatprep.subr.mxu0 %v7125_v46 }
 0x20a   : > { %6275 = vmatmul.mubr.f32.gmra.mxu1 %v7111_v56  ;;  %6285 = vmatpush3.msra.mxu0 %v2352_v24  ;;  %v2344_v56 = vld [vmem:[%s11165_s7 + $0x28] sm:$0xff] }
 0x20b   : > { %6277 = vmatprep.mubr.f32.mxu1 %v7118_v1  ;;  %2156 = vmatmul.mubr.f32.gmra.mxu0 %v7098_v5  ;;  %v2345_v5 = vld [vmem:[%s11165_s7 + $0x30] sm:$0xff]  ;;  %v2343_v1 = vld [vmem:[%s11165_s7 + $0x20] sm:$0xff] }
 0x20c   : > { %2160 = vmatprep.mubr.f32.mxu0 %v7076_v9  ;;  %6286 = vmatprep.subr.mxu0 %v7125_v46  ;;  %v2349_v9 = vld [vmem:[%s11165_s7 + $0x50] sm:$0xff] }
 0x20d   : > { %6287 = vmatpush3.msra.mxu0 %v2351_v27 }
 0x20e   : > { %6278 = vmatmul.mubr.f32.gmra.mxu1 %v2026_v18  ;;  %6288 = vmatprep.subr.mxu0 %v7125_v46 }
 0x20f   : > { %2161 = vmatmul.mubr.f32.gmra.mxu0 %v7106_v16  ;;  %6317 = vmatprep.mubr.msk.f32.mxu1 %vm6583_vm1, %v7125_v46 }
 0x210   : > { %2165 = vmatprep.mubr.f32.mxu0 %v7086_v45  ;;  %6289 = vmatpush3.msra.mxu0 %v2350_v30 }
 0x211   : > { %6290 = vmatprep.subr.mxu0 %v7125_v46 }
 0x212   : > { %6291 = vmatpush3.msra.mxu0 %v2349_v9 }
 0x213   : > { %2166 = vmatmul.mubr.f32.gmra.mxu0 %v7113_v63  ;;  %6292 = vmatprep.subr.mxu0 %v7125_v46 }
 0x214   : > { %2170 = vmatprep.mubr.f32.mxu0 %v7096_v35  ;;  %6293 = vmatpush3.msra.mxu0 %v2348_v47 }
 0x215   : > { %6294 = vmatprep.subr.mxu0 %v7125_v46 }
 0x216   : > { %6295 = vmatpush3.msra.mxu0 %v2347_v61 }
 0x217   : > { %2171 = vmatmul.mubr.f32.gmra.mxu0 %v7120_v31  ;;  %6296 = vmatprep.subr.mxu0 %v7125_v46  ;;  %v2342_v31 = vld [vmem:[%s11165_s7 + $0x18] sm:$0xff]  ;;  %s7725_s7 = sld [smem:[#allocation11 + $0x38]] }
 0x218   : > { %2175 = vmatprep.mubr.f32.mxu0 %v7125_v46  ;;  %6297 = vmatpush3.msra.mxu0 %v2346_v58 }
 0x219   : > { %6298 = vmatprep.subr.mxu0 %v7125_v46 }
 0x21a   : > { %6299 = vmatpush3.msra.mxu0 %v2345_v5 }
 0x21b   : > { %2176 = vmatmul.mubr.f32.gmra.mxu0 %v2010_v41  ;;  %6300 = vmatprep.subr.mxu0 %v7125_v46 }
 0x21c   : > { %6301 = vmatpush3.msra.mxu0 %v2344_v56  ;;  %6312 = vmatprep.mubr.msk.f32.mxu0 %vm6583_vm1, %v7125_v46 }
 0x21d   : > { %6302 = vmatprep.subr.mxu0 %v7125_v46 }
 0x21e   : > { %6303 = vmatpush3.msra.mxu0 %v2343_v1 }
 0x21f   : > { %6304 = vmatprep.subr.mxu0 %v7125_v46 }
 0x220   : > { %6305 = vmatpush3.msra.mxu0 %v2342_v31 }
 0x221   : > { %6306 = vmatprep.subr.mxu0 %v7125_v46 }
 0x222   : > { %6307 = vmatpush3.msra.mxu0 %v2341_v19 }
 0x223   : > { %6308 = vmatprep.subr.mxu0 %v7125_v46 }
 0x224   : > { %6309 = vmatpush3.msra.mxu0 %v2340_v4 }
 0x225   : > { %6310 = vmatprep.subr.mxu0 %v7125_v46 }
 0x226   : > { %6311 = vmatpush3.msra.mxu0 %v2339_v54 }
 0x268   : > { %v5789_v45 = vpop.f32.mrf.mxu0 }
 0x26a   : > { %v5790_v35 = vpop.f32.mrf.mxu0 }
 0x26b   : > { %v7212_v38 = vadd.f32 %v5790_v35, %v5789_v45 }
 0x26c   : > { %v5792_v16 = vpop.f32.mrf.mxu0  ;;  %v6182_v53 = vpop.f32.mrf.mxu1 }
 0x26e   : > { %v5793_v63 = vpop.f32.mrf.mxu0  ;;  %v1754_v59 = vpop.f32.mrf.mxu1 }
 0x26f   : > { %v7225_v17 = vadd.f32 %v5793_v63, %v5792_v16  ;;  %v1755_v54 = vadd.f32 %v7212_v38, %v1754_v59 }
 0x272   : > { %v5795_v21 = vpop.f32.mrf.mxu0 }
 0x274   : > { %v5796_v32 = vpop.f32.mrf.mxu0 }
 0x275   : > { %v7241_v33 = vadd.f32 %v5796_v32, %v5795_v21  ;;  %v1760_v21 = vadd.f32 %v6182_v53, %v7225_v17 }
 0x276   : > { %v6185_v13 = vpop.f32.mrf.mxu1 }
 0x278   : > { %v5798_v42 = vpop.f32.mrf.mxu0  ;;  %v1764_v62 = vpop.f32.mrf.mxu1 }
 0x27a   : > { %v5799_v49 = vpop.f32.mrf.mxu0 }
 0x27b   : > { %v7247_v3 = vadd.f32 %v5799_v49, %v5798_v42  ;;  %v1765_v49 = vadd.f32 %v7241_v33, %v1764_v62 }
 0x27d   : > { %v5801_v55 = vpop.f32.mrf.mxu0 }
 0x27f   : > { %v5802_v57 = vpop.f32.mrf.mxu0 }
 0x280   : > { %v7249_v60 = vadd.f32 %v5802_v57, %v5801_v55 }
 0x281   : > { %v7261_v11 = vpop.f32.mrf.mxu1 }
 0x283   : > { %v5804_v2 = vpop.f32.mrf.mxu0  ;;  %v1774_v52 = vpop.f32.mrf.mxu1 }
 0x284   : > { %v1775_v17 = vadd.f32 %v7249_v60, %v1774_v52  ;;  %v5400_v52 = vld [vmem:[%s11168_s5] ss:$0 sm:$0xff]  ;;  %s7716_s5 = sld [smem:[#allocation11 + $0x33]] }
 0x285   : > { %v5805_v43 = vpop.f32.mrf.mxu0 }
 0x286   : > { %v7251_v50 = vadd.f32 %v5805_v43, %v5804_v2 }
 0x288   : > { %v7253_v22 = vpop.f32.mrf.mxu0 }
 0x28a   : > { %v7255_v26 = vpop.f32.mrf.mxu0 }
 0x28c   : > { %v7263_v34 = vpop.f32.mrf.mxu1 }
 0x28e   : > { %v7257_v28 = vpop.f32.mrf.mxu0  ;;  %v7265_v8 = vpop.f32.mrf.mxu1 }
 0x290   : > { %v7259_v51 = vpop.f32.mrf.mxu0 }
 0x293   : > { %v5869_v15 = vpop.f32.mrf.mxu0 }
 0x295   : > { %v5870_v14 = vpop.f32.mrf.mxu0 }
 0x296   : > { %v6226_v40 = vpop.f32.mrf.mxu1  ;;  %v5871_v1 = vadd.f32 %v5870_v14, %v5869_v15  ;;  %v1770_v15 = vadd.f32 %v6185_v13, %v7247_v3  ;;  %v1780_v13 = vadd.f32 %v7261_v11, %v7251_v50  ;;  %v5812_v11 = vadd.f32 %v7259_v51, %v7257_v28 }
 0x298   : > { %v1964_v39 = vpop.f32.mrf.mxu1  ;;  %v1860_v43 = vadd.f32 %v5871_v1, %v1755_v54  ;;  %v1790_v54 = vadd.f32 %v7263_v34, %v5812_v11 }
 0x299   : > { %v5872_v25 = vpop.f32.mrf.mxu0 }
 0x29a   : > { %v1965_v33 = vadd.f32 %v1964_v39, %v1860_v43 }
 0x29b   : > { %v5873_v20 = vpop.f32.mrf.mxu0 }
 0x29c   : > { %v5874_v63 = vadd.f32 %v5873_v20, %v5872_v25 }
 0x29d   : > { %v6229_v23 = vpop.f32.mrf.mxu1 }
 0x29e   : > { %v1865_v55 = vadd.f32 %v5874_v63, %v1760_v21 }
 0x29f   : > { %v5875_v36 = vpop.f32.mrf.mxu0  ;;  %v1974_v0 = vpop.f32.mrf.mxu1 }
 0x2a0   : > { %v1970_v38 = vadd.f32 %v6226_v40, %v1865_v55 }
 0x2a1   : > { %v5876_v37 = vpop.f32.mrf.mxu0 }
 0x2a2   : > { %v5877_v4 = vadd.f32 %v5876_v37, %v5875_v36 }
 0x2a3   : > { %v7267_v10 = vpop.f32.mrf.mxu1 }
 0x2a4   : > { %v1870_v14 = vadd.f32 %v5877_v4, %v1765_v49 }
 0x2a5   : > { %v5878_v12 = vpop.f32.mrf.mxu0  ;;  %v1984_v27 = vpop.f32.mrf.mxu1 }
 0x2a7   : > { %v5879_v44 = vpop.f32.mrf.mxu0 }
 0x2a8   : > { %v5880_v57 = vadd.f32 %v5879_v44, %v5878_v12 }
 0x2a9   : > { %v7271_v9 = vpop.f32.mrf.mxu1 }
 0x2aa   : > { %11167 = vst [vmem:[#allocation35_spill] sm:$0xff] %v7271_v9  ;;  %v1875_v59 = vadd.f32 %v5880_v57, %v1770_v15 }
 0x2ab   : > { %v5881_v7 = vpop.f32.mrf.mxu0  ;;  %v7275_v45 = vpop.f32.mrf.mxu1 }
 0x2ac   : > { %v1980_v60 = vadd.f32 %v6229_v23, %v1875_v59 }
 0x2ad   : > { %v5882_v29 = vpop.f32.mrf.mxu0 }
 0x2ae   : > { %v5883_v46 = vadd.f32 %v5882_v29, %v5881_v7 }
 0x2b0   : > { %v5884_v18 = vpop.f32.mrf.mxu0  ;;  %v1880_v62 = vadd.f32 %v5883_v46, %v1775_v17  ;;  %v5809_v46 = vadd.f32 %v7255_v26, %v7253_v22  ;;  %v5401_v22 = vld [vmem:[%s11169_s6] ss:$0 sm:$0xff]  ;;  %s7719_s6 = sld [smem:[#allocation11 + $0x35]] }
 0x2b1   : > { %v11170_v59 = vld [vmem:[#allocation35_spill] sm:$0xff] }
 0x2b2   : > { %v5885_v41 = vpop.f32.mrf.mxu0  ;;  %v1985_v39 = vadd.f32 %v1984_v27, %v1880_v62  ;;  %v1785_v50 = vadd.f32 %v5809_v46, %v7265_v8 }
 0x2b3   : > { %v5886_v7 = vadd.f32 %v5885_v41, %v5884_v18 }
 0x2b5   : > { %v5887_v48 = vpop.f32.mrf.mxu0 }
 0x2b7   : > { %v5888_v24 = vpop.f32.mrf.mxu0 }
 0x2ba   : > { %v7269_v30 = vpop.f32.mrf.mxu0 }
 0x2bc   : > { %v7273_v47 = vpop.f32.mrf.mxu0 }
 0x2bd   : > { %v5892_v21 = vadd.f32 %v7273_v47, %v7269_v30 }
 0x2bf   : > { %v5949_v61 = vpop.f32.mrf.mxu0 }
 0x2c1   : > { %v5950_v58 = vpop.f32.mrf.mxu0 }
 0x2c2   : > { %v6270_v35 = vpop.f32.mrf.mxu1  ;;  %v5951_v42 = vadd.f32 %v5950_v58, %v5949_v61  ;;  %v1975_v58 = vadd.f32 %v1974_v0, %v1870_v14  ;;  %v5889_v0 = vadd.f32 %v5888_v24, %v5887_v48 }
 0x2c3   : > { %v5952_v5 = vpop.f32.mrf.mxu0 }
 0x2c4   : > { %v2247_v16 = vpop.f32.mrf.mxu1  ;;  %v1890_v27 = vadd.f32 %v5889_v0, %v1785_v50 }
 0x2c5   : > { %v5953_v56 = vpop.f32.mrf.mxu0  ;;  %v2248_v53 = vadd.f32 %v5951_v42, %v2247_v16 }
 0x2c6   : > { %v6273_v31 = vpop.f32.mrf.mxu1  ;;  %v5954_v32 = vadd.f32 %v5953_v56, %v5952_v5  ;;  %v1995_v47 = vadd.f32 %v7275_v45, %v1890_v27 }
 0x2c7   : > { %v5955_v19 = vpop.f32.mrf.mxu0  ;;  %v2286_v56 = vadd.f32 %v2248_v53, %v1965_v33 }
 0x2c8   : > { %v2257_v9 = vpop.f32.mrf.mxu1  ;;  %v2253_v20 = vadd.f32 %v6270_v35, %v5954_v32  ;;  %v1885_v35 = vadd.f32 %v5886_v7, %v1780_v13 }
 0x2c9   : > { %v5956_v6 = vpop.f32.mrf.mxu0  ;;  %v2301_v23 = vmul.f32 %v5400_v52, %v2286_v56 }
 0x2ca   : > { %v5957_v2 = vadd.f32 %v5956_v6, %v5955_v19  ;;  %v6276_v12 = vpop.f32.mrf.mxu1  ;;  %v2287_v29 = vadd.f32 %v2253_v20, %v1970_v38  ;;  %v1990_v8 = vadd.f32 %v7267_v10, %v1885_v35 }
 0x2cb   : > { %v5958_v25 = vpop.f32.mrf.mxu0  ;;  %v7301_v42 = vadd.f32 %v5401_v22, %v2301_v23 }
 0x2cc   : > { %v2258_v37 = vadd.f32 %v5957_v2, %v2257_v9  ;;  %v2267_v18 = vpop.f32.mrf.mxu1  ;;  %v2302_v16 = vmul.f32 %v5400_v52, %v2287_v29 }
 0x2cd   : > { %v5959_v36 = vpop.f32.mrf.mxu0 }
 0x2ce   : > { %v5960_v61 = vadd.f32 %v5959_v36, %v5958_v25  ;;  %v2288_v40 = vadd.f32 %v2258_v37, %v1975_v58  ;;  %v6279_v19 = vpop.f32.mrf.mxu1  ;;  %v7298_v32 = vadd.f32 %v5401_v22, %v2302_v16  ;;  %v1895_v25 = vadd.f32 %v5892_v21, %v1790_v54 }
 0x2cf   : > { %v5961_v44 = vpop.f32.mrf.mxu0 }
 0x2d0   : > { %v2263_v5 = vadd.f32 %v6273_v31, %v5960_v61  ;;  %v2303_v26 = vmul.f32 %v5400_v52, %v2288_v40  ;;  %v2277_v49 = vpop.f32.mrf.mxu1  ;;  %v2324_v10 = vadd.f32 %v7298_v32, %v7301_v42  ;;  %v2000_v37 = vadd.f32 %v11170_v59, %v1895_v25 }
 0x2d1   : > { %v5962_v3 = vpop.f32.mrf.mxu0 }
 0x2d2   : > { %v5963_v9 = vadd.f32 %v5962_v3, %v5961_v44  ;;  %v2289_v63 = vadd.f32 %v2263_v5, %v1980_v60  ;;  %v7303_v55 = vadd.f32 %v5401_v22, %v2303_v26 }
 0x2d3   : > { %v5964_v41 = vpop.f32.mrf.mxu0 }
 0x2d4   : > { %v2268_v1 = vadd.f32 %v5963_v9, %v2267_v18  ;;  %v2304_v28 = vmul.f32 %v5400_v52, %v2289_v63  ;;  %v2325_v17 = vadd.f32 %v2324_v10, %v7303_v55 }
 0x2d5   : > { %v5965_v31 = vpop.f32.mrf.mxu0 }
 0x2d6   : > { %v2290_v48 = vadd.f32 %v2268_v1, %v1985_v39  ;;  %v5966_v24 = vadd.f32 %v5965_v31, %v5964_v41  ;;  %v7308_v15 = vadd.f32 %v5401_v22, %v2304_v28 }
 0x2d7   : > { %v5967_v4 = vpop.f32.mrf.mxu0 }
 0x2d8   : > { %v2273_v51 = vadd.f32 %v6276_v12, %v5966_v24  ;;  %v2305_v57 = vmul.f32 %v5400_v52, %v2290_v48  ;;  %v2326_v61 = vadd.f32 %v2325_v17, %v7308_v15  ;;  %v7495_v24 = vstv %s5405_s9  ;;  %s5417_s9 = sld [smem:[#allocation11 + $0xd]] }
 0x2d9   : > { %v5968_v6 = vpop.f32.mrf.mxu0  ;;  %v7508_v17 = vstv %s5409_s18  ;;  %s5421_s18 = sld [smem:[#allocation11 + $0x11]] }
 0x2da   : > { %v2291_v2 = vadd.f32 %v2273_v51, %v1990_v8  ;;  %v5969_v43 = vadd.f32 %v5968_v6, %v5967_v4  ;;  %v7311_v53 = vadd.f32 %v5401_v22, %v2305_v57  ;;  %v7499_v8 = vstv %s5406_s25  ;;  %11175 = vst [vmem:[#allocation37_spill] sm:$0xff] %v7508_v17  ;;  %s5418_s25 = sld [smem:[#allocation11 + $0xe]] }
 0x2db   : > { %v5970_v30 = vpop.f32.mrf.mxu0  ;;  %v7502_v57 = vstv %s5407_s28  ;;  %s5419_s28 = sld [smem:[#allocation11 + $0xf]] }
 0x2dc   : > { %v2306_v14 = vmul.f32 %v5400_v52, %v2291_v2  ;;  %v2278_v34 = vadd.f32 %v5969_v43, %v2277_v49  ;;  %v2327_v12 = vadd.f32 %v2326_v61, %v7311_v53  ;;  %v2516_v2 = vlaneseq }
 0x2dd   : > { %v5971_v20 = vpop.f32.mrf.mxu0  ;;  %v7511_v61 = vstv %s5410_s21  ;;  %s5422_s21 = sld [smem:[#allocation11 + $0x12]] }
 0x2de   : > { %v2292_v36 = vadd.f32 %v2278_v34, %v1995_v47  ;;  %v5972_v38 = vadd.f32 %v5971_v20, %v5970_v30  ;;  %v7315_v33 = vadd.f32 %v5401_v22, %v2306_v14  ;;  %v7505_v30 = vstv %s5408_s30  ;;  %11176 = vst [vmem:[#allocation38_spill] sm:$0xff] %v7511_v61  ;;  %s5420_s30 = sld [smem:[#allocation11 + $0x10]] }
 0x2df   : > { %11174 = vst [vmem:[#allocation36_spill] sm:$0xff] %v7505_v30  ;;  %v2517_v10 = vshrl.u32 %v2516_v2, 7 }
 0x2e0   : > { %v2307_v45 = vmul.f32 %v5400_v52, %v2292_v36  ;;  %v2283_v62 = vadd.f32 %v6279_v19, %v5972_v38  ;;  %v2328_v7 = vadd.f32 %v2327_v12, %v7315_v33 }
 0x2e1   : > { %v2518_v36 = vsub.s32 0, %v2517_v10 }
 0x2e2   : > { %v7318_v44 = vadd.f32 %v5401_v22, %v2307_v45  ;;  %v2293_v58 = vadd.f32 %v2283_v62, %v2000_v37 }
 0x2e4   : > { %v2308_v29 = vmul.f32 %v5400_v52, %v2293_v58  ;;  %v2329_v5 = vadd.f32 %v2328_v7, %v7318_v44  ;;  %v11171_v52 = vld [vmem:[#allocation34_spill] sm:$0xff] }
 0x2e5   : > { %449 = vst.msk [vmem:[#allocation3 + $0x80] sm:$0xff] %vm432_vm4, %v11171_v52  ;;  %433 = vst.msk [vmem:[#allocation3] sm:$0xff] %vm432_vm4, %v11171_v52 }
 0x2e6   : > { %v7322_v56 = vadd.f32 %v5401_v22, %v2308_v29  ;;  %434 = vst.msk [vmem:[#allocation3 + $0x8] sm:$0xff] %vm432_vm4, %v11171_v52  ;;  %435 = vst.msk [vmem:[#allocation3 + $0x10] sm:$0xff] %vm432_vm4, %v11171_v52  ;;  %v7493_v22 = vstv %s2597_s29  ;;  %s5416_s29 = sld [smem:[#allocation11 + $0xc]] }
 0x2e7   : > { %436 = vst.msk [vmem:[#allocation3 + $0x18] sm:$0xff] %vm432_vm4, %v11171_v52  ;;  %437 = vst.msk [vmem:[#allocation3 + $0x20] sm:$0xff] %vm432_vm4, %v11171_v52 }
 0x2e8   : > { %v2330_v3 = vadd.f32 %v2329_v5, %v7322_v56  ;;  %438 = vst.msk [vmem:[#allocation3 + $0x28] sm:$0xff] %vm432_vm4, %v11171_v52  ;;  %439 = vst.msk [vmem:[#allocation3 + $0x30] sm:$0xff] %vm432_vm4, %v11171_v52 }
 0x2e9   : > { %440 = vst.msk [vmem:[#allocation3 + $0x38] sm:$0xff] %vm432_vm4, %v11171_v52  ;;  %441 = vst.msk [vmem:[#allocation3 + $0x40] sm:$0xff] %vm432_vm4, %v11171_v52 }
 0x2ea   : > { %v2331_v13 = vrot.slane %v2330_v3, 4  ;;  %442 = vst.msk [vmem:[#allocation3 + $0x48] sm:$0xff] %vm432_vm4, %v11171_v52  ;;  %443 = vst.msk [vmem:[#allocation3 + $0x50] sm:$0xff] %vm432_vm4, %v11171_v52 }
 0x2eb   : > { %444 = vst.msk [vmem:[#allocation3 + $0x58] sm:$0xff] %vm432_vm4, %v11171_v52  ;;  %445 = vst.msk [vmem:[#allocation3 + $0x60] sm:$0xff] %vm432_vm4, %v11171_v52 }
 0x2ec   : > { %v2332_v60 = vadd.f32 %v2331_v13, %v2330_v3  ;;  %446 = vst.msk [vmem:[#allocation3 + $0x68] sm:$0xff] %vm432_vm4, %v11171_v52  ;;  %447 = vst.msk [vmem:[#allocation3 + $0x70] sm:$0xff] %vm432_vm4, %v11171_v52  ;;  %v7520_v3 = vstv %s5411_s26  ;;  %v2529_v13 = vand.u32 127, %v2516_v2  ;;  %s5423_s26 = sld [smem:[#allocation11 + $0x13]] }
 0x2ed   : > { %448 = vst.msk [vmem:[#allocation3 + $0x78] sm:$0xff] %vm432_vm4, %v11171_v52  ;;  %450 = vst.msk [vmem:[#allocation3 + $0x88] sm:$0xff] %vm432_vm4, %v11171_v52  ;;  %v2599_v26 = vld [vmem:[#allocation3 + $0x5] sm:$0xff] }
 0x2ee   : > { %v2333_v40 = vrot.slane %v2332_v60, 2  ;;  %451 = vst.msk [vmem:[#allocation3 + $0x90] sm:$0xff] %vm432_vm4, %v11171_v52  ;;  %452 = vst.msk [vmem:[#allocation3 + $0x98] sm:$0xff] %vm432_vm4, %v11171_v52  ;;  %v2608_v27 = vmul.f32 %v7493_v22, %v2599_v26  ;;  %v2651_v28 = vld [vmem:[#allocation3 + $0x6] sm:$0xff]  ;;  %vm2554_vm5 = vcmp.lt.s32.totalorder %v2529_v13, 32 }
 0x2ef   : > { %453 = vst.msk [vmem:[#allocation3 + $0xa0] sm:$0xff] %vm432_vm4, %v11171_v52  ;;  %454 = vst.msk [vmem:[#allocation3 + $0xa8] sm:$0xff] %vm432_vm4, %v11171_v52  ;;  %v2660_v6 = vmul.f32 %v7499_v8, %v2651_v28  ;;  %v2703_v47 = vld [vmem:[#allocation3 + $0x7] sm:$0xff] }
 0x2f0   : > { %v2334_v9 = vadd.f32 %v2333_v40, %v2332_v60  ;;  %455 = vst.msk [vmem:[#allocation3 + $0xb0] sm:$0xff] %vm432_vm4, %v11171_v52  ;;  %456 = vst.msk [vmem:[#allocation3 + $0xb8] sm:$0xff] %vm432_vm4, %v11171_v52  ;;  %v2712_v34 = vmul.f32 %v7505_v30, %v2703_v47  ;;  %v2755_v45 = vld [vmem:[#allocation3 + $0x8] sm:$0xff] }
 0x2f1   : > { %457 = vst.msk [vmem:[#allocation3 + $0xc0] sm:$0xff] %vm432_vm4, %v11171_v52  ;;  %458 = vst.msk [vmem:[#allocation3 + $0xc8] sm:$0xff] %vm432_vm4, %v11171_v52  ;;  %v2764_v29 = vmul.f32 %v7511_v61, %v2755_v45  ;;  %v2652_v45 = vld [vmem:[#allocation3 + $0x1e] sm:$0xff] }
 0x2f2   : > { %v2335_v46 = vrot.slane %v2334_v9, 1  ;;  %459 = vst.msk [vmem:[#allocation3 + $0xd0] sm:$0xff] %vm432_vm4, %v11171_v52  ;;  %460 = vst.msk [vmem:[#allocation3 + $0xd8] sm:$0xff] %vm432_vm4, %v11171_v52  ;;  %v2661_v13 = vmul.f32 %v7499_v8, %v2652_v45 }
 0x2f3   : > { %461 = vst.msk [vmem:[#allocation3 + $0xe0] sm:$0xff] %vm432_vm4, %v11171_v52  ;;  %462 = vst.msk [vmem:[#allocation3 + $0xe8] sm:$0xff] %vm432_vm4, %v11171_v52 }
 0x2f4   : > { %v2336_v39 = vadd.f32 %v2335_v46, %v2334_v9  ;;  %463 = vst.msk [vmem:[#allocation3 + $0xf0] sm:$0xff] %vm432_vm4, %v11171_v52  ;;  %464 = vst.msk [vmem:[#allocation3 + $0xf8] sm:$0xff] %vm432_vm4, %v11171_v52  ;;  %v7531_v9 = vstv %s5412_s11  ;;  %v2807_v46 = vld [vmem:[#allocation3 + $0x9] sm:$0xff]  ;;  %s5424_s11 = sld [smem:[#allocation11 + $0x14]] }
 0x2f5   : > { %465 = vst.msk [vmem:[#allocation3 + $0x100] sm:$0xff] %vm432_vm4, %v11171_v52  ;;  %466 = vst.msk [vmem:[#allocation3 + $0x108] sm:$0xff] %vm432_vm4, %v11171_v52 }
 0x2f6   : > { %v2338_v0 = vmul.f32 0.015625, %v2336_v39  ;;  %467 = vst.msk [vmem:[#allocation3 + $0x110] sm:$0xff] %vm432_vm4, %v11171_v52  ;;  %468 = vst.msk [vmem:[#allocation3 + $0x118] sm:$0xff] %vm432_vm4, %v11171_v52 }
 0x2f7   : > { %469 = vst.msk [vmem:[#allocation3 + $0x120] sm:$0xff] %vm432_vm4, %v11171_v52  ;;  %470 = vst.msk [vmem:[#allocation3 + $0x128] sm:$0xff] %vm432_vm4, %v11171_v52 }
 0x2f8   : > { %6313 = vmatmul.mubr.f32.vlgmr.msra.gmra.mxu0 %v2338_v0  ;;  %471 = vst.msk [vmem:[#allocation3 + $0x130] sm:$0xff] %vm432_vm4, %v11171_v52  ;;  %472 = vst.msk [vmem:[#allocation3 + $0x138] sm:$0xff] %vm432_vm4, %v11171_v52  ;;  %v2816_v0 = vmul.f32 %v7531_v9, %v2807_v46 }
 0x2f9   : > { %473 = vst.msk [vmem:[#allocation3 + $0x140] sm:$0xff] %vm432_vm4, %v11171_v52  ;;  %474 = vst.msk [vmem:[#allocation3 + $0x148] sm:$0xff] %vm432_vm4, %v11171_v52 }
 0x2fa   : > { %475 = vst.msk [vmem:[#allocation4] sm:$0xff] %vm432_vm4, %v11171_v52  ;;  %476 = vst.msk [vmem:[#allocation4 + $0x8] sm:$0xff] %vm432_vm4, %v11171_v52 }
 0x2fb   : > { %477 = vst.msk [vmem:[#allocation4 + $0x10] sm:$0xff] %vm432_vm4, %v11171_v52  ;;  %478 = vst.msk [vmem:[#allocation4 + $0x18] sm:$0xff] %vm432_vm4, %v11171_v52 }
 0x2fc   : > { %479 = vst.msk [vmem:[#allocation4 + $0x20] sm:$0xff] %vm432_vm4, %v11171_v52  ;;  %480 = vst.msk [vmem:[#allocation4 + $0x28] sm:$0xff] %vm432_vm4, %v11171_v52 }
 0x2fd   : > { %481 = vst.msk [vmem:[#allocation4 + $0x30] sm:$0xff] %vm432_vm4, %v11171_v52  ;;  %482 = vst.msk [vmem:[#allocation4 + $0x38] sm:$0xff] %vm432_vm4, %v11171_v52 }
 0x2fe   : > { %483 = vst.msk [vmem:[#allocation4 + $0x40] sm:$0xff] %vm432_vm4, %v11171_v52  ;;  %484 = vst.msk [vmem:[#allocation4 + $0x48] sm:$0xff] %vm432_vm4, %v11171_v52 }
 0x2ff   : > { %485 = vst.msk [vmem:[#allocation4 + $0x50] sm:$0xff] %vm432_vm4, %v11171_v52  ;;  %486 = vst.msk [vmem:[#allocation4 + $0x58] sm:$0xff] %vm432_vm4, %v11171_v52 }
 0x300   : > { %487 = vst.msk [vmem:[#allocation4 + $0x60] sm:$0xff] %vm432_vm4, %v11171_v52  ;;  %488 = vst.msk [vmem:[#allocation4 + $0x68] sm:$0xff] %vm432_vm4, %v11171_v52 }
 0x301   : > { %489 = vst.msk [vmem:[#allocation4 + $0x70] sm:$0xff] %vm432_vm4, %v11171_v52  ;;  %490 = vst.msk [vmem:[#allocation4 + $0x78] sm:$0xff] %vm432_vm4, %v11171_v52  ;;  %v2624_v48 = vld [vmem:[#allocation4 + $0x5] sm:$0xff] }
 0x302   : > { %491 = vst.msk [vmem:[#allocation4 + $0x80] sm:$0xff] %vm432_vm4, %v11171_v52  ;;  %492 = vst.msk [vmem:[#allocation4 + $0x88] sm:$0xff] %vm432_vm4, %v11171_v52  ;;  %v2633_v21 = vmul.f32 %v7495_v24, %v2624_v48  ;;  %v2676_v49 = vld [vmem:[#allocation4 + $0x6] sm:$0xff]  ;;  %v7559_v48 = vstv %s5415_s27  ;;  %s5427_s27 = sld [smem:[#allocation11 + $0x17]] }
 0x303   : > { %493 = vst.msk [vmem:[#allocation4 + $0x90] sm:$0xff] %vm432_vm4, %v11171_v52  ;;  %494 = vst.msk [vmem:[#allocation4 + $0x98] sm:$0xff] %vm432_vm4, %v11171_v52  ;;  %v2685_v25 = vmul.f32 %v7502_v57, %v2676_v49  ;;  %v2728_v20 = vld [vmem:[#allocation4 + $0x7] sm:$0xff] }
 0x304   : > { %495 = vst.msk [vmem:[#allocation4 + $0xa0] sm:$0xff] %vm432_vm4, %v11171_v52  ;;  %496 = vst.msk [vmem:[#allocation4 + $0xa8] sm:$0xff] %vm432_vm4, %v11171_v52  ;;  %v2641_v54 = vadd.f32 %v2633_v21, %v2608_v27  ;;  %v2737_v59 = vmul.f32 %v7508_v17, %v2728_v20  ;;  %v2780_v5 = vld [vmem:[#allocation4 + $0x8] sm:$0xff] }
 0x305   : > { %497 = vst.msk [vmem:[#allocation4 + $0xb0] sm:$0xff] %vm432_vm4, %v11171_v52  ;;  %498 = vst.msk [vmem:[#allocation4 + $0xb8] sm:$0xff] %vm432_vm4, %v11171_v52  ;;  %v2789_v40 = vmul.f32 %v7520_v3, %v2780_v5  ;;  %v2884_v26 = vld [vmem:[#allocation4 + $0xa] sm:$0xff] }
 0x306   : > { %499 = vst.msk [vmem:[#allocation4 + $0xc0] sm:$0xff] %vm432_vm4, %v11171_v52  ;;  %500 = vst.msk [vmem:[#allocation4 + $0xc8] sm:$0xff] %vm432_vm4, %v11171_v52  ;;  %v2668_v43 = vadd.f32 %v2660_v6, %v2641_v54  ;;  %v2893_v21 = vmul.f32 %v7559_v48, %v2884_v26 }
 0x307   : > { %501 = vst.msk [vmem:[#allocation4 + $0xd0] sm:$0xff] %vm432_vm4, %v11171_v52  ;;  %502 = vst.msk [vmem:[#allocation4 + $0xd8] sm:$0xff] %vm432_vm4, %v11171_v52 }
 0x308   : > { %503 = vst.msk [vmem:[#allocation4 + $0xe0] sm:$0xff] %vm432_vm4, %v11171_v52  ;;  %504 = vst.msk [vmem:[#allocation4 + $0xe8] sm:$0xff] %vm432_vm4, %v11171_v52  ;;  %v2693_v14 = vadd.f32 %v2685_v25, %v2668_v43  ;;  %v2936_v43 = vld [vmem:[#allocation4 + $0xb] sm:$0xff]  ;;  %v7576_v25 = vstv %s5417_s9  ;;  %s5429_s9 = sld [smem:[#allocation11 + $0x19]] }
 0x309   : > { %505 = vst.msk [vmem:[#allocation4 + $0xf0] sm:$0xff] %vm432_vm4, %v11171_v52  ;;  %506 = vst.msk [vmem:[#allocation4 + $0xf8] sm:$0xff] %vm432_vm4, %v11171_v52  ;;  %v2945_v47 = vmul.f32 %v7576_v25, %v2936_v43  ;;  %v2781_v43 = vld [vmem:[#allocation4 + $0x20] sm:$0xff] }
 0x30a   : > { %507 = vst.msk [vmem:[#allocation4 + $0x100] sm:$0xff] %vm432_vm4, %v11171_v52  ;;  %508 = vst.msk [vmem:[#allocation4 + $0x108] sm:$0xff] %vm432_vm4, %v11171_v52  ;;  %v2720_v38 = vadd.f32 %v2712_v34, %v2693_v14  ;;  %v7582_v14 = vstv %s5418_s25  ;;  %v2600_v34 = vld [vmem:[#allocation3 + $0x1d] sm:$0xff]  ;;  %s5430_s25 = sld [smem:[#allocation11 + $0x1a]] }
 0x30b   : > { %509 = vst.msk [vmem:[#allocation4 + $0x110] sm:$0xff] %vm432_vm4, %v11171_v52  ;;  %510 = vst.msk [vmem:[#allocation4 + $0x118] sm:$0xff] %vm432_vm4, %v11171_v52 }
 0x30c   : > { %511 = vst.msk [vmem:[#allocation4 + $0x120] sm:$0xff] %vm432_vm4, %v11171_v52  ;;  %512 = vst.msk [vmem:[#allocation4 + $0x128] sm:$0xff] %vm432_vm4, %v11171_v52  ;;  %v2745_v7 = vadd.f32 %v2737_v59, %v2720_v38  ;;  %v7586_v38 = vstv %s5419_s28  ;;  %v2609_v59 = vmul.f32 %v7493_v22, %v2600_v34  ;;  %s5431_s28 = sld [smem:[#allocation11 + $0x1b]] }
 0x30d   : > { %513 = vst.msk [vmem:[#allocation4 + $0x130] sm:$0xff] %vm432_vm4, %v11171_v52  ;;  %514 = vst.msk [vmem:[#allocation4 + $0x138] sm:$0xff] %vm432_vm4, %v11171_v52 }
 0x30e   : > { %515 = vst.msk [vmem:[#allocation4 + $0x140] sm:$0xff] %vm432_vm4, %v11171_v52  ;;  %516 = vst.msk [vmem:[#allocation4 + $0x148] sm:$0xff] %vm432_vm4, %v11171_v52 }
 0x30f   : > { %11172 = vst [vmem:[#allocation35_spill] sm:$0xff] %v7493_v22  ;;  %11173 = vst [vmem:[#allocation34_spill] sm:$0xff] %v7499_v8 }
 0x310   : > { %11179 = vst [vmem:[#allocation41_spill] sm:$0xff] %v7520_v3  ;;  %11182 = vst [vmem:[#allocation44_spill] sm:$0xff] %v7531_v9 }
 0x311   : > { %11187 = vst [vmem:[#allocation49_spill] sm:$0xff] %v7559_v48  ;;  %11191 = vst [vmem:[#allocation53_spill] sm:$0xff] %v7576_v25 }
 0x312   : > { %11192 = vst [vmem:[#allocation54_spill] sm:$0xff] %v7582_v14  ;;  %11193 = vst [vmem:[#allocation55_spill] sm:$0xff] %v7586_v38 }
 0x3b8   : > { %v2421_v18 = vpop.f32.mrf.mxu0 }
 0x3b9   : > { %v2425_v41 = vmax.f32 %v2421_v18, 0.0  ;;  %v2832_v18 = vld [vmem:[#allocation4 + $0x9] sm:$0xff] }
 0x3ba   : > { %v6314_v35 = vpop.f32.mrf.mxu0 }
 0x3bb   : > { %6318 = vmatmul.mubr.msk.f32.vlgmr.msra.gmra.mxu1 %vm2427_vm3, %v2425_v41  ;;  %v7541_v41 = vstv %s5413_s12  ;;  %s5425_s12 = sld [smem:[#allocation11 + $0x15]] }
 0x3bc   : > { %11184 = vst [vmem:[#allocation46_spill] sm:$0xff] %v7541_v41  ;;  %v2841_v52 = vmul.f32 %v7541_v41, %v2832_v18  ;;  %v2704_v18 = vld [vmem:[#allocation3 + $0x1f] sm:$0xff] }
 0x47b   : > { %v2501_v16 = vpop.f32.mrf.mxu1 }
 0x47c   : > { %v2505_v63 = vadd.f32 3.0, %v2501_v16 }
 0x47d   : > { %v6319_v1 = vpop.f32.mrf.mxu1 }
 0x47e   : > { %v2506_v50 = vmax.f32 %v2505_v63, 0.0  ;;  %v7549_v63 = vstv %s5414_s20  ;;  %v2859_v1 = vld [vmem:[#allocation3 + $0xa] sm:$0xff]  ;;  %s5426_s20 = sld [smem:[#allocation11 + $0x16]] }
 0x47f   : > { %11185 = vst [vmem:[#allocation47_spill] sm:$0xff] %v7549_v63 }
 0x480   : > { %v2507_v11 = vmin.f32 %v2506_v50, 6.0 }
 0x482   : > { %v2508_v23 = vmul.f32 %v2507_v11, %v2501_v16  ;;  %v2868_v11 = vmul.f32 %v7549_v63, %v2859_v1  ;;  %v2713_v1 = vmul.f32 %v7505_v30, %v2704_v18 }
 0x484   : > { %v5404_v31 = vmul.f32 -0.16666667, %v2508_v23 }
 0x486   : > { %v2511_v19 = vmul.f32 1.442695, %v5404_v31 }
 0x488   : > { %6399 = vpow2.f32 %v2511_v19 }
 0x495   : > { %v6400_v4 = vpop.eup %6399 }
 0x496   : > { %v2513_v51 = vadd.f32 1.0, %v6400_v4 }
 0x498   : > { %6401 = vrcp.f32 %v2513_v51  ;;  %v7567_v51 = vstv %s5416_s29  ;;  %s5428_s29 = sld [smem:[#allocation11 + $0x18]] }
 0x499   : > { %11189 = vst [vmem:[#allocation51_spill] sm:$0xff] %v7567_v51 }
 0x4a5   : > { %v6402_v37 = vpop.eup %6401 }
 0x4a6   : > { %v2519_v62 = vrot.slane %v6402_v37, %v2518_v36  ;;  %v2973_v36 = vmul.f32 %v7582_v14, %v2600_v34 }
 0x4a8   : > { %v7514_v12 = vmul.f32 %v2519_v62, %v7303_v55  ;;  %v7517_v58 = vmul.f32 %v2519_v62, %v7301_v42  ;;  %v7525_v60 = vmul.f32 %v2519_v62, %v7308_v15  ;;  %v7528_v55 = vmul.f32 %v2519_v62, %v7298_v32 }
 0x4a9   : > { %v2772_v42 = vadd.f32 %v2764_v29, %v2745_v7  ;;  %v7536_v39 = vmul.f32 %v2519_v62, %v7311_v53  ;;  %v7557_v19 = vmul.f32 %v2519_v62, %v7315_v33  ;;  %v7565_v28 = vmul.f32 %v2519_v62, %v7318_v44  ;;  %v2911_v33 = vld [vmem:[#allocation3 + $0xb] sm:$0xff] }
 0x4aa   : > { %11177 = vst [vmem:[#allocation39_spill] sm:$0xff] %v7514_v12  ;;  %11178 = vst [vmem:[#allocation40_spill] sm:$0xff] %v7517_v58  ;;  %2534 = vadd.xlane.f32.xlu1 %v7514_v12  ;;  %2530 = vadd.xlane.f32.xlu0 %v7517_v58  ;;  %v2555_v32 = vsel %vm2554_vm5, %v7517_v58, -inf  ;;  %v2556_v53 = vsel %vm2554_vm5, %v7528_v55, -inf  ;;  %v2557_v16 = vsel %vm2554_vm5, %v7514_v12, -inf  ;;  %v2558_v23 = vsel %vm2554_vm5, %v7525_v60, -inf }
 0x4ab   : > { %11180 = vst [vmem:[#allocation42_spill] sm:$0xff] %v7525_v60  ;;  %11181 = vst [vmem:[#allocation43_spill] sm:$0xff] %v7528_v55  ;;  %v2797_v15 = vadd.f32 %v2789_v40, %v2772_v42  ;;  %v2559_v31 = vsel %vm2554_vm5, %v7536_v39, -inf  ;;  %v2560_v4 = vsel %vm2554_vm5, %v7557_v19, -inf  ;;  %v2920_v6 = vmul.f32 %v7567_v51, %v2911_v33  ;;  %v2677_v42 = vld [vmem:[#allocation4 + $0x1e] sm:$0xff] }
 0x4ac   : > { %11183 = vst [vmem:[#allocation45_spill] sm:$0xff] %v7536_v39  ;;  %11186 = vst [vmem:[#allocation48_spill] sm:$0xff] %v7557_v19  ;;  %v2561_v49 = vsel %vm2554_vm5, %v7565_v28, -inf  ;;  %v7574_v2 = vmul.f32 %v2519_v62, %v7322_v56  ;;  %v2625_v56 = vld [vmem:[#allocation4 + $0x1d] sm:$0xff]  ;;  %v7591_v29 = vstv %s5420_s30  ;;  %s5432_s30 = sld [smem:[#allocation11 + $0x1c]] }
 0x4ad   : > { %v2824_v35 = vadd.f32 %v2816_v0, %v2797_v15  ;;  %11188 = vst [vmem:[#allocation50_spill] sm:$0xff] %v7565_v28  ;;  %v2634_v37 = vmul.f32 %v7495_v24, %v2625_v56  ;;  %v2999_v7 = vmul.f32 %v7586_v38, %v2625_v56  ;;  %11194 = vst [vmem:[#allocation56_spill] sm:$0xff] %v7591_v29  ;;  %v7595_v15 = vstv %s5421_s18  ;;  %s5433_s18 = sld [smem:[#allocation11 + $0x1d]] }
 0x4ae   : > { %2536 = vadd.xlane.f32.xlu1 %v7525_v60  ;;  %2532 = vadd.xlane.f32.xlu0 %v7528_v55  ;;  %11190 = vst [vmem:[#allocation52_spill] sm:$0xff] %v7574_v2  ;;  %v2562_v10 = vsel %vm2554_vm5, %v7574_v2, -inf  ;;  %v3026_v46 = vmul.f32 %v7591_v29, %v2652_v45  ;;  %11195 = vst [vmem:[#allocation57_spill] sm:$0xff] %v7595_v15  ;;  %v2790_v56 = vmul.f32 %v7520_v3, %v2781_v43 }
 0x4af   : > { %v2849_v50 = vadd.f32 %v2841_v52, %v2824_v35  ;;  %v2642_v5 = vadd.f32 %v2634_v37, %v2609_v59  ;;  %v3051_v52 = vmul.f32 %v7595_v15, %v2677_v42  ;;  %v7615_v37 = vstv %s5426_s20  ;;  %s5438_s20 = sld [smem:[#allocation11 + $0x22]] }
 0x4b0   : > { %11200 = vst [vmem:[#allocation62_spill] sm:$0xff] %v7615_v37  ;;  %v7826_v55 = vstv %s7702_s2  ;;  %s11241_s2 = sld [smem:[#allocation81_spill]] }
 0x4b1   : > { %v2876_v27 = vadd.f32 %v2868_v11, %v2849_v50  ;;  %v2669_v0 = vadd.f32 %v2661_v13, %v2642_v5  ;;  %v2729_v50 = vld [vmem:[#allocation4 + $0x1f] sm:$0xff]  ;;  %11230 = vst [vmem:[#allocation92_spill] sm:$0xff] %v7826_v55 }
 0x4b2   : > { %2538 = vadd.xlane.f32.xlu0 %v7536_v39  ;;  %2563 = vmax.xlane.f32.xlu1 %v2555_v32  ;;  %v2686_v32 = vmul.f32 %v7502_v57, %v2677_v42  ;;  %v7619_v42 = vstv %s5427_s27  ;;  %s7661_s27 = sld [smem:[#allocation11 + $0x24]] }
 0x4b3   : > { %v2901_v54 = vadd.f32 %v2893_v21, %v2876_v27  ;;  %v2738_v27 = vmul.f32 %v7508_v17, %v2729_v50  ;;  %v2756_v21 = vld [vmem:[#allocation3 + $0x20] sm:$0xff]  ;;  %11201 = vst [vmem:[#allocation63_spill] sm:$0xff] %v7619_v42 }
 0x4b5   : > { %v2928_v44 = vadd.f32 %v2920_v6, %v2901_v54  ;;  %v7607_v54 = vstv %s5424_s11  ;;  %s5436_s11 = sld [smem:[#allocation11 + $0x20]] }
 0x4b6   : > { %2565 = vmax.xlane.f32.xlu0 %v2556_v53  ;;  %2567 = vmax.xlane.f32.xlu1 %v2557_v16  ;;  %v7599_v53 = vstv %s5422_s21  ;;  %v2694_v16 = vadd.f32 %v2686_v32, %v2669_v0  ;;  %11198 = vst [vmem:[#allocation60_spill] sm:$0xff] %v7607_v54  ;;  %v2860_v0 = vld [vmem:[#allocation3 + $0x22] sm:$0xff]  ;;  %s5434_s21 = sld [smem:[#allocation11 + $0x1e]] }
 0x4b7   : > { %v2953_v20 = vadd.f32 %v2945_v47, %v2928_v44  ;;  %11196 = vst [vmem:[#allocation58_spill] sm:$0xff] %v7599_v53  ;;  %v3130_v47 = vmul.f32 %v7607_v54, %v2756_v21 }
 0x4b8   : > { %v2721_v26 = vadd.f32 %v2713_v1, %v2694_v16  ;;  %v2869_v16 = vmul.f32 %v7549_v63, %v2860_v0  ;;  %v2885_v1 = vld [vmem:[#allocation4 + $0x22] sm:$0xff] }
 0x4b9   : > { %v2981_v62 = vadd.f32 %v2973_v36, %v2953_v20  ;;  %v2808_v20 = vld [vmem:[#allocation3 + $0x21] sm:$0xff] }
 0x4ba   : > { %2569 = vmax.xlane.f32.xlu0 %v2558_v23  ;;  %2571 = vmax.xlane.f32.xlu1 %v2559_v31  ;;  %v3078_v23 = vmul.f32 %v7599_v53, %v2704_v18  ;;  %v7603_v31 = vstv %s5423_s26  ;;  %v2746_v6 = vadd.f32 %v2738_v27, %v2721_v26  ;;  %v3182_v13 = vmul.f32 %v7615_v37, %v2808_v20  ;;  %s5435_s26 = sld [smem:[#allocation11 + $0x1f]] }
 0x4bb   : > { %v3007_v40 = vadd.f32 %v2999_v7, %v2981_v62  ;;  %11197 = vst [vmem:[#allocation59_spill] sm:$0xff] %v7603_v31  ;;  %v3103_v33 = vmul.f32 %v7603_v31, %v2729_v50  ;;  %v2817_v62 = vmul.f32 %v7531_v9, %v2808_v20  ;;  %v2833_v7 = vld [vmem:[#allocation4 + $0x21] sm:$0xff]  ;;  %v2894_v27 = vmul.f32 %v7559_v48, %v2885_v1 }
 0x4bc   : > { %v3207_v18 = vmul.f32 %v7619_v42, %v2833_v7 }
 0x4bd   : > { %v3034_v35 = vadd.f32 %v3026_v46, %v3007_v40  ;;  %v2842_v46 = vmul.f32 %v7541_v41, %v2833_v7  ;;  %v7639_v7 = vstv %s5432_s30  ;;  %s7674_s30 = sld [smem:[#allocation11 + $0x2c]] }
 0x4be   : > { %2540 = vadd.xlane.f32.xlu0 %v7557_v19  ;;  %2573 = vmax.xlane.f32.xlu1 %v2560_v4  ;;  %11206 = vst [vmem:[#allocation68_spill] sm:$0xff] %v7639_v7 }
 0x4bf   : > { %v3059_v11 = vadd.f32 %v3051_v52, %v3034_v35  ;;  %v7623_v35 = vstv %s5428_s29  ;;  %s7663_s29 = sld [smem:[#allocation11 + $0x26]] }
 0x4c0   : > { %11202 = vst [vmem:[#allocation64_spill] sm:$0xff] %v7623_v35 }
 0x4c1   : > { %v3086_v4 = vadd.f32 %v3078_v23, %v3059_v11  ;;  %v3234_v11 = vmul.f32 %v7623_v35, %v2860_v0  ;;  %v7627_v23 = vstv %s5429_s9  ;;  %s7665_s9 = sld [smem:[#allocation11 + $0x28]] }
 0x4c2   : > { %2542 = vadd.xlane.f32.xlu0 %v7565_v28  ;;  %2575 = vmax.xlane.f32.xlu1 %v2561_v49  ;;  %v2765_v49 = vmul.f32 %v7511_v61, %v2756_v21  ;;  %11203 = vst [vmem:[#allocation65_spill] sm:$0xff] %v7627_v23  ;;  %v2912_v21 = vld [vmem:[#allocation3 + $0x23] sm:$0xff] }
 0x4c3   : > { %v3111_v44 = vadd.f32 %v3103_v33, %v3086_v4  ;;  %v3259_v33 = vmul.f32 %v7627_v23, %v2885_v1 }
 0x4c4   : > { %v2773_v34 = vadd.f32 %v2765_v49, %v2746_v6  ;;  %v7631_v6 = vstv %s5430_s25  ;;  %s7669_s25 = sld [smem:[#allocation11 + $0x2a]] }
 0x4c5   : > { %v3138_v36 = vadd.f32 %v3130_v47, %v3111_v44  ;;  %11204 = vst [vmem:[#allocation66_spill] sm:$0xff] %v7631_v6  ;;  %v2937_v44 = vld [vmem:[#allocation4 + $0x23] sm:$0xff] }
 0x4c6   : > { %2544 = vadd.xlane.f32.xlu0 %v7574_v2  ;;  %2577 = vmax.xlane.f32.xlu1 %v2562_v10  ;;  %v7611_v10 = vstv %s5425_s12  ;;  %v2798_v45 = vadd.f32 %v2790_v56, %v2773_v34  ;;  %v3286_v34 = vmul.f32 %v7631_v6, %v2912_v21  ;;  %v7635_v56 = vstv %s5431_s28  ;;  %s5437_s12 = sld [smem:[#allocation11 + $0x21]] }
 0x4c7   : > { %11199 = vst [vmem:[#allocation61_spill] sm:$0xff] %v7611_v10  ;;  %v3155_v59 = vmul.f32 %v7611_v10, %v2781_v43  ;;  %v2921_v43 = vmul.f32 %v7567_v51, %v2912_v21  ;;  %11205 = vst [vmem:[#allocation67_spill] sm:$0xff] %v7635_v56  ;;  %s5439_s28 = sld [smem:[#allocation11 + $0x23]] }
 0x4c8   : > { %v2825_v40 = vadd.f32 %v2817_v62, %v2798_v45  ;;  %v3311_v62 = vmul.f32 %v7635_v56, %v2937_v44 }
 0x4c9   : > { %v3163_v5 = vadd.f32 %v3155_v59, %v3138_v36  ;;  %v2946_v36 = vmul.f32 %v7576_v25, %v2937_v44  ;;  %v2601_v59 = vld [vmem:[#allocation3 + $0x35] sm:$0xff] }
 0x4ca   : > { %v2850_v52 = vadd.f32 %v2842_v46, %v2825_v40  ;;  %v2626_v40 = vld [vmem:[#allocation4 + $0x35] sm:$0xff]  ;;  %v3339_v0 = vmul.f32 %v7639_v7, %v2601_v59  ;;  %v7791_v39 = vstv %s7669_s25  ;;  %s7809_s25 = sld [smem:[#allocation11 + $0x5a]] }
 0x4cb   : > { %v3190_v32 = vadd.f32 %v3182_v13, %v3163_v5  ;;  %v2974_v13 = vmul.f32 %v7582_v14, %v2601_v59  ;;  %v3000_v1 = vmul.f32 %v7586_v38, %v2626_v40  ;;  %11223 = vst [vmem:[#allocation85_spill] sm:$0xff] %v7791_v39 }
 0x4cc   : > { %v2877_v26 = vadd.f32 %v2869_v16, %v2850_v52  ;;  %v2635_v52 = vmul.f32 %v7495_v24, %v2626_v40 }
 0x4cd   : > { %v3215_v50 = vadd.f32 %v3207_v18, %v3190_v32  ;;  %v7643_v32 = vstv %s5433_s18  ;;  %v2610_v18 = vmul.f32 %v7493_v22, %v2601_v59  ;;  %s7676_s18 = sld [smem:[#allocation11 + $0x2e]] }
 0x4ce   : > { %v2902_v49 = vadd.f32 %v2894_v27, %v2877_v26  ;;  %11207 = vst [vmem:[#allocation69_spill] sm:$0xff] %v7643_v32  ;;  %v3365_v26 = vmul.f32 %v7643_v32, %v2626_v40  ;;  %v7649_v27 = vstv %s5434_s21  ;;  %v7659_v40 = vstv %s5436_s11  ;;  %s7680_s21 = sld [smem:[#allocation11 + $0x30]] }
 0x4cf   : > { %v3242_v4 = vadd.f32 %v3234_v11, %v3215_v50  ;;  %v2653_v50 = vld [vmem:[#allocation3 + $0x36] sm:$0xff]  ;;  %11208 = vst [vmem:[#allocation70_spill] sm:$0xff] %v7649_v27  ;;  %v2643_v21 = vadd.f32 %v2635_v52, %v2610_v18  ;;  %11210 = vst [vmem:[#allocation72_spill] sm:$0xff] %v7659_v40  ;;  %s7687_s11 = sld [smem:[#allocation11 + $0x34]] }
 0x4d0   : > { %v2929_v20 = vadd.f32 %v2921_v43, %v2902_v49  ;;  %v3027_v49 = vmul.f32 %v7591_v29, %v2653_v50  ;;  %v2678_v43 = vld [vmem:[#allocation4 + $0x36] sm:$0xff] }
 0x4d1   : > { %v3267_v47 = vadd.f32 %v3259_v33, %v3242_v4  ;;  %v2662_v4 = vmul.f32 %v7499_v8, %v2653_v50 }
 0x4d2   : > { %v2954_v5 = vadd.f32 %v2946_v36, %v2929_v20  ;;  %v2687_v36 = vmul.f32 %v7502_v57, %v2678_v43 }
 0x4d3   : > { %v3294_v45 = vadd.f32 %v3286_v34, %v3267_v47  ;;  %v3392_v47 = vmul.f32 %v7649_v27, %v2653_v50  ;;  %v7654_v34 = vstv %s5435_s26  ;;  %v2670_v20 = vadd.f32 %v2662_v4, %v2643_v21  ;;  %s7685_s26 = sld [smem:[#allocation11 + $0x32]] }
 0x4d4   : > { %v2982_v16 = vadd.f32 %v2974_v13, %v2954_v5  ;;  %11209 = vst [vmem:[#allocation71_spill] sm:$0xff] %v7654_v34  ;;  %v3417_v13 = vmul.f32 %v7654_v34, %v2678_v43 }
 0x4d5   : > { %v3319_v46 = vadd.f32 %v3311_v62, %v3294_v45  ;;  %v3052_v45 = vmul.f32 %v7595_v15, %v2678_v43  ;;  %v2705_v62 = vld [vmem:[#allocation3 + $0x37] sm:$0xff] }
 0x4d6   : > { %v3008_v33 = vadd.f32 %v3000_v1, %v2982_v16  ;;  %v3079_v52 = vmul.f32 %v7599_v53, %v2705_v62  ;;  %v2730_v16 = vld [vmem:[#allocation4 + $0x37] sm:$0xff]  ;;  %v3444_v50 = vmul.f32 %v7659_v40, %v2705_v62 }
 0x4d7   : > { %v3347_v11 = vadd.f32 %v3339_v0, %v3319_v46  ;;  %v2695_v46 = vadd.f32 %v2687_v36, %v2670_v20  ;;  %v2714_v0 = vmul.f32 %v7505_v30, %v2705_v62  ;;  %v2739_v21 = vmul.f32 %v7508_v17, %v2730_v16  ;;  %v2782_v62 = vld [vmem:[#allocation4 + $0x38] sm:$0xff] }
 0x4d8   : > { %v3035_v59 = vadd.f32 %v3027_v49, %v3008_v33  ;;  %v3104_v33 = vmul.f32 %v7603_v31, %v2730_v16  ;;  %v2757_v49 = vld [vmem:[#allocation3 + $0x38] sm:$0xff] }
 0x4d9   : > { %v3373_v44 = vadd.f32 %v3365_v26, %v3347_v11  ;;  %v7672_v11 = vstv %s5437_s12  ;;  %v2722_v26 = vadd.f32 %v2714_v0, %v2695_v46  ;;  %s7689_s12 = sld [smem:[#allocation11 + $0x36]]  ;;  %v2766_v36 = vmul.f32 %v7511_v61, %v2757_v49 }
 0x4da   : > { %v3060_v18 = vadd.f32 %v3052_v45, %v3035_v59  ;;  %11211 = vst [vmem:[#allocation73_spill] sm:$0xff] %v7672_v11  ;;  %v3131_v45 = vmul.f32 %v7607_v54, %v2757_v49  ;;  %v7694_v46 = vstv %s5439_s28  ;;  %s7710_s28 = sld [smem:[#allocation11 + $0x2f]] }
 0x4db   : > { %v3400_v5 = vadd.f32 %v3392_v47, %v3373_v44  ;;  %v3469_v44 = vmul.f32 %v7672_v11, %v2730_v16  ;;  %v7683_v47 = vstv %s5438_s20  ;;  %v2747_v20 = vadd.f32 %v2739_v21, %v2722_v26  ;;  %11213 = vst [vmem:[#allocation75_spill] sm:$0xff] %v7694_v46  ;;  %s7696_s20 = sld [smem:[#allocation11 + $0x27]] }
 0x4dc   : > { %v3087_v4 = vadd.f32 %v3079_v52, %v3060_v18  ;;  %11212 = vst [vmem:[#allocation74_spill] sm:$0xff] %v7683_v47  ;;  %v2791_v18 = vmul.f32 %v7520_v3, %v2782_v62  ;;  %v3156_v16 = vmul.f32 %v7611_v10, %v2782_v62  ;;  %v3521_v26 = vmul.f32 %v7694_v46, %v2782_v62  ;;  %v4642_v46 = vld [vmem:[#allocation3 + $0x129] sm:$0xff] }
 0x4dd   : > { %v3425_v1 = vadd.f32 %v3417_v13, %v3400_v5  ;;  %v3496_v13 = vmul.f32 %v7683_v47, %v2757_v49  ;;  %v2774_v0 = vadd.f32 %v2766_v36, %v2747_v20  ;;  %v7708_v21 = vstv %s7661_s27  ;;  %s7723_s27 = sld [smem:[#allocation11 + $0x37]] }
 0x4de   : > { %v3112_v59 = vadd.f32 %v3104_v33, %v3087_v4  ;;  %11214 = vst [vmem:[#allocation76_spill] sm:$0xff] %v7708_v21  ;;  %v7884_v11 = vstv %s7760_s10  ;;  %s10069_s10 = sld [smem:[#allocation11 + $0x47]] }
 0x4df   : > { %v3452_v43 = vadd.f32 %v3444_v50, %v3425_v1  ;;  %v2809_v1 = vld [vmem:[#allocation3 + $0x39] sm:$0xff]  ;;  %v2799_v4 = vadd.f32 %v2791_v18, %v2774_v0  ;;  %11249 = vst [vmem:[#allocation109_spill] sm:$0xff] %v7884_v11 }
 0x4e0   : > { %v3139_v52 = vadd.f32 %v3131_v45, %v3112_v59  ;;  %v2818_v33 = vmul.f32 %v7531_v9, %v2809_v1  ;;  %v3548_v36 = vmul.f32 %v7708_v21, %v2809_v1  ;;  %v7721_v59 = vstv %s5441_s0  ;;  %v2861_v0 = vld [vmem:[#allocation3 + $0x3a] sm:$0xff]  ;;  %s7737_s0 = sld [smem:[#allocation11 + $0x3b]] }
 0x4e1   : > { %v3477_v5 = vadd.f32 %v3469_v44, %v3452_v43  ;;  %v3183_v43 = vmul.f32 %v7615_v37, %v2809_v1  ;;  %v2834_v44 = vld [vmem:[#allocation4 + $0x39] sm:$0xff]  ;;  %11215 = vst [vmem:[#allocation77_spill] sm:$0xff] %v7721_v59 }
 0x4e2   : > { %v3164_v49 = vadd.f32 %v3156_v16, %v3139_v52  ;;  %v2826_v45 = vadd.f32 %v2818_v33, %v2799_v4  ;;  %v2843_v62 = vmul.f32 %v7541_v41, %v2834_v44  ;;  %v3573_v52 = vmul.f32 %v7721_v59, %v2834_v44  ;;  %v2886_v33 = vld [vmem:[#allocation4 + $0x3a] sm:$0xff] }
 0x4e3   : > { %v3504_v50 = vadd.f32 %v3496_v13, %v3477_v5  ;;  %v3208_v13 = vmul.f32 %v7619_v42, %v2834_v44  ;;  %v7735_v16 = vstv %s7663_s29  ;;  %v3235_v4 = vmul.f32 %v7623_v35, %v2861_v0  ;;  %s7751_s29 = sld [smem:[#allocation11 + $0x40]] }
 0x4e4   : > { %v3191_v5 = vadd.f32 %v3183_v43, %v3164_v49  ;;  %11216 = vst [vmem:[#allocation78_spill] sm:$0xff] %v7735_v16  ;;  %v2851_v1 = vadd.f32 %v2843_v62, %v2826_v45  ;;  %v3600_v43 = vmul.f32 %v7735_v16, %v2861_v0  ;;  %v7749_v44 = vstv %s7696_s20  ;;  %s7765_s20 = sld [smem:[#allocation11 + $0x48]] }
 0x4e5   : > { %v3529_v20 = vadd.f32 %v3521_v26, %v3504_v50  ;;  %v2870_v50 = vmul.f32 %v7549_v63, %v2861_v0  ;;  %11217 = vst [vmem:[#allocation79_spill] sm:$0xff] %v7749_v44  ;;  %v3260_v62 = vmul.f32 %v7627_v23, %v2886_v33  ;;  %v3625_v0 = vmul.f32 %v7749_v44, %v2886_v33  ;;  %v4694_v23 = vld [vmem:[#allocation3 + $0x12a] sm:$0xff] }
 0x4e6   : > { %v3216_v26 = vadd.f32 %v3208_v13, %v3191_v5  ;;  %v2913_v5 = vld [vmem:[#allocation3 + $0x3b] sm:$0xff] }
 0x4e7   : > { %v3556_v18 = vadd.f32 %v3548_v36, %v3529_v20  ;;  %v2878_v20 = vadd.f32 %v2870_v50, %v2851_v1  ;;  %v2895_v36 = vmul.f32 %v7559_v48, %v2886_v33  ;;  %v2922_v1 = vmul.f32 %v7567_v51, %v2913_v5 }
 0x4e8   : > { %v3243_v45 = vadd.f32 %v3235_v4, %v3216_v26  ;;  %v3287_v26 = vmul.f32 %v7631_v6, %v2913_v5  ;;  %v2938_v4 = vld [vmem:[#allocation4 + $0x3b] sm:$0xff] }
 0x4e9   : > { %v3581_v49 = vadd.f32 %v3573_v52, %v3556_v18  ;;  %v7763_v18 = vstv %s7665_s9  ;;  %v2903_v52 = vadd.f32 %v2895_v36, %v2878_v20  ;;  %s7779_s9 = sld [smem:[#allocation11 + $0x50]]  ;;  %v7875_v59 = vstv %s7751_s29 }
 0x4ea   : > { %11218 = vst [vmem:[#allocation80_spill] sm:$0xff] %v7763_v18  ;;  %v3268_v50 = vadd.f32 %v3260_v62, %v3243_v45  ;;  %v3652_v33 = vmul.f32 %v7763_v18, %v2913_v5  ;;  %v2947_v62 = vmul.f32 %v7576_v25, %v2938_v4  ;;  %v3312_v5 = vmul.f32 %v7635_v56, %v2938_v4 }
 0x4eb   : > { %v3608_v13 = vadd.f32 %v3600_v43, %v3581_v49  ;;  %v7777_v43 = vstv %s7698_s1  ;;  %v2930_v45 = vadd.f32 %v2922_v1, %v2903_v52  ;;  %s7788_s1 = sld [smem:[#allocation11 + $0x56]]  ;;  %v7797_v52 = vstv %s7674_s30  ;;  %11246 = vst [vmem:[#allocation106_spill] sm:$0xff] %v7875_v59 }
 0x4ec   : > { %11221 = vst [vmem:[#allocation83_spill] sm:$0xff] %v7777_v43  ;;  %v3677_v19 = vmul.f32 %v7777_v43, %v2938_v4  ;;  %11224 = vst [vmem:[#allocation86_spill] sm:$0xff] %v7797_v52  ;;  %v7800_v1 = vstv %s7676_s18  ;;  %v7812_v4 = vstv %s7687_s11  ;;  %s7821_s30 = sld [smem:[#allocation11 + $0x5c]]  ;;  %v4486_v43 = vld [vmem:[#allocation3 + $0x126] sm:$0xff]  ;;  %v7881_v56 = vstv %s7757_s16 }
 0x4ed   : > { %v3633_v49 = vadd.f32 %v3625_v0, %v3608_v13  ;;  %v3295_v13 = vadd.f32 %v3287_v26, %v3268_v50  ;;  %11225 = vst [vmem:[#allocation87_spill] sm:$0xff] %v7800_v1  ;;  %v7803_v50 = vstv %s7680_s21  ;;  %v7806_v26 = vstv %s7685_s26  ;;  %11228 = vst [vmem:[#allocation90_spill] sm:$0xff] %v7812_v4  ;;  %s7828_s18 = sld [smem:[#allocation11 + $0x5e]] }
 0x4ee   : > { %11226 = vst [vmem:[#allocation88_spill] sm:$0xff] %v7803_v50  ;;  %11227 = vst [vmem:[#allocation89_spill] sm:$0xff] %v7806_v26  ;;  %s7842_s21 = sld [smem:[#allocation11 + $0x60]]  ;;  %v7900_v59 = vstv %s7771_s17 }
 0x4ef   : > { %v3660_v28 = vadd.f32 %v3652_v33, %v3633_v49  ;;  %v7815_v49 = vstv %s7689_s12  ;;  %11248 = vst [vmem:[#allocation108_spill] sm:$0xff] %v7881_v56  ;;  %11255 = vst [vmem:[#allocation114_spill] sm:$0xff] %v7900_v59  ;;  %s10203_s16 = sld [smem:[#allocation11 + $0x4f]] }
 0x4f0   : > { %11229 = vst [vmem:[#allocation91_spill] sm:$0xff] %v7815_v49  ;;  %s10233_s17 = sld [smem:[#allocation11 + $0x51]] }
 0x4f1   : > { %v7823_v12 = vadd.f32 %v3677_v19, %v3660_v28  ;;  %v7847_v19 = vstv %s7719_s6  ;;  %v7850_v28 = vstv %s7723_s27  ;;  %s9938_s6 = sld [smem:[#allocation11 + $0x41]] }
 0x4f2   : > { %11235 = vst [vmem:[#allocation97_spill] sm:$0xff] %v7847_v19  ;;  %11236 = vst [vmem:[#allocation98_spill] sm:$0xff] %v7850_v28  ;;  %v4538_v28 = vld [vmem:[#allocation3 + $0x127] sm:$0xff]  ;;  %s10334_s26 = sld [smem:[#allocation11 + $0x5b]] }
 0x4f3   : > { %s10342_s11 = sld [smem:[#allocation11 + $0x5d]] }
 0x4f4   : > { %v7941_v48 = vstv %s7842_s21  ;;  %s10357_s12 = sld [smem:[#allocation11 + $0x5f]] }
 0x4f5   : > { %11268 = vst [vmem:[#allocation127_spill] sm:$0xff] %v7941_v48  ;;  %s12159_s27 = sld [smem:[#allocation18_spill]] }
 0x533   : > { %v2535_v20 = vpop.xlane.xlu1 %2534  ;;  %v2531_v36 = vpop.xlane.xlu0 %2530 }
 0x534   : > { %v2548_v0 = vmul.f32 0.03125, %v2535_v20  ;;  %v2546_v2 = vmul.f32 0.03125, %v2531_v36  ;;  %v7817_v36 = vadd.f32 %v2947_v62, %v2930_v45  ;;  %v7831_v45 = vstv %s7705_s3  ;;  %s11244_s3 = sld [smem:[#allocation82_spill]] }
 0x535   : > { %11231 = vst [vmem:[#allocation93_spill] sm:$0xff] %v7831_v45  ;;  %v7834_v62 = vstv %s7710_s28  ;;  %s10369_s28 = sld [smem:[#allocation11 + $0x61]] }
 0x536   : > { %2582 = vst.msk [vmem:[#allocation3 + $0x80] sm:$0xff] %vm432_vm4, %v2548_v0  ;;  %2580 = vst.msk [vmem:[#allocation3 + $0x50] sm:$0xff] %vm432_vm4, %v2546_v2  ;;  %v7819_v0 = vadd.f32 %v3312_v5, %v3295_v13  ;;  %v7837_v13 = vstv %s7712_s4  ;;  %v7840_v5 = vstv %s7716_s5  ;;  %s11251_s4 = sld [smem:[#allocation84_spill]] }
 0x537   : > { %v2537_v33 = vpop.xlane.xlu1 %2536  ;;  %v2533_v20 = vpop.xlane.xlu0 %2532  ;;  %11232 = vst [vmem:[#allocation94_spill] sm:$0xff] %v7834_v62  ;;  %11233 = vst [vmem:[#allocation95_spill] sm:$0xff] %v7837_v13  ;;  %v7862_v13 = vstv %s7737_s0  ;;  %v7871_v62 = vstv %s7746_s24  ;;  %s9885_s5 = sld [smem:[#allocation11 + $0x3f]]  ;;  %s394_s0 = sand.u32 1, %s12159_s27  }
 0x538   : > { %v2549_v2 = vmul.f32 0.03125, %v2537_v33  ;;  %v2547_v60 = vmul.f32 0.03125, %v2533_v20  ;;  %11234 = vst [vmem:[#allocation96_spill] sm:$0xff] %v7840_v5  ;;  %v7853_v33 = vstv %s7725_s7  ;;  %v7856_v20 = vstv %s7729_s8  ;;  %11240 = vst [vmem:[#allocation102_spill] sm:$0xff] %v7862_v13  ;;  %v4590_v13 = vld [vmem:[#allocation3 + $0x128] sm:$0xff]  ;;  %s9990_s7 = sld [smem:[#allocation11 + $0x43]] }
 0x539   : > { %11237 = vst [vmem:[#allocation99_spill] sm:$0xff] %v7853_v33  ;;  %11238 = vst [vmem:[#allocation100_spill] sm:$0xff] %v7856_v20  ;;  %v7859_v5 = vstv %s7732_s22  ;;  %s10015_s8 = sld [smem:[#allocation11 + $0x45]]  ;;  %s5395_s29 = sshll.u32 %s394_s0, 6 }
 0x53a   : > { %2583 = vst.msk [vmem:[#allocation3 + $0x98] sm:$0xff] %vm432_vm4, %v2549_v2  ;;  %2581 = vst.msk [vmem:[#allocation3 + $0x68] sm:$0xff] %vm432_vm4, %v2547_v60  ;;  %v7865_v60 = vstv %s7739_s15  ;;  %v7868_v2 = vstv %s7743_s19  ;;  %v7903_v56 = vstv %s11244_s3  ;;  %s10173_s15 = sld [smem:[#allocation11 + $0x4d]] }
 0x53b   : > { %v2539_v58 = vpop.xlane.xlu0 %2538  ;;  %11239 = vst [vmem:[#allocation101_spill] sm:$0xff] %v7859_v5  ;;  %11242 = vst [vmem:[#allocation103_spill] sm:$0xff] %v7865_v60  ;;  %v2564_v19 = vpop.xlane.xlu1 %2563  ;;  %v7878_v5 = vstv %s7753_s13  ;;  %s10101_s13 = sld [smem:[#allocation11 + $0x49]] }
 0x53c   : > { %11243 = vst [vmem:[#allocation104_spill] sm:$0xff] %v7868_v2  ;;  %v2550_v44 = vmul.f32 0.03125, %v2539_v58  ;;  %11245 = vst [vmem:[#allocation105_spill] sm:$0xff] %v7871_v62  ;;  %v7887_v2 = vstv %s7765_s20  ;;  %v7890_v58 = vstv %s11241_s2  ;;  %s10259_s19 = sld [smem:[#allocation11 + $0x53]]  ;;  %s10750_s20 = scalar_lea.vmem [#allocation12], %s5395_s29 }
 0x53d   : > { %2589 = vst.msk [vmem:[#allocation4 + $0x50] sm:$0xff] %vm432_vm4, %v2564_v19  ;;  %11247 = vst [vmem:[#allocation107_spill] sm:$0xff] %v7878_v5  ;;  %v7894_v19 = vmul.f32 %v7887_v2, %v4486_v43  ;;  %v7897_v5 = vmul.f32 %v7890_v58, %v4538_v28  ;;  %v2602_v11 = vld [vmem:[#allocation3 + $0x4d] sm:$0xff]  ;;  %v7909_v43 = vmul.f32 %v7903_v56, %v4642_v46  ;;  %v7912_v28 = vstv %s7779_s9  ;;  %v8015_v3 = vld [vmem:[#allocation3 + $0x80] sm:$0xff]  ;;  %s10295_s22 = sld [smem:[#allocation11 + $0x55]] }
 0x53e   : > { %11250 = vst [vmem:[#allocation110_spill] sm:$0xff] %v7887_v2  ;;  %11252 = vst [vmem:[#allocation111_spill] sm:$0xff] %v7890_v58  ;;  %v2654_v42 = vld [vmem:[#allocation3 + $0x4e] sm:$0xff]  ;;  %v7920_v25 = vmul.f32 %v7912_v28, %v4694_v23  ;;  %v7929_v46 = vstv %s7793_s23  ;;  %v8033_v62 = vld [vmem:[#allocation3 + $0x81] sm:$0xff]  ;;  %s10313_s23 = sld [smem:[#allocation11 + $0x57]] }
 0x53f   : > { %2584 = vst.msk [vmem:[#allocation3 + $0xb0] sm:$0xff] %vm432_vm4, %v2550_v44  ;;  %11253 = vst [vmem:[#allocation112_spill] sm:$0xff] %v7894_v19  ;;  %v2706_v10 = vld [vmem:[#allocation3 + $0x4f] sm:$0xff]  ;;  %v2566_v45 = vpop.xlane.xlu0 %2565  ;;  %v2568_v31 = vpop.xlane.xlu1 %2567  ;;  %v7906_v44 = vmul.f32 %v7900_v59, %v4590_v13  ;;  %v7923_v13 = vstv %s7785_s14  ;;  %v7938_v59 = vstv %s7828_s18  ;;  %v7947_v23 = vmul.f32 %v7499_v8, %v2654_v42  ;;  %s10141_s14 = sld [smem:[#allocation11 + $0x4b]] }
 0x540   : > { %11254 = vst [vmem:[#allocation113_spill] sm:$0xff] %v7897_v5  ;;  %11256 = vst [vmem:[#allocation115_spill] sm:$0xff] %v7903_v56  ;;  %v7915_v5 = vstv %s11251_s4  ;;  %v2758_v19 = vld [vmem:[#allocation3 + $0x50] sm:$0xff]  ;;  %v7932_v56 = vstv %s7809_s25  ;;  %s10321_s24 = sld [smem:[#allocation11 + $0x59]]  ;;  %s10793_s4 = scalar_lea.sflag [#allocation7], %s394_s0 }
 0x541   : > { %11257 = vst [vmem:[#allocation116_spill] sm:$0xff] %v7906_v44  ;;  %11258 = vst [vmem:[#allocation117_spill] sm:$0xff] %v7909_v43  ;;  %v2810_v58 = vld [vmem:[#allocation3 + $0x51] sm:$0xff]  ;;  %v7926_v44 = vstv %s7788_s1  ;;  %v7974_v34 = vmul.f32 %v7607_v54, %v2758_v19  ;;  %v8011_v41 = vld [vmem:[#allocation3 + $0x65] sm:$0xff]  ;;  %s12170_s9 = sld [smem:[#allocation21_spill]] }
 0x542   : > { %11259 = vst [vmem:[#allocation118_spill] sm:$0xff] %v7912_v28  ;;  %11260 = vst [vmem:[#allocation119_spill] sm:$0xff] %v7915_v5  ;;  %v2862_v2 = vld [vmem:[#allocation3 + $0x52] sm:$0xff]  ;;  %v7935_v5 = vstv %s7821_s30  ;;  %v7971_v28 = vmul.f32 %v7599_v53, %v2706_v10  ;;  %v8029_v55 = vld [vmem:[#allocation3 + $0x67] sm:$0xff]  ;;  %s5289_s30 = sshll.u32 %s10750_s20, 4  ;;  %s12178_s2 = sld [smem:[#allocation370_spill]]  ;;  %s10787_s30 = int_to_ptr.vmem [resolvable:$true] %s5289_s30 }
 0x543   : > { %2590 = vst.msk [vmem:[#allocation4 + $0x68] sm:$0xff] %vm432_vm4, %v2566_v45  ;;  %2591 = vst.msk [vmem:[#allocation4 + $0x80] sm:$0xff] %vm432_vm4, %v2568_v31  ;;  %v2914_v43 = vld [vmem:[#allocation3 + $0x53] sm:$0xff]  ;;  %v7944_v31 = vmul.f32 %v7493_v22, %v2602_v11  ;;  %v7950_v45 = vmul.f32 %v7505_v30, %v2706_v10  ;;  %v7962_v48 = vmul.f32 %v7549_v63, %v2862_v2 }
 0x544   : > { %11261 = vst [vmem:[#allocation120_spill] sm:$0xff] %v7920_v25  ;;  %11262 = vst [vmem:[#allocation121_spill] sm:$0xff] %v7923_v13  ;;  %v7953_v25 = vmul.f32 %v7582_v14, %v2602_v11  ;;  %v7968_v13 = vmul.f32 %v7567_v51, %v2914_v43  ;;  %v8018_v17 = vmul.f32 %v7763_v18, %v2914_v43 }
 0x545   : > { %11263 = vst [vmem:[#allocation122_spill] sm:$0xff] %v7926_v44  ;;  %11264 = vst [vmem:[#allocation123_spill] sm:$0xff] %v7929_v46  ;;  %v2570_v46 = vpop.xlane.xlu0 %2569  ;;  %v2572_v44 = vpop.xlane.xlu1 %2571 }
 0x546   : > { %11265 = vst [vmem:[#allocation124_spill] sm:$0xff] %v7932_v56  ;;  %11266 = vst [vmem:[#allocation125_spill] sm:$0xff] %v7935_v5  ;;  %v7956_v56 = vmul.f32 %v7511_v61, %v2758_v19  ;;  %v7959_v5 = vmul.f32 %v7531_v9, %v2810_v58 }
 0x547   : > { %11267 = vst [vmem:[#allocation126_spill] sm:$0xff] %v7938_v59  ;;  %11269 = vst [vmem:[#allocation128_spill] sm:$0xff] %v7950_v45  ;;  %v7965_v59 = vmul.f32 %v7591_v29, %v2654_v42  ;;  %v7995_v45 = vld [vmem:[#allocation3 + $0x7e] sm:$0xff]  ;;  %s5516_s25 = sshll.u32 %s12170_s9, 10 }
 0x548   : > { %11270 = vst [vmem:[#allocation129_spill] sm:$0xff] %v7956_v56  ;;  %11271 = vst [vmem:[#allocation130_spill] sm:$0xff] %v7959_v5  ;;  %v7977_v56 = vmul.f32 %v7615_v37, %v2810_v58  ;;  %v7985_v5 = vmul.f32 %v7631_v6, %v2914_v43  ;;  %s10785_s3 = scalar_lea.hbm %s12178_s2, %s5516_s25 }
 0x549   : > { %11272 = vst [vmem:[#allocation131_spill] sm:$0xff] %v7962_v48  ;;  %11273 = vst [vmem:[#allocation132_spill] sm:$0xff] %v7965_v59  ;;  %v7982_v48 = vmul.f32 %v7623_v35, %v2862_v2  ;;  %v2574_v15 = vpop.xlane.xlu1 %2573  ;;  %v8036_v59 = vmul.f32 %v7803_v50, %v2758_v19 }
 0x54a   : > { %11274 = vst [vmem:[#allocation133_spill] sm:$0xff] %v7968_v13  ;;  %11275 = vst [vmem:[#allocation134_spill] sm:$0xff] %v7971_v28  ;;  %v7988_v13 = vmul.f32 %v7639_v7, %v2602_v11  ;;  %v7991_v28 = vmul.f32 %v7649_v27, %v2654_v42 }
 0x54b   : > { %11276 = vst [vmem:[#allocation135_spill] sm:$0xff] %v7974_v34  ;;  %11277 = vst [vmem:[#allocation136_spill] sm:$0xff] %v7977_v56  ;;  %v7993_v34 = vld [vmem:[#allocation3 + $0x7d] sm:$0xff] }
 0x54c   : > { %2592 = vst.msk [vmem:[#allocation4 + $0x98] sm:$0xff] %vm432_vm4, %v2570_v46  ;;  %2593 = vst.msk [vmem:[#allocation4 + $0xb0] sm:$0xff] %vm432_vm4, %v2572_v44  ;;  %v7997_v56 = vld [vmem:[#allocation3 + $0x7f] sm:$0xff]  ;;  %v8000_v44 = vmul.f32 %v7659_v40, %v2706_v10  ;;  %v8003_v46 = vmul.f32 %v7683_v47, %v2758_v19  ;;  %v8056_v19 = vmul.f32 %v7493_v22, %v8011_v41 }
 0x54d   : > { %11278 = vst [vmem:[#allocation137_spill] sm:$0xff] %v7982_v48  ;;  %11279 = vst [vmem:[#allocation138_spill] sm:$0xff] %v7985_v5  ;;  %v8006_v5 = vmul.f32 %v7708_v21, %v2810_v58  ;;  %v8009_v48 = vmul.f32 %v7735_v16, %v2862_v2 }
 0x54e   : > { %11280 = vst [vmem:[#allocation139_spill] sm:$0xff] %v7991_v28  ;;  %11281 = vst [vmem:[#allocation140_spill] sm:$0xff] %v8000_v44  ;;  %v8013_v28 = vld [vmem:[#allocation3 + $0x66] sm:$0xff]  ;;  %v8021_v44 = vmul.f32 %v7791_v39, %v2602_v11  ;;  %v8042_v11 = vmul.f32 %v7812_v4, %v2862_v2 }
 0x54f   : > { %11282 = vst [vmem:[#allocation141_spill] sm:$0xff] %v8003_v46  ;;  %11283 = vst [vmem:[#allocation142_spill] sm:$0xff] %v8006_v5  ;;  %v8024_v46 = vmul.f32 %v7797_v52, %v2654_v42  ;;  %v8027_v5 = vmul.f32 %v7800_v1, %v2706_v10  ;;  %v8045_v42 = vmul.f32 %v7815_v49, %v2914_v43  ;;  %v8047_v10 = vld [vmem:[#allocation3 + $0x69] sm:$0xff] }
 0x550   : > { %11284 = vst [vmem:[#allocation143_spill] sm:$0xff] %v8009_v48  ;;  %11285 = vst [vmem:[#allocation144_spill] sm:$0xff] %v8018_v17  ;;  %v8031_v48 = vld [vmem:[#allocation3 + $0x68] sm:$0xff]  ;;  %v8039_v17 = vmul.f32 %v7806_v26, %v2810_v58  ;;  %v8060_v58 = vmul.f32 %v7493_v22, %v7993_v34  ;;  %v8064_v2 = vmul.f32 %v7499_v8, %v8013_v28 }
 0x551   : > { %11286 = vst [vmem:[#allocation145_spill] sm:$0xff] %v8024_v46  ;;  %11287 = vst [vmem:[#allocation146_spill] sm:$0xff] %v8027_v5  ;;  %v8049_v5 = vld [vmem:[#allocation3 + $0x6a] sm:$0xff]  ;;  %v8051_v46 = vld [vmem:[#allocation3 + $0x82] sm:$0xff]  ;;  %v8068_v43 = vmul.f32 %v7499_v8, %v7995_v45  ;;  %v8080_v22 = vmul.f32 %v7505_v30, %v7997_v56  ;;  %v8088_v8 = vmul.f32 %v7511_v61, %v8015_v3 }
 0x552   : > { %11288 = vst [vmem:[#allocation147_spill] sm:$0xff] %v8042_v11  ;;  %11289 = vst [vmem:[#allocation148_spill] sm:$0xff] %v8045_v42  ;;  %v8070_v42 = vld [vmem:[#allocation3 + $0x6b] sm:$0xff]  ;;  %v8072_v11 = vld [vmem:[#allocation3 + $0x83] sm:$0xff] }
 0x553   : > { %2594 = vst.msk [vmem:[#allocation4 + $0xc8] sm:$0xff] %vm432_vm4, %v2574_v15  ;;  %11290 = vst [vmem:[#allocation149_spill] sm:$0xff] %v8056_v19  ;;  %v8076_v15 = vmul.f32 %v7505_v30, %v8029_v55  ;;  %v8102_v30 = vmul.f32 %v7549_v63, %v8049_v5 }
 0x554   : > { %11291 = vst [vmem:[#allocation150_spill] sm:$0xff] %v8060_v58  ;;  %11292 = vst [vmem:[#allocation151_spill] sm:$0xff] %v8064_v2  ;;  %v8084_v58 = vmul.f32 %v7511_v61, %v8031_v48  ;;  %v8094_v2 = vmul.f32 %v7531_v9, %v8047_v10  ;;  %v8108_v61 = vld [vmem:[#allocation3 + $0x96] sm:$0xff] }
 0x555   : > { %11293 = vst [vmem:[#allocation152_spill] sm:$0xff] %v8068_v43  ;;  %11294 = vst [vmem:[#allocation153_spill] sm:$0xff] %v8076_v15  ;;  %v8090_v43 = vld [vmem:[#allocation3 + $0x95] sm:$0xff]  ;;  %v8098_v15 = vmul.f32 %v7531_v9, %v8033_v62 }
 0x556   : > { %11295 = vst [vmem:[#allocation154_spill] sm:$0xff] %v8080_v22  ;;  %11296 = vst [vmem:[#allocation155_spill] sm:$0xff] %v8084_v58  ;;  %v8106_v58 = vmul.f32 %v7549_v63, %v8051_v46  ;;  %v2576_v22 = vpop.xlane.xlu1 %2575  ;;  %v8128_v63 = vld [vmem:[#allocation3 + $0x98] sm:$0xff]  ;;  %v8133_v9 = vmul.f32 %v7582_v14, %v8090_v43 }
 0x557   : > { %11297 = vst [vmem:[#allocation156_spill] sm:$0xff] %v8088_v8  ;;  %11298 = vst [vmem:[#allocation157_spill] sm:$0xff] %v8094_v2  ;;  %v8110_v8 = vld [vmem:[#allocation3 + $0x97] sm:$0xff]  ;;  %v8114_v2 = vmul.f32 %v7567_v51, %v8070_v42 }
 0x558   : > { %11299 = vst [vmem:[#allocation158_spill] sm:$0xff] %v8098_v15  ;;  %11300 = vst [vmem:[#allocation159_spill] sm:$0xff] %v8102_v30  ;;  %v8118_v15 = vmul.f32 %v7567_v51, %v8072_v11  ;;  %v8122_v30 = vmul.f32 %v7582_v14, %v8011_v41  ;;  %v8137_v51 = vadd.f32 %v7953_v25, %v7817_v36 }
 0x559   : > { %11301 = vst [vmem:[#allocation160_spill] sm:$0xff] %v8106_v58  ;;  %11302 = vst [vmem:[#allocation161_spill] sm:$0xff] %v8114_v2  ;;  %v8126_v58 = vmul.f32 %v7582_v14, %v7993_v34  ;;  %v8145_v2 = vmul.f32 %v7591_v29, %v7995_v45  ;;  %v8155_v14 = vmul.f32 %v7599_v53, %v8029_v55 }
 0x55a   : > { %11303 = vst [vmem:[#allocation162_spill] sm:$0xff] %v8118_v15  ;;  %11304 = vst [vmem:[#allocation163_spill] sm:$0xff] %v8122_v30  ;;  %v8141_v15 = vmul.f32 %v7591_v29, %v8013_v28  ;;  %v8159_v25 = vmul.f32 %v7599_v53, %v7997_v56  ;;  %v8163_v36 = vmul.f32 %v7599_v53, %v8110_v8 }
 0x55b   : > { %11305 = vst [vmem:[#allocation164_spill] sm:$0xff] %v8126_v58  ;;  %2595 = vst.msk [vmem:[#allocation4 + $0xe0] sm:$0xff] %vm432_vm4, %v2576_v22  ;;  %v8147_v58 = vld [vmem:[#allocation3 + $0x99] sm:$0xff]  ;;  %v8151_v22 = vmul.f32 %v7591_v29, %v8108_v61  ;;  %v8171_v29 = vmul.f32 %v7607_v54, %v8031_v48  ;;  %v8183_v53 = vmul.f32 %v7615_v37, %v8047_v10 }
 0x55c   : > { %11306 = vst [vmem:[#allocation165_spill] sm:$0xff] %v8133_v9  ;;  %11307 = vst [vmem:[#allocation166_spill] sm:$0xff] %v8141_v15  ;;  %v8165_v9 = vld [vmem:[#allocation3 + $0x9a] sm:$0xff]  ;;  %v11423_v15 = vld [vmem:[#allocation130_spill] sm:$0xff] }
 0x55d   : > { %11308 = vst [vmem:[#allocation167_spill] sm:$0xff] %v8145_v2  ;;  %11309 = vst [vmem:[#allocation168_spill] sm:$0xff] %v8151_v22  ;;  %v8167_v2 = vld [vmem:[#allocation3 + $0x9b] sm:$0xff]  ;;  %v8175_v22 = vmul.f32 %v7607_v54, %v8015_v3 }
 0x55e   : > { %11310 = vst [vmem:[#allocation169_spill] sm:$0xff] %v8155_v14  ;;  %11311 = vst [vmem:[#allocation170_spill] sm:$0xff] %v8159_v25  ;;  %v8179_v14 = vmul.f32 %v7607_v54, %v8128_v63  ;;  %v8189_v25 = vmul.f32 %v7615_v37, %v8033_v62  ;;  %v8205_v54 = vmul.f32 %v7623_v35, %v8165_v9 }
 0x55f   : > { %11312 = vst [vmem:[#allocation171_spill] sm:$0xff] %v8163_v36  ;;  %11313 = vst [vmem:[#allocation172_spill] sm:$0xff] %v8171_v29  ;;  %v8185_v36 = vld [vmem:[#allocation3 + $0xad] sm:$0xff]  ;;  %v8193_v29 = vmul.f32 %v7615_v37, %v8147_v58 }
 0x560   : > { %11314 = vst [vmem:[#allocation173_spill] sm:$0xff] %v8175_v22  ;;  %11315 = vst [vmem:[#allocation174_spill] sm:$0xff] %v8179_v14  ;;  %v8197_v22 = vmul.f32 %v7623_v35, %v8049_v5  ;;  %v8201_v14 = vmul.f32 %v7623_v35, %v8051_v46  ;;  %v8219_v37 = vld [vmem:[#allocation3 + $0xae] sm:$0xff]  ;;  %v8231_v35 = vmul.f32 %v7639_v7, %v8090_v43 }
 0x561   : > { %11316 = vst [vmem:[#allocation175_spill] sm:$0xff] %v8183_v53  ;;  %11317 = vst [vmem:[#allocation176_spill] sm:$0xff] %v8189_v25  ;;  %v8209_v53 = vmul.f32 %v7631_v6, %v8070_v42  ;;  %v8213_v25 = vmul.f32 %v7631_v6, %v8072_v11 }
 0x562   : > { %11318 = vst [vmem:[#allocation177_spill] sm:$0xff] %v8193_v29  ;;  %11319 = vst [vmem:[#allocation178_spill] sm:$0xff] %v8197_v22  ;;  %v8217_v29 = vmul.f32 %v7631_v6, %v8167_v2  ;;  %v3440_v6 = vld [vmem:[#allocation3 + $0xaf] sm:$0xff] }
 0x563   : > { %11320 = vst [vmem:[#allocation179_spill] sm:$0xff] %v8201_v14  ;;  %11321 = vst [vmem:[#allocation180_spill] sm:$0xff] %v8205_v54  ;;  %v8223_v14 = vmul.f32 %v7639_v7, %v8011_v41  ;;  %v8227_v54 = vmul.f32 %v7639_v7, %v7993_v34  ;;  %v3492_v22 = vld [vmem:[#allocation3 + $0xb0] sm:$0xff] }
 0x564   : > { %11322 = vst [vmem:[#allocation181_spill] sm:$0xff] %v8209_v53  ;;  %11323 = vst [vmem:[#allocation182_spill] sm:$0xff] %v8213_v25  ;;  %v8235_v25 = vmul.f32 %v7639_v7, %v8185_v36  ;;  %v8243_v53 = vmul.f32 %v7649_v27, %v8013_v28  ;;  %v3544_v7 = vld [vmem:[#allocation3 + $0xb1] sm:$0xff] }
 0x565   : > { %11324 = vst [vmem:[#allocation183_spill] sm:$0xff] %v8217_v29  ;;  %11325 = vst [vmem:[#allocation184_spill] sm:$0xff] %v8223_v14  ;;  %v8239_v29 = vadd.f32 %v7988_v13, %v7819_v0  ;;  %v8259_v0 = vmul.f32 %v7659_v40, %v8029_v55  ;;  %v8263_v13 = vmul.f32 %v7659_v40, %v7997_v56  ;;  %v11427_v14 = vld [vmem:[#allocation97_spill] sm:$0xff] }
 0x566   : > { %11326 = vst [vmem:[#allocation185_spill] sm:$0xff] %v8227_v54  ;;  %11327 = vst [vmem:[#allocation186_spill] sm:$0xff] %v8231_v35  ;;  %v8247_v54 = vmul.f32 %v7649_v27, %v7995_v45  ;;  %v8251_v35 = vmul.f32 %v7649_v27, %v8108_v61 }
 0x567   : > { %11328 = vst [vmem:[#allocation187_spill] sm:$0xff] %v8235_v25  ;;  %11329 = vst [vmem:[#allocation188_spill] sm:$0xff] %v8243_v53  ;;  %v8255_v25 = vmul.f32 %v7649_v27, %v8219_v37  ;;  %v8274_v27 = vmul.f32 %v7683_v47, %v8031_v48  ;;  %v8285_v53 = vmul.f32 %v7683_v47, %v3492_v22 }
 0x568   : > { %11330 = vst [vmem:[#allocation189_spill] sm:$0xff] %v8247_v54  ;;  %11331 = vst [vmem:[#allocation190_spill] sm:$0xff] %v8251_v35  ;;  %v8267_v54 = vmul.f32 %v7659_v40, %v8110_v8  ;;  %v8270_v35 = vmul.f32 %v7659_v40, %v3440_v6  ;;  %v8297_v40 = vmul.f32 %v7708_v21, %v8147_v58 }
 0x569   : > { %11332 = vst [vmem:[#allocation191_spill] sm:$0xff] %v8255_v25  ;;  %11333 = vst [vmem:[#allocation192_spill] sm:$0xff] %v8259_v0  ;;  %v8278_v25 = vmul.f32 %v7683_v47, %v8015_v3  ;;  %v8282_v0 = vmul.f32 %v7683_v47, %v8128_v63  ;;  %v8312_v47 = vmul.f32 %v7735_v16, %v8165_v9 }
 0x56a   : > { %11334 = vst [vmem:[#allocation193_spill] sm:$0xff] %v8263_v13  ;;  %11335 = vst [vmem:[#allocation194_spill] sm:$0xff] %v8267_v54  ;;  %v3596_v13 = vld [vmem:[#allocation3 + $0xb2] sm:$0xff]  ;;  %v8289_v54 = vmul.f32 %v7708_v21, %v8047_v10 }
 0x56b   : > { %11336 = vst [vmem:[#allocation195_spill] sm:$0xff] %v8270_v35  ;;  %11337 = vst [vmem:[#allocation196_spill] sm:$0xff] %v8274_v27  ;;  %v8293_v35 = vmul.f32 %v7708_v21, %v8033_v62  ;;  %v8300_v27 = vmul.f32 %v7708_v21, %v3544_v7  ;;  %v8327_v21 = vmul.f32 %v7763_v18, %v8167_v2 }
 0x56c   : > { %11338 = vst [vmem:[#allocation197_spill] sm:$0xff] %v8278_v25  ;;  %11339 = vst [vmem:[#allocation198_spill] sm:$0xff] %v8282_v0  ;;  %v3648_v25 = vld [vmem:[#allocation3 + $0xb3] sm:$0xff]  ;;  %v8304_v0 = vmul.f32 %v7735_v16, %v8049_v5 }
 0x56d   : > { %11340 = vst [vmem:[#allocation199_spill] sm:$0xff] %v8285_v53  ;;  %11341 = vst [vmem:[#allocation200_spill] sm:$0xff] %v8289_v54  ;;  %v8308_v53 = vmul.f32 %v7735_v16, %v8051_v46  ;;  %v11404_v54 = vld [vmem:[#allocation59_spill] sm:$0xff] }
 0x56e   : > { %11342 = vst [vmem:[#allocation201_spill] sm:$0xff] %v8293_v35  ;;  %11343 = vst [vmem:[#allocation202_spill] sm:$0xff] %v8297_v40  ;;  %v8315_v35 = vmul.f32 %v7735_v16, %v3596_v13  ;;  %v8319_v40 = vmul.f32 %v7763_v18, %v8070_v42  ;;  %v8342_v16 = vmul.f32 %v7791_v39, %v8090_v43 }
 0x56f   : > { %11344 = vst [vmem:[#allocation203_spill] sm:$0xff] %v8300_v27  ;;  %11345 = vst [vmem:[#allocation204_spill] sm:$0xff] %v8304_v0  ;;  %v8323_v27 = vmul.f32 %v7763_v18, %v8072_v11  ;;  %v11402_v0 = vld [vmem:[#allocation53_spill] sm:$0xff] }
 0x570   : > { %11346 = vst [vmem:[#allocation205_spill] sm:$0xff] %v8308_v53  ;;  %11347 = vst [vmem:[#allocation206_spill] sm:$0xff] %v8312_v47  ;;  %v8330_v53 = vmul.f32 %v7763_v18, %v3648_v25  ;;  %v8334_v47 = vmul.f32 %v7791_v39, %v8011_v41  ;;  %v8356_v18 = vmul.f32 %v7797_v52, %v7995_v45 }
 0x571   : > { %11348 = vst [vmem:[#allocation207_spill] sm:$0xff] %v8315_v35  ;;  %11349 = vst [vmem:[#allocation208_spill] sm:$0xff] %v8319_v40  ;;  %v8338_v35 = vmul.f32 %v7791_v39, %v7993_v34  ;;  %v2627_v40 = vld [vmem:[#allocation4 + $0x4d] sm:$0xff] }
 0x572   : > { %11350 = vst [vmem:[#allocation209_spill] sm:$0xff] %v8323_v27  ;;  %11351 = vst [vmem:[#allocation210_spill] sm:$0xff] %v8327_v21  ;;  %v8346_v27 = vmul.f32 %v7791_v39, %v8185_v36  ;;  %v3712_v21 = vadd.f32 %v8021_v44, %v7823_v12  ;;  %v8372_v12 = vmul.f32 %v7800_v1, %v7997_v56  ;;  %v11417_v39 = vld [vmem:[#allocation146_spill] sm:$0xff] }
 0x573   : > { %11352 = vst [vmem:[#allocation211_spill] sm:$0xff] %v8330_v53  ;;  %11353 = vst [vmem:[#allocation212_spill] sm:$0xff] %v8334_v47  ;;  %v8352_v53 = vmul.f32 %v7797_v52, %v8013_v28  ;;  %v8376_v44 = vmul.f32 %v7800_v1, %v8110_v8  ;;  %v8391_v56 = vmul.f32 %v7803_v50, %v8128_v63 }
 0x574   : > { %11354 = vst [vmem:[#allocation213_spill] sm:$0xff] %v8338_v35  ;;  %11355 = vst [vmem:[#allocation214_spill] sm:$0xff] %v8342_v16  ;;  %v8360_v35 = vmul.f32 %v7797_v52, %v8108_v61  ;;  %v8364_v16 = vmul.f32 %v7797_v52, %v8219_v37  ;;  %v8398_v8 = vmul.f32 %v7806_v26, %v8047_v10 }
 0x575   : > { %11356 = vst [vmem:[#allocation215_spill] sm:$0xff] %v8346_v27  ;;  %11357 = vst [vmem:[#allocation216_spill] sm:$0xff] %v8352_v53  ;;  %v8368_v27 = vmul.f32 %v7800_v1, %v8029_v55  ;;  %v8413_v63 = vmul.f32 %v7812_v4, %v8049_v5  ;;  %v8421_v10 = vmul.f32 %v7812_v4, %v8165_v9 }
 0x576   : > { %11358 = vst [vmem:[#allocation217_spill] sm:$0xff] %v8356_v18  ;;  %11359 = vst [vmem:[#allocation218_spill] sm:$0xff] %v8360_v35  ;;  %v8379_v18 = vmul.f32 %v7800_v1, %v3440_v6  ;;  %v8383_v35 = vmul.f32 %v7803_v50, %v8031_v48  ;;  %v8402_v6 = vmul.f32 %v7806_v26, %v8033_v62 }
 0x577   : > { %11360 = vst [vmem:[#allocation219_spill] sm:$0xff] %v8364_v16  ;;  %11361 = vst [vmem:[#allocation220_spill] sm:$0xff] %v8368_v27  ;;  %v8387_v16 = vmul.f32 %v7803_v50, %v8015_v3  ;;  %v8406_v3 = vmul.f32 %v7806_v26, %v8147_v58  ;;  %v8424_v62 = vmul.f32 %v7812_v4, %v3596_v13 }
 0x578   : > { %11362 = vst [vmem:[#allocation221_spill] sm:$0xff] %v8372_v12  ;;  %11363 = vst [vmem:[#allocation222_spill] sm:$0xff] %v8376_v44  ;;  %v8394_v12 = vmul.f32 %v7803_v50, %v3492_v22  ;;  %v8417_v22 = vmul.f32 %v7812_v4, %v8051_v46  ;;  %v8428_v58 = vmul.f32 %v7815_v49, %v8070_v42 }
 0x579   : > { %11364 = vst [vmem:[#allocation223_spill] sm:$0xff] %v8379_v18  ;;  %11365 = vst [vmem:[#allocation224_spill] sm:$0xff] %v8383_v35  ;;  %v8409_v18 = vmul.f32 %v7806_v26, %v3544_v7  ;;  %v2636_v7 = vmul.f32 %v7495_v24, %v2627_v40  ;;  %v8433_v5 = vmul.f32 %v7815_v49, %v8072_v11  ;;  %v11405_v35 = vld [vmem:[#allocation145_spill] sm:$0xff]  ;;  %v11411_v26 = vld [vmem:[#allocation140_spill] sm:$0xff] }
 0x57a   : > { %11366 = vst [vmem:[#allocation225_spill] sm:$0xff] %v8387_v16  ;;  %11367 = vst [vmem:[#allocation226_spill] sm:$0xff] %v8391_v56  ;;  %v8437_v46 = vmul.f32 %v7815_v49, %v8167_v2  ;;  %v8440_v9 = vmul.f32 %v7815_v49, %v3648_v25  ;;  %v3001_v13 = vmul.f32 %v7586_v38, %v2627_v40  ;;  %v11396_v56 = vld [vmem:[#allocation41_spill] sm:$0xff] }
 0x57b   : > { %11368 = vst [vmem:[#allocation227_spill] sm:$0xff] %v8394_v12  ;;  %11369 = vst [vmem:[#allocation228_spill] sm:$0xff] %v8398_v8  ;;  %v8445_v42 = vmul.f32 %v7853_v33, %v8011_v41  ;;  %v8453_v11 = vmul.f32 %v7853_v33, %v8090_v43  ;;  %v2644_v2 = vadd.f32 %v2636_v7, %v7944_v31 }
 0x57c   : > { %11370 = vst [vmem:[#allocation229_spill] sm:$0xff] %v8402_v6  ;;  %11371 = vst [vmem:[#allocation230_spill] sm:$0xff] %v8406_v3  ;;  %v8458_v25 = vmul.f32 %v7853_v33, %v8185_v36  ;;  %v8466_v41 = vmul.f32 %v7856_v20, %v7995_v45  ;;  %v8471_v43 = vmul.f32 %v7856_v20, %v8108_v61  ;;  %v2731_v36 = vld [vmem:[#allocation4 + $0x4f] sm:$0xff]  ;;  %v11399_v6 = vld [vmem:[#allocation139_spill] sm:$0xff] }
 0x57d   : > { %11372 = vst [vmem:[#allocation231_spill] sm:$0xff] %v8409_v18  ;;  %11373 = vst [vmem:[#allocation232_spill] sm:$0xff] %v8413_v63  ;;  %v2679_v18 = vld [vmem:[#allocation4 + $0x4e] sm:$0xff]  ;;  %v2671_v31 = vadd.f32 %v7947_v23, %v2644_v2  ;;  %v8478_v12 = vmul.f32 %v7856_v20, %v8219_v37 }
 0x57e   : > { %11374 = vst [vmem:[#allocation233_spill] sm:$0xff] %v8417_v22  ;;  %11375 = vst [vmem:[#allocation234_spill] sm:$0xff] %v8421_v10  ;;  %v2688_v7 = vmul.f32 %v7502_v57, %v2679_v18  ;;  %v11390_v45 = vld [vmem:[#allocation132_spill] sm:$0xff]  ;;  %v11392_v23 = vld [vmem:[#allocation105_spill] sm:$0xff] }
 0x57f   : > { %11376 = vst [vmem:[#allocation235_spill] sm:$0xff] %v8424_v62  ;;  %11377 = vst [vmem:[#allocation236_spill] sm:$0xff] %v8428_v58  ;;  %v8449_v62 = vmul.f32 %v7853_v33, %v7993_v34  ;;  %v3009_v34 = vadd.f32 %v3001_v13, %v8137_v51  ;;  %v8482_v51 = vmul.f32 %v7865_v60, %v8029_v55  ;;  %v11391_v13 = vld [vmem:[#allocation57_spill] sm:$0xff]  ;;  %v11397_v22 = vld [vmem:[#allocation46_spill] sm:$0xff] }
 0x580   : > { %11378 = vst [vmem:[#allocation237_spill] sm:$0xff] %v8433_v5  ;;  %11379 = vst [vmem:[#allocation238_spill] sm:$0xff] %v8437_v46  ;;  %v2835_v46 = vld [vmem:[#allocation4 + $0x51] sm:$0xff]  ;;  %v8488_v2 = vmul.f32 %v11392_v23, %v8031_v48  ;;  %v2696_v10 = vadd.f32 %v2688_v7, %v2671_v31  ;;  %v11394_v5 = vld [vmem:[#allocation92_spill] sm:$0xff]  ;;  %v3105_v23 = vmul.f32 %v11404_v54, %v2731_v36 }
 0x581   : > { %11380 = vst [vmem:[#allocation239_spill] sm:$0xff] %v8440_v9  ;;  %11381 = vst [vmem:[#allocation240_spill] sm:$0xff] %v8445_v42  ;;  %v8462_v9 = vmul.f32 %v7856_v20, %v8013_v28  ;;  %v3366_v28 = vmul.f32 %v7643_v32, %v2627_v40  ;;  %v3036_v61 = vadd.f32 %v11390_v45, %v3009_v34  ;;  %v11398_v45 = vld [vmem:[#allocation128_spill] sm:$0xff]  ;;  %v11400_v48 = vld [vmem:[#allocation71_spill] sm:$0xff] }
 0x582   : > { %11382 = vst [vmem:[#allocation241_spill] sm:$0xff] %v8449_v62  ;;  %11383 = vst [vmem:[#allocation242_spill] sm:$0xff] %v8453_v11  ;;  %v2939_v11 = vld [vmem:[#allocation4 + $0x53] sm:$0xff]  ;;  %v3729_v37 = vmul.f32 %v11394_v5, %v2627_v40  ;;  %v2844_v44 = vmul.f32 %v11397_v22, %v2835_v46  ;;  %v2723_v58 = vadd.f32 %v11398_v45, %v2696_v10  ;;  %v11401_v7 = vld [vmem:[#allocation49_spill] sm:$0xff] }
 0x583   : > { %11384 = vst [vmem:[#allocation243_spill] sm:$0xff] %v8458_v25  ;;  %11385 = vst [vmem:[#allocation244_spill] sm:$0xff] %v8462_v9  ;;  %v2783_v25 = vld [vmem:[#allocation4 + $0x50] sm:$0xff]  ;;  %v3374_v3 = vadd.f32 %v3366_v28, %v8239_v29  ;;  %v3418_v16 = vmul.f32 %v11400_v48, %v2679_v18  ;;  %v8500_v29 = vmul.f32 %v11402_v0, %v2939_v11  ;;  %v11403_v40 = vld [vmem:[#allocation134_spill] sm:$0xff] }
 0x584   : > { %11386 = vst [vmem:[#allocation245_spill] sm:$0xff] %v8466_v41  ;;  %11387 = vst [vmem:[#allocation246_spill] sm:$0xff] %v8471_v43  ;;  %v3053_v43 = vmul.f32 %v11391_v13, %v2679_v18  ;;  %v2887_v41 = vld [vmem:[#allocation4 + $0x52] sm:$0xff]  ;;  %v2792_v55 = vmul.f32 %v11396_v56, %v2783_v25  ;;  %v3737_v31 = vadd.f32 %v3729_v37, %v3712_v21  ;;  %v11409_v37 = vld [vmem:[#allocation65_spill] sm:$0xff] }
 0x585   : > { %11388 = vst [vmem:[#allocation247_spill] sm:$0xff] %v8478_v12  ;;  %11389 = vst [vmem:[#allocation248_spill] sm:$0xff] %v8482_v51  ;;  %v11395_v12 = vld [vmem:[#allocation37_spill] sm:$0xff]  ;;  %v3401_v63 = vadd.f32 %v11399_v6, %v3374_v3  ;;  %v2896_v8 = vmul.f32 %v11401_v7, %v2887_v41  ;;  %v11408_v20 = vld [vmem:[#allocation63_spill] sm:$0xff]  ;;  %v3261_v4 = vmul.f32 %v11409_v37, %v2887_v41 }
 0x586   : > { %11393 = vst [vmem:[#allocation132_spill] sm:$0xff] %v8488_v2  ;;  %v2740_v62 = vmul.f32 %v11395_v12, %v2731_v36  ;;  %v3061_v34 = vadd.f32 %v3053_v43, %v3036_v61  ;;  %v3764_v43 = vadd.f32 %v11405_v35, %v3737_v31  ;;  %v11406_v61 = vld [vmem:[#allocation93_spill] sm:$0xff]  ;;  %v11407_v6 = vld [vmem:[#allocation61_spill] sm:$0xff]  ;;  %v3209_v21 = vmul.f32 %v11408_v20, %v2835_v46  ;;  %v11418_v51 = vld [vmem:[#allocation94_spill] sm:$0xff] }
 0x587   : > { %v3426_v49 = vadd.f32 %v3418_v16, %v3401_v63  ;;  %v3781_v10 = vmul.f32 %v11406_v61, %v2679_v18  ;;  %v3157_v3 = vmul.f32 %v11407_v6, %v2783_v25  ;;  %v11410_v2 = vld [vmem:[#allocation129_spill] sm:$0xff]  ;;  %v11414_v63 = vld [vmem:[#allocation67_spill] sm:$0xff]  ;;  %v8527_v9 = vld [vmem:[#allocation4 + $0x66] sm:$0xff]  ;;  %v3989_v19 = vmul.f32 %v11427_v14, %v2887_v41 }
 0x588   : > { %v3088_v28 = vadd.f32 %v11403_v40, %v3061_v34  ;;  %v2748_v60 = vadd.f32 %v2740_v62, %v2723_v58  ;;  %v11412_v34 = vld [vmem:[#allocation73_spill] sm:$0xff]  ;;  %v11413_v62 = vld [vmem:[#allocation135_spill] sm:$0xff]  ;;  %v8514_v35 = vmul.f32 %v11414_v63, %v2939_v11  ;;  %v11415_v18 = vld [vmem:[#allocation75_spill] sm:$0xff] }
 0x589   : > { %v3453_v50 = vadd.f32 %v11411_v26, %v3426_v49  ;;  %v3470_v40 = vmul.f32 %v11412_v34, %v2731_v36  ;;  %v3789_v1 = vadd.f32 %v3781_v10, %v3764_v43  ;;  %v3522_v58 = vmul.f32 %v11415_v18, %v2783_v25  ;;  %v11419_v49 = vld [vmem:[#allocation79_spill] sm:$0xff]  ;;  %v11420_v10 = vld [vmem:[#allocation83_spill] sm:$0xff] }
 0x58a   : > { %v3113_v45 = vadd.f32 %v3105_v23, %v3088_v28  ;;  %v2775_v33 = vadd.f32 %v11410_v2, %v2748_v60  ;;  %v11416_v23 = vld [vmem:[#allocation77_spill] sm:$0xff]  ;;  %v3833_v60 = vmul.f32 %v11418_v51, %v2731_v36  ;;  %v3626_v43 = vmul.f32 %v11419_v49, %v2887_v41 }
 0x58b   : > { %v3574_v31 = vmul.f32 %v11416_v23, %v2835_v46  ;;  %v3478_v52 = vadd.f32 %v3470_v40, %v3453_v50  ;;  %v3816_v27 = vadd.f32 %v11417_v39, %v3789_v1  ;;  %v8520_v2 = vld [vmem:[#allocation4 + $0x65] sm:$0xff] }
 0x58c   : > { %v3140_v16 = vadd.f32 %v11413_v62, %v3113_v45  ;;  %v2800_v28 = vadd.f32 %v2792_v55, %v2775_v33  ;;  %v8524_v45 = vmul.f32 %v11420_v10, %v2939_v11  ;;  %v11422_v62 = vld [vmem:[#allocation95_spill] sm:$0xff]  ;;  %v11424_v33 = vld [vmem:[#allocation141_spill] sm:$0xff]  ;;  %v11425_v39 = vld [vmem:[#allocation96_spill] sm:$0xff] }
 0x58d   : > { %v3885_v53 = vmul.f32 %v11422_v62, %v2783_v25  ;;  %v3505_v50 = vadd.f32 %v11424_v33, %v3478_v52  ;;  %v3841_v55 = vadd.f32 %v3833_v60, %v3816_v27  ;;  %v3937_v1 = vmul.f32 %v11425_v39, %v2835_v46  ;;  %v8532_v36 = vld [vmem:[#allocation4 + $0x67] sm:$0xff] }
 0x58e   : > { %v3165_v26 = vadd.f32 %v3157_v3, %v3140_v16  ;;  %11421 = vst [vmem:[#allocation46_spill] sm:$0xff] %v8524_v45  ;;  %v2827_v47 = vadd.f32 %v11423_v15, %v2800_v28  ;;  %v2784_v40 = vld [vmem:[#allocation4 + $0x68] sm:$0xff]  ;;  %v11428_v45 = vld [vmem:[#allocation98_spill] sm:$0xff]  ;;  %v8541_v15 = vmul.f32 %v7495_v24, %v8520_v2  ;;  %v8546_v60 = vmul.f32 %v7502_v57, %v8527_v9 }
 0x58f   : > { %v2836_v3 = vld [vmem:[#allocation4 + $0x69] sm:$0xff]  ;;  %v8537_v30 = vmul.f32 %v11428_v45, %v2939_v11  ;;  %v3530_v27 = vadd.f32 %v3522_v58, %v3505_v50  ;;  %v3868_v46 = vadd.f32 %v8036_v59, %v3841_v55  ;;  %v8550_v41 = vmul.f32 %v11395_v12, %v8532_v36  ;;  %v11433_v58 = vld [vmem:[#allocation142_spill] sm:$0xff] }
 0x590   : > { %v11426_v16 = vld [vmem:[#allocation136_spill] sm:$0xff]  ;;  %v2852_v52 = vadd.f32 %v2844_v44, %v2827_v47  ;;  %v8553_v11 = vmul.f32 %v11396_v56, %v2784_v40  ;;  %v8556_v33 = vmul.f32 %v11397_v22, %v2836_v3  ;;  %v11432_v47 = vld [vmem:[#allocation131_spill] sm:$0xff] }
 0x591   : > { %v3192_v42 = vadd.f32 %v11426_v16, %v3165_v26  ;;  %v2888_v25 = vld [vmem:[#allocation4 + $0x6a] sm:$0xff]  ;;  %11429 = vst [vmem:[#allocation128_spill] sm:$0xff] %v8550_v41  ;;  %v3557_v59 = vadd.f32 %v11433_v58, %v3530_v27  ;;  %v3893_v50 = vadd.f32 %v3885_v53, %v3868_v46  ;;  %v3002_v41 = vmul.f32 %v7586_v38, %v8520_v2 }
 0x592   : > { %v2940_v28 = vld [vmem:[#allocation4 + $0x6b] sm:$0xff]  ;;  %11430 = vst [vmem:[#allocation139_spill] sm:$0xff] %v8553_v11  ;;  %11431 = vst [vmem:[#allocation134_spill] sm:$0xff] %v8556_v33  ;;  %v2879_v44 = vadd.f32 %v11432_v47, %v2852_v52  ;;  %v8561_v55 = vmul.f32 %v11401_v7, %v2888_v25  ;;  %v8571_v11 = vmul.f32 %v11391_v13, %v8527_v9 }
 0x593   : > { %v3217_v26 = vadd.f32 %v3209_v21, %v3192_v42  ;;  %v11435_v16 = vld [vmem:[#allocation137_spill] sm:$0xff]  ;;  %v8565_v21 = vmul.f32 %v11402_v0, %v2940_v28  ;;  %v3582_v52 = vadd.f32 %v3574_v31, %v3557_v59  ;;  %v3920_v27 = vadd.f32 %v8039_v17, %v3893_v50  ;;  %v11444_v59 = vld [vmem:[#allocation138_spill] sm:$0xff] }
 0x594   : > { %11434 = vst [vmem:[#allocation145_spill] sm:$0xff] %v8561_v55  ;;  %v2904_v33 = vadd.f32 %v2896_v8, %v2879_v44  ;;  %v8576_v53 = vmul.f32 %v11404_v54, %v8532_v36  ;;  %v8582_v47 = vmul.f32 %v11408_v20, %v2836_v3  ;;  %v8585_v58 = vmul.f32 %v11409_v37, %v2888_v25  ;;  %v11442_v8 = vld [vmem:[#allocation143_spill] sm:$0xff] }
 0x595   : > { %v3244_v42 = vadd.f32 %v11435_v16, %v3217_v26  ;;  %11436 = vst [vmem:[#allocation129_spill] sm:$0xff] %v8565_v21  ;;  %v8579_v26 = vmul.f32 %v11407_v6, %v2784_v40  ;;  %v11441_v16 = vld [vmem:[#allocation133_spill] sm:$0xff]  ;;  %v3609_v31 = vadd.f32 %v11442_v8, %v3582_v52  ;;  %v3945_v44 = vadd.f32 %v3937_v1, %v3920_v27  ;;  %v2785_v55 = vld [vmem:[#allocation4 + $0x80] sm:$0xff] }
 0x596   : > { %11437 = vst [vmem:[#allocation140_spill] sm:$0xff] %v8576_v53  ;;  %11439 = vst [vmem:[#allocation146_spill] sm:$0xff] %v8582_v47  ;;  %v2931_v21 = vadd.f32 %v11441_v16, %v2904_v33  ;;  %v8590_v17 = vmul.f32 %v11414_v63, %v2940_v28  ;;  %v11446_v16 = vld [vmem:[#allocation147_spill] sm:$0xff]  ;;  %v8605_v1 = vmul.f32 %v11415_v18, %v2784_v40  ;;  %v11463_v53 = vld [vmem:[#allocation149_spill] sm:$0xff] }
 0x597   : > { %v3269_v46 = vadd.f32 %v3261_v4, %v3244_v42  ;;  %11438 = vst [vmem:[#allocation135_spill] sm:$0xff] %v8579_v26  ;;  %11440 = vst [vmem:[#allocation130_spill] sm:$0xff] %v8585_v58  ;;  %v3367_v4 = vmul.f32 %v7643_v32, %v8520_v2  ;;  %v8597_v42 = vmul.f32 %v11400_v48, %v8527_v9  ;;  %v2889_v26 = vld [vmem:[#allocation4 + $0x82] sm:$0xff] }
 0x598   : > { %11443 = vst [vmem:[#allocation141_spill] sm:$0xff] %v8590_v17  ;;  %v8601_v58 = vmul.f32 %v11412_v34, %v8532_v36  ;;  %v3634_v33 = vadd.f32 %v3626_v43, %v3609_v31  ;;  %v3972_v52 = vadd.f32 %v11446_v16, %v3945_v44  ;;  %11447 = vst [vmem:[#allocation131_spill] sm:$0xff] %v8605_v1  ;;  %v11451_v43 = vld [vmem:[#allocation144_spill] sm:$0xff]  ;;  %v8620_v16 = vld [vmem:[#allocation4 + $0x7d] sm:$0xff] }
 0x599   : > { %v3296_v50 = vadd.f32 %v11444_v59, %v3269_v46  ;;  %v8608_v27 = vmul.f32 %v11416_v23, %v2836_v3  ;;  %v2956_v46 = vadd.f32 %v8500_v29, %v2931_v21  ;;  %v8612_v8 = vmul.f32 %v11419_v49, %v2888_v25  ;;  %v2837_v1 = vld [vmem:[#allocation4 + $0x81] sm:$0xff] }
 0x59a   : > { %11445 = vst [vmem:[#allocation136_spill] sm:$0xff] %v8601_v58  ;;  %v8615_v59 = vmul.f32 %v11420_v10, %v2940_v28  ;;  %v3730_v17 = vmul.f32 %v11394_v5, %v8520_v2  ;;  %v3661_v31 = vadd.f32 %v11451_v43, %v3634_v33  ;;  %v3997_v44 = vadd.f32 %v3989_v19, %v3972_v52  ;;  %v11456_v52 = vld [vmem:[#allocation148_spill] sm:$0xff]  ;;  %v11461_v58 = vld [vmem:[#allocation46_spill] sm:$0xff] }
 0x59b   : > { %11448 = vst [vmem:[#allocation142_spill] sm:$0xff] %v8608_v27  ;;  %11449 = vst [vmem:[#allocation137_spill] sm:$0xff] %v8612_v8  ;;  %v8624_v47 = vmul.f32 %v11406_v61, %v8527_v9  ;;  %v8628_v29 = vmul.f32 %v11418_v51, %v8532_v36  ;;  %v3321_v21 = vadd.f32 %v8514_v35, %v3296_v50  ;;  %v2681_v8 = vld [vmem:[#allocation4 + $0x7e] sm:$0xff]  ;;  %v11458_v35 = vld [vmem:[#allocation101_spill] sm:$0xff] }
 0x59c   : > { %11450 = vst [vmem:[#allocation133_spill] sm:$0xff] %v8615_v59  ;;  %v2733_v59 = vld [vmem:[#allocation4 + $0x7f] sm:$0xff]  ;;  %v8632_v27 = vmul.f32 %v11422_v62, %v2784_v40  ;;  %v8635_v33 = vmul.f32 %v11425_v39, %v2836_v3  ;;  %v8638_v19 = vmul.f32 %v11427_v14, %v2888_v25  ;;  %v4024_v43 = vadd.f32 %v11456_v52, %v3997_v44  ;;  %v11462_v44 = vld [vmem:[#allocation104_spill] sm:$0xff] }
 0x59d   : > { %11452 = vst [vmem:[#allocation143_spill] sm:$0xff] %v8628_v29  ;;  %v8642_v29 = vmul.f32 %v11428_v45, %v2940_v28  ;;  %v4095_v50 = vmul.f32 %v11458_v35, %v8520_v2  ;;  %v11459_v40 = vld [vmem:[#allocation102_spill] sm:$0xff]  ;;  %v11460_v3 = vld [vmem:[#allocation163_spill] sm:$0xff]  ;;  %v3686_v25 = vadd.f32 %v11461_v58, %v3661_v31  ;;  %v8654_v52 = vmul.f32 %v11462_v44, %v8532_v36  ;;  %v11464_v58 = vld [vmem:[#allocation184_spill] sm:$0xff] }
 0x59e   : > { %11453 = vst [vmem:[#allocation138_spill] sm:$0xff] %v8632_v27  ;;  %11454 = vst [vmem:[#allocation147_spill] sm:$0xff] %v8635_v33  ;;  %v8648_v27 = vmul.f32 %v11459_v40, %v8527_v9  ;;  %v2984_v33 = vadd.f32 %v11460_v3, %v2956_v46  ;;  %v2638_v28 = vmul.f32 %v7495_v24, %v8620_v16 }
 0x59f   : > { %11455 = vst [vmem:[#allocation144_spill] sm:$0xff] %v8638_v19  ;;  %11457 = vst [vmem:[#allocation148_spill] sm:$0xff] %v8642_v29  ;;  %v2941_v19 = vld [vmem:[#allocation4 + $0x83] sm:$0xff]  ;;  %v4049_v29 = vadd.f32 %v8537_v30, %v4024_v43  ;;  %v2645_v2 = vadd.f32 %v8541_v15, %v11463_v53  ;;  %v8662_v9 = vmul.f32 %v7502_v57, %v2681_v8 }
 0x5a0   : > { %v8665_v46 = vmul.f32 %v11395_v12, %v2733_v59  ;;  %v3349_v31 = vadd.f32 %v11464_v58, %v3321_v21  ;;  %v8669_v3 = vmul.f32 %v11396_v56, %v2785_v55  ;;  %v8672_v36 = vmul.f32 %v11397_v22, %v2837_v1  ;;  %v11466_v30 = vld [vmem:[#allocation240_spill] sm:$0xff] }
 0x5a1   : > { %v8675_v44 = vmul.f32 %v11401_v7, %v2889_v26  ;;  %v4077_v43 = vadd.f32 %v11466_v30, %v4049_v29  ;;  %v8679_v15 = vmul.f32 %v11402_v0, %v2941_v19  ;;  %v8683_v53 = vmul.f32 %v7586_v38, %v8620_v16  ;;  %v11470_v58 = vld [vmem:[#allocation212_spill] sm:$0xff] }
 0x5a2   : > { %11465 = vst [vmem:[#allocation163_spill] sm:$0xff] %v8672_v36  ;;  %v8686_v21 = vmul.f32 %v11391_v13, %v2681_v8  ;;  %v3713_v56 = vadd.f32 %v11470_v58, %v3686_v25  ;;  %v3010_v12 = vadd.f32 %v3002_v41, %v2984_v33  ;;  %v8690_v36 = vmul.f32 %v11404_v54, %v2733_v59 }
 0x5a3   : > { %11467 = vst [vmem:[#allocation46_spill] sm:$0xff] %v8679_v15  ;;  %11468 = vst [vmem:[#allocation149_spill] sm:$0xff] %v8683_v53  ;;  %v8693_v7 = vmul.f32 %v11407_v6, %v2785_v55  ;;  %v8696_v29 = vmul.f32 %v11408_v20, %v2837_v1  ;;  %v8699_v30 = vmul.f32 %v11409_v37, %v2889_v26  ;;  %v2541_v15 = vpop.xlane.xlu0 %2540 }
 0x5a4   : > { %11469 = vst [vmem:[#allocation184_spill] sm:$0xff] %v8686_v21  ;;  %11471 = vst [vmem:[#allocation240_spill] sm:$0xff] %v8690_v36  ;;  %v8702_v0 = vmul.f32 %v11414_v63, %v2941_v19  ;;  %v8706_v21 = vmul.f32 %v7643_v32, %v8620_v16  ;;  %v3375_v41 = vadd.f32 %v3367_v4, %v3349_v31  ;;  %v8728_v31 = vld [vmem:[#allocation4 + $0x96] sm:$0xff] }
 0x5a5   : > { %11472 = vst [vmem:[#allocation212_spill] sm:$0xff] %v8693_v7  ;;  %11473 = vst [vmem:[#allocation249_spill] sm:$0xff] %v8696_v29  ;;  %v8709_v33 = vmul.f32 %v11400_v48, %v2681_v8  ;;  %v8712_v25 = vmul.f32 %v11412_v34, %v2733_v59  ;;  %v4103_v58 = vadd.f32 %v4095_v50, %v4077_v43  ;;  %v8714_v7 = vld [vmem:[#allocation4 + $0x95] sm:$0xff] }
 0x5a6   : > { %11474 = vst [vmem:[#allocation250_spill] sm:$0xff] %v8699_v30  ;;  %11475 = vst [vmem:[#allocation251_spill] sm:$0xff] %v8702_v0  ;;  %v8717_v29 = vmul.f32 %v11415_v18, %v2785_v55  ;;  %v8720_v30 = vmul.f32 %v11416_v23, %v2837_v1  ;;  %v8723_v0 = vmul.f32 %v11419_v49, %v2889_v26 }
 0x5a7   : > { %11476 = vst [vmem:[#allocation252_spill] sm:$0xff] %v8706_v21  ;;  %11477 = vst [vmem:[#allocation253_spill] sm:$0xff] %v8709_v33  ;;  %v8726_v4 = vmul.f32 %v11420_v10, %v2941_v19  ;;  %v8730_v33 = vld [vmem:[#allocation4 + $0x97] sm:$0xff]  ;;  %v8736_v50 = vmul.f32 %v11394_v5, %v8620_v16  ;;  %v3738_v43 = vadd.f32 %v3730_v17, %v3713_v56 }
 0x5a8   : > { %11478 = vst [vmem:[#allocation254_spill] sm:$0xff] %v8712_v25  ;;  %11479 = vst [vmem:[#allocation255_spill] sm:$0xff] %v8717_v29  ;;  %v8732_v25 = vld [vmem:[#allocation4 + $0x98] sm:$0xff]  ;;  %v8739_v29 = vmul.f32 %v11406_v61, %v2681_v8  ;;  %v8751_v36 = vmul.f32 %v11422_v62, %v2785_v55  ;;  %v8754_v53 = vmul.f32 %v11425_v39, %v2837_v1  ;;  %v11494_v55 = vld [vmem:[#allocation151_spill] sm:$0xff] }
 0x5a9   : > { %11480 = vst [vmem:[#allocation256_spill] sm:$0xff] %v8720_v30  ;;  %11481 = vst [vmem:[#allocation257_spill] sm:$0xff] %v8723_v0  ;;  %v8742_v30 = vmul.f32 %v11418_v51, %v2733_v59  ;;  %v8744_v0 = vld [vmem:[#allocation4 + $0x99] sm:$0xff]  ;;  %v8757_v56 = vmul.f32 %v11427_v14, %v2889_v26  ;;  %v8760_v17 = vmul.f32 %v11428_v45, %v2941_v19 }
 0x5aa   : > { %11482 = vst [vmem:[#allocation258_spill] sm:$0xff] %v8726_v4  ;;  %11483 = vst [vmem:[#allocation259_spill] sm:$0xff] %v8736_v50  ;;  %v8746_v4 = vld [vmem:[#allocation4 + $0x9a] sm:$0xff]  ;;  %v8764_v59 = vmul.f32 %v11458_v35, %v8620_v16  ;;  %v8773_v1 = vmul.f32 %v7586_v38, %v8714_v7  ;;  %v8778_v19 = vmul.f32 %v11391_v13, %v8728_v31  ;;  %v4480_v13 = vld [vmem:[#allocation3 + $0x96] sm:$0xff] }
 0x5ab   : > { %11484 = vst [vmem:[#allocation260_spill] sm:$0xff] %v8739_v29  ;;  %11485 = vst [vmem:[#allocation261_spill] sm:$0xff] %v8742_v30  ;;  %v8748_v21 = vld [vmem:[#allocation4 + $0x9b] sm:$0xff]  ;;  %v8767_v30 = vmul.f32 %v11459_v40, %v2681_v8  ;;  %v8782_v16 = vmul.f32 %v11404_v54, %v8730_v33  ;;  %v8786_v8 = vmul.f32 %v11407_v6, %v8732_v25  ;;  %v9026_v6 = vld [vmem:[#allocation3 + $0x81] sm:$0xff] }
 0x5ac   : > { %11486 = vst [vmem:[#allocation262_spill] sm:$0xff] %v8748_v21  ;;  %11487 = vst [vmem:[#allocation263_spill] sm:$0xff] %v8751_v36  ;;  %v11493_v29 = vld [vmem:[#allocation150_spill] sm:$0xff]  ;;  %v2672_v36 = vadd.f32 %v11494_v55, %v2645_v2  ;;  %v8794_v2 = vmul.f32 %v11409_v37, %v8746_v4  ;;  %v11504_v55 = vld [vmem:[#allocation188_spill] sm:$0xff] }
 0x5ad   : > { %11488 = vst [vmem:[#allocation264_spill] sm:$0xff] %v8754_v53  ;;  %11489 = vst [vmem:[#allocation265_spill] sm:$0xff] %v8757_v56  ;;  %v2646_v50 = vadd.f32 %v2638_v28, %v11493_v29  ;;  %v11496_v26 = vld [vmem:[#allocation166_spill] sm:$0xff]  ;;  %v8790_v28 = vmul.f32 %v11408_v20, %v8744_v0  ;;  %v8802_v29 = vmul.f32 %v7643_v32, %v8714_v7 }
 0x5ae   : > { %11490 = vst [vmem:[#allocation266_spill] sm:$0xff] %v8760_v17  ;;  %11491 = vst [vmem:[#allocation267_spill] sm:$0xff] %v8764_v59  ;;  %v3037_v56 = vadd.f32 %v11496_v26, %v3010_v12  ;;  %v8798_v12 = vmul.f32 %v11414_v63, %v8748_v21  ;;  %v3402_v26 = vadd.f32 %v11504_v55, %v3375_v41  ;;  %v2551_v17 = vmul.f32 0.03125, %v2541_v15  ;;  %v8836_v55 = vld [vmem:[#allocation4 + $0xad] sm:$0xff]  ;;  %v4269_v20 = vld [vmem:[#allocation3 + $0x69] sm:$0xff] }
 0x5af   : > { %11492 = vst [vmem:[#allocation268_spill] sm:$0xff] %v8767_v30  ;;  %11495 = vst [vmem:[#allocation150_spill] sm:$0xff] %v8773_v1  ;;  %v11505_v30 = vld [vmem:[#allocation244_spill] sm:$0xff]  ;;  %v8808_v59 = vmul.f32 %v11400_v48, %v8728_v31  ;;  %v8812_v53 = vmul.f32 %v11412_v34, %v8730_v33  ;;  %v8821_v41 = vmul.f32 %v11416_v23, %v8744_v0  ;;  %v9133_v38 = vld [vmem:[#allocation3 + $0xae] sm:$0xff] }
 0x5b0   : > { %11497 = vst [vmem:[#allocation151_spill] sm:$0xff] %v8778_v19  ;;  %11498 = vst [vmem:[#allocation166_spill] sm:$0xff] %v8782_v16  ;;  %v4130_v40 = vadd.f32 %v11505_v30, %v4103_v58  ;;  %v8825_v15 = vmul.f32 %v11419_v49, %v8746_v4  ;;  %v8829_v30 = vmul.f32 %v11420_v10, %v8748_v21 }
 0x5b1   : > { %11499 = vst [vmem:[#allocation269_spill] sm:$0xff] %v8786_v8  ;;  %11500 = vst [vmem:[#allocation270_spill] sm:$0xff] %v8790_v28  ;;  %v8833_v58 = vmul.f32 %v11394_v5, %v8714_v7  ;;  %v2543_v28 = vpop.xlane.xlu0 %2542 }
 0x5b2   : > { %11501 = vst [vmem:[#allocation271_spill] sm:$0xff] %v8794_v2  ;;  %11502 = vst [vmem:[#allocation272_spill] sm:$0xff] %v8798_v12  ;;  %v8816_v12 = vmul.f32 %v11415_v18, %v8732_v25  ;;  %v11509_v2 = vld [vmem:[#allocation216_spill] sm:$0xff]  ;;  %v4155_v8 = vadd.f32 %v8648_v27, %v4130_v40 }
 0x5b3   : > { %11503 = vst [vmem:[#allocation273_spill] sm:$0xff] %v8802_v29  ;;  %11506 = vst [vmem:[#allocation188_spill] sm:$0xff] %v8808_v59  ;;  %v3765_v63 = vadd.f32 %v11509_v2, %v3738_v43  ;;  %v8838_v43 = vld [vmem:[#allocation4 + $0xae] sm:$0xff]  ;;  %v3062_v29 = vadd.f32 %v8571_v11, %v3037_v56  ;;  %v8882_v11 = vmul.f32 %v11458_v35, %v8714_v7  ;;  %v2552_v56 = vmul.f32 0.03125, %v2543_v28 }
 0x5b4   : > { %11507 = vst [vmem:[#allocation244_spill] sm:$0xff] %v8812_v53  ;;  %11508 = vst [vmem:[#allocation274_spill] sm:$0xff] %v8816_v12  ;;  %v8840_v2 = vld [vmem:[#allocation4 + $0xaf] sm:$0xff]  ;;  %v8927_v28 = vmul.f32 %v11406_v61, %v8838_v43 }
 0x5b5   : > { %11510 = vst [vmem:[#allocation216_spill] sm:$0xff] %v8821_v41  ;;  %11511 = vst [vmem:[#allocation275_spill] sm:$0xff] %v8825_v15  ;;  %v8844_v41 = vmul.f32 %v11406_v61, %v8728_v31  ;;  %v8848_v15 = vmul.f32 %v11418_v51, %v8730_v33  ;;  %v8860_v12 = vld [vmem:[#allocation4 + $0xb1] sm:$0xff]  ;;  %v11520_v53 = vld [vmem:[#allocation152_spill] sm:$0xff]  ;;  %v3790_v37 = vadd.f32 %v8624_v47, %v3765_v63  ;;  %v2545_v1 = vpop.xlane.xlu0 %2544 }
 0x5b6   : > { %11512 = vst [vmem:[#allocation276_spill] sm:$0xff] %v8829_v30  ;;  %11513 = vst [vmem:[#allocation277_spill] sm:$0xff] %v8833_v58  ;;  %v8852_v30 = vmul.f32 %v11422_v62, %v8732_v25  ;;  %v8858_v58 = vld [vmem:[#allocation4 + $0xb0] sm:$0xff]  ;;  %v2673_v59 = vadd.f32 %v11520_v53, %v2646_v50  ;;  %v8894_v63 = vmul.f32 %v11412_v34, %v8840_v2  ;;  %v11531_v40 = vld [vmem:[#allocation248_spill] sm:$0xff] }
 0x5b7   : > { %2585 = vst.msk [vmem:[#allocation3 + $0xc8] sm:$0xff] %vm432_vm4, %v2551_v17  ;;  %11514 = vst [vmem:[#allocation278_spill] sm:$0xff] %v8840_v2  ;;  %v8856_v17 = vmul.f32 %v11425_v39, %v8744_v0  ;;  %v8876_v53 = vld [vmem:[#allocation4 + $0xb2] sm:$0xff]  ;;  %v8898_v47 = vmul.f32 %v11415_v18, %v8858_v58  ;;  %v8902_v27 = vmul.f32 %v11416_v23, %v8860_v12  ;;  %v11559_v18 = vld [vmem:[#allocation136_spill] sm:$0xff] }
 0x5b8   : > { %11515 = vst [vmem:[#allocation279_spill] sm:$0xff] %v8844_v41  ;;  %11516 = vst [vmem:[#allocation280_spill] sm:$0xff] %v8848_v15  ;;  %v2697_v41 = vadd.f32 %v8546_v60, %v2672_v36  ;;  %v3427_v15 = vadd.f32 %v8597_v42, %v3402_v26  ;;  %v8878_v60 = vld [vmem:[#allocation4 + $0xb3] sm:$0xff]  ;;  %v8886_v42 = vmul.f32 %v7643_v32, %v8836_v55  ;;  %v8979_v32 = vld [vmem:[#allocation4 + $0xc9] sm:$0xff] }
 0x5b9   : > { %11517 = vst [vmem:[#allocation281_spill] sm:$0xff] %v8852_v30  ;;  %11518 = vst [vmem:[#allocation282_spill] sm:$0xff] %v8856_v17  ;;  %v8868_v30 = vmul.f32 %v11427_v14, %v8746_v4  ;;  %v8872_v17 = vmul.f32 %v11428_v45, %v8748_v21  ;;  %v8890_v36 = vmul.f32 %v11400_v48, %v8838_v43  ;;  %v4583_v21 = vld [vmem:[#allocation3 + $0x80] sm:$0xff] }
 0x5ba   : > { %11519 = vst [vmem:[#allocation283_spill] sm:$0xff] %v8858_v58  ;;  %11523 = vst [vmem:[#allocation285_spill] sm:$0xff] %v8876_v53  ;;  %v4182_v50 = vadd.f32 %v11531_v40, %v4155_v8  ;;  %v2698_v26 = vadd.f32 %v8662_v9, %v2673_v59  ;;  %v8921_v8 = vmul.f32 %v11394_v5, %v8836_v55  ;;  %v11539_v9 = vld [vmem:[#allocation220_spill] sm:$0xff] }
 0x5bb   : > { %11521 = vst [vmem:[#allocation152_spill] sm:$0xff] %v8868_v30  ;;  %11522 = vst [vmem:[#allocation284_spill] sm:$0xff] %v8872_v17  ;;  %v11532_v17 = vld [vmem:[#allocation153_spill] sm:$0xff]  ;;  %v3817_v59 = vadd.f32 %v11539_v9, %v3790_v37  ;;  %v8943_v37 = vld [vmem:[#allocation4 + $0xc7] sm:$0xff]  ;;  %v8955_v9 = vmul.f32 %v11427_v14, %v8876_v53 }
 0x5bc   : > { %11524 = vst [vmem:[#allocation286_spill] sm:$0xff] %v8878_v60  ;;  %11525 = vst [vmem:[#allocation287_spill] sm:$0xff] %v8882_v11  ;;  %v2724_v30 = vadd.f32 %v11532_v17, %v2697_v41  ;;  %v11533_v11 = vld [vmem:[#allocation169_spill] sm:$0xff]  ;;  %v8935_v41 = vmul.f32 %v11422_v62, %v8858_v58  ;;  %v8941_v17 = vld [vmem:[#allocation4 + $0xc6] sm:$0xff] }
 0x5bd   : > { %11526 = vst [vmem:[#allocation288_spill] sm:$0xff] %v8886_v42  ;;  %11527 = vst [vmem:[#allocation289_spill] sm:$0xff] %v8890_v36  ;;  %v3089_v36 = vadd.f32 %v11533_v11, %v3062_v29  ;;  %v11534_v42 = vld [vmem:[#allocation192_spill] sm:$0xff]  ;;  %v8931_v29 = vmul.f32 %v11418_v51, %v8840_v2 }
 0x5be   : > { %11528 = vst [vmem:[#allocation290_spill] sm:$0xff] %v8894_v63  ;;  %11529 = vst [vmem:[#allocation291_spill] sm:$0xff] %v8898_v47  ;;  %v3454_v34 = vadd.f32 %v11534_v42, %v3427_v15  ;;  %v8909_v63 = vld [vmem:[#allocation4 + $0xc5] sm:$0xff]  ;;  %v8913_v47 = vmul.f32 %v11419_v49, %v8876_v53  ;;  %v8939_v15 = vmul.f32 %v11425_v39, %v8860_v12  ;;  %v8947_v42 = vld [vmem:[#allocation3 + $0xc5] sm:$0xff] }
 0x5bf   : > { %11530 = vst [vmem:[#allocation292_spill] sm:$0xff] %v8902_v27  ;;  %11535 = vst [vmem:[#allocation248_spill] sm:$0xff] %v8909_v63  ;;  %v8917_v27 = vmul.f32 %v11420_v10, %v8878_v60  ;;  %v8945_v11 = vld [vmem:[#allocation4 + $0xc8] sm:$0xff]  ;;  %v8949_v40 = vld [vmem:[#allocation3 + $0xc6] sm:$0xff] }
 0x5c0   : > { %11536 = vst [vmem:[#allocation153_spill] sm:$0xff] %v8913_v47  ;;  %11538 = vst [vmem:[#allocation192_spill] sm:$0xff] %v8921_v8  ;;  %v8971_v8 = vld [vmem:[#allocation3 + $0xc9] sm:$0xff]  ;;  %v11557_v47 = vld [vmem:[#allocation128_spill] sm:$0xff] }
 0x5c1   : > { %11537 = vst [vmem:[#allocation169_spill] sm:$0xff] %v8917_v27  ;;  %2586 = vst.msk [vmem:[#allocation3 + $0xe0] sm:$0xff] %vm432_vm4, %v2552_v56  ;;  %v8951_v56 = vld [vmem:[#allocation3 + $0xc7] sm:$0xff]  ;;  %v11558_v49 = vld [vmem:[#allocation140_spill] sm:$0xff] }
 0x5c2   : > { %11540 = vst [vmem:[#allocation220_spill] sm:$0xff] %v8927_v28  ;;  %11541 = vst [vmem:[#allocation293_spill] sm:$0xff] %v8931_v29  ;;  %v8967_v29 = vmul.f32 %v11394_v5, %v8909_v63  ;;  %v8969_v28 = vld [vmem:[#allocation3 + $0xc8] sm:$0xff]  ;;  %v3114_v23 = vadd.f32 %v11558_v49, %v3089_v36  ;;  %v8989_v5 = vmul.f32 %v11418_v51, %v8943_v37  ;;  %v4584_v53 = vld [vmem:[#allocation3 + $0x98] sm:$0xff] }
 0x5c3   : > { %11542 = vst [vmem:[#allocation294_spill] sm:$0xff] %v8935_v41  ;;  %11543 = vst [vmem:[#allocation295_spill] sm:$0xff] %v8939_v15  ;;  %v8959_v41 = vmul.f32 %v11428_v45, %v8878_v60  ;;  %v8963_v15 = vmul.f32 %v11458_v35, %v8836_v55  ;;  %v11556_v27 = vld [vmem:[#allocation154_spill] sm:$0xff]  ;;  %v4207_v49 = vadd.f32 %v8654_v52, %v4182_v50  ;;  %v11574_v52 = vld [vmem:[#allocation88_spill] sm:$0xff] }
 0x5c4   : > { %11544 = vst [vmem:[#allocation296_spill] sm:$0xff] %v8941_v17  ;;  %11545 = vst [vmem:[#allocation297_spill] sm:$0xff] %v8943_v37  ;;  %v2725_v10 = vadd.f32 %v11556_v27, %v2698_v26  ;;  %v8977_v48 = vld [vmem:[#allocation3 + $0xca] sm:$0xff]  ;;  %v9013_v50 = vmul.f32 %v11574_v52, %v8969_v28  ;;  %v11591_v37 = vld [vmem:[#allocation172_spill] sm:$0xff] }
 0x5c5   : > { %11546 = vst [vmem:[#allocation298_spill] sm:$0xff] %v8945_v11  ;;  %11547 = vst [vmem:[#allocation299_spill] sm:$0xff] %v8947_v42  ;;  %v11565_v27 = vld [vmem:[#allocation143_spill] sm:$0xff]  ;;  %v11568_v36 = vld [vmem:[#allocation86_spill] sm:$0xff]  ;;  %v9069_v54 = vadd.f32 %v11591_v37, %v3114_v23 }
 0x5c6   : > { %11548 = vst [vmem:[#allocation300_spill] sm:$0xff] %v8949_v40  ;;  %11549 = vst [vmem:[#allocation301_spill] sm:$0xff] %v8951_v56  ;;  %v11570_v26 = vld [vmem:[#allocation87_spill] sm:$0xff] }
 0x5c7   : > { %11550 = vst [vmem:[#allocation302_spill] sm:$0xff] %v8955_v9  ;;  %11551 = vst [vmem:[#allocation303_spill] sm:$0xff] %v8959_v41  ;;  %v2749_v9 = vadd.f32 %v11557_v47, %v2724_v30  ;;  %v3479_v41 = vadd.f32 %v11559_v18, %v3454_v34  ;;  %v3842_v30 = vadd.f32 %v11565_v27, %v3817_v59  ;;  %v11566_v34 = vld [vmem:[#allocation85_spill] sm:$0xff]  ;;  %v4427_v37 = vld [vmem:[#allocation3 + $0x95] sm:$0xff] }
 0x5c8   : > { %11552 = vst [vmem:[#allocation304_spill] sm:$0xff] %v8963_v15  ;;  %11553 = vst [vmem:[#allocation305_spill] sm:$0xff] %v8967_v29  ;;  %v8981_v15 = vld [vmem:[#allocation4 + $0xca] sm:$0xff]  ;;  %v8985_v29 = vmul.f32 %v11406_v61, %v8941_v17  ;;  %v8995_v18 = vmul.f32 %v11566_v34, %v8947_v42  ;;  %v8999_v47 = vmul.f32 %v11568_v36, %v8949_v40 }
 0x5c9   : > { %11554 = vst [vmem:[#allocation306_spill] sm:$0xff] %v8969_v28  ;;  %11555 = vst [vmem:[#allocation307_spill] sm:$0xff] %v8971_v8  ;;  %v9003_v61 = vmul.f32 %v11570_v26, %v8951_v56  ;;  %v11576_v59 = vld [vmem:[#allocation89_spill] sm:$0xff] }
 0x5ca   : > { %11560 = vst [vmem:[#allocation154_spill] sm:$0xff] %v8977_v48  ;;  %11561 = vst [vmem:[#allocation128_spill] sm:$0xff] %v8979_v32  ;;  %v9017_v27 = vmul.f32 %v11576_v59, %v8971_v8  ;;  %v4479_v17 = vld [vmem:[#allocation3 + $0x7e] sm:$0xff] }
 0x5cb   : > { %11562 = vst [vmem:[#allocation140_spill] sm:$0xff] %v8981_v15  ;;  %11563 = vst [vmem:[#allocation136_spill] sm:$0xff] %v8985_v29  ;;  %v9005_v29 = vld [vmem:[#allocation4 + $0xcb] sm:$0xff] }
 0x5cc   : > { %11564 = vst [vmem:[#allocation308_spill] sm:$0xff] %v8989_v5  ;;  %11567 = vst [vmem:[#allocation143_spill] sm:$0xff] %v8995_v18  ;;  %v9009_v5 = vmul.f32 %v11422_v62, %v8945_v11  ;;  %v11580_v18 = vld [vmem:[#allocation132_spill] sm:$0xff] }
 0x5cd   : > { %11569 = vst [vmem:[#allocation85_spill] sm:$0xff] %v8999_v47  ;;  %11571 = vst [vmem:[#allocation86_spill] sm:$0xff] %v9003_v61  ;;  %v11578_v47 = vld [vmem:[#allocation99_spill] sm:$0xff]  ;;  %v9024_v61 = vadd.f32 %v11580_v18, %v4207_v49  ;;  %v9028_v62 = vld [vmem:[#allocation3 + $0x99] sm:$0xff]  ;;  %v9044_v49 = vmul.f32 %v11427_v14, %v8981_v15 }
 0x5ce   : > { %11572 = vst [vmem:[#allocation87_spill] sm:$0xff] %v9005_v29  ;;  %11573 = vst [vmem:[#allocation309_spill] sm:$0xff] %v9009_v5  ;;  %v9021_v51 = vmul.f32 %v11578_v47, %v8947_v42  ;;  %v11582_v5 = vld [vmem:[#allocation90_spill] sm:$0xff]  ;;  %v9046_v18 = vld [vmem:[#allocation3 + $0xb1] sm:$0xff] }
 0x5cf   : > { %11575 = vst [vmem:[#allocation88_spill] sm:$0xff] %v9013_v50  ;;  %11577 = vst [vmem:[#allocation89_spill] sm:$0xff] %v9017_v27  ;;  %v9032_v11 = vmul.f32 %v11582_v5, %v8977_v48  ;;  %v11584_v50 = vld [vmem:[#allocation100_spill] sm:$0xff]  ;;  %v9040_v27 = vmul.f32 %v11425_v39, %v8979_v32  ;;  %v9059_v39 = vadd.f32 %v8665_v46, %v2725_v10  ;;  %v4373_v15 = vld [vmem:[#allocation3 + $0x6b] sm:$0xff] }
 0x5d0   : > { %11579 = vst [vmem:[#allocation310_spill] sm:$0xff] %v9021_v51  ;;  %11581 = vst [vmem:[#allocation132_spill] sm:$0xff] %v9024_v61  ;;  %v9036_v16 = vmul.f32 %v11584_v50, %v8949_v40  ;;  %v4321_v61 = vld [vmem:[#allocation3 + $0x6a] sm:$0xff]  ;;  %v9048_v51 = vld [vmem:[#allocation3 + $0x82] sm:$0xff] }
 0x5d1   : > { %11583 = vst [vmem:[#allocation311_spill] sm:$0xff] %v9032_v11  ;;  %11586 = vst [vmem:[#allocation312_spill] sm:$0xff] %v9040_v27  ;;  %v9052_v11 = vmul.f32 %v11428_v45, %v9005_v29  ;;  %v11590_v27 = vld [vmem:[#allocation155_spill] sm:$0xff]  ;;  %v11592_v45 = vld [vmem:[#allocation196_spill] sm:$0xff] }
 0x5d2   : > { %11585 = vst [vmem:[#allocation100_spill] sm:$0xff] %v9036_v16  ;;  %11587 = vst [vmem:[#allocation313_spill] sm:$0xff] %v9044_v49  ;;  %v9056_v16 = vmul.f32 %v11458_v35, %v8909_v63  ;;  %v9062_v32 = vadd.f32 %v11590_v27, %v2749_v9  ;;  %v9064_v49 = vld [vmem:[#allocation3 + $0x9a] sm:$0xff]  ;;  %v9066_v14 = vld [vmem:[#allocation3 + $0xb2] sm:$0xff] }
 0x5d3   : > { %11588 = vst [vmem:[#allocation314_spill] sm:$0xff] %v9052_v11  ;;  %v9072_v11 = vadd.f32 %v11592_v45, %v3479_v41  ;;  %v11593_v29 = vld [vmem:[#allocation224_spill] sm:$0xff]  ;;  %v4374_v46 = vld [vmem:[#allocation3 + $0x83] sm:$0xff] }
 0x5d4   : > { %11589 = vst [vmem:[#allocation315_spill] sm:$0xff] %v9056_v16  ;;  %v9075_v35 = vadd.f32 %v11593_v29, %v3842_v30  ;;  %v11594_v16 = vld [vmem:[#allocation106_spill] sm:$0xff]  ;;  %v9080_v9 = vld [vmem:[#allocation3 + $0x9b] sm:$0xff]  ;;  %v9082_v27 = vld [vmem:[#allocation3 + $0xb3] sm:$0xff] }
 0x5d5   : > { %v9078_v10 = vmul.f32 %v11594_v16, %v4269_v20  ;;  %11596 = vst [vmem:[#allocation172_spill] sm:$0xff] %v9080_v9  ;;  %11597 = vst [vmem:[#allocation196_spill] sm:$0xff] %v9082_v27  ;;  %v9086_v19 = vmul.f32 %v11594_v16, %v9026_v6  ;;  %v9090_v23 = vmul.f32 %v11594_v16, %v9028_v62  ;;  %v9100_v29 = vld [vmem:[#allocation3 + $0xcb] sm:$0xff]  ;;  %v4426_v41 = vld [vmem:[#allocation3 + $0x7d] sm:$0xff] }
 0x5d6   : > { %v9094_v45 = vmul.f32 %v11594_v16, %v9046_v18  ;;  %v9098_v20 = vmul.f32 %v11594_v16, %v8971_v8  ;;  %11602 = vst [vmem:[#allocation319_spill] sm:$0xff] %v9100_v29  ;;  %v11603_v30 = vld [vmem:[#allocation107_spill] sm:$0xff] }
 0x5d7   : > { %11595 = vst [vmem:[#allocation155_spill] sm:$0xff] %v9078_v10  ;;  %11598 = vst [vmem:[#allocation224_spill] sm:$0xff] %v9086_v19  ;;  %v9103_v10 = vmul.f32 %v11603_v30, %v4321_v61  ;;  %v9107_v19 = vmul.f32 %v11603_v30, %v9048_v51  ;;  %v9121_v61 = vmul.f32 %v11603_v30, %v8977_v48 }
 0x5d8   : > { %11599 = vst [vmem:[#allocation316_spill] sm:$0xff] %v9090_v23  ;;  %11600 = vst [vmem:[#allocation317_spill] sm:$0xff] %v9094_v45  ;;  %v9111_v23 = vmul.f32 %v11603_v30, %v9064_v49  ;;  %v9115_v45 = vmul.f32 %v11603_v30, %v9066_v14 }
 0x5d9   : > { %11601 = vst [vmem:[#allocation318_spill] sm:$0xff] %v9098_v20  ;;  %11604 = vst [vmem:[#allocation320_spill] sm:$0xff] %v9103_v10  ;;  %v9117_v20 = vld [vmem:[#allocation3 + $0xad] sm:$0xff]  ;;  %v11609_v10 = vld [vmem:[#allocation108_spill] sm:$0xff] }
 0x5da   : > { %11605 = vst [vmem:[#allocation321_spill] sm:$0xff] %v9107_v19  ;;  %11606 = vst [vmem:[#allocation322_spill] sm:$0xff] %v9111_v23  ;;  %v9124_v63 = vmul.f32 %v11609_v10, %v4373_v15  ;;  %v9127_v19 = vmul.f32 %v11609_v10, %v4374_v46  ;;  %v9131_v23 = vmul.f32 %v11609_v10, %v9080_v9  ;;  %v11615_v15 = vld [vmem:[#allocation109_spill] sm:$0xff] }
 0x5db   : > { %11607 = vst [vmem:[#allocation323_spill] sm:$0xff] %v9115_v45  ;;  %11608 = vst [vmem:[#allocation324_spill] sm:$0xff] %v9121_v61  ;;  %v4531_v45 = vld [vmem:[#allocation3 + $0x7f] sm:$0xff]  ;;  %v9137_v60 = vmul.f32 %v11609_v10, %v9082_v27  ;;  %v9141_v61 = vmul.f32 %v11609_v10, %v9100_v29  ;;  %v9147_v46 = vmul.f32 %v11615_v15, %v4427_v37  ;;  %v11621_v29 = vld [vmem:[#allocation110_spill] sm:$0xff] }
 0x5dc   : > { %11610 = vst [vmem:[#allocation325_spill] sm:$0xff] %v9124_v63  ;;  %11611 = vst [vmem:[#allocation326_spill] sm:$0xff] %v9127_v19  ;;  %v9144_v63 = vmul.f32 %v11615_v15, %v4426_v41  ;;  %v4532_v19 = vld [vmem:[#allocation3 + $0x97] sm:$0xff]  ;;  %v9153_v9 = vmul.f32 %v11615_v15, %v9117_v20  ;;  %v9163_v41 = vmul.f32 %v11621_v29, %v4480_v13 }
 0x5dd   : > { %11612 = vst [vmem:[#allocation327_spill] sm:$0xff] %v9131_v23  ;;  %11613 = vst [vmem:[#allocation328_spill] sm:$0xff] %v9137_v60  ;;  %v9149_v23 = vld [vmem:[#allocation3 + $0xaf] sm:$0xff]  ;;  %v9157_v60 = vmul.f32 %v11615_v15, %v8947_v42 }
 0x5de   : > { %11614 = vst [vmem:[#allocation329_spill] sm:$0xff] %v9141_v61  ;;  %11616 = vst [vmem:[#allocation330_spill] sm:$0xff] %v9144_v63  ;;  %v9160_v61 = vmul.f32 %v11621_v29, %v4479_v17  ;;  %v9171_v63 = vmul.f32 %v11621_v29, %v8949_v40  ;;  %v11626_v27 = vld [vmem:[#allocation111_spill] sm:$0xff] }
 0x5df   : > { %11617 = vst [vmem:[#allocation331_spill] sm:$0xff] %v9147_v46  ;;  %11618 = vst [vmem:[#allocation332_spill] sm:$0xff] %v9149_v23  ;;  %v9167_v46 = vmul.f32 %v11621_v29, %v9133_v38  ;;  %v9176_v42 = vld [vmem:[#allocation3 + $0xb0] sm:$0xff]  ;;  %v9179_v17 = vmul.f32 %v11626_v27, %v4532_v19 }
 0x5e0   : > { %11619 = vst [vmem:[#allocation333_spill] sm:$0xff] %v9153_v9  ;;  %11620 = vst [vmem:[#allocation334_spill] sm:$0xff] %v9157_v60  ;;  %v9174_v9 = vmul.f32 %v11626_v27, %v4531_v45  ;;  %v2553_v60 = vmul.f32 0.03125, %v2545_v1  ;;  %v11634_v45 = vld [vmem:[#allocation35_spill] sm:$0xff] }
 0x5e1   : > { %11622 = vst [vmem:[#allocation335_spill] sm:$0xff] %v9160_v61  ;;  %11623 = vst [vmem:[#allocation336_spill] sm:$0xff] %v9163_v41  ;;  %v9183_v41 = vmul.f32 %v11626_v27, %v9149_v23  ;;  %v11632_v61 = vld [vmem:[#allocation114_spill] sm:$0xff]  ;;  %v2615_v1 = vmul.f32 %v9117_v20, %v11634_v45 }
 0x5e2   : > { %11624 = vst [vmem:[#allocation337_spill] sm:$0xff] %v9167_v46  ;;  %11625 = vst [vmem:[#allocation338_spill] sm:$0xff] %v9171_v63  ;;  %v9187_v46 = vmul.f32 %v11626_v27, %v8951_v56  ;;  %v9190_v63 = vmul.f32 %v11632_v61, %v4583_v21  ;;  %v9201_v40 = vmul.f32 %v11632_v61, %v4584_v53 }
 0x5e3   : > { %11627 = vst [vmem:[#allocation339_spill] sm:$0xff] %v9174_v9  ;;  %11628 = vst [vmem:[#allocation340_spill] sm:$0xff] %v9176_v42  ;;  %v2614_v9 = vmul.f32 %v4427_v37, %v11634_v45  ;;  %v9205_v21 = vmul.f32 %v11632_v61, %v9176_v42  ;;  %v11638_v37 = vld [vmem:[#allocation115_spill] sm:$0xff] }
 0x5e4   : > { %11629 = vst [vmem:[#allocation341_spill] sm:$0xff] %v9179_v17  ;;  %11630 = vst [vmem:[#allocation342_spill] sm:$0xff] %v9183_v41  ;;  %v2639_v17 = vmul.f32 %v8714_v7, %v7495_v24  ;;  %v2640_v41 = vmul.f32 %v8836_v55, %v7495_v24  ;;  %v9213_v45 = vmul.f32 %v11638_v37, %v9026_v6  ;;  %v11645_v6 = vld [vmem:[#allocation156_spill] sm:$0xff] }
 0x5e5   : > { %11631 = vst [vmem:[#allocation343_spill] sm:$0xff] %v9187_v46  ;;  %11633 = vst [vmem:[#allocation344_spill] sm:$0xff] %v9190_v63  ;;  %v9217_v7 = vmul.f32 %v11638_v37, %v9028_v62  ;;  %v9221_v24 = vmul.f32 %v11638_v37, %v9046_v18 }
 0x5e6   : > { %2587 = vst.msk [vmem:[#allocation3 + $0xf8] sm:$0xff] %vm432_vm4, %v2553_v60  ;;  %11635 = vst [vmem:[#allocation35_spill] sm:$0xff] %v9201_v40  ;;  %v9209_v60 = vmul.f32 %v11632_v61, %v8969_v28  ;;  %v2647_v40 = vadd.f32 %v2639_v17, %v2614_v9  ;;  %v2648_v63 = vadd.f32 %v2640_v41, %v2615_v1  ;;  %v11646_v28 = vld [vmem:[#allocation139_spill] sm:$0xff]  ;;  %v11649_v41 = vld [vmem:[#allocation34_spill] sm:$0xff] }
 0x5e7   : > { %11636 = vst [vmem:[#allocation345_spill] sm:$0xff] %v9205_v21  ;;  %11639 = vst [vmem:[#allocation347_spill] sm:$0xff] %v9213_v45  ;;  %v9225_v21 = vmul.f32 %v11638_v37, %v8971_v8  ;;  %v2777_v45 = vadd.f32 %v11645_v6, %v9059_v39  ;;  %v2666_v17 = vmul.f32 %v4480_v13, %v11649_v41  ;;  %v11651_v39 = vld [vmem:[#allocation135_spill] sm:$0xff] }
 0x5e8   : > { %11637 = vst [vmem:[#allocation346_spill] sm:$0xff] %v9209_v60  ;;  %11640 = vst [vmem:[#allocation348_spill] sm:$0xff] %v9217_v7  ;;  %v11643_v60 = vld [vmem:[#allocation118_spill] sm:$0xff]  ;;  %v2801_v7 = vadd.f32 %v11646_v28, %v9062_v32  ;;  %v9252_v32 = vadd.f32 %v11651_v39, %v9069_v54  ;;  %v11652_v28 = vld [vmem:[#allocation131_spill] sm:$0xff] }
 0x5e9   : > { %11641 = vst [vmem:[#allocation349_spill] sm:$0xff] %v9221_v24  ;;  %11642 = vst [vmem:[#allocation350_spill] sm:$0xff] %v9225_v21  ;;  %v9229_v46 = vmul.f32 %v11643_v60, %v9048_v51  ;;  %v9237_v56 = vmul.f32 %v11643_v60, %v9064_v49  ;;  %v9241_v9 = vmul.f32 %v11643_v60, %v9066_v14  ;;  %v11656_v21 = vld [vmem:[#allocation36_spill] sm:$0xff]  ;;  %v11657_v39 = vld [vmem:[#allocation157_spill] sm:$0xff] }
 0x5ea   : > { %v2667_v51 = vmul.f32 %v9133_v38, %v11649_v41  ;;  %v9248_v1 = vmul.f32 %v11643_v60, %v8977_v48  ;;  %v9256_v6 = vadd.f32 %v11652_v28, %v9072_v11  ;;  %v2674_v13 = vadd.f32 %v2666_v17, %v2647_v40  ;;  %v11659_v40 = vld [vmem:[#allocation38_spill] sm:$0xff] }
 0x5eb   : > { %11644 = vst [vmem:[#allocation351_spill] sm:$0xff] %v9229_v46  ;;  %11647 = vst [vmem:[#allocation156_spill] sm:$0xff] %v9237_v56  ;;  %v11654_v56 = vld [vmem:[#allocation138_spill] sm:$0xff]  ;;  %v2691_v41 = vmul.f32 %v8728_v31, %v7502_v57  ;;  %v2718_v24 = vmul.f32 %v4532_v19, %v11656_v21  ;;  %v2719_v54 = vmul.f32 %v9149_v23, %v11656_v21 }
 0x5ec   : > { %11648 = vst [vmem:[#allocation139_spill] sm:$0xff] %v9241_v9  ;;  %11650 = vst [vmem:[#allocation34_spill] sm:$0xff] %v9248_v1  ;;  %v9260_v9 = vadd.f32 %v11654_v56, %v9075_v35  ;;  %v2675_v46 = vadd.f32 %v2667_v51, %v2648_v63  ;;  %v2692_v1 = vmul.f32 %v8838_v43, %v7502_v57  ;;  %v11660_v51 = vld [vmem:[#allocation41_spill] sm:$0xff] }
 0x5ed   : > { %11653 = vst [vmem:[#allocation135_spill] sm:$0xff] %v9256_v6  ;;  %v2802_v11 = vadd.f32 %v8669_v3, %v2777_v45  ;;  %v2828_v28 = vadd.f32 %v11657_v39, %v2801_v7  ;;  %v11658_v6 = vld [vmem:[#allocation37_spill] sm:$0xff]  ;;  %v2770_v31 = vmul.f32 %v4584_v53, %v11659_v40  ;;  %v2771_v57 = vmul.f32 %v9176_v42, %v11659_v40  ;;  %v11661_v45 = vld [vmem:[#allocation44_spill] sm:$0xff]  ;;  %v11662_v42 = vld [vmem:[#allocation158_spill] sm:$0xff] }
 0x5ee   : > { %11655 = vst [vmem:[#allocation131_spill] sm:$0xff] %v9260_v9  ;;  %v2743_v35 = vmul.f32 %v8730_v33, %v11658_v6  ;;  %v2744_v63 = vmul.f32 %v8840_v2, %v11658_v6  ;;  %v3702_v56 = vld [vmem:[#allocation3 + $0xf5] sm:$0xff]  ;;  %v2795_v21 = vmul.f32 %v8732_v25, %v11660_v51  ;;  %v2796_v3 = vmul.f32 %v8858_v58, %v11660_v51  ;;  %v11663_v58 = vld [vmem:[#allocation134_spill] sm:$0xff] }
 0x5ef   : > { %v3754_v19 = vld [vmem:[#allocation3 + $0xf6] sm:$0xff]  ;;  %v2822_v33 = vmul.f32 %v9028_v62, %v11661_v45  ;;  %v2823_v7 = vmul.f32 %v9046_v18, %v11661_v45  ;;  %v2699_v9 = vadd.f32 %v2691_v41, %v2674_v13  ;;  %v2700_v40 = vadd.f32 %v2692_v1, %v2675_v46  ;;  %v11664_v62 = vld [vmem:[#allocation47_spill] sm:$0xff] }
 0x5f0   : > { %v3806_v17 = vld [vmem:[#allocation3 + $0xf7] sm:$0xff]  ;;  %v2847_v48 = vmul.f32 %v8744_v0, %v11397_v22  ;;  %v2848_v25 = vmul.f32 %v8860_v12, %v11397_v22  ;;  %v2829_v51 = vadd.f32 %v11662_v42, %v2802_v11  ;;  %v2853_v2 = vadd.f32 %v11663_v58, %v2828_v28 }
 0x5f1   : > { %v3858_v6 = vld [vmem:[#allocation3 + $0xf8] sm:$0xff]  ;;  %v2874_v23 = vmul.f32 %v9064_v49, %v11664_v62  ;;  %v2875_v45 = vmul.f32 %v9066_v14, %v11664_v62  ;;  %v9297_v13 = vmul.f32 %v11566_v34, %v3702_v56  ;;  %v9300_v46 = vmul.f32 %v11568_v36, %v3754_v19  ;;  %v11673_v41 = vld [vmem:[#allocation91_spill] sm:$0xff] }
 0x5f2   : > { %v3910_v53 = vld [vmem:[#allocation3 + $0xf9] sm:$0xff]  ;;  %v9303_v0 = vmul.f32 %v11570_v26, %v3806_v17  ;;  %v9306_v22 = vmul.f32 %v11578_v47, %v3702_v56  ;;  %v9309_v58 = vmul.f32 %v11574_v52, %v3858_v6  ;;  %v9318_v1 = vmul.f32 %v11584_v50, %v3754_v19  ;;  %v11675_v28 = vld [vmem:[#allocation103_spill] sm:$0xff] }
 0x5f3   : > { %v3962_v39 = vld [vmem:[#allocation3 + $0xfa] sm:$0xff]  ;;  %11665 = vst [vmem:[#allocation138_spill] sm:$0xff] %v9297_v13  ;;  %11666 = vst [vmem:[#allocation36_spill] sm:$0xff] %v9300_v46  ;;  %v9312_v42 = vmul.f32 %v11576_v59, %v3910_v53  ;;  %v9324_v62 = vmul.f32 %v11675_v28, %v3806_v17  ;;  %v11680_v13 = vld [vmem:[#allocation163_spill] sm:$0xff] }
 0x5f4   : > { %v4014_v8 = vld [vmem:[#allocation3 + $0xfb] sm:$0xff]  ;;  %11667 = vst [vmem:[#allocation157_spill] sm:$0xff] %v9303_v0  ;;  %11668 = vst [vmem:[#allocation37_spill] sm:$0xff] %v9306_v22  ;;  %v9315_v49 = vmul.f32 %v11582_v5, %v3962_v39  ;;  %v2726_v22 = vadd.f32 %v2718_v24, %v2699_v9  ;;  %v2854_v47 = vadd.f32 %v11680_v13, %v2829_v51 }
 0x5f5   : > { %11669 = vst [vmem:[#allocation38_spill] sm:$0xff] %v9309_v58  ;;  %11670 = vst [vmem:[#allocation41_spill] sm:$0xff] %v9312_v42  ;;  %v9321_v11 = vmul.f32 %v11673_v41, %v4014_v8  ;;  %v11677_v0 = vld [vmem:[#allocation105_spill] sm:$0xff]  ;;  %v9330_v58 = vmul.f32 %v11594_v16, %v3910_v53  ;;  %v2727_v42 = vadd.f32 %v2719_v54, %v2700_v40  ;;  %v11686_v24 = vld [vmem:[#allocation160_spill] sm:$0xff] }
 0x5f6   : > { %11671 = vst [vmem:[#allocation44_spill] sm:$0xff] %v9315_v49  ;;  %11672 = vst [vmem:[#allocation158_spill] sm:$0xff] %v9318_v1  ;;  %v9327_v46 = vmul.f32 %v11677_v0, %v3858_v6  ;;  %v11681_v49 = vld [vmem:[#allocation159_spill] sm:$0xff]  ;;  %v9335_v1 = vmul.f32 %v11603_v30, %v3962_v39  ;;  %v2751_v16 = vadd.f32 %v2743_v35, %v2726_v22  ;;  %v11687_v54 = vld [vmem:[#allocation145_spill] sm:$0xff] }
 0x5f7   : > { %11674 = vst [vmem:[#allocation134_spill] sm:$0xff] %v9321_v11  ;;  %11676 = vst [vmem:[#allocation47_spill] sm:$0xff] %v9324_v62  ;;  %v2880_v5 = vadd.f32 %v11681_v49, %v2853_v2  ;;  %v9338_v11 = vmul.f32 %v11609_v10, %v4014_v8  ;;  %v9341_v62 = vmul.f32 %v11615_v15, %v3702_v56  ;;  %v11693_v22 = vld [vmem:[#allocation119_spill] sm:$0xff]  ;;  %v11839_v15 = vld [vmem:[#allocation221_spill] sm:$0xff] }
 0x5f8   : > { %11678 = vst [vmem:[#allocation91_spill] sm:$0xff] %v9327_v46  ;;  %11679 = vst [vmem:[#allocation103_spill] sm:$0xff] %v9330_v58  ;;  %v9344_v46 = vmul.f32 %v11621_v29, %v3754_v19  ;;  %v2752_v58 = vadd.f32 %v2744_v63, %v2727_v42  ;;  %v2881_v9 = vadd.f32 %v11686_v24, %v2854_v47  ;;  %v11692_v63 = vld [vmem:[#allocation161_spill] sm:$0xff]  ;;  %v3597_v10 = vld [vmem:[#allocation3 + $0xca] sm:$0xff] }
 0x5f9   : > { %11682 = vst [vmem:[#allocation105_spill] sm:$0xff] %v9335_v1  ;;  %11683 = vst [vmem:[#allocation163_spill] sm:$0xff] %v9338_v11  ;;  %v2905_v40 = vadd.f32 %v11687_v54, %v2880_v5  ;;  %v9349_v2 = vmul.f32 %v11626_v27, %v3806_v17  ;;  %v9352_v51 = vmul.f32 %v11632_v61, %v3858_v6  ;;  %v11695_v42 = vld [vmem:[#allocation121_spill] sm:$0xff]  ;;  %v11697_v54 = vld [vmem:[#allocation122_spill] sm:$0xff] }
 0x5fa   : > { %11684 = vst [vmem:[#allocation159_spill] sm:$0xff] %v9341_v62  ;;  %11685 = vst [vmem:[#allocation352_spill] sm:$0xff] %v9344_v46  ;;  %v9355_v13 = vmul.f32 %v11638_v37, %v3910_v53  ;;  %v9358_v49 = vmul.f32 %v11643_v60, %v3962_v39  ;;  %v2778_v11 = vadd.f32 %v2770_v31, %v2751_v16  ;;  %v11701_v16 = vld [vmem:[#allocation162_spill] sm:$0xff]  ;;  %v11822_v27 = vld [vmem:[#allocation76_spill] sm:$0xff] }
 0x5fb   : > { %11688 = vst [vmem:[#allocation160_spill] sm:$0xff] %v9349_v2  ;;  %11689 = vst [vmem:[#allocation145_spill] sm:$0xff] %v9352_v51  ;;  %v2779_v1 = vadd.f32 %v2771_v57, %v2752_v58  ;;  %v2906_v35 = vadd.f32 %v8675_v44, %v2881_v9  ;;  %v2932_v47 = vadd.f32 %v11692_v63, %v2905_v40  ;;  %v11699_v2 = vld [vmem:[#allocation123_spill] sm:$0xff]  ;;  %v11702_v57 = vld [vmem:[#allocation129_spill] sm:$0xff] }
 0x5fc   : > { %11690 = vst [vmem:[#allocation353_spill] sm:$0xff] %v9355_v13  ;;  %11691 = vst [vmem:[#allocation354_spill] sm:$0xff] %v9358_v49  ;;  %v9363_v5 = vmul.f32 %v11693_v22, %v4014_v8  ;;  %v9366_v24 = vmul.f32 %v11695_v42, %v3702_v56  ;;  %v9369_v51 = vmul.f32 %v11697_v54, %v3754_v19  ;;  %v11703_v58 = vld [vmem:[#allocation124_spill] sm:$0xff]  ;;  %v11705_v40 = vld [vmem:[#allocation125_spill] sm:$0xff] }
 0x5fd   : > { %v9372_v13 = vmul.f32 %v11699_v2, %v3806_v17  ;;  %v2803_v46 = vadd.f32 %v2795_v21, %v2778_v11  ;;  %v2804_v49 = vadd.f32 %v2796_v3, %v2779_v1  ;;  %v2933_v31 = vadd.f32 %v11701_v16, %v2906_v35  ;;  %v11707_v56 = vld [vmem:[#allocation126_spill] sm:$0xff]  ;;  %v11709_v19 = vld [vmem:[#allocation127_spill] sm:$0xff]  ;;  %v11711_v21 = vld [vmem:[#allocation46_spill] sm:$0xff] }
 0x5fe   : > { %11694 = vst [vmem:[#allocation161_spill] sm:$0xff] %v9363_v5  ;;  %11696 = vst [vmem:[#allocation355_spill] sm:$0xff] %v9366_v24  ;;  %v2957_v44 = vadd.f32 %v11702_v57, %v2932_v47  ;;  %v9377_v9 = vmul.f32 %v11703_v58, %v3858_v6  ;;  %v9380_v63 = vmul.f32 %v11705_v40, %v3910_v53  ;;  %v11712_v1 = vld [vmem:[#allocation164_spill] sm:$0xff]  ;;  %v11714_v6 = vld [vmem:[#allocation285_spill] sm:$0xff] }
 0x5ff   : > { %11698 = vst [vmem:[#allocation356_spill] sm:$0xff] %v9369_v51  ;;  %11700 = vst [vmem:[#allocation357_spill] sm:$0xff] %v9372_v13  ;;  %v9383_v5 = vmul.f32 %v11707_v56, %v3962_v39  ;;  %v9386_v51 = vmul.f32 %v11709_v19, %v4014_v8  ;;  %v2830_v17 = vadd.f32 %v2822_v33, %v2803_v46  ;;  %v11713_v35 = vld [vmem:[#allocation49_spill] sm:$0xff]  ;;  %v11715_v53 = vld [vmem:[#allocation51_spill] sm:$0xff] }
 0x600   : > { %11704 = vst [vmem:[#allocation162_spill] sm:$0xff] %v9377_v9  ;;  %11706 = vst [vmem:[#allocation129_spill] sm:$0xff] %v9380_v63  ;;  %v2831_v13 = vadd.f32 %v2823_v7, %v2804_v49  ;;  %v2958_v3 = vadd.f32 %v11711_v21, %v2933_v31  ;;  %v2985_v11 = vadd.f32 %v11712_v1, %v2957_v44  ;;  %v11716_v57 = vld [vmem:[#allocation172_spill] sm:$0xff]  ;;  %v11718_v33 = vld [vmem:[#allocation165_spill] sm:$0xff] }
 0x601   : > { %11708 = vst [vmem:[#allocation358_spill] sm:$0xff] %v9383_v5  ;;  %11710 = vst [vmem:[#allocation359_spill] sm:$0xff] %v9386_v51  ;;  %v2899_v47 = vmul.f32 %v8746_v4, %v11713_v35  ;;  %v2900_v16 = vmul.f32 %v11714_v6, %v11713_v35  ;;  %v2926_v63 = vmul.f32 %v11716_v57, %v11715_v53  ;;  %v11717_v39 = vld [vmem:[#allocation196_spill] sm:$0xff]  ;;  %v11719_v46 = vld [vmem:[#allocation149_spill] sm:$0xff] }
 0x602   : > { %v2927_v5 = vmul.f32 %v11717_v39, %v11715_v53  ;;  %v2855_v8 = vadd.f32 %v2847_v48, %v2830_v17  ;;  %v2856_v51 = vadd.f32 %v2848_v25, %v2831_v13  ;;  %v2986_v7 = vadd.f32 %v11718_v33, %v2958_v3  ;;  %v11720_v31 = vld [vmem:[#allocation53_spill] sm:$0xff]  ;;  %v11721_v44 = vld [vmem:[#allocation262_spill] sm:$0xff]  ;;  %v11723_v19 = vld [vmem:[#allocation54_spill] sm:$0xff] }
 0x603   : > { %v3011_v49 = vadd.f32 %v11719_v46, %v2985_v11  ;;  %v2951_v21 = vmul.f32 %v11721_v44, %v11720_v31  ;;  %v11722_v4 = vld [vmem:[#allocation286_spill] sm:$0xff]  ;;  %v2979_v35 = vmul.f32 %v9117_v20, %v11723_v19  ;;  %v11724_v57 = vld [vmem:[#allocation299_spill] sm:$0xff]  ;;  %v11728_v33 = vld [vmem:[#allocation248_spill] sm:$0xff] }
 0x604   : > { %v2952_v1 = vmul.f32 %v11722_v4, %v11720_v31  ;;  %v2980_v56 = vmul.f32 %v11724_v57, %v11723_v19  ;;  %v2882_v40 = vadd.f32 %v2874_v23, %v2855_v8  ;;  %v2883_v53 = vadd.f32 %v2875_v45, %v2856_v51  ;;  %v11725_v48 = vld [vmem:[#allocation150_spill] sm:$0xff]  ;;  %v11726_v13 = vld [vmem:[#allocation167_spill] sm:$0xff]  ;;  %v11731_v23 = vld [vmem:[#allocation168_spill] sm:$0xff] }
 0x605   : > { %v3012_v25 = vadd.f32 %v11725_v48, %v2986_v7  ;;  %v3038_v17 = vadd.f32 %v11726_v13, %v3011_v49  ;;  %v11727_v3 = vld [vmem:[#allocation55_spill] sm:$0xff]  ;;  %v11729_v44 = vld [vmem:[#allocation56_spill] sm:$0xff]  ;;  %v11732_v51 = vld [vmem:[#allocation184_spill] sm:$0xff] }
 0x606   : > { %v3005_v11 = vmul.f32 %v8836_v55, %v11727_v3  ;;  %v3006_v46 = vmul.f32 %v11728_v33, %v11727_v3  ;;  %v3032_v31 = vmul.f32 %v9133_v38, %v11729_v44  ;;  %v11730_v20 = vld [vmem:[#allocation175_spill] sm:$0xff]  ;;  %v2907_v58 = vadd.f32 %v2899_v47, %v2882_v40  ;;  %v11733_v7 = vld [vmem:[#allocation300_spill] sm:$0xff]  ;;  %v11736_v24 = vld [vmem:[#allocation146_spill] sm:$0xff] }
 0x607   : > { %v3193_v9 = vadd.f32 %v11730_v20, %v9252_v32  ;;  %v2908_v19 = vadd.f32 %v2900_v16, %v2883_v53  ;;  %v3039_v45 = vadd.f32 %v11731_v23, %v3012_v25  ;;  %v3063_v8 = vadd.f32 %v11732_v51, %v3038_v17  ;;  %v11734_v48 = vld [vmem:[#allocation57_spill] sm:$0xff]  ;;  %v11737_v32 = vld [vmem:[#allocation151_spill] sm:$0xff]  ;;  %v11738_v47 = vld [vmem:[#allocation170_spill] sm:$0xff] }
 0x608   : > { %v3033_v49 = vmul.f32 %v11733_v7, %v11729_v44  ;;  %v3057_v55 = vmul.f32 %v8838_v43, %v11734_v48  ;;  %v11735_v13 = vld [vmem:[#allocation296_spill] sm:$0xff]  ;;  %v2934_v2 = vadd.f32 %v2926_v63, %v2907_v58  ;;  %v11739_v53 = vld [vmem:[#allocation58_spill] sm:$0xff]  ;;  %v11742_v23 = vld [vmem:[#allocation59_spill] sm:$0xff] }
 0x609   : > { %v3058_v3 = vmul.f32 %v11735_v13, %v11734_v48  ;;  %v3218_v38 = vadd.f32 %v11736_v24, %v3193_v9  ;;  %v2935_v54 = vadd.f32 %v2927_v5, %v2908_v19  ;;  %v3064_v40 = vadd.f32 %v11737_v32, %v3039_v45  ;;  %v11740_v25 = vld [vmem:[#allocation332_spill] sm:$0xff]  ;;  %v11741_v20 = vld [vmem:[#allocation301_spill] sm:$0xff]  ;;  %v11743_v51 = vld [vmem:[#allocation278_spill] sm:$0xff] }
 0x60a   : > { %v3090_v16 = vadd.f32 %v11738_v47, %v3063_v8  ;;  %v3084_v17 = vmul.f32 %v11740_v25, %v11739_v53  ;;  %v3085_v44 = vmul.f32 %v11741_v20, %v11739_v53  ;;  %v3109_v43 = vmul.f32 %v11743_v51, %v11742_v23  ;;  %v11744_v42 = vld [vmem:[#allocation178_spill] sm:$0xff]  ;;  %v11745_v24 = vld [vmem:[#allocation171_spill] sm:$0xff]  ;;  %v11746_v5 = vld [vmem:[#allocation240_spill] sm:$0xff] }
 0x60b   : > { %v3245_v22 = vadd.f32 %v11744_v42, %v3218_v38  ;;  %v2959_v48 = vadd.f32 %v2951_v21, %v2934_v2  ;;  %v2960_v60 = vadd.f32 %v2952_v1, %v2935_v54  ;;  %v3091_v58 = vadd.f32 %v11745_v24, %v3064_v40  ;;  %v11747_v63 = vld [vmem:[#allocation297_spill] sm:$0xff]  ;;  %v11748_v45 = vld [vmem:[#allocation60_spill] sm:$0xff]  ;;  %v11749_v8 = vld [vmem:[#allocation340_spill] sm:$0xff] }
 0x60c   : > { %v3115_v9 = vadd.f32 %v11746_v5, %v3090_v16  ;;  %v3110_v19 = vmul.f32 %v11747_v63, %v11742_v23  ;;  %v3136_v32 = vmul.f32 %v11749_v8, %v11748_v45  ;;  %v11750_v47 = vld [vmem:[#allocation306_spill] sm:$0xff]  ;;  %v11753_v54 = vld [vmem:[#allocation173_spill] sm:$0xff]  ;;  %v11754_v1 = vld [vmem:[#allocation61_spill] sm:$0xff] }
 0x60d   : > { %v3137_v53 = vmul.f32 %v11750_v47, %v11748_v45  ;;  %v11751_v25 = vld [vmem:[#allocation130_spill] sm:$0xff]  ;;  %v2987_v51 = vadd.f32 %v2979_v35, %v2959_v48  ;;  %v2988_v37 = vadd.f32 %v2980_v56, %v2960_v60  ;;  %v11755_v38 = vld [vmem:[#allocation283_spill] sm:$0xff]  ;;  %v11757_v24 = vld [vmem:[#allocation62_spill] sm:$0xff] }
 0x60e   : > { %v3270_v62 = vadd.f32 %v11751_v25, %v3245_v22  ;;  %v11752_v42 = vld [vmem:[#allocation166_spill] sm:$0xff]  ;;  %v3142_v21 = vadd.f32 %v11753_v54, %v3115_v9  ;;  %v3161_v40 = vmul.f32 %v11755_v38, %v11754_v1  ;;  %v9453_v5 = vmul.f32 %v9046_v18, %v11757_v24  ;;  %v11758_v8 = vld [vmem:[#allocation181_spill] sm:$0xff]  ;;  %v11760_v56 = vld [vmem:[#allocation212_spill] sm:$0xff] }
 0x60f   : > { %v3116_v2 = vadd.f32 %v11752_v42, %v3091_v58  ;;  %v11756_v16 = vld [vmem:[#allocation298_spill] sm:$0xff]  ;;  %v3013_v47 = vadd.f32 %v3005_v11, %v2987_v51  ;;  %v3014_v22 = vadd.f32 %v3006_v46, %v2988_v37  ;;  %v11761_v58 = vld [vmem:[#allocation307_spill] sm:$0xff]  ;;  %v11763_v54 = vld [vmem:[#allocation128_spill] sm:$0xff] }
 0x610   : > { %v3162_v23 = vmul.f32 %v11756_v16, %v11754_v1  ;;  %v3297_v45 = vadd.f32 %v11758_v8, %v3270_v62  ;;  %v11759_v35 = vld [vmem:[#allocation174_spill] sm:$0xff]  ;;  %v3167_v48 = vadd.f32 %v11760_v56, %v3142_v21  ;;  %v3189_v9 = vmul.f32 %v11761_v58, %v11757_v24  ;;  %v11764_v18 = vld [vmem:[#allocation141_spill] sm:$0xff]  ;;  %v11766_v51 = vld [vmem:[#allocation176_spill] sm:$0xff]  ;;  %v2578_v21 = vpop.xlane.xlu1 %2577 }
 0x611   : > { %v3143_v60 = vadd.f32 %v11759_v35, %v3116_v2  ;;  %v11762_v25 = vld [vmem:[#allocation63_spill] sm:$0xff]  ;;  %v3040_v62 = vadd.f32 %v3032_v31, %v3013_v47  ;;  %v3041_v11 = vadd.f32 %v3033_v49, %v3014_v22  ;;  %v11765_v37 = vld [vmem:[#allocation269_spill] sm:$0xff]  ;;  %v11767_v8 = vld [vmem:[#allocation64_spill] sm:$0xff]  ;;  %2596 = vst.msk [vmem:[#allocation4 + $0xf8] sm:$0xff] %vm432_vm4, %v2578_v21 }
 0x612   : > { %v9462_v42 = vmul.f32 %v8860_v12, %v11762_v25  ;;  %v9466_v1 = vmul.f32 %v11763_v54, %v11762_v25  ;;  %v3322_v38 = vadd.f32 %v11764_v18, %v3297_v45  ;;  %v3194_v2 = vadd.f32 %v11766_v51, %v3167_v48  ;;  %v11768_v12 = vld [vmem:[#allocation154_spill] sm:$0xff]  ;;  %v11769_v56 = vld [vmem:[#allocation65_spill] sm:$0xff]  ;;  %v11770_v45 = vld [vmem:[#allocation185_spill] sm:$0xff] }
 0x613   : > { %v3168_v46 = vadd.f32 %v11765_v37, %v3143_v60  ;;  %v9473_v24 = vmul.f32 %v9066_v14, %v11767_v8  ;;  %v9477_v35 = vmul.f32 %v11768_v12, %v11767_v8  ;;  %v9481_v58 = vmul.f32 %v11714_v6, %v11769_v56  ;;  %v11771_v22 = vld [vmem:[#allocation177_spill] sm:$0xff]  ;;  %v11773_v14 = vld [vmem:[#allocation140_spill] sm:$0xff]  ;;  %v11775_v6 = vld [vmem:[#allocation319_spill] sm:$0xff] }
 0x614   : > { %v3350_v31 = vadd.f32 %v11770_v45, %v3322_v38  ;;  %v3065_v49 = vadd.f32 %v3057_v55, %v3040_v62  ;;  %v3066_v47 = vadd.f32 %v3058_v3, %v3041_v11  ;;  %v11772_v48 = vld [vmem:[#allocation249_spill] sm:$0xff]  ;;  %v9489_v54 = vmul.f32 %v11773_v14, %v11769_v56  ;;  %v11776_v38 = vld [vmem:[#allocation252_spill] sm:$0xff]  ;;  %v11777_v62 = vld [vmem:[#allocation270_spill] sm:$0xff] }
 0x615   : > { %v3195_v60 = vadd.f32 %v11771_v22, %v3168_v46  ;;  %v3219_v25 = vadd.f32 %v11772_v48, %v3194_v2  ;;  %v11774_v18 = vld [vmem:[#allocation66_spill] sm:$0xff]  ;;  %v11778_v46 = vld [vmem:[#allocation179_spill] sm:$0xff]  ;;  %v11779_v12 = vld [vmem:[#allocation67_spill] sm:$0xff] }
 0x616   : > { %v9493_v37 = vmul.f32 %v11717_v39, %v11774_v18  ;;  %v9497_v51 = vmul.f32 %v11775_v6, %v11774_v18  ;;  %v3376_v21 = vadd.f32 %v11776_v38, %v3350_v31  ;;  %v3092_v55 = vadd.f32 %v3084_v17, %v3065_v49  ;;  %v9502_v8 = vld [vmem:[#allocation3 + $0xdd] sm:$0xff]  ;;  %v11780_v39 = vld [vmem:[#allocation87_spill] sm:$0xff]  ;;  %v11816_v61 = vld [vmem:[#allocation75_spill] sm:$0xff] }
 0x617   : > { %v3093_v3 = vadd.f32 %v3085_v44, %v3066_v47  ;;  %v3220_v11 = vadd.f32 %v11777_v62, %v3195_v60  ;;  %v3246_v2 = vadd.f32 %v11778_v46, %v3219_v25  ;;  %v9506_v56 = vmul.f32 %v11722_v4, %v11779_v12  ;;  %v11781_v22 = vld [vmem:[#allocation68_spill] sm:$0xff]  ;;  %v11782_v17 = vld [vmem:[#allocation189_spill] sm:$0xff]  ;;  %v11783_v47 = vld [vmem:[#allocation180_spill] sm:$0xff] }
 0x618   : > { %v9510_v45 = vmul.f32 %v11780_v39, %v11779_v12  ;;  %v9514_v48 = vmul.f32 %v11724_v57, %v11781_v22  ;;  %v3403_v44 = vadd.f32 %v11782_v17, %v3376_v21  ;;  %v3117_v31 = vadd.f32 %v3109_v43, %v3092_v55  ;;  %v11784_v25 = vld [vmem:[#allocation250_spill] sm:$0xff]  ;;  %v11785_v38 = vld [vmem:[#allocation69_spill] sm:$0xff]  ;;  %v11786_v57 = vld [vmem:[#allocation253_spill] sm:$0xff] }
 0x619   : > { %v3118_v49 = vadd.f32 %v3110_v19, %v3093_v3  ;;  %v3247_v60 = vadd.f32 %v11783_v47, %v3220_v11  ;;  %v3271_v14 = vadd.f32 %v11784_v25, %v3246_v2  ;;  %v9519_v18 = vld [vmem:[#allocation4 + $0xdd] sm:$0xff]  ;;  %v9523_v4 = vmul.f32 %v11781_v22, %v9502_v8  ;;  %v11788_v21 = vld [vmem:[#allocation200_spill] sm:$0xff]  ;;  %v11791_v47 = vld [vmem:[#allocation70_spill] sm:$0xff] }
 0x61a   : > { %v9527_v62 = vmul.f32 %v11728_v33, %v11785_v38  ;;  %v3428_v46 = vadd.f32 %v11786_v57, %v3403_v44  ;;  %v11787_v12 = vld [vmem:[#allocation135_spill] sm:$0xff]  ;;  %v3144_v19 = vadd.f32 %v3136_v32, %v3117_v31  ;;  %v11790_v2 = vld [vmem:[#allocation182_spill] sm:$0xff]  ;;  %v9534_v17 = vld [vmem:[#allocation3 + $0xde] sm:$0xff]  ;;  %v9538_v22 = vmul.f32 %v11785_v38, %v9519_v18 }
 0x61b   : > { %v3558_v43 = vadd.f32 %v11788_v21, %v11787_v12  ;;  %v3145_v55 = vadd.f32 %v3137_v53, %v3118_v49  ;;  %v11789_v3 = vld [vmem:[#allocation271_spill] sm:$0xff]  ;;  %v3298_v39 = vadd.f32 %v11790_v2, %v3271_v14  ;;  %v9542_v33 = vmul.f32 %v11733_v7, %v11791_v47  ;;  %v11792_v44 = vld [vmem:[#allocation193_spill] sm:$0xff]  ;;  %v11793_v57 = vld [vmem:[#allocation142_spill] sm:$0xff] }
 0x61c   : > { %v3272_v11 = vadd.f32 %v11789_v3, %v3247_v60  ;;  %v3455_v25 = vadd.f32 %v11792_v44, %v3428_v46  ;;  %v3169_v32 = vadd.f32 %v3161_v40, %v3144_v19  ;;  %v11794_v31 = vld [vmem:[#allocation183_spill] sm:$0xff]  ;;  %v9552_v38 = vmul.f32 %v11791_v47, %v9534_v17  ;;  %v11796_v3 = vld [vmem:[#allocation71_spill] sm:$0xff]  ;;  %v11798_v44 = vld [vmem:[#allocation204_spill] sm:$0xff] }
 0x61d   : > { %v3583_v12 = vadd.f32 %v11793_v57, %v3558_v43  ;;  %v3170_v53 = vadd.f32 %v3162_v23, %v3145_v55  ;;  %v11795_v60 = vld [vmem:[#allocation251_spill] sm:$0xff]  ;;  %v9556_v7 = vmul.f32 %v11735_v13, %v11796_v3  ;;  %v11797_v2 = vld [vmem:[#allocation254_spill] sm:$0xff]  ;;  %v11799_v19 = vld [vmem:[#allocation272_spill] sm:$0xff] }
 0x61e   : > { %v3299_v49 = vadd.f32 %v11794_v31, %v3272_v11  ;;  %v3323_v14 = vadd.f32 %v11795_v60, %v3298_v39  ;;  %v9548_v21 = vld [vmem:[#allocation4 + $0xde] sm:$0xff]  ;;  %v3480_v46 = vadd.f32 %v11797_v2, %v3455_v25  ;;  %v3196_v40 = vadd.f32 %v9453_v5, %v3169_v32  ;;  %v9563_v57 = vld [vmem:[#allocation3 + $0xdf] sm:$0xff] }
 0x61f   : > { %v3610_v43 = vadd.f32 %v11798_v44, %v3583_v12  ;;  %v3197_v23 = vadd.f32 %v3189_v9, %v3170_v53  ;;  %v11800_v11 = vld [vmem:[#allocation186_spill] sm:$0xff]  ;;  %v9567_v47 = vmul.f32 %v11796_v3, %v9548_v21  ;;  %v11801_v31 = vld [vmem:[#allocation72_spill] sm:$0xff]  ;;  %v11802_v25 = vld [vmem:[#allocation197_spill] sm:$0xff] }
 0x620   : > { %v3324_v55 = vadd.f32 %v11799_v19, %v3299_v49  ;;  %v3351_v39 = vadd.f32 %v11800_v11, %v3323_v14  ;;  %v9571_v13 = vmul.f32 %v11741_v20, %v11801_v31  ;;  %v3507_v60 = vadd.f32 %v11802_v25, %v3480_v46  ;;  %v11803_v12 = vld [vmem:[#allocation137_spill] sm:$0xff]  ;;  %v11804_v32 = vld [vmem:[#allocation187_spill] sm:$0xff]  ;;  %v9581_v3 = vld [vmem:[#allocation3 + $0xc8] sm:$0xff] }
 0x621   : > { %v3635_v2 = vadd.f32 %v11803_v12, %v3610_v43  ;;  %v3221_v5 = vadd.f32 %v9462_v42, %v3196_v40  ;;  %v3222_v9 = vadd.f32 %v9466_v1, %v3197_v23  ;;  %v11805_v49 = vld [vmem:[#allocation273_spill] sm:$0xff]  ;;  %v9579_v44 = vld [vmem:[#allocation4 + $0xdf] sm:$0xff]  ;;  %v9585_v20 = vmul.f32 %v11801_v31, %v9563_v57  ;;  %v11806_v19 = vld [vmem:[#allocation73_spill] sm:$0xff] }
 0x622   : > { %v3352_v53 = vadd.f32 %v11804_v32, %v3324_v55  ;;  %v3377_v14 = vadd.f32 %v11805_v49, %v3351_v39  ;;  %v9589_v46 = vmul.f32 %v11747_v63, %v11806_v19  ;;  %v11807_v43 = vld [vmem:[#allocation255_spill] sm:$0xff]  ;;  %v11808_v40 = vld [vmem:[#allocation208_spill] sm:$0xff]  ;;  %v11810_v25 = vld [vmem:[#allocation190_spill] sm:$0xff]  ;;  %v9601_v31 = vmul.f32 %v11806_v19, %v9579_v44 }
 0x623   : > { %v3532_v42 = vadd.f32 %v11807_v43, %v3507_v60  ;;  %v3662_v1 = vadd.f32 %v11808_v40, %v3635_v2  ;;  %v3248_v23 = vadd.f32 %v9473_v24, %v3221_v5  ;;  %v3249_v55 = vadd.f32 %v9477_v35, %v3222_v9  ;;  %v11809_v11 = vld [vmem:[#allocation288_spill] sm:$0xff]  ;;  %v9597_v32 = vld [vmem:[#allocation3 + $0xe0] sm:$0xff]  ;;  %v11814_v9 = vld [vmem:[#allocation191_spill] sm:$0xff] }
 0x624   : > { %v3378_v39 = vadd.f32 %v11809_v11, %v3352_v53  ;;  %v3404_v12 = vadd.f32 %v11810_v25, %v3377_v14  ;;  %v11811_v63 = vld [vmem:[#allocation74_spill] sm:$0xff]  ;;  %v11815_v14 = vld [vmem:[#allocation188_spill] sm:$0xff]  ;;  %v9613_v11 = vld [vmem:[#allocation4 + $0xe0] sm:$0xff] }
 0x625   : > { %v9605_v49 = vmul.f32 %v11811_v63, %v9581_v3  ;;  %v11812_v60 = vld [vmem:[#allocation201_spill] sm:$0xff]  ;;  %v3273_v35 = vadd.f32 %v9481_v58, %v3248_v23  ;;  %v3274_v5 = vadd.f32 %v9489_v54, %v3249_v55  ;;  %v3545_v19 = vld [vmem:[#allocation3 + $0xc9] sm:$0xff]  ;;  %v9617_v25 = vmul.f32 %v11811_v63, %v9597_v32 }
 0x626   : > { %v3559_v2 = vadd.f32 %v11812_v60, %v3532_v42  ;;  %v11813_v43 = vld [vmem:[#allocation133_spill] sm:$0xff]  ;;  %v3405_v53 = vadd.f32 %v11814_v9, %v3378_v39  ;;  %v3429_v40 = vadd.f32 %v11815_v14, %v3404_v12  ;;  %v9621_v42 = vmul.f32 %v11756_v16, %v11816_v61 }
 0x627   : > { %v3687_v24 = vadd.f32 %v11813_v43, %v3662_v1  ;;  %v11817_v1 = vld [vmem:[#allocation256_spill] sm:$0xff]  ;;  %v11818_v58 = vld [vmem:[#allocation213_spill] sm:$0xff]  ;;  %v3300_v54 = vadd.f32 %v9493_v37, %v3273_v35  ;;  %v3301_v55 = vadd.f32 %v9497_v51, %v3274_v5  ;;  %v11820_v43 = vld [vmem:[#allocation194_spill] sm:$0xff]  ;;  %v9635_v16 = vmul.f32 %v11816_v61, %v9613_v11 }
 0x628   : > { %v3584_v60 = vadd.f32 %v11817_v1, %v3559_v2  ;;  %v11819_v39 = vld [vmem:[#allocation289_spill] sm:$0xff]  ;;  %v3456_v9 = vadd.f32 %v11820_v43, %v3429_v40  ;;  %v9638_v2 = vmul.f32 %v11822_v27, %v3545_v19  ;;  %v11824_v37 = vld [vmem:[#allocation259_spill] sm:$0xff]  ;;  %v11827_v19 = vld [vmem:[#allocation77_spill] sm:$0xff] }
 0x629   : > { %v3714_v23 = vadd.f32 %v11818_v58, %v3687_v24  ;;  %v3430_v12 = vadd.f32 %v11819_v39, %v3405_v53  ;;  %v9629_v14 = vld [vmem:[#allocation3 + $0xe1] sm:$0xff]  ;;  %v9631_v63 = vld [vmem:[#allocation4 + $0xc9] sm:$0xff]  ;;  %v3325_v51 = vadd.f32 %v9506_v56, %v3300_v54  ;;  %v3326_v5 = vadd.f32 %v9510_v45, %v3301_v55  ;;  %v11825_v53 = vld [vmem:[#allocation195_spill] sm:$0xff] }
 0x62a   : > { %11821 = vst [vmem:[#allocation46_spill] sm:$0xff] %v9631_v63  ;;  %v11823_v24 = vld [vmem:[#allocation205_spill] sm:$0xff]  ;;  %v11826_v58 = vld [vmem:[#allocation244_spill] sm:$0xff]  ;;  %v9650_v61 = vmul.f32 %v11822_v27, %v9629_v14 }
 0x62b   : > { %v3611_v1 = vadd.f32 %v11823_v24, %v3584_v60  ;;  %v3739_v35 = vadd.f32 %v11824_v37, %v3714_v23  ;;  %v3457_v40 = vadd.f32 %v11825_v53, %v3430_v12  ;;  %v3481_v39 = vadd.f32 %v11826_v58, %v3456_v9  ;;  %v9646_v43 = vld [vmem:[#allocation4 + $0xe1] sm:$0xff]  ;;  %v11828_v23 = vld [vmem:[#allocation257_spill] sm:$0xff]  ;;  %v11830_v12 = vld [vmem:[#allocation290_spill] sm:$0xff] }
 0x62c   : > { %v9654_v60 = vmul.f32 %v11827_v19, %v9631_v63  ;;  %v11829_v56 = vld [vmem:[#allocation217_spill] sm:$0xff]  ;;  %v3353_v45 = vadd.f32 %v9514_v48, %v3325_v51  ;;  %v3354_v55 = vadd.f32 %v9523_v4, %v3326_v5  ;;  %v11831_v37 = vld [vmem:[#allocation198_spill] sm:$0xff]  ;;  %v9666_v27 = vmul.f32 %v11827_v19, %v9646_v43  ;;  %v11835_v51 = vld [vmem:[#allocation199_spill] sm:$0xff] }
 0x62d   : > { %v3636_v24 = vadd.f32 %v11828_v23, %v3611_v1  ;;  %v3766_v54 = vadd.f32 %v11829_v56, %v3739_v35  ;;  %v3482_v9 = vadd.f32 %v11830_v12, %v3457_v40  ;;  %v3508_v53 = vadd.f32 %v11831_v37, %v3481_v39  ;;  %v9662_v58 = vld [vmem:[#allocation3 + $0xe2] sm:$0xff]  ;;  %v11834_v35 = vld [vmem:[#allocation260_spill] sm:$0xff]  ;;  %v11847_v63 = vld [vmem:[#allocation147_spill] sm:$0xff] }
 0x62e   : > { %v11832_v29 = vld [vmem:[#allocation78_spill] sm:$0xff]  ;;  %v3379_v48 = vadd.f32 %v9527_v62, %v3353_v45  ;;  %v3380_v4 = vadd.f32 %v9538_v22, %v3354_v55  ;;  %v11836_v40 = vld [vmem:[#allocation274_spill] sm:$0xff]  ;;  %v11842_v45 = vld [vmem:[#allocation291_spill] sm:$0xff] }
 0x62f   : > { %v9669_v30 = vmul.f32 %v11832_v29, %v3597_v10  ;;  %v11833_v1 = vld [vmem:[#allocation209_spill] sm:$0xff]  ;;  %v3791_v56 = vadd.f32 %v11834_v35, %v3766_v54  ;;  %v3509_v5 = vadd.f32 %v11835_v51, %v3482_v9  ;;  %v3533_v39 = vadd.f32 %v11836_v40, %v3508_v53  ;;  %v11838_v10 = vld [vmem:[#allocation258_spill] sm:$0xff]  ;;  %v11841_v54 = vld [vmem:[#allocation228_spill] sm:$0xff] }
 0x630   : > { %v3663_v23 = vadd.f32 %v11833_v1, %v3636_v24  ;;  %v9677_v12 = vld [vmem:[#allocation4 + $0xca] sm:$0xff]  ;;  %v9681_v19 = vmul.f32 %v11832_v29, %v9662_v58  ;;  %v11840_v1 = vld [vmem:[#allocation131_spill] sm:$0xff]  ;;  %v3406_v62 = vadd.f32 %v9542_v33, %v3379_v48  ;;  %v3407_v22 = vadd.f32 %v9552_v38, %v3380_v4  ;;  %v11843_v9 = vld [vmem:[#allocation202_spill] sm:$0xff] }
 0x631   : > { %11837 = vst [vmem:[#allocation164_spill] sm:$0xff] %v9677_v12  ;;  %v3818_v24 = vadd.f32 %v11839_v15, %v3791_v56  ;;  %v3921_v35 = vadd.f32 %v11841_v54, %v11840_v1  ;;  %v3534_v55 = vadd.f32 %v11842_v45, %v3509_v5  ;;  %v3560_v53 = vadd.f32 %v11843_v9, %v3533_v39  ;;  %v9691_v51 = vld [vmem:[#allocation4 + $0xe2] sm:$0xff]  ;;  %v11844_v29 = vld [vmem:[#allocation79_spill] sm:$0xff]  ;;  %v11846_v15 = vld [vmem:[#allocation261_spill] sm:$0xff] }
 0x632   : > { %v3688_v37 = vadd.f32 %v11838_v10, %v3663_v23  ;;  %v9695_v40 = vmul.f32 %v11844_v29, %v9677_v12  ;;  %v11845_v23 = vld [vmem:[#allocation214_spill] sm:$0xff]  ;;  %v3431_v33 = vadd.f32 %v9556_v7, %v3406_v62  ;;  %v3432_v38 = vadd.f32 %v9567_v47, %v3407_v22  ;;  %v11848_v48 = vld [vmem:[#allocation203_spill] sm:$0xff]  ;;  %v11849_v5 = vld [vmem:[#allocation216_spill] sm:$0xff] }
 0x633   : > { %v3843_v56 = vadd.f32 %v11846_v15, %v3818_v24  ;;  %v3946_v1 = vadd.f32 %v11847_v63, %v3921_v35  ;;  %v3561_v4 = vadd.f32 %v11848_v48, %v3534_v55  ;;  %v3585_v39 = vadd.f32 %v11849_v5, %v3560_v53  ;;  %v11850_v45 = vld [vmem:[#allocation277_spill] sm:$0xff]  ;;  %v11853_v35 = vld [vmem:[#allocation292_spill] sm:$0xff]  ;;  %v11854_v62 = vld [vmem:[#allocation206_spill] sm:$0xff] }
 0x634   : > { %v3715_v10 = vadd.f32 %v11845_v23, %v3688_v37  ;;  %v9706_v54 = vmul.f32 %v11844_v29, %v9691_v51  ;;  %v11851_v12 = vld [vmem:[#allocation225_spill] sm:$0xff]  ;;  %v11852_v23 = vld [vmem:[#allocation232_spill] sm:$0xff]  ;;  %v3458_v63 = vadd.f32 %v9571_v13, %v3431_v33  ;;  %v3459_v7 = vadd.f32 %v9585_v20, %v3432_v38  ;;  %v11855_v53 = vld [vmem:[#allocation80_spill] sm:$0xff] }
 0x635   : > { %v3870_v37 = vadd.f32 %v11851_v12, %v3843_v56  ;;  %v3973_v24 = vadd.f32 %v11852_v23, %v3946_v1  ;;  %v3586_v47 = vadd.f32 %v11853_v35, %v3561_v4  ;;  %v3612_v22 = vadd.f32 %v11854_v62, %v3585_v39  ;;  %v9715_v55 = vld [vmem:[#allocation3 + $0xe3] sm:$0xff]  ;;  %v11858_v12 = vld [vmem:[#allocation144_spill] sm:$0xff]  ;;  %v11859_v20 = vld [vmem:[#allocation207_spill] sm:$0xff] }
 0x636   : > { %v3740_v9 = vadd.f32 %v11850_v45, %v3715_v10  ;;  %v3658_v29 = vmul.f32 %v11775_v6, %v11855_v53  ;;  %v11856_v15 = vld [vmem:[#allocation218_spill] sm:$0xff]  ;;  %v11857_v10 = vld [vmem:[#allocation263_spill] sm:$0xff]  ;;  %v3483_v1 = vadd.f32 %v9589_v46, %v3458_v63  ;;  %v3484_v13 = vadd.f32 %v9601_v31, %v3459_v7  ;;  %v9726_v39 = vld [vmem:[#allocation4 + $0xcb] sm:$0xff] }
 0x637   : > { %v3895_v5 = vadd.f32 %v11857_v10, %v3870_v37  ;;  %v3998_v56 = vadd.f32 %v11858_v12, %v3973_v24  ;;  %v3613_v33 = vadd.f32 %v11859_v20, %v3586_v47  ;;  %v11860_v38 = vld [vmem:[#allocation275_spill] sm:$0xff]  ;;  %v9730_v45 = vmul.f32 %v11855_v53, %v9715_v55  ;;  %v11863_v23 = vld [vmem:[#allocation229_spill] sm:$0xff]  ;;  %v11864_v35 = vld [vmem:[#allocation236_spill] sm:$0xff] }
 0x638   : > { %v3767_v48 = vadd.f32 %v11856_v15, %v3740_v9  ;;  %v3637_v4 = vadd.f32 %v11860_v38, %v3612_v22  ;;  %v9732_v6 = vld [vmem:[#allocation4 + $0xe3] sm:$0xff]  ;;  %v3510_v31 = vadd.f32 %v9605_v49, %v3483_v1  ;;  %v3511_v63 = vadd.f32 %v9617_v25, %v3484_v13  ;;  %v11865_v7 = vld [vmem:[#allocation153_spill] sm:$0xff]  ;;  %v11866_v62 = vld [vmem:[#allocation210_spill] sm:$0xff] }
 0x639   : > { %11861 = vst [vmem:[#allocation49_spill] sm:$0xff] %v9732_v6  ;;  %v11862_v9 = vld [vmem:[#allocation279_spill] sm:$0xff]  ;;  %v3922_v24 = vadd.f32 %v11863_v23, %v3895_v5  ;;  %v4025_v46 = vadd.f32 %v11864_v35, %v3998_v56  ;;  %v3638_v47 = vadd.f32 %v11865_v7, %v3613_v33  ;;  %v11867_v15 = vld [vmem:[#allocation83_spill] sm:$0xff]  ;;  %v11868_v10 = vld [vmem:[#allocation222_spill] sm:$0xff]  ;;  %v3710_v33 = vmul.f32 %v11566_v34, %v9502_v8 }
 0x63a   : > { %v3792_v37 = vadd.f32 %v11862_v9, %v3767_v48  ;;  %v3664_v22 = vadd.f32 %v11866_v62, %v3637_v4  ;;  %v3683_v53 = vmul.f32 %v11867_v15, %v9726_v39  ;;  %v11869_v20 = vld [vmem:[#allocation264_spill] sm:$0xff]  ;;  %v3535_v5 = vadd.f32 %v9621_v42, %v3510_v31  ;;  %v11871_v56 = vld [vmem:[#allocation211_spill] sm:$0xff]  ;;  %v11875_v42 = vld [vmem:[#allocation169_spill] sm:$0xff] }
 0x63b   : > { %v3947_v38 = vadd.f32 %v11869_v20, %v3922_v24  ;;  %v11870_v48 = vld [vmem:[#allocation148_spill] sm:$0xff]  ;;  %v3665_v23 = vadd.f32 %v11871_v56, %v3638_v47  ;;  %v9750_v49 = vmul.f32 %v11867_v15, %v9732_v6  ;;  %v3536_v13 = vadd.f32 %v9635_v16, %v3511_v63  ;;  %v11874_v24 = vld [vmem:[#allocation233_spill] sm:$0xff]  ;;  %v11876_v7 = vld [vmem:[#allocation215_spill] sm:$0xff] }
 0x63c   : > { %v3819_v12 = vadd.f32 %v11868_v10, %v3792_v37  ;;  %v4050_v9 = vadd.f32 %v11870_v48, %v4025_v46  ;;  %v11872_v25 = vld [vmem:[#allocation276_spill] sm:$0xff]  ;;  %v3562_v46 = vadd.f32 %v9638_v2, %v3535_v5  ;;  %v11878_v16 = vld [vmem:[#allocation226_spill] sm:$0xff]  ;;  %v11879_v34 = vld [vmem:[#allocation265_spill] sm:$0xff] }
 0x63d   : > { %v3689_v1 = vadd.f32 %v11872_v25, %v3664_v22  ;;  %v11873_v4 = vld [vmem:[#allocation280_spill] sm:$0xff]  ;;  %v3974_v35 = vadd.f32 %v11874_v24, %v3947_v38  ;;  %v3690_v31 = vadd.f32 %v11875_v42, %v3665_v23  ;;  %v9765_v22 = vmul.f32 %v11568_v36, %v9534_v17  ;;  %v11881_v2 = vld [vmem:[#allocation143_spill] sm:$0xff]  ;;  %v11883_v23 = vld [vmem:[#allocation93_spill] sm:$0xff] }
 0x63e   : > { %v3844_v37 = vadd.f32 %v11873_v4, %v3819_v12  ;;  %v11877_v62 = vld [vmem:[#allocation92_spill] sm:$0xff]  ;;  %v11880_v12 = vld [vmem:[#allocation241_spill] sm:$0xff]  ;;  %v3587_v38 = vadd.f32 %v9654_v60, %v3562_v46  ;;  %v9775_v25 = vmul.f32 %v11883_v23, %v9548_v21  ;;  %v11886_v42 = vld [vmem:[#allocation267_spill] sm:$0xff] }
 0x63f   : > { %v3716_v47 = vadd.f32 %v11876_v7, %v3689_v1  ;;  %v3735_v15 = vmul.f32 %v11877_v62, %v9519_v18  ;;  %v3999_v10 = vadd.f32 %v11879_v34, %v3974_v35  ;;  %v4078_v20 = vadd.f32 %v11880_v12, %v4050_v9  ;;  %v11882_v5 = vld [vmem:[#allocation192_spill] sm:$0xff]  ;;  %v11884_v36 = vld [vmem:[#allocation281_spill] sm:$0xff]  ;;  %v11888_v46 = vld [vmem:[#allocation219_spill] sm:$0xff] }
 0x640   : > { %v3871_v63 = vadd.f32 %v11878_v16, %v3844_v37  ;;  %v3717_v48 = vadd.f32 %v11881_v2, %v3690_v31  ;;  %v3563_v1 = vadd.f32 %v9650_v61, %v3536_v13  ;;  %v11885_v24 = vld [vmem:[#allocation237_spill] sm:$0xff]  ;;  %v3614_v9 = vadd.f32 %v9669_v30, %v3587_v38  ;;  %v11889_v16 = vld [vmem:[#allocation94_spill] sm:$0xff]  ;;  %v11893_v2 = vld [vmem:[#allocation220_spill] sm:$0xff] }
 0x641   : > { %v3741_v56 = vadd.f32 %v11882_v5, %v3716_v47  ;;  %v4026_v37 = vadd.f32 %v11885_v24, %v3999_v10  ;;  %v4104_v35 = vadd.f32 %v11886_v42, %v4078_v20  ;;  %v11887_v7 = vld [vmem:[#allocation305_spill] sm:$0xff]  ;;  %v9786_v47 = vmul.f32 %v11570_v26, %v9563_v57  ;;  %v11890_v13 = vld [vmem:[#allocation230_spill] sm:$0xff]  ;;  %v11894_v26 = vld [vmem:[#allocation95_spill] sm:$0xff] }
 0x642   : > { %v3896_v4 = vadd.f32 %v11884_v36, %v3871_v63  ;;  %v3742_v60 = vadd.f32 %v11887_v7, %v3717_v48  ;;  %v9790_v34 = vmul.f32 %v11889_v16, %v9579_v44  ;;  %v9794_v61 = vmul.f32 %v11574_v52, %v9597_v32  ;;  %v11891_v10 = vld [vmem:[#allocation266_spill] sm:$0xff]  ;;  %v11892_v20 = vld [vmem:[#allocation85_spill] sm:$0xff]  ;;  %v11924_v23 = vld [vmem:[#allocation243_spill] sm:$0xff] }
 0x643   : > { %v3768_v31 = vadd.f32 %v11888_v46, %v3741_v56  ;;  %v4051_v30 = vadd.f32 %v11891_v10, %v4026_v37  ;;  %v3639_v12 = vadd.f32 %v9695_v40, %v3614_v9  ;;  %v9803_v5 = vmul.f32 %v11894_v26, %v9613_v11  ;;  %v11895_v36 = vld [vmem:[#allocation282_spill] sm:$0xff]  ;;  %v11897_v7 = vld [vmem:[#allocation245_spill] sm:$0xff]  ;;  %v11898_v37 = vld [vmem:[#allocation136_spill] sm:$0xff] }
 0x644   : > { %v3923_v63 = vadd.f32 %v11890_v13, %v3896_v4  ;;  %v3769_v38 = vadd.f32 %v11892_v20, %v3742_v60  ;;  %v3588_v56 = vadd.f32 %v9666_v27, %v3563_v1  ;;  %v11896_v52 = vld [vmem:[#allocation242_spill] sm:$0xff]  ;;  %v4131_v4 = vadd.f32 %v11897_v7, %v4104_v35  ;;  %v11899_v40 = vld [vmem:[#allocation223_spill] sm:$0xff]  ;;  %v11900_v10 = vld [vmem:[#allocation96_spill] sm:$0xff] }
 0x645   : > { %v3793_v48 = vadd.f32 %v11893_v2, %v3768_v31  ;;  %v4079_v42 = vadd.f32 %v11896_v52, %v4051_v30  ;;  %v3666_v46 = vadd.f32 %v3658_v29, %v3639_v12  ;;  %v9813_v60 = vmul.f32 %v11576_v59, %v9629_v14  ;;  %v4012_v31 = vld [vmem:[#allocation3 + $0xcb] sm:$0xff]  ;;  %v11906_v59 = vld [vmem:[#allocation97_spill] sm:$0xff]  ;;  %v11920_v26 = vld [vmem:[#allocation284_spill] sm:$0xff] }
 0x646   : > { %v3948_v24 = vadd.f32 %v11895_v36, %v3923_v63  ;;  %v3794_v13 = vadd.f32 %v11898_v37, %v3769_v38  ;;  %v9817_v20 = vmul.f32 %v11900_v10, %v9646_v43  ;;  %v11901_v27 = vld [vmem:[#allocation90_spill] sm:$0xff]  ;;  %v11903_v29 = vld [vmem:[#allocation287_spill] sm:$0xff]  ;;  %v9829_v52 = vmul.f32 %v11906_v59, %v9691_v51 }
 0x647   : > { %v3820_v9 = vadd.f32 %v11899_v40, %v3793_v48  ;;  %v9821_v1 = vmul.f32 %v11901_v27, %v9662_v58  ;;  %v11902_v63 = vld [vmem:[#allocation234_spill] sm:$0xff]  ;;  %v4105_v30 = vadd.f32 %v11903_v29, %v4079_v42  ;;  %v3691_v12 = vadd.f32 %v3683_v53, %v3666_v46  ;;  %v11905_v48 = vld [vmem:[#allocation293_spill] sm:$0xff]  ;;  %v11907_v40 = vld [vmem:[#allocation152_spill] sm:$0xff] }
 0x648   : > { %v3975_v35 = vadd.f32 %v11902_v63, %v3948_v24  ;;  %v11904_v38 = vld [vmem:[#allocation86_spill] sm:$0xff]  ;;  %v3615_v37 = vadd.f32 %v9681_v19, %v3588_v56  ;;  %v9836_v10 = vmul.f32 %v11673_v41, %v4012_v31  ;;  %v11909_v46 = vld [vmem:[#allocation308_spill] sm:$0xff]  ;;  %v11910_v63 = vld [vmem:[#allocation227_spill] sm:$0xff]  ;;  %v9843_v29 = vmul.f32 %v11673_v41, %v9715_v55 }
 0x649   : > { %v3821_v2 = vadd.f32 %v11904_v38, %v3794_v13  ;;  %v3845_v36 = vadd.f32 %v11905_v48, %v3820_v9  ;;  %v9831_v7 = vld [vmem:[#allocation4 + $0x96] sm:$0xff]  ;;  %v3718_v53 = vadd.f32 %v3710_v33, %v3691_v12  ;;  %v11915_v33 = vld [vmem:[#allocation268_spill] sm:$0xff] }
 0x64a   : > { %v4000_v27 = vadd.f32 %v11907_v40, %v3975_v35  ;;  %v11908_v24 = vld [vmem:[#allocation246_spill] sm:$0xff]  ;;  %v4156_v12 = vadd.f32 %v11915_v33, %v4131_v4  ;;  %v11923_v33 = vld [vmem:[#allocation231_spill] sm:$0xff] }
 0x64b   : > { %v4132_v42 = vadd.f32 %v11908_v24, %v4105_v30  ;;  %v3846_v13 = vadd.f32 %v11909_v46, %v3821_v2  ;;  %v3872_v9 = vadd.f32 %v11910_v63, %v3845_v36  ;;  %v9845_v38 = vld [vmem:[#allocation3 + $0x10d] sm:$0xff]  ;;  %v4166_v2 = vld [vmem:[#allocation3 + $0x7f] sm:$0xff]  ;;  %v3743_v40 = vadd.f32 %v3735_v15, %v3718_v53 }
 0x64c   : > { %11911 = vst [vmem:[#allocation285_spill] sm:$0xff] %v9845_v38  ;;  %v11912_v48 = vld [vmem:[#allocation238_spill] sm:$0xff]  ;;  %v11916_v36 = vld [vmem:[#allocation88_spill] sm:$0xff]  ;;  %v11918_v63 = vld [vmem:[#allocation99_spill] sm:$0xff] }
 0x64d   : > { %v4027_v19 = vadd.f32 %v11912_v48, %v4000_v27  ;;  %v11913_v56 = vld [vmem:[#allocation98_spill] sm:$0xff]  ;;  %v3873_v24 = vadd.f32 %v11916_v36, %v3846_v13  ;;  %v9859_v59 = vmul.f32 %v11918_v63, %v9502_v8  ;;  %v9861_v27 = vld [vmem:[#allocation4 + $0x10d] sm:$0xff]  ;;  %v9867_v4 = vmul.f32 %v11918_v63, %v9845_v38 }
 0x64e   : > { %v9850_v35 = vmul.f32 %v11913_v56, %v9732_v6  ;;  %v11914_v31 = vld [vmem:[#allocation102_spill] sm:$0xff]  ;;  %11919 = vst [vmem:[#allocation51_spill] sm:$0xff] %v9861_v27  ;;  %v4167_v48 = vld [vmem:[#allocation3 + $0x97] sm:$0xff]  ;;  %v3640_v56 = vadd.f32 %v9706_v54, %v3615_v37  ;;  %v3770_v53 = vadd.f32 %v9765_v22, %v3743_v40  ;;  %v11922_v13 = vld [vmem:[#allocation309_spill] sm:$0xff] }
 0x64f   : > { %v4149_v30 = vmul.f32 %v11914_v31, %v9831_v7  ;;  %v11917_v46 = vld [vmem:[#allocation294_spill] sm:$0xff]  ;;  %v4052_v16 = vadd.f32 %v11920_v26, %v4027_v19  ;;  %11921 = vst [vmem:[#allocation172_spill] sm:$0xff] %v9867_v4  ;;  %v11925_v6 = vld [vmem:[#allocation101_spill] sm:$0xff]  ;;  %v4176_v37 = vmul.f32 %v11675_v28, %v4167_v48  ;;  %v11932_v48 = vld [vmem:[#allocation304_spill] sm:$0xff] }
 0x650   : > { %v3897_v41 = vadd.f32 %v11917_v46, %v3872_v9  ;;  %v3898_v9 = vadd.f32 %v11922_v13, %v3873_v24  ;;  %v4175_v46 = vmul.f32 %v11675_v28, %v4166_v2  ;;  %v9876_v54 = vmul.f32 %v11925_v6, %v9519_v18  ;;  %v11928_v19 = vld [vmem:[#allocation89_spill] sm:$0xff]  ;;  %v11929_v2 = vld [vmem:[#allocation295_spill] sm:$0xff] }
 0x651   : > { %v4157_v15 = vadd.f32 %v4149_v30, %v4132_v42  ;;  %v4080_v62 = vadd.f32 %v11924_v23, %v4052_v16  ;;  %v9880_v26 = vmul.f32 %v11925_v6, %v9861_v27  ;;  %v9883_v42 = vld [vmem:[#allocation4 + $0x7f] sm:$0xff]  ;;  %v3795_v22 = vadd.f32 %v9775_v25, %v3770_v53  ;;  %v9892_v40 = vld [vmem:[#allocation4 + $0xae] sm:$0xff] }
 0x652   : > { %v3924_v36 = vadd.f32 %v11923_v33, %v3897_v41  ;;  %11927 = vst [vmem:[#allocation165_spill] sm:$0xff] %v9883_v42  ;;  %v3925_v30 = vadd.f32 %v11928_v19, %v3898_v9  ;;  %v9890_v16 = vld [vmem:[#allocation3 + $0x10e] sm:$0xff]  ;;  %v4183_v24 = vadd.f32 %v4175_v46, %v4156_v12  ;;  %v3667_v63 = vadd.f32 %v9730_v45, %v3640_v56  ;;  %v11933_v9 = vld [vmem:[#allocation312_spill] sm:$0xff]  ;;  %v11941_v38 = vld [vmem:[#allocation313_spill] sm:$0xff] }
 0x653   : > { %11926 = vst [vmem:[#allocation196_spill] sm:$0xff] %v9880_v26  ;;  %11930 = vst [vmem:[#allocation149_spill] sm:$0xff] %v9890_v16  ;;  %v9894_v41 = vld [vmem:[#allocation4 + $0x97] sm:$0xff]  ;;  %v4106_v13 = vadd.f32 %v11932_v48, %v4080_v62  ;;  %v9900_v33 = vmul.f32 %v11584_v50, %v9534_v17  ;;  %v4184_v25 = vadd.f32 %v4176_v37, %v4157_v15  ;;  %v11934_v19 = vld [vmem:[#allocation235_spill] sm:$0xff] }
 0x654   : > { %v3949_v23 = vadd.f32 %v11929_v2, %v3924_v36  ;;  %11931 = vst [vmem:[#allocation53_spill] sm:$0xff] %v9894_v41  ;;  %v3822_v53 = vadd.f32 %v9786_v47, %v3795_v22  ;;  %v3950_v36 = vadd.f32 %v11933_v9, %v3925_v30  ;;  %v9905_v26 = vld [vmem:[#allocation4 + $0xc6] sm:$0xff]  ;;  %v9911_v45 = vmul.f32 %v11584_v50, %v9890_v16  ;;  %v4218_v37 = vld [vmem:[#allocation3 + $0x80] sm:$0xff]  ;;  %v11939_v48 = vld [vmem:[#allocation302_spill] sm:$0xff] }
 0x655   : > { %v4168_v12 = vld [vmem:[#allocation3 + $0xaf] sm:$0xff]  ;;  %v11935_v46 = vld [vmem:[#allocation104_spill] sm:$0xff]  ;;  %v4150_v15 = vmul.f32 %v11914_v31, %v9892_v40  ;;  %v3692_v27 = vadd.f32 %v9750_v49, %v3667_v63 }
 0x656   : > { %v3976_v2 = vadd.f32 %v11934_v19, %v3949_v23  ;;  %v4200_v4 = vmul.f32 %v11935_v46, %v9883_v42  ;;  %11936 = vst [vmem:[#allocation262_spill] sm:$0xff] %v9911_v45  ;;  %v11937_v62 = vld [vmem:[#allocation247_spill] sm:$0xff]  ;;  %v4201_v47 = vmul.f32 %v11935_v46, %v9894_v41  ;;  %v3847_v22 = vadd.f32 %v9790_v34, %v3822_v53  ;;  %v9921_v19 = vld [vmem:[#allocation4 + $0xaf] sm:$0xff] }
 0x657   : > { %v4133_v56 = vadd.f32 %v11937_v62, %v4106_v13  ;;  %v11938_v30 = vld [vmem:[#allocation311_spill] sm:$0xff]  ;;  %11940 = vst [vmem:[#allocation286_spill] sm:$0xff] %v9921_v19  ;;  %v4219_v50 = vld [vmem:[#allocation3 + $0x98] sm:$0xff]  ;;  %v4151_v13 = vmul.f32 %v11914_v31, %v9905_v26  ;;  %v4177_v45 = vmul.f32 %v11675_v28, %v4168_v12  ;;  %v9936_v12 = vstv %s9885_s5  ;;  %s6503_s5 = scalar_lea.vmem %s10787_s30, 1024 }
 0x658   : > { %v3977_v23 = vadd.f32 %v11938_v30, %v3950_v36  ;;  %v4001_v9 = vadd.f32 %v11939_v48, %v3976_v2  ;;  %v4208_v6 = vadd.f32 %v4200_v4, %v4183_v24  ;;  %v4209_v16 = vadd.f32 %v4201_v47, %v4184_v25  ;;  %v11942_v53 = vld [vmem:[#allocation239_spill] sm:$0xff]  ;;  %v4242_v48 = vld [vmem:[#allocation4 + $0x68] sm:$0xff]  ;;  %11943 = vst [vmem:[#allocation54_spill] sm:$0xff] %v9936_v12  ;;  %v9943_v47 = vld [vmem:[#allocation4 + $0x98] sm:$0xff]  ;;  %p6504_p7 = scmp.ne.s32.totalorder %s10787_s30, %s6503_s5 }
 0x659   : > { %v4158_v62 = vadd.f32 %v4150_v15, %v4133_v56  ;;  %v4220_v30 = vld [vmem:[#allocation3 + $0xb0] sm:$0xff]  ;;  %v4227_v2 = vmul.f32 %v11677_v0, %v4218_v37  ;;  %v4202_v24 = vmul.f32 %v11935_v46, %v9921_v19  ;;  %v4228_v41 = vmul.f32 %v11677_v0, %v4219_v50  ;;  %v11946_v19 = vld [vmem:[#allocation310_spill] sm:$0xff] }
 0x65a   : > { %v4002_v34 = vadd.f32 %v11941_v38, %v3977_v23  ;;  %v4028_v36 = vadd.f32 %v11942_v53, %v4001_v9  ;;  %v9933_v56 = vld [vmem:[#allocation4 + $0x80] sm:$0xff]  ;;  %v3874_v49 = vadd.f32 %v9794_v61, %v3847_v22  ;;  %v4229_v23 = vmul.f32 %v11677_v0, %v4220_v30  ;;  %v9951_v61 = vld [vmem:[#allocation4 + $0x10e] sm:$0xff]  ;;  %v4169_v22 = vld [vmem:[#allocation3 + $0xc7] sm:$0xff]  ;;  %p6505_p8 = pnand %p6504_p7, %p6681_p5 }
 0x65b   : > { %v4185_v4 = vadd.f32 %v4177_v45, %v4158_v62  ;;  %v11944_v63 = vld [vmem:[#allocation303_spill] sm:$0xff]  ;;  %v4235_v15 = vadd.f32 %v4227_v2, %v4208_v6  ;;  %v9945_v45 = vld [vmem:[#allocation4 + $0xb0] sm:$0xff]  ;;  %v4236_v9 = vadd.f32 %v4228_v41, %v4209_v16  ;;  %v4251_v50 = vmul.f32 %v9936_v12, %v4242_v48  ;;  %v11945_v62 = vld [vmem:[#allocation314_spill] sm:$0xff] }
 0x65c   : > { %v4029_v38 = vadd.f32 %v9836_v10, %v4002_v34  ;;  %v4053_v25 = vadd.f32 %v11944_v63, %v4028_v36  ;;  %v4152_v10 = vmul.f32 %v11914_v31, %v9548_v21  ;;  %v4252_v6 = vmul.f32 %v9936_v12, %v9933_v56  ;;  %v11947_v41 = vld [vmem:[#allocation132_spill] sm:$0xff]  ;;  %v11948_v48 = vld [vmem:[#allocation315_spill] sm:$0xff]  ;;  %p6506_p6 = pneg %p6505_p8 }
 0x65d   : > { %v4210_v37 = vadd.f32 %v4202_v24, %v4185_v4  ;;  %v4253_v36 = vmul.f32 %v9936_v12, %v9943_v47  ;;  %v4254_v16 = vmul.f32 %v9936_v12, %v9945_v45  ;;  %v4259_v30 = vadd.f32 %v4251_v50, %v11947_v41  ;;  %v11954_v41 = vld [vmem:[#allocation224_spill] sm:$0xff] }
 0x65e   : > { %v4054_v53 = vadd.f32 %v11945_v62, %v4029_v38  ;;  %v4081_v42 = vadd.f32 %v11946_v19, %v4053_v25  ;;  %v3899_v19 = vadd.f32 %v9803_v5, %v3874_v49  ;;  %v4260_v24 = vadd.f32 %v4252_v6, %v4235_v15  ;;  %v11949_v38 = vld [vmem:[#allocation138_spill] sm:$0xff]  ;;  %v11952_v5 = vld [vmem:[#allocation100_spill] sm:$0xff] }
 0x65f   : > { %v4237_v34 = vadd.f32 %v4229_v23, %v4210_v37  ;;  %v9966_v63 = vadd.f32 %v11949_v38, %v3692_v27  ;;  %v9970_v25 = vmul.f32 %v11914_v31, %v9951_v61  ;;  %v9972_v37 = vld [vmem:[#allocation4 + $0xc7] sm:$0xff]  ;;  %v4261_v23 = vadd.f32 %v4253_v36, %v4236_v9  ;;  %v9980_v6 = vld [vmem:[#allocation4 + $0x99] sm:$0xff]  ;;  %v11956_v31 = vld [vmem:[#allocation317_spill] sm:$0xff] }
 0x660   : > { %v4082_v2 = vadd.f32 %v9859_v59, %v4054_v53  ;;  %v4107_v4 = vadd.f32 %v11948_v48, %v4081_v42  ;;  %v4178_v59 = vmul.f32 %v11675_v28, %v4169_v22  ;;  %v11953_v42 = vld [vmem:[#allocation155_spill] sm:$0xff]  ;;  %v4294_v53 = vld [vmem:[#allocation4 + $0x69] sm:$0xff]  ;;  %v4287_v48 = vadd.f32 %v11954_v41, %v4260_v24 }
 0x661   : > { %11950 = vst [vmem:[#allocation299_spill] sm:$0xff] %v9966_v63  ;;  %11951 = vst [vmem:[#allocation150_spill] sm:$0xff] %v9970_v25  ;;  %v4262_v62 = vadd.f32 %v4254_v16, %v4237_v34  ;;  %v4286_v15 = vadd.f32 %v11953_v42, %v4259_v30  ;;  %v9978_v27 = vld [vmem:[#allocation4 + $0x81] sm:$0xff]  ;;  %v9985_v34 = vld [vmem:[#allocation4 + $0xb1] sm:$0xff]  ;;  %v3926_v22 = vadd.f32 %v9813_v60, %v3899_v19 }
 0x662   : > { %v4108_v50 = vadd.f32 %v9876_v54, %v4082_v2  ;;  %v4134_v49 = vadd.f32 %v11952_v5, %v4107_v4  ;;  %v11955_v38 = vld [vmem:[#allocation316_spill] sm:$0xff]  ;;  %11957 = vst [vmem:[#allocation167_spill] sm:$0xff] %v9985_v34  ;;  %v9988_v54 = vstv %s9938_s6  ;;  %v4179_v30 = vmul.f32 %v11675_v28, %v9563_v57  ;;  %s6585_s6 = smov [#allocation12]  }
 0x663   : > { %v4288_v25 = vadd.f32 %v11955_v38, %v4261_v23  ;;  %v4289_v9 = vadd.f32 %v11956_v31, %v4262_v62  ;;  %11958 = vst [vmem:[#allocation55_spill] sm:$0xff] %v9988_v54  ;;  %v4203_v2 = vmul.f32 %v11935_v46, %v9972_v37  ;;  %v4303_v4 = vmul.f32 %v9988_v54, %v4294_v53  ;;  %v10003_v62 = vld [vmem:[#allocation3 + $0x10f] sm:$0xff]  ;;  %v10009_v19 = vld [vmem:[#allocation4 + $0xc8] sm:$0xff] }
 0x664   : > { %v4135_v36 = vadd.f32 %v9900_v33, %v4108_v50  ;;  %v4159_v16 = vadd.f32 %v4151_v13, %v4134_v49  ;;  %v4304_v31 = vmul.f32 %v9988_v54, %v9978_v27  ;;  %v4305_v24 = vmul.f32 %v9988_v54, %v9980_v6  ;;  %v10005_v33 = vld [vmem:[#allocation4 + $0x10f] sm:$0xff] }
 0x665   : > { %v4204_v13 = vmul.f32 %v11935_v46, %v9579_v44  ;;  %v4306_v50 = vmul.f32 %v9988_v54, %v9985_v34  ;;  %v4230_v5 = vmul.f32 %v11677_v0, %v9581_v3  ;;  %v4311_v49 = vadd.f32 %v4303_v4, %v4286_v15  ;;  %v4346_v15 = vld [vmem:[#allocation4 + $0x6a] sm:$0xff] }
 0x666   : > { %v4160_v23 = vadd.f32 %v4152_v10, %v4135_v36  ;;  %v4186_v60 = vadd.f32 %v4178_v59, %v4159_v16  ;;  %v4312_v42 = vadd.f32 %v4304_v31, %v4287_v48  ;;  %v4313_v53 = vadd.f32 %v4305_v24, %v4288_v25  ;;  %v10036_v31 = vld [vmem:[#allocation4 + $0x9a] sm:$0xff]  ;;  %v10038_v24 = vld [vmem:[#allocation4 + $0xb2] sm:$0xff]  ;;  %v11978_v63 = vld [vmem:[#allocation328_spill] sm:$0xff] }
 0x667   : > { %v3951_v10 = vadd.f32 %v9817_v20, %v3926_v22  ;;  %v4314_v38 = vadd.f32 %v4306_v50, %v4289_v9  ;;  %v10020_v36 = vmul.f32 %v11675_v28, %v10003_v62  ;;  %v10024_v16 = vmul.f32 %v11935_v46, %v10005_v33  ;;  %v10030_v20 = vld [vmem:[#allocation4 + $0x82] sm:$0xff]  ;;  %11964 = vst [vmem:[#allocation168_spill] sm:$0xff] %v10036_v31 }
 0x668   : > { %v4187_v59 = vadd.f32 %v4179_v30, %v4160_v23  ;;  %v4211_v41 = vadd.f32 %v4203_v2, %v4186_v60  ;;  %v4231_v3 = vmul.f32 %v11677_v0, %v9597_v32  ;;  %v4255_v25 = vmul.f32 %v9936_v12, %v10009_v19  ;;  %11961 = vst [vmem:[#allocation175_spill] sm:$0xff] %v10030_v20  ;;  %v10032_v9 = vld [vmem:[#allocation3 + $0x110] sm:$0xff]  ;;  %v11962_v28 = vld [vmem:[#allocation320_spill] sm:$0xff]  ;;  %v11963_v2 = vld [vmem:[#allocation322_spill] sm:$0xff] }
 0x669   : > { %11959 = vst [vmem:[#allocation248_spill] sm:$0xff] %v10020_v36  ;;  %11960 = vst [vmem:[#allocation56_spill] sm:$0xff] %v10024_v16  ;;  %v4338_v30 = vadd.f32 %v11962_v28, %v4311_v49  ;;  %v4340_v4 = vadd.f32 %v11963_v2, %v4313_v53  ;;  %v4256_v23 = vmul.f32 %v9936_v12, %v9613_v11  ;;  %v11966_v60 = vld [vmem:[#allocation321_spill] sm:$0xff]  ;;  %v11967_v16 = vld [vmem:[#allocation323_spill] sm:$0xff]  ;;  %v10045_v46 = vstv %s9990_s7  ;;  %s6507_s7 = sshll.u32 %s6585_s6, 4  ;;  %s6508_s7 = int_to_ptr.vmem [resolvable:$false] %s6507_s7 }
 0x66a   : > { %v4212_v48 = vadd.f32 %v4204_v13, %v4187_v59  ;;  %v4238_v22 = vadd.f32 %v4230_v5, %v4211_v41  ;;  %11965 = vst [vmem:[#allocation184_spill] sm:$0xff] %v10038_v24  ;;  %v4339_v50 = vadd.f32 %v11966_v60, %v4312_v42  ;;  %v4341_v36 = vadd.f32 %v11967_v16, %v4314_v38  ;;  %v10062_v2 = vld [vmem:[#allocation4 + $0x83] sm:$0xff]  ;;  %v10064_v60 = vld [vmem:[#allocation4 + $0x9b] sm:$0xff]  ;;  %p6510_p9 = scmp.lt.s32.totalorder %s10787_s30, %s6508_s7 }
 0x66b   : > { %v3978_v13 = vadd.f32 %v9821_v1, %v3951_v10  ;;  %v4355_v49 = vmul.f32 %v10045_v46, %v4346_v15  ;;  %v10051_v53 = vmul.f32 %v11677_v0, %v10032_v9  ;;  %v4356_v41 = vmul.f32 %v10045_v46, %v10030_v20  ;;  %v11969_v1 = vld [vmem:[#allocation318_spill] sm:$0xff]  ;;  %11971 = vst [vmem:[#allocation57_spill] sm:$0xff] %v10062_v2  ;;  %v10083_v20 = vld [vmem:[#allocation3 + $0x111] sm:$0xff] }
 0x66c   : > { %v4239_v5 = vadd.f32 %v4231_v3, %v4212_v48  ;;  %v4263_v59 = vadd.f32 %v4255_v25, %v4238_v22  ;;  %v4357_v42 = vmul.f32 %v10045_v46, %v10036_v31  ;;  %v4358_v38 = vmul.f32 %v10045_v46, %v10038_v24  ;;  %v11970_v3 = vld [vmem:[#allocation46_spill] sm:$0xff]  ;;  %11972 = vst [vmem:[#allocation296_spill] sm:$0xff] %v10064_v60  ;;  %v11980_v34 = vld [vmem:[#allocation164_spill] sm:$0xff] }
 0x66d   : > { %11968 = vst [vmem:[#allocation300_spill] sm:$0xff] %v10051_v53  ;;  %v4307_v25 = vmul.f32 %v9988_v54, %v11970_v3  ;;  %v4363_v15 = vadd.f32 %v4355_v49, %v4338_v30  ;;  %v4398_v48 = vld [vmem:[#allocation4 + $0x6b] sm:$0xff]  ;;  %v4364_v22 = vadd.f32 %v4356_v41, %v4339_v50  ;;  %v10067_v53 = vstv %s10015_s8  ;;  %s6509_s8 = scalar_lea.vmem %s6508_s7, 2048 }
 0x66e   : > { %v4264_v16 = vadd.f32 %v4256_v23, %v4239_v5  ;;  %v4290_v10 = vadd.f32 %v11969_v1, %v4263_v59  ;;  %v4365_v0 = vadd.f32 %v4357_v42, %v4340_v4  ;;  %v4366_v28 = vadd.f32 %v4358_v38, %v4341_v36  ;;  %v10072_v5 = vld [vmem:[#allocation4 + $0x110] sm:$0xff]  ;;  %v11973_v59 = vld [vmem:[#allocation106_spill] sm:$0xff]  ;;  %v11977_v42 = vld [vmem:[#allocation327_spill] sm:$0xff]  ;;  %p6511_p11 = scmp.lt.s32.totalorder %s6509_s8, %s6503_s5 }
 0x66f   : > { %v4003_v23 = vadd.f32 %v9829_v52, %v3978_v13  ;;  %v4283_v1 = vmul.f32 %v11973_v59, %v9629_v14  ;;  %v11974_v49 = vld [vmem:[#allocation325_spill] sm:$0xff]  ;;  %v11976_v36 = vld [vmem:[#allocation326_spill] sm:$0xff]  ;;  %v4407_v31 = vmul.f32 %v10067_v53, %v4398_v48  ;;  %v11979_v13 = vld [vmem:[#allocation324_spill] sm:$0xff] }
 0x670   : > { %v4315_v30 = vadd.f32 %v4307_v25, %v4290_v10  ;;  %v4390_v50 = vadd.f32 %v11974_v49, %v4363_v15  ;;  %v10077_v4 = vld [vmem:[#allocation4 + $0xb3] sm:$0xff]  ;;  %v4391_v41 = vadd.f32 %v11976_v36, %v4364_v22  ;;  %v4392_v38 = vadd.f32 %v11977_v42, %v4365_v0  ;;  %p6512_p0 = por %p6511_p11, %p6510_p9 }
 0x671   : > { %11975 = vst [vmem:[#allocation146_spill] sm:$0xff] %v10077_v4  ;;  %v4393_v24 = vadd.f32 %v11978_v63, %v4366_v28  ;;  %v10085_v52 = vld [vmem:[#allocation4 + $0x111] sm:$0xff]  ;;  %v4359_v10 = vmul.f32 %v10045_v46, %v11980_v34  ;;  %v4408_v25 = vmul.f32 %v10067_v53, %v10062_v2  ;;  %v4409_v15 = vmul.f32 %v10067_v53, %v10064_v60  ;;  %v11995_v2 = vld [vmem:[#allocation335_spill] sm:$0xff] }
 0x672   : > { %v4342_v3 = vadd.f32 %v11979_v13, %v4315_v30  ;;  %v10096_v63 = vmul.f32 %v9936_v12, %v10072_v5  ;;  %v4291_v48 = vadd.f32 %v4283_v1, %v4264_v16  ;;  %v4410_v22 = vmul.f32 %v10067_v53, %v10077_v4  ;;  %v4452_v1 = vld [vmem:[#allocation4 + $0x7d] sm:$0xff]  ;;  %v11997_v34 = vld [vmem:[#allocation337_spill] sm:$0xff]  ;;  %p6513_p1 = pnand %p6512_p0, %p6506_p6 }
 0x673   : > { %v4415_v0 = vadd.f32 %v4407_v31, %v4390_v50  ;;  %v4030_v28 = vadd.f32 %v9843_v29, %v4003_v23  ;;  %v4416_v49 = vadd.f32 %v4408_v25, %v4391_v41  ;;  %v4417_v36 = vadd.f32 %v4409_v15, %v4392_v38  ;;  %v11984_v29 = vld [vmem:[#allocation329_spill] sm:$0xff]  ;;  %v11985_v50 = vld [vmem:[#allocation330_spill] sm:$0xff]  ;;  %v11986_v38 = vld [vmem:[#allocation331_spill] sm:$0xff] }
 0x674   : > { %11981 = vst [vmem:[#allocation151_spill] sm:$0xff] %v10096_v63  ;;  %v4367_v30 = vadd.f32 %v4359_v10, %v4342_v3  ;;  %v10105_v42 = vmul.f32 %v11973_v59, %v10083_v20  ;;  %v4308_v13 = vmul.f32 %v9988_v54, %v9646_v43  ;;  %v10111_v16 = vmul.f32 %v9988_v54, %v10085_v52  ;;  %v10118_v59 = vld [vmem:[#allocation4 + $0x95] sm:$0xff]  ;;  %v10120_v25 = vld [vmem:[#allocation4 + $0xad] sm:$0xff]  ;;  %v10122_v15 = vld [vmem:[#allocation4 + $0xc5] sm:$0xff] }
 0x675   : > { %v4418_v31 = vadd.f32 %v4410_v22, %v4393_v24  ;;  %v4411_v23 = vmul.f32 %v10067_v53, %v9726_v39  ;;  %v4443_v41 = vadd.f32 %v11985_v50, %v4415_v0  ;;  %v4444_v10 = vadd.f32 %v11986_v38, %v4416_v49  ;;  %11987 = vst [vmem:[#allocation332_spill] sm:$0xff] %v10118_v59  ;;  %v11990_v63 = vld [vmem:[#allocation333_spill] sm:$0xff]  ;;  %v11991_v24 = vld [vmem:[#allocation334_spill] sm:$0xff]  ;;  %v11993_v50 = vld [vmem:[#allocation107_spill] sm:$0xff] }
 0x676   : > { %11982 = vst [vmem:[#allocation170_spill] sm:$0xff] %v10105_v42  ;;  %11983 = vst [vmem:[#allocation58_spill] sm:$0xff] %v10111_v16  ;;  %v4394_v3 = vadd.f32 %v11984_v29, %v4367_v30  ;;  %v4316_v42 = vadd.f32 %v4308_v13, %v4291_v48  ;;  %v4445_v16 = vadd.f32 %v11990_v63, %v4417_v36  ;;  %v10127_v4 = vstv %s10069_s10  ;;  %v11992_v0 = vld [vmem:[#allocation109_spill] sm:$0xff] }
 0x677   : > { %11988 = vst [vmem:[#allocation301_spill] sm:$0xff] %v10120_v25  ;;  %11989 = vst [vmem:[#allocation59_spill] sm:$0xff] %v10122_v15  ;;  %v4446_v22 = vadd.f32 %v11991_v24, %v4418_v31  ;;  %v4055_v30 = vadd.f32 %v9850_v35, %v4030_v28  ;;  %v4439_v29 = vmul.f32 %v11992_v0, %v9502_v8  ;;  %v4504_v31 = vld [vmem:[#allocation4 + $0x7e] sm:$0xff]  ;;  %v10153_v12 = vstv %s10101_s13 }
 0x678   : > { %v4419_v39 = vadd.f32 %v4411_v23, %v4394_v3  ;;  %v4461_v49 = vmul.f32 %v10127_v4, %v4452_v1  ;;  %v4335_v38 = vmul.f32 %v11993_v50, %v9662_v58  ;;  %v4462_v48 = vmul.f32 %v10127_v4, %v10118_v59 }
 0x679   : > { %v4463_v63 = vmul.f32 %v10127_v4, %v10120_v25  ;;  %v4464_v36 = vmul.f32 %v10127_v4, %v10122_v15  ;;  %v4360_v8 = vmul.f32 %v10045_v46, %v9691_v51  ;;  %v4465_v28 = vmul.f32 %v10127_v4, %v9519_v18  ;;  %v10147_v25 = vld [vmem:[#allocation3 + $0x112] sm:$0xff]  ;;  %v11994_v15 = vld [vmem:[#allocation110_spill] sm:$0xff] }
 0x67a   : > { %v4447_v35 = vadd.f32 %v4439_v29, %v4419_v39  ;;  %v4469_v13 = vadd.f32 %v4461_v49, %v4443_v41  ;;  %v4343_v1 = vadd.f32 %v4335_v38, %v4316_v42  ;;  %v4470_v3 = vadd.f32 %v4462_v48, %v4444_v10  ;;  %v11996_v39 = vld [vmem:[#allocation336_spill] sm:$0xff]  ;;  %v11998_v41 = vld [vmem:[#allocation338_spill] sm:$0xff] }
 0x67b   : > { %v4471_v23 = vadd.f32 %v4463_v63, %v4445_v16  ;;  %v4472_v24 = vadd.f32 %v4464_v36, %v4446_v22  ;;  %v4492_v59 = vmul.f32 %v11994_v15, %v9534_v17  ;;  %v4513_v42 = vmul.f32 %v10153_v12, %v4504_v31  ;;  %v10175_v36 = vld [vmem:[#allocation3 + $0x113] sm:$0xff] }
 0x67c   : > { %v4473_v60 = vadd.f32 %v4465_v28, %v4447_v35  ;;  %v4496_v54 = vadd.f32 %v11995_v2, %v4469_v13  ;;  %v4497_v29 = vadd.f32 %v11996_v39, %v4470_v3  ;;  %v4514_v10 = vmul.f32 %v10153_v12, %v9831_v7  ;;  %v12001_v35 = vld [vmem:[#allocation111_spill] sm:$0xff] }
 0x67d   : > { %v4498_v18 = vadd.f32 %v11997_v34, %v4471_v23  ;;  %v4499_v49 = vadd.f32 %v11998_v41, %v4472_v24  ;;  %v4515_v17 = vmul.f32 %v10153_v12, %v9892_v40  ;;  %v4516_v2 = vmul.f32 %v10153_v12, %v9905_v26  ;;  %v12000_v34 = vld [vmem:[#allocation108_spill] sm:$0xff]  ;;  %v12002_v28 = vld [vmem:[#allocation339_spill] sm:$0xff]  ;;  %v12008_v41 = vld [vmem:[#allocation286_spill] sm:$0xff] }
 0x67e   : > { %v4500_v16 = vadd.f32 %v4492_v59, %v4473_v60  ;;  %v10167_v22 = vmul.f32 %v11993_v50, %v10147_v25  ;;  %v4387_v38 = vmul.f32 %v12000_v34, %v9715_v55  ;;  %v4517_v60 = vmul.f32 %v10153_v12, %v9548_v21  ;;  %v12003_v55 = vld [vmem:[#allocation341_spill] sm:$0xff]  ;;  %v12004_v21 = vld [vmem:[#allocation342_spill] sm:$0xff]  ;;  %v12005_v23 = vld [vmem:[#allocation343_spill] sm:$0xff] }
 0x67f   : > { %v4521_v59 = vadd.f32 %v4513_v42, %v4496_v54  ;;  %v4368_v7 = vadd.f32 %v4360_v8, %v4343_v1  ;;  %v4522_v48 = vadd.f32 %v4514_v10, %v4497_v29  ;;  %v4523_v63 = vadd.f32 %v4515_v17, %v4498_v18  ;;  %v12006_v8 = vld [vmem:[#allocation165_spill] sm:$0xff]  ;;  %v12007_v29 = vld [vmem:[#allocation53_spill] sm:$0xff] }
 0x680   : > { %11999 = vst [vmem:[#allocation278_spill] sm:$0xff] %v10167_v22  ;;  %v4524_v40 = vadd.f32 %v4516_v2, %v4499_v49  ;;  %v4525_v26 = vadd.f32 %v4517_v60, %v4500_v16  ;;  %v4544_v50 = vmul.f32 %v12001_v35, %v9563_v57  ;;  %v10181_v31 = vstv %s10141_s14  ;;  %v12009_v42 = vld [vmem:[#allocation37_spill] sm:$0xff] }
 0x681   : > { %v4548_v13 = vadd.f32 %v12002_v28, %v4521_v59  ;;  %v4549_v3 = vadd.f32 %v12003_v55, %v4522_v48  ;;  %v4550_v54 = vadd.f32 %v12004_v21, %v4523_v63  ;;  %v4565_v1 = vmul.f32 %v10181_v31, %v12006_v8  ;;  %v12013_v55 = vld [vmem:[#allocation344_spill] sm:$0xff]  ;;  %v12014_v21 = vld [vmem:[#allocation35_spill] sm:$0xff] }
 0x682   : > { %v4551_v24 = vadd.f32 %v12005_v23, %v4524_v40  ;;  %v4552_v39 = vadd.f32 %v4544_v50, %v4525_v26  ;;  %v4566_v18 = vmul.f32 %v10181_v31, %v12007_v29  ;;  %v4567_v57 = vmul.f32 %v10181_v31, %v12008_v41  ;;  %v10205_v40 = vld [vmem:[#allocation4 + $0x112] sm:$0xff] }
 0x683   : > { %v4568_v49 = vmul.f32 %v10181_v31, %v9972_v37  ;;  %v10195_v16 = vadd.f32 %v12009_v42, %v4055_v30  ;;  %v10199_v10 = vmul.f32 %v12000_v34, %v10175_v36  ;;  %v4569_v17 = vmul.f32 %v10181_v31, %v9579_v44  ;;  %v4405_v37 = vld [vmem:[#allocation4 + $0x113] sm:$0xff]  ;;  %v12011_v30 = vld [vmem:[#allocation49_spill] sm:$0xff] }
 0x684   : > { %v4573_v2 = vadd.f32 %v4565_v1, %v4548_v13  ;;  %v4395_v60 = vadd.f32 %v4387_v38, %v4368_v7  ;;  %v4574_v59 = vadd.f32 %v4566_v18, %v4549_v3  ;;  %v4575_v48 = vadd.f32 %v4567_v57, %v4550_v54  ;;  %v12012_v34 = vld [vmem:[#allocation114_spill] sm:$0xff]  ;;  %v12015_v38 = vld [vmem:[#allocation345_spill] sm:$0xff] }
 0x685   : > { %12010 = vst [vmem:[#allocation178_spill] sm:$0xff] %v10199_v10  ;;  %v4576_v63 = vadd.f32 %v4568_v49, %v4551_v24  ;;  %v4412_v26 = vmul.f32 %v10067_v53, %v12011_v30  ;;  %v4577_v50 = vadd.f32 %v4569_v17, %v4552_v39  ;;  %v4596_v28 = vmul.f32 %v12012_v34, %v9597_v32  ;;  %v12016_v3 = vld [vmem:[#allocation346_spill] sm:$0xff]  ;;  %v4459_v49 = vld [vmem:[#allocation4 + $0x125] sm:$0xff] }
 0x686   : > { %v4600_v44 = vadd.f32 %v12013_v55, %v4573_v2  ;;  %v4601_v13 = vadd.f32 %v12014_v21, %v4574_v59  ;;  %v4602_v7 = vadd.f32 %v12015_v38, %v4575_v48  ;;  %v10216_v23 = vstv %s10173_s15  ;;  %v4433_v24 = vld [vmem:[#allocation3 + $0x125] sm:$0xff] }
 0x687   : > { %v4603_v54 = vadd.f32 %v12016_v3, %v4576_v63  ;;  %v4604_v8 = vadd.f32 %v4596_v28, %v4577_v50  ;;  %v4618_v1 = vmul.f32 %v10216_v23, %v9943_v47  ;;  %v4619_v39 = vmul.f32 %v10216_v23, %v9945_v45  ;;  %v12019_v2 = vld [vmem:[#allocation285_spill] sm:$0xff]  ;;  %v12022_v28 = vld [vmem:[#allocation348_spill] sm:$0xff]  ;;  %v10439_v10 = vld [vmem:[#allocation4 + $0xf8] sm:$0xff] }
 0x688   : > { %v4620_v32 = vmul.f32 %v10216_v23, %v10009_v19  ;;  %v10226_v29 = vmul.f32 %v10045_v46, %v10205_v40  ;;  %v10229_v18 = vmul.f32 %v10067_v53, %v4405_v37  ;;  %v4420_v41 = vadd.f32 %v4412_v26, %v4395_v60  ;;  %v4511_v37 = vld [vmem:[#allocation4 + $0x126] sm:$0xff]  ;;  %v12023_v55 = vld [vmem:[#allocation349_spill] sm:$0xff] }
 0x689   : > { %v4621_v57 = vmul.f32 %v10216_v23, %v9613_v11  ;;  %v4617_v45 = vmul.f32 %v10216_v23, %v9933_v56  ;;  %v4626_v42 = vadd.f32 %v4618_v1, %v4601_v13  ;;  %v4627_v19 = vadd.f32 %v4619_v39, %v4602_v7  ;;  %v12021_v11 = vld [vmem:[#allocation115_spill] sm:$0xff]  ;;  %v12024_v13 = vld [vmem:[#allocation350_spill] sm:$0xff] }
 0x68a   : > { %12017 = vst [vmem:[#allocation171_spill] sm:$0xff] %v10226_v29  ;;  %12018 = vst [vmem:[#allocation240_spill] sm:$0xff] %v10229_v18  ;;  %v4628_v17 = vadd.f32 %v4620_v32, %v4603_v54  ;;  %v10239_v59 = vmul.f32 %v11992_v0, %v12019_v2  ;;  %v10242_v48 = vmul.f32 %v11992_v0, %v4433_v24  ;;  %v4563_v26 = vld [vmem:[#allocation4 + $0x127] sm:$0xff]  ;;  %v12025_v7 = vld [vmem:[#allocation51_spill] sm:$0xff]  ;;  %v10257_v24 = vstv %s10203_s16 }
 0x68b   : > { %v4629_v60 = vadd.f32 %v4621_v57, %v4604_v8  ;;  %v4648_v63 = vmul.f32 %v12021_v11, %v9629_v14  ;;  %v4625_v50 = vadd.f32 %v4617_v45, %v4600_v44  ;;  %v4653_v56 = vadd.f32 %v12022_v28, %v4626_v42  ;;  %v12027_v14 = vld [vmem:[#allocation159_spill] sm:$0xff]  ;;  %v12028_v8 = vld [vmem:[#allocation149_spill] sm:$0xff]  ;;  %v4615_v32 = vld [vmem:[#allocation4 + $0x128] sm:$0xff] }
 0x68c   : > { %12020 = vst [vmem:[#allocation297_spill] sm:$0xff] %v10242_v48  ;;  %v4654_v21 = vadd.f32 %v12023_v55, %v4627_v19  ;;  %v4655_v38 = vadd.f32 %v12024_v13, %v4628_v17  ;;  %v10251_v3 = vmul.f32 %v10127_v4, %v12025_v7  ;;  %v10254_v0 = vmul.f32 %v10127_v4, %v4459_v49  ;;  %v12033_v19 = vld [vmem:[#allocation347_spill] sm:$0xff]  ;;  %v4667_v17 = vld [vmem:[#allocation4 + $0x129] sm:$0xff] }
 0x68d   : > { %v4656_v54 = vadd.f32 %v4648_v63, %v4629_v60  ;;  %v10262_v44 = vadd.f32 %v12027_v14, %v4420_v41  ;;  %v10266_v1 = vmul.f32 %v11994_v15, %v12028_v8  ;;  %v10270_v39 = vmul.f32 %v10153_v12, %v9951_v61  ;;  %v12034_v63 = vld [vmem:[#allocation118_spill] sm:$0xff]  ;;  %v12040_v13 = vld [vmem:[#allocation46_spill] sm:$0xff] }
 0x68e   : > { %12026 = vst [vmem:[#allocation60_spill] sm:$0xff] %v10254_v0  ;;  %v4673_v57 = vmul.f32 %v10257_v24, %v9646_v43  ;;  %v10275_v49 = vmul.f32 %v10153_v12, %v4511_v37  ;;  %v10279_v41 = vmul.f32 %v12001_v35, %v10003_v62  ;;  %v10283_v15 = vmul.f32 %v10181_v31, %v10005_v33  ;;  %v12063_v0 = vld [vmem:[#allocation36_spill] sm:$0xff]  ;;  %v12071_v29 = vld [vmem:[#allocation157_spill] sm:$0xff] }
 0x68f   : > { %v10286_v45 = vmul.f32 %v10181_v31, %v4563_v26  ;;  %v10290_v42 = vmul.f32 %v12012_v34, %v10032_v9  ;;  %v4652_v43 = vadd.f32 %v12033_v19, %v4625_v50  ;;  %v4700_v37 = vmul.f32 %v12034_v63, %v9662_v58  ;;  %v10311_v50 = vld [vmem:[#allocation3 + $0xe3] sm:$0xff]  ;;  %v12043_v19 = vld [vmem:[#allocation119_spill] sm:$0xff] }
 0x690   : > { %12029 = vst [vmem:[#allocation340_spill] sm:$0xff] %v10275_v49  ;;  %12030 = vst [vmem:[#allocation306_spill] sm:$0xff] %v10283_v15  ;;  %v4681_v60 = vadd.f32 %v4673_v57, %v4656_v54  ;;  %v10299_v35 = vmul.f32 %v10216_v23, %v10072_v5  ;;  %v10302_v26 = vmul.f32 %v10216_v23, %v4615_v32  ;;  %v10309_v34 = vstv %s10233_s17  ;;  %v12084_v15 = vld [vmem:[#allocation356_spill] sm:$0xff] }
 0x691   : > { %12031 = vst [vmem:[#allocation130_spill] sm:$0xff] %v10286_v45  ;;  %12032 = vst [vmem:[#allocation166_spill] sm:$0xff] %v10290_v42  ;;  %v10306_v9 = vmul.f32 %v12021_v11, %v10083_v20  ;;  %v4669_v58 = vmul.f32 %v10257_v24, %v9978_v27  ;;  %v4670_v5 = vmul.f32 %v10257_v24, %v9980_v6  ;;  %v12039_v20 = vld [vmem:[#allocation167_spill] sm:$0xff] }
 0x692   : > { %12035 = vst [vmem:[#allocation173_spill] sm:$0xff] %v10299_v35  ;;  %12036 = vst [vmem:[#allocation61_spill] sm:$0xff] %v10302_v26  ;;  %v4708_v28 = vadd.f32 %v4700_v37, %v4681_v60  ;;  %v4725_v55 = vmul.f32 %v10309_v34, %v9691_v51  ;;  %v4671_v11 = vmul.f32 %v10257_v24, %v12039_v20  ;;  %v3727_v37 = vld [vmem:[#allocation4 + $0xf5] sm:$0xff] }
 0x693   : > { %12037 = vst [vmem:[#allocation283_spill] sm:$0xff] %v10306_v9  ;;  %12038 = vst [vmem:[#allocation298_spill] sm:$0xff] %v10311_v50  ;;  %v4672_v54 = vmul.f32 %v10257_v24, %v12040_v13  ;;  %v10329_v14 = vmul.f32 %v10257_v24, %v10085_v52  ;;  %v10332_v27 = vmul.f32 %v10257_v24, %v4667_v17  ;;  %v12056_v26 = vld [vmem:[#allocation121_spill] sm:$0xff]  ;;  %v12074_v9 = vld [vmem:[#allocation96_spill] sm:$0xff] }
 0x694   : > { %v10336_v32 = vadd.f32 %v4669_v58, %v4652_v43  ;;  %v10338_v51 = vadd.f32 %v4670_v5, %v4653_v56  ;;  %v4733_v57 = vadd.f32 %v4725_v55, %v4708_v28  ;;  %v4752_v60 = vmul.f32 %v12043_v19, %v10311_v50  ;;  %v10352_v43 = vld [vmem:[#allocation4 + $0x12a] sm:$0xff]  ;;  %v12047_v58 = vld [vmem:[#allocation175_spill] sm:$0xff] }
 0x695   : > { %12041 = vst [vmem:[#allocation62_spill] sm:$0xff] %v10329_v14  ;;  %12042 = vst [vmem:[#allocation181_spill] sm:$0xff] %v10332_v27  ;;  %v10344_v20 = vadd.f32 %v4671_v11, %v4654_v21  ;;  %v10346_v52 = vadd.f32 %v4672_v54, %v4655_v38  ;;  %v10350_v17 = vmul.f32 %v12034_v63, %v10147_v25  ;;  %v10355_v56 = vstv %s10259_s19  ;;  %v12048_v28 = vld [vmem:[#allocation168_spill] sm:$0xff]  ;;  %v10437_v14 = vld [vmem:[#allocation4 + $0xf7] sm:$0xff] }
 0x696   : > { %12046 = vst [vmem:[#allocation307_spill] sm:$0xff] %v10352_v43  ;;  %v10361_v5 = vmul.f32 %v10309_v34, %v12047_v58  ;;  %v10365_v21 = vmul.f32 %v10309_v34, %v12048_v28  ;;  %v4760_v38 = vadd.f32 %v4752_v60, %v4733_v57  ;;  %v4777_v25 = vmul.f32 %v10355_v56, %v12011_v30  ;;  %v12049_v63 = vld [vmem:[#allocation184_spill] sm:$0xff] }
 0x697   : > { %12044 = vst [vmem:[#allocation174_spill] sm:$0xff] %v10346_v52  ;;  %12045 = vst [vmem:[#allocation212_spill] sm:$0xff] %v10350_v17  ;;  %v10373_v55 = vmul.f32 %v10309_v34, %v12049_v63  ;;  %v12050_v11 = vld [vmem:[#allocation164_spill] sm:$0xff]  ;;  %v10381_v54 = vmul.f32 %v10309_v34, %v10205_v40  ;;  %v10386_v30 = vmul.f32 %v10309_v34, %v10352_v43  ;;  %v10393_v27 = vstv %s10295_s22  ;;  %v12065_v17 = vld [vmem:[#allocation355_spill] sm:$0xff] }
 0x698   : > { %v10377_v13 = vmul.f32 %v10309_v34, %v12050_v11  ;;  %v12053_v57 = vld [vmem:[#allocation92_spill] sm:$0xff]  ;;  %v10390_v58 = vmul.f32 %v12043_v19, %v10175_v36  ;;  %v4785_v50 = vadd.f32 %v4777_v25, %v4760_v38  ;;  %v10395_v11 = vld [vmem:[#allocation4 + $0xf6] sm:$0xff]  ;;  %v10399_v45 = vmul.f32 %v12056_v26, %v12019_v2 }
 0x699   : > { %12052 = vst [vmem:[#allocation128_spill] sm:$0xff] %v10381_v54  ;;  %v3736_v60 = vmul.f32 %v12053_v57, %v3727_v37  ;;  %12054 = vst [vmem:[#allocation141_spill] sm:$0xff] %v10386_v30  ;;  %v10403_v40 = vmul.f32 %v10393_v27, %v12025_v7  ;;  %v12057_v57 = vld [vmem:[#allocation299_spill] sm:$0xff]  ;;  %v12058_v30 = vld [vmem:[#allocation101_spill] sm:$0xff]  ;;  %v10412_v25 = vstv %s10313_s23  ;;  %v10419_v2 = vstv %s10321_s24 }
 0x69a   : > { %12051 = vst [vmem:[#allocation63_spill] sm:$0xff] %v10377_v13  ;;  %12055 = vst [vmem:[#allocation269_spill] sm:$0xff] %v10390_v58  ;;  %v4101_v49 = vmul.f32 %v12058_v30, %v3727_v37  ;;  %v12059_v36 = vld [vmem:[#allocation122_spill] sm:$0xff]  ;;  %v12061_v58 = vld [vmem:[#allocation123_spill] sm:$0xff]  ;;  %v10422_v7 = vstv %s10334_s26  ;;  %v4813_v48 = vadd.f32 %v12065_v17, %v4785_v50  ;;  %v10431_v18 = vmul.f32 %v10412_v25, %v9951_v61 }
 0x69b   : > { %v3744_v43 = vadd.f32 %v3736_v60, %v12057_v57  ;;  %v10409_v38 = vmul.f32 %v12059_v36, %v12028_v8  ;;  %v10416_v54 = vmul.f32 %v12061_v58, %v10003_v62  ;;  %v12064_v30 = vld [vmem:[#allocation93_spill] sm:$0xff]  ;;  %v10435_v62 = vmul.f32 %v10419_v2, %v10005_v33  ;;  %v12069_v61 = vld [vmem:[#allocation102_spill] sm:$0xff] }
 0x69c   : > { %v3788_v57 = vmul.f32 %v12064_v30, %v10395_v11  ;;  %v4109_v8 = vadd.f32 %v4101_v49, %v10195_v16  ;;  %12066 = vst [vmem:[#allocation154_spill] sm:$0xff] %v10431_v18  ;;  %v10445_v16 = vld [vmem:[#allocation4 + $0xf9] sm:$0xff]  ;;  %v4153_v17 = vmul.f32 %v12069_v61, %v10395_v11  ;;  %v10451_v13 = vstv %s10357_s12  ;;  %v12075_v18 = vld [vmem:[#allocation352_spill] sm:$0xff] }
 0x69d   : > { %12060 = vst [vmem:[#allocation176_spill] sm:$0xff] %v10409_v38  ;;  %12062 = vst [vmem:[#allocation64_spill] sm:$0xff] %v10416_v54  ;;  %v3771_v60 = vadd.f32 %v12063_v0, %v3744_v43  ;;  %v4466_v0 = vmul.f32 %v10127_v4, %v3727_v37  ;;  %v10443_v43 = vstv %s10342_s11  ;;  %v12068_v49 = vld [vmem:[#allocation158_spill] sm:$0xff]  ;;  %v10454_v33 = vstv %s10369_s28 }
 0x69e   : > { %12067 = vst [vmem:[#allocation65_spill] sm:$0xff] %v10435_v62  ;;  %v4136_v50 = vadd.f32 %v12068_v49, %v4109_v8  ;;  %12070 = vst [vmem:[#allocation185_spill] sm:$0xff] %v10454_v33  ;;  %v10456_v62 = vld [vmem:[#allocation4 + $0xfa] sm:$0xff]  ;;  %v4831_v4 = vmul.f32 %v10393_v27, %v3727_v37  ;;  %v3944_v22 = vmul.f32 %v12074_v9, %v10445_v16 }
 0x69f   : > { %v3796_v30 = vadd.f32 %v3788_v57, %v3771_v60  ;;  %v4474_v54 = vadd.f32 %v4466_v0, %v10262_v44  ;;  %v12072_v60 = vld [vmem:[#allocation94_spill] sm:$0xff]  ;;  %v12073_v8 = vld [vmem:[#allocation95_spill] sm:$0xff]  ;;  %v4518_v44 = vmul.f32 %v10153_v12, %v10395_v11  ;;  %v12081_v12 = vld [vmem:[#allocation38_spill] sm:$0xff] }
 0x6a0   : > { %v3840_v57 = vmul.f32 %v12072_v60, %v10437_v14  ;;  %v3892_v49 = vmul.f32 %v12073_v8, %v10439_v10  ;;  %v10465_v63 = vld [vmem:[#allocation4 + $0xfb] sm:$0xff]  ;;  %v4161_v61 = vadd.f32 %v4153_v17, %v4136_v50  ;;  %v4839_v37 = vadd.f32 %v4831_v4, %v4813_v48  ;;  %v12078_v8 = vld [vmem:[#allocation104_spill] sm:$0xff]  ;;  %v4739_v33 = vld [vmem:[#allocation3 + $0x83] sm:$0xff] }
 0x6a1   : > { %v3823_v52 = vadd.f32 %v12071_v29, %v3796_v30  ;;  %v4501_v35 = vadd.f32 %v12075_v18, %v4474_v54  ;;  %v12076_v29 = vld [vmem:[#allocation97_spill] sm:$0xff]  ;;  %v12077_v60 = vld [vmem:[#allocation47_spill] sm:$0xff]  ;;  %v4205_v42 = vmul.f32 %v12078_v8, %v10437_v14  ;;  %v12080_v18 = vld [vmem:[#allocation351_spill] sm:$0xff] }
 0x6a2   : > { %v3996_v30 = vmul.f32 %v12076_v29, %v10456_v62  ;;  %v4188_v38 = vadd.f32 %v12077_v60, %v4161_v61  ;;  %v12079_v50 = vld [vmem:[#allocation98_spill] sm:$0xff]  ;;  %v4704_v54 = vadd.f32 %v12080_v18, %v10336_v32  ;;  %v12082_v4 = vld [vmem:[#allocation54_spill] sm:$0xff]  ;;  %v4570_v61 = vmul.f32 %v10181_v31, %v10437_v14  ;;  %v12083_v60 = vld [vmem:[#allocation160_spill] sm:$0xff] }
 0x6a3   : > { %v3848_v0 = vadd.f32 %v3840_v57, %v3823_v52  ;;  %v10479_v17 = vmul.f32 %v12079_v50, %v10465_v63  ;;  %v4526_v9 = vadd.f32 %v4518_v44, %v4501_v35  ;;  %v4257_v57 = vmul.f32 %v12082_v4, %v10439_v10 }
 0x6a4   : > { %v4213_v52 = vadd.f32 %v4205_v42, %v4188_v38  ;;  %v6584_v29 = vmov 0   ;;  %v4866_v50 = vadd.f32 %v12084_v15, %v4839_v37  ;;  %v4729_v35 = vadd.f32 %v10361_v5, %v4704_v54  ;;  %v12086_v38 = vld [vmem:[#allocation55_spill] sm:$0xff]  ;;  %v12087_v37 = vld [vmem:[#allocation57_spill] sm:$0xff] }
 0x6a5   : > { %v3875_v48 = vadd.f32 %v12081_v12, %v3848_v0  ;;  %6397 = vset.pattern.permute.xlu0 %v6584_v29  ;;  %v4553_v8 = vadd.f32 %v12083_v60, %v4526_v9  ;;  %v4748_v44 = vmul.f32 %v12043_v19, %v4739_v33  ;;  %6398 = vset.pattern.permute.xlu1 %v6584_v29  ;;  %v12085_v0 = vld [vmem:[#allocation91_spill] sm:$0xff]  ;;  %v12088_v33 = vld [vmem:[#allocation41_spill] sm:$0xff]  ;;  %v12089_v29 = vld [vmem:[#allocation145_spill] sm:$0xff] }
 0x6a6   : > { %v4240_v42 = vadd.f32 %v12085_v0, %v4213_v52  ;;  %v4309_v18 = vmul.f32 %v12086_v38, %v10445_v16  ;;  %v4361_v31 = vmul.f32 %v10045_v46, %v10456_v62  ;;  %v4792_v12 = vld [vmem:[#allocation3 + $0x95] sm:$0xff]  ;;  %v4883_v9 = vmul.f32 %v10412_v25, %v10395_v11 }
 0x6a7   : > { %v3900_v32 = vadd.f32 %v3892_v49, %v3875_v48  ;;  %v4578_v4 = vadd.f32 %v4570_v61, %v4553_v8  ;;  %v4756_v15 = vadd.f32 %v4748_v44, %v4729_v35  ;;  %v4773_v5 = vmul.f32 %v10355_v56, %v12087_v37  ;;  %v12090_v35 = vld [vmem:[#allocation103_spill] sm:$0xff]  ;;  %v12091_v38 = vld [vmem:[#allocation332_spill] sm:$0xff] }
 0x6a8   : > { %v4265_v49 = vadd.f32 %v4257_v57, %v4240_v42  ;;  %v4413_v48 = vmul.f32 %v10067_v53, %v10465_v63  ;;  %v4622_v52 = vmul.f32 %v10216_v23, %v10439_v10  ;;  %v4891_v60 = vadd.f32 %v4883_v9, %v4866_v50 }
 0x6a9   : > { %v3927_v54 = vadd.f32 %v12088_v33, %v3900_v32  ;;  %v4605_v46 = vadd.f32 %v12089_v29, %v4578_v4  ;;  %v4781_v61 = vadd.f32 %v4773_v5, %v4756_v15  ;;  %v4801_v8 = vmul.f32 %v12056_v26, %v4792_v12  ;;  %v4845_v32 = vld [vmem:[#allocation3 + $0x96] sm:$0xff]  ;;  %v4870_v15 = vld [vmem:[#allocation4 + $0x96] sm:$0xff] }
 0x6aa   : > { %v4292_v44 = vadd.f32 %v12090_v35, %v4265_v49  ;;  %v4674_v0 = vmul.f32 %v10257_v24, %v10445_v16  ;;  %v4726_v57 = vmul.f32 %v10309_v34, %v10456_v62  ;;  %v4778_v23 = vmul.f32 %v10355_v56, %v10465_v63  ;;  %v12092_v4 = vld [vmem:[#allocation44_spill] sm:$0xff]  ;;  %v12093_v34 = vld [vmem:[#allocation353_spill] sm:$0xff] }
 0x6ab   : > { %v3952_v11 = vadd.f32 %v3944_v22, %v3927_v54  ;;  %v4630_v53 = vadd.f32 %v4622_v52, %v4605_v46  ;;  %v4809_v42 = vadd.f32 %v4801_v8, %v4781_v61  ;;  %v4827_v50 = vmul.f32 %v10393_v27, %v12091_v38  ;;  %v12094_v5 = vld [vmem:[#allocation357_spill] sm:$0xff]  ;;  %v4949_v38 = vld [vmem:[#allocation3 + $0x98] sm:$0xff] }
 0x6ac   : > { %v4317_v22 = vadd.f32 %v4309_v18, %v4292_v44  ;;  %v4935_v9 = vmul.f32 %v10419_v2, %v10437_v14  ;;  %v4987_v24 = vmul.f32 %v10422_v7, %v10439_v10  ;;  %v4918_v33 = vadd.f32 %v12094_v5, %v4891_v60  ;;  %v10525_v52 = vld [vmem:[#allocation3 + $0x9b] sm:$0xff] }
 0x6ad   : > { %v3979_v12 = vadd.f32 %v12092_v4, %v3952_v11  ;;  %v4657_v37 = vadd.f32 %v12093_v34, %v4630_v53  ;;  %v4835_v54 = vadd.f32 %v4827_v50, %v4809_v42  ;;  %v4854_v49 = vmul.f32 %v12059_v36, %v4845_v32  ;;  %v12095_v46 = vld [vmem:[#allocation105_spill] sm:$0xff]  ;;  %v4897_v14 = vld [vmem:[#allocation3 + $0x97] sm:$0xff]  ;;  %v12097_v32 = vld [vmem:[#allocation134_spill] sm:$0xff] }
 0x6ae   : > { %v4344_v61 = vadd.f32 %v12095_v46, %v4317_v22  ;;  %v10530_v18 = vmul.f32 %v10443_v43, %v10445_v16  ;;  %v12096_v10 = vld [vmem:[#allocation156_spill] sm:$0xff]  ;;  %v10536_v60 = vmul.f32 %v10451_v13, %v10456_v62  ;;  %v4879_v44 = vmul.f32 %v10412_v25, %v4870_v15  ;;  %v4922_v42 = vld [vmem:[#allocation4 + $0x97] sm:$0xff]  ;;  %v12099_v15 = vld [vmem:[#allocation163_spill] sm:$0xff] }
 0x6af   : > { %v4004_v29 = vadd.f32 %v3996_v30, %v3979_v12  ;;  %v4705_v8 = vadd.f32 %v12096_v10, %v10338_v51  ;;  %v4682_v11 = vadd.f32 %v4674_v0, %v4657_v37  ;;  %v4862_v35 = vadd.f32 %v4854_v49, %v4835_v54  ;;  %v12098_v4 = vld [vmem:[#allocation354_spill] sm:$0xff]  ;;  %v12101_v46 = vld [vmem:[#allocation124_spill] sm:$0xff] }
 0x6b0   : > { %v4369_v53 = vadd.f32 %v4361_v31, %v4344_v61  ;;  %v4749_v50 = vmul.f32 %v10525_v52, %v12043_v19  ;;  %v4943_v0 = vadd.f32 %v4935_v9, %v4918_v33  ;;  %v4906_v62 = vmul.f32 %v12061_v58, %v4897_v14  ;;  %v4793_v22 = vld [vmem:[#allocation3 + $0xad] sm:$0xff]  ;;  %v12100_v31 = vld [vmem:[#allocation296_spill] sm:$0xff] }
 0x6b1   : > { %v4031_v30 = vadd.f32 %v12097_v32, %v4004_v29  ;;  %v4730_v16 = vadd.f32 %v10365_v21, %v4705_v8  ;;  %v4709_v51 = vadd.f32 %v12098_v4, %v4682_v11  ;;  %v4887_v12 = vadd.f32 %v4879_v44, %v4862_v35  ;;  %v12102_v10 = vld [vmem:[#allocation172_spill] sm:$0xff]  ;;  %v12104_v44 = vld [vmem:[#allocation162_spill] sm:$0xff] }
 0x6b2   : > { %v4396_v37 = vadd.f32 %v12099_v15, %v4369_v53  ;;  %v4774_v54 = vmul.f32 %v10355_v56, %v12100_v31  ;;  %v4931_v29 = vmul.f32 %v10419_v2, %v4922_v42  ;;  %v4958_v61 = vmul.f32 %v12101_v46, %v4949_v38  ;;  %v5001_v8 = vld [vmem:[#allocation3 + $0x99] sm:$0xff]  ;;  %v4846_v53 = vld [vmem:[#allocation3 + $0xae] sm:$0xff] }
 0x6b3   : > { %v4056_v34 = vadd.f32 %v10479_v17, %v4031_v30  ;;  %v4757_v5 = vadd.f32 %v4749_v50, %v4730_v16  ;;  %v4734_v49 = vadd.f32 %v4726_v57, %v4709_v51  ;;  %v4914_v21 = vadd.f32 %v4906_v62, %v4887_v12  ;;  %v12103_v17 = vld [vmem:[#allocation161_spill] sm:$0xff]  ;;  %v12105_v16 = vld [vmem:[#allocation196_spill] sm:$0xff] }
 0x6b4   : > { %v4421_v33 = vadd.f32 %v4413_v48, %v4396_v37  ;;  %v4802_v11 = vmul.f32 %v12056_v26, %v4793_v22  ;;  %v4970_v32 = vadd.f32 %v12104_v44, %v4943_v0  ;;  %v4983_v57 = vmul.f32 %v10422_v7, %v9943_v47  ;;  %v5053_v50 = vld [vmem:[#allocation3 + $0x9a] sm:$0xff]  ;;  %v12108_v37 = vld [vmem:[#allocation262_spill] sm:$0xff] }
 0x6b5   : > { %v4084_v9 = vadd.f32 %v12102_v10, %v4056_v34  ;;  %v4782_v14 = vadd.f32 %v4774_v54, %v4757_v5  ;;  %v4761_v35 = vadd.f32 %v12103_v17, %v4734_v49  ;;  %v4939_v30 = vadd.f32 %v4931_v29, %v4914_v21  ;;  %v12106_v48 = vld [vmem:[#allocation301_spill] sm:$0xff]  ;;  %v4898_v49 = vld [vmem:[#allocation3 + $0xaf] sm:$0xff] }
 0x6b6   : > { %v4449_v38 = vadd.f32 %v10239_v59, %v4421_v33  ;;  %v4828_v51 = vmul.f32 %v10393_v27, %v12106_v48  ;;  %v12107_v22 = vld [vmem:[#allocation125_spill] sm:$0xff]  ;;  %v5035_v0 = vmul.f32 %v10443_v43, %v9980_v6  ;;  %v4855_v59 = vmul.f32 %v12059_v36, %v4846_v53  ;;  %v12109_v10 = vld [vmem:[#allocation126_spill] sm:$0xff] }
 0x6b7   : > { %v4110_v42 = vadd.f32 %v12105_v16, %v4084_v9  ;;  %v4810_v4 = vadd.f32 %v4802_v11, %v4782_v14  ;;  %v4786_v12 = vadd.f32 %v4778_v23, %v4761_v35  ;;  %v4966_v62 = vadd.f32 %v4958_v61, %v4939_v30  ;;  %v4871_v15 = vld [vmem:[#allocation4 + $0xae] sm:$0xff]  ;;  %v12110_v61 = vld [vmem:[#allocation150_spill] sm:$0xff]  ;;  %v12113_v16 = vld [vmem:[#allocation139_spill] sm:$0xff] }
 0x6b8   : > { %v5010_v34 = vmul.f32 %v12107_v22, %v5001_v8  ;;  %v4475_v5 = vadd.f32 %v10251_v3, %v4449_v38  ;;  %v4995_v21 = vadd.f32 %v4987_v24, %v4970_v32  ;;  %v5062_v9 = vmul.f32 %v12109_v10, %v5053_v50  ;;  %v4923_v11 = vld [vmem:[#allocation4 + $0xaf] sm:$0xff]  ;;  %v10573_v3 = vld [vmem:[#allocation3 + $0xb3] sm:$0xff] }
 0x6b9   : > { %v4137_v47 = vadd.f32 %v12108_v37, %v4110_v42  ;;  %v4836_v54 = vadd.f32 %v4828_v51, %v4810_v4  ;;  %v4991_v29 = vadd.f32 %v4983_v57, %v4966_v62  ;;  %v5087_v23 = vmul.f32 %v10451_v13, %v12048_v28  ;;  %v12111_v24 = vld [vmem:[#allocation127_spill] sm:$0xff]  ;;  %v12112_v30 = vld [vmem:[#allocation248_spill] sm:$0xff]  ;;  %v12114_v38 = vld [vmem:[#allocation129_spill] sm:$0xff] }
 0x6ba   : > { %v4502_v6 = vadd.f32 %v10266_v1, %v4475_v5  ;;  %v4880_v14 = vmul.f32 %v10412_v25, %v4871_v15  ;;  %v4814_v17 = vadd.f32 %v10399_v45, %v4786_v12  ;;  %v5114_v44 = vmul.f32 %v12111_v24, %v10525_v52  ;;  %v4950_v1 = vld [vmem:[#allocation3 + $0xb0] sm:$0xff]  ;;  %v4794_v15 = vld [vmem:[#allocation3 + $0xc5] sm:$0xff] }
 0x6bb   : > { %v4162_v33 = vadd.f32 %v12110_v61, %v4137_v47  ;;  %v4863_v8 = vadd.f32 %v4855_v59, %v4836_v54  ;;  %v5018_v35 = vadd.f32 %v5010_v34, %v4991_v29  ;;  %v4907_v32 = vmul.f32 %v12061_v58, %v4898_v49  ;;  %v12115_v52 = vld [vmem:[#allocation56_spill] sm:$0xff]  ;;  %v4975_v34 = vld [vmem:[#allocation4 + $0xb0] sm:$0xff]  ;;  %v12117_v54 = vld [vmem:[#allocation300_spill] sm:$0xff] }
 0x6bc   : > { %v4527_v57 = vadd.f32 %v10270_v39, %v4502_v6  ;;  %v4706_v42 = vadd.f32 %v12113_v16, %v10344_v20  ;;  %v5022_v50 = vadd.f32 %v12114_v38, %v4995_v21  ;;  %v4932_v45 = vmul.f32 %v10419_v2, %v4923_v11  ;;  %v12118_v49 = vld [vmem:[#allocation306_spill] sm:$0xff]  ;;  %v5002_v61 = vld [vmem:[#allocation3 + $0xb1] sm:$0xff]  ;;  %v12119_v6 = vld [vmem:[#allocation185_spill] sm:$0xff] }
 0x6bd   : > { %v4189_v28 = vadd.f32 %v12112_v30, %v4162_v33  ;;  %v4888_v53 = vadd.f32 %v4880_v14, %v4863_v8  ;;  %v5043_v4 = vadd.f32 %v5035_v0, %v5018_v35  ;;  %v4750_v48 = vmul.f32 %v10573_v3, %v12043_v19  ;;  %v12116_v0 = vld [vmem:[#allocation146_spill] sm:$0xff] }
 0x6be   : > { %v4554_v12 = vadd.f32 %v10279_v41, %v4527_v57  ;;  %v4731_v39 = vadd.f32 %v10373_v55, %v4706_v42  ;;  %v4840_v37 = vadd.f32 %v10403_v40, %v4814_v17  ;;  %v4959_v47 = vmul.f32 %v12101_v46, %v4950_v1  ;;  %v12121_v11 = vld [vmem:[#allocation166_spill] sm:$0xff] }
 0x6bf   : > { %v4214_v51 = vadd.f32 %v12115_v52, %v4189_v28  ;;  %v4915_v62 = vadd.f32 %v4907_v32, %v4888_v53  ;;  %v5070_v20 = vadd.f32 %v5062_v9, %v5043_v4  ;;  %v4775_v5 = vmul.f32 %v10355_v56, %v12116_v0  ;;  %v12120_v9 = vld [vmem:[#allocation151_spill] sm:$0xff]  ;;  %v5027_v32 = vld [vmem:[#allocation4 + $0xb1] sm:$0xff]  ;;  %v12122_v28 = vld [vmem:[#allocation176_spill] sm:$0xff] }
 0x6c0   : > { %v4579_v21 = vadd.f32 %v12118_v49, %v4554_v12  ;;  %v4758_v41 = vadd.f32 %v4750_v48, %v4731_v39  ;;  %v5139_v55 = vmul.f32 %v12119_v6, %v12100_v31  ;;  %v4984_v8 = vmul.f32 %v10422_v7, %v4975_v34  ;;  %v4847_v16 = vld [vmem:[#allocation3 + $0xc6] sm:$0xff]  ;;  %v5054_v4 = vld [vmem:[#allocation3 + $0xb2] sm:$0xff] }
 0x6c1   : > { %v4241_v59 = vadd.f32 %v12117_v54, %v4214_v51  ;;  %v4940_v29 = vadd.f32 %v4932_v45, %v4915_v62  ;;  %v5095_v33 = vadd.f32 %v5087_v23, %v5070_v20  ;;  %v4803_v40 = vmul.f32 %v12056_v26, %v4794_v15  ;;  %v12123_v31 = vld [vmem:[#allocation170_spill] sm:$0xff]  ;;  %v12125_v51 = vld [vmem:[#allocation173_spill] sm:$0xff] }
 0x6c2   : > { %v4606_v17 = vadd.f32 %v12121_v11, %v4579_v21  ;;  %v4783_v30 = vadd.f32 %v4775_v5, %v4758_v41  ;;  %v4867_v57 = vadd.f32 %v12122_v28, %v4840_v37  ;;  %v5047_v53 = vadd.f32 %v10530_v18, %v5022_v50  ;;  %v12124_v48 = vld [vmem:[#allocation59_spill] sm:$0xff]  ;;  %v12126_v50 = vld [vmem:[#allocation58_spill] sm:$0xff]  ;;  %v12134_v28 = vld [vmem:[#allocation171_spill] sm:$0xff] }
 0x6c3   : > { %v4266_v14 = vadd.f32 %v12120_v9, %v4241_v59  ;;  %v4967_v35 = vadd.f32 %v4959_v47, %v4940_v29  ;;  %v5122_v1 = vadd.f32 %v5114_v44, %v5095_v33  ;;  %v5011_v23 = vmul.f32 %v12107_v22, %v5002_v61  ;;  %v4872_v44 = vld [vmem:[#allocation4 + $0xc6] sm:$0xff]  ;;  %v12127_v47 = vld [vmem:[#allocation154_spill] sm:$0xff] }
 0x6c4   : > { %v4811_v45 = vadd.f32 %v4803_v40, %v4783_v30  ;;  %v4829_v52 = vmul.f32 %v10393_v27, %v12124_v48  ;;  %v4631_v12 = vadd.f32 %v12125_v51, %v4606_v17  ;;  %v10611_v62 = vmul.f32 %v12119_v6, %v10465_v63  ;;  %v12128_v54 = vld [vmem:[#allocation358_spill] sm:$0xff]  ;;  %v12130_v40 = vld [vmem:[#allocation283_spill] sm:$0xff] }
 0x6c5   : > { %v4293_v42 = vadd.f32 %v12123_v31, %v4266_v14  ;;  %v4992_v38 = vadd.f32 %v4984_v8, %v4967_v35  ;;  %v5147_v34 = vadd.f32 %v5139_v55, %v5122_v1  ;;  %v5036_v18 = vmul.f32 %v10443_v43, %v5027_v32  ;;  %v4899_v29 = vld [vmem:[#allocation3 + $0xc7] sm:$0xff]  ;;  %v12131_v14 = vld [vmem:[#allocation184_spill] sm:$0xff]  ;;  %v12135_v31 = vld [vmem:[#allocation64_spill] sm:$0xff] }
 0x6c6   : > { %v4837_v37 = vadd.f32 %v4829_v52, %v4811_v45  ;;  %v4856_v20 = vmul.f32 %v12059_v36, %v4847_v16  ;;  %v4892_v5 = vadd.f32 %v12127_v47, %v4867_v57  ;;  %v5074_v59 = vadd.f32 %v12128_v54, %v5047_v53  ;;  %v12129_v63 = vld [vmem:[#allocation278_spill] sm:$0xff]  ;;  %v4924_v17 = vld [vmem:[#allocation4 + $0xc7] sm:$0xff]  ;;  %v12133_v32 = vld [vmem:[#allocation34_spill] sm:$0xff] }
 0x6c7   : > { %v4318_v39 = vadd.f32 %v12126_v50, %v4293_v42  ;;  %v5019_v15 = vadd.f32 %v5011_v23, %v4992_v38  ;;  %v5502_v49 = vmul.f32 -1.442695, %v5147_v34  ;;  %v5063_v21 = vmul.f32 %v12109_v10, %v5054_v4  ;;  %v10621_v8 = vld [vmem:[#allocation3 + $0xcb] sm:$0xff]  ;;  %v10630_v16 = vld [vmem:[#allocation4 + $0xcb] sm:$0xff] }
 0x6c8   : > { %v4864_v33 = vadd.f32 %v4856_v20, %v4837_v37  ;;  %v4881_v55 = vmul.f32 %v10412_v25, %v4872_v44  ;;  %v4658_v9 = vadd.f32 %v12130_v40, %v4631_v12  ;;  %v5088_v11 = vmul.f32 %v10451_v13, %v12131_v14  ;;  %v12132_v35 = vld [vmem:[#allocation174_spill] sm:$0xff]  ;;  %v4795_v50 = vld [vmem:[#allocation3 + $0xdd] sm:$0xff] }
 0x6c9   : > { %v4345_v61 = vadd.f32 %v12129_v63, %v4318_v39  ;;  %v5044_v41 = vadd.f32 %v5036_v18, %v5019_v15  ;;  %6403 = vpow2.f32 %v5502_v49  ;;  %v4707_v30 = vadd.f32 %v12133_v32, %v12132_v35  ;;  %v4951_v4 = vld [vmem:[#allocation3 + $0xc8] sm:$0xff]  ;;  %v12138_v39 = vld [vmem:[#allocation62_spill] sm:$0xff]  ;;  %v4976_v20 = vld [vmem:[#allocation4 + $0xc8] sm:$0xff] }
 0x6ca   : > { %v4889_v1 = vadd.f32 %v4881_v55, %v4864_v33  ;;  %v4908_v23 = vmul.f32 %v12061_v58, %v4899_v29  ;;  %v4919_v42 = vadd.f32 %v12135_v31, %v4892_v5  ;;  %v5115_v38 = vmul.f32 %v12111_v24, %v10573_v3  ;;  %v12136_v45 = vld [vmem:[#allocation63_spill] sm:$0xff]  ;;  %v12139_v5 = vld [vmem:[#allocation240_spill] sm:$0xff]  ;;  %v12141_v14 = vld [vmem:[#allocation297_spill] sm:$0xff] }
 0x6cb   : > { %v4370_v57 = vadd.f32 %v12134_v28, %v4345_v61  ;;  %v5071_v53 = vadd.f32 %v5063_v21, %v5044_v41  ;;  %v4732_v48 = vadd.f32 %v12136_v45, %v4707_v30  ;;  %v4751_v52 = vmul.f32 %v10621_v8, %v12043_v19  ;;  %v12137_v51 = vld [vmem:[#allocation178_spill] sm:$0xff]  ;;  %v12140_v41 = vld [vmem:[#allocation65_spill] sm:$0xff] }
 0x6cc   : > { %v4916_v18 = vadd.f32 %v4908_v23, %v4889_v1  ;;  %v4933_v44 = vmul.f32 %v10419_v2, %v4924_v17  ;;  %v4683_v15 = vadd.f32 %v12138_v39, %v4658_v9  ;;  %v5140_v37 = vmul.f32 %v12119_v6, %v12116_v0  ;;  %v5003_v63 = vld [vmem:[#allocation3 + $0xc9] sm:$0xff]  ;;  %v5028_v40 = vld [vmem:[#allocation4 + $0xc9] sm:$0xff] }
 0x6cd   : > { %v4397_v12 = vadd.f32 %v12137_v51, %v4370_v57  ;;  %v5096_v34 = vadd.f32 %v5088_v11, %v5071_v53  ;;  %v4759_v3 = vadd.f32 %v4751_v52, %v4732_v48  ;;  %v4776_v47 = vmul.f32 %v10630_v16, %v10355_v56  ;;  %v4821_v61 = vld [vmem:[#allocation4 + $0xdd] sm:$0xff]  ;;  %v5080_v28 = vld [vmem:[#allocation4 + $0xca] sm:$0xff] }
 0x6ce   : > { %v4941_v21 = vadd.f32 %v4933_v44, %v4916_v18  ;;  %v4960_v29 = vmul.f32 %v12101_v46, %v4951_v4  ;;  %v4944_v33 = vadd.f32 %v12140_v41, %v4919_v42  ;;  %v10649_v55 = vadd.f32 %v10536_v60, %v5074_v59  ;;  %v5055_v30 = vld [vmem:[#allocation3 + $0xca] sm:$0xff]  ;;  %v4848_v57 = vld [vmem:[#allocation3 + $0xde] sm:$0xff] }
 0x6cf   : > { %v4422_v54 = vadd.f32 %v12139_v5, %v4397_v12  ;;  %v5123_v49 = vadd.f32 %v5115_v38, %v5096_v34  ;;  %v4784_v0 = vadd.f32 %v4776_v47, %v4759_v3  ;;  %v4804_v9 = vmul.f32 %v12056_v26, %v4795_v50  ;;  %v12142_v53 = vld [vmem:[#allocation212_spill] sm:$0xff]  ;;  %v4954_v59 = vld [vmem:[#allocation3 + $0x110] sm:$0xff]  ;;  %v4979_v51 = vld [vmem:[#allocation4 + $0x110] sm:$0xff] }
 0x6d0   : > { %v4968_v35 = vadd.f32 %v4960_v29, %v4941_v21  ;;  %v4985_v32 = vmul.f32 %v10422_v7, %v4976_v20  ;;  %v4710_v1 = vadd.f32 %v12142_v53, %v4683_v15  ;;  %v5012_v23 = vmul.f32 %v12107_v22, %v5003_v63  ;;  %v12143_v42 = vld [vmem:[#allocation60_spill] sm:$0xff]  ;;  %v12144_v39 = vld [vmem:[#allocation112_spill] sm:$0xff]  ;;  %v5031_v29 = vld [vmem:[#allocation4 + $0x111] sm:$0xff] }
 0x6d1   : > { %v4450_v11 = vadd.f32 %v12141_v14, %v4422_v54  ;;  %v5148_v17 = vadd.f32 %v5140_v37, %v5123_v49  ;;  %v4812_v31 = vadd.f32 %v4804_v9, %v4784_v0  ;;  %v4830_v60 = vmul.f32 %v10393_v27, %v4821_v61  ;;  %v4873_v52 = vld [vmem:[#allocation4 + $0xde] sm:$0xff]  ;;  %v4900_v20 = vld [vmem:[#allocation3 + $0xdf] sm:$0xff] }
 0x6d2   : > { %v4993_v45 = vadd.f32 %v4985_v32, %v4968_v35  ;;  %v5037_v48 = vmul.f32 %v10443_v43, %v5028_v40  ;;  %v5064_v12 = vmul.f32 %v12109_v10, %v5055_v30  ;;  %v5089_v34 = vmul.f32 %v10451_v13, %v5080_v28  ;;  %v5006_v50 = vld [vmem:[#allocation3 + $0x111] sm:$0xff]  ;;  %v4952_v30 = vld [vmem:[#allocation3 + $0xe0] sm:$0xff] }
 0x6d3   : > { %v4476_v38 = vadd.f32 %v12143_v42, %v4450_v11  ;;  %v5503_v4 = vmul.f32 -1.442695, %v5148_v17  ;;  %v4838_v18 = vadd.f32 %v4830_v60, %v4812_v31  ;;  %v4857_v44 = vmul.f32 %v12059_v36, %v4848_v57  ;;  %v12145_v47 = vld [vmem:[#allocation128_spill] sm:$0xff]  ;;  %v4925_v0 = vld [vmem:[#allocation4 + $0xdf] sm:$0xff]  ;;  %v12147_v28 = vld [vmem:[#allocation113_spill] sm:$0xff] }
 0x6d4   : > { %v5020_v37 = vadd.f32 %v5012_v23, %v4993_v45  ;;  %v4963_v3 = vmul.f32 %v12101_v46, %v4954_v59  ;;  %v4735_v5 = vadd.f32 %v12145_v47, %v4710_v1  ;;  %v4882_v49 = vmul.f32 %v10412_v25, %v4873_v52  ;;  %v12146_v61 = vld [vmem:[#allocation340_spill] sm:$0xff]  ;;  %v10674_v60 = vld [vmem:[#allocation4 + $0x113] sm:$0xff] }
 0x6d5   : > { %v4503_v15 = vadd.f32 %v12144_v39, %v4476_v38  ;;  %6405 = vpow2.f32 %v5503_v4  ;;  %v4865_v54 = vadd.f32 %v4857_v44, %v4838_v18  ;;  %v4988_v21 = vmul.f32 %v10422_v7, %v4979_v51  ;;  %v5058_v31 = vld [vmem:[#allocation3 + $0x112] sm:$0xff]  ;;  %v12148_v59 = vld [vmem:[#allocation269_spill] sm:$0xff]  ;;  %v12149_v4 = vld [vmem:[#allocation130_spill] sm:$0xff] }
 0x6d6   : > { %v6404_v63 = vpop.eup %6403  ;;  %v5045_v40 = vadd.f32 %v5037_v48, %v5020_v37  ;;  %v4971_v9 = vadd.f32 %v4963_v3, %v4944_v33  ;;  %v5015_v14 = vmul.f32 %v12107_v22, %v5006_v50  ;;  %v5116_v17 = vmul.f32 %v12111_v24, %v10621_v8  ;;  %v4798_v33 = vld [vmem:[#allocation3 + $0x125] sm:$0xff]  ;;  %v4977_v51 = vld [vmem:[#allocation4 + $0xe0] sm:$0xff]  ;;  %v12150_v3 = vld [vmem:[#allocation116_spill] sm:$0xff] }
 0x6d7   : > { %v4528_v41 = vadd.f32 %v12146_v61, %v4503_v15  ;;  %v5179_v11 = vadd.f32 1.0, %v6404_v63  ;;  %v4890_v35 = vadd.f32 %v4882_v49, %v4865_v54  ;;  %v4909_v32 = vmul.f32 %v12061_v58, %v4900_v20  ;;  %v4824_v18 = vld [vmem:[#allocation4 + $0x125] sm:$0xff]  ;;  %v5004_v50 = vld [vmem:[#allocation3 + $0xe1] sm:$0xff] }
 0x6d8   : > { %v5072_v53 = vadd.f32 %v5064_v12, %v5045_v40  ;;  %v4996_v1 = vadd.f32 %v4988_v21, %v4971_v9  ;;  %v5040_v23 = vmul.f32 %v10443_v43, %v5031_v29  ;;  %v4762_v42 = vadd.f32 %v12148_v59, %v4735_v5  ;;  %v5083_v15 = vld [vmem:[#allocation4 + $0x112] sm:$0xff]  ;;  %v5029_v63 = vld [vmem:[#allocation4 + $0xe1] sm:$0xff] }
 0x6d9   : > { %v4555_v57 = vadd.f32 %v12147_v28, %v4528_v41  ;;  %6407 = vrcp.f32 %v5179_v11  ;;  %v4917_v38 = vadd.f32 %v4909_v32, %v4890_v35  ;;  %v4934_v8 = vmul.f32 %v10419_v2, %v4925_v0  ;;  %v4851_v49 = vld [vmem:[#allocation3 + $0x126] sm:$0xff]  ;;  %v12151_v40 = vld [vmem:[#allocation61_spill] sm:$0xff] }
 0x6da   : > { %v5097_v48 = vadd.f32 %v5089_v34, %v5072_v53  ;;  %v4961_v52 = vmul.f32 %v12101_v46, %v4952_v30  ;;  %v5023_v12 = vadd.f32 %v5015_v14, %v4996_v1  ;;  %v5067_v39 = vmul.f32 %v12109_v10, %v5058_v31  ;;  %v5056_v11 = vld [vmem:[#allocation3 + $0xe2] sm:$0xff]  ;;  %v4876_v35 = vld [vmem:[#allocation4 + $0x126] sm:$0xff] }
 0x6db   : > { %v4580_v45 = vadd.f32 %v12149_v4, %v4555_v57  ;;  %v4942_v44 = vadd.f32 %v4934_v8, %v4917_v38  ;;  %v4779_v37 = vmul.f32 %v10674_v60, %v10355_v56  ;;  %v4807_v20 = vmul.f32 %v12056_v26, %v4798_v33  ;;  %v5110_v30 = vld [vmem:[#allocation3 + $0x113] sm:$0xff]  ;;  %v12152_v53 = vld [vmem:[#allocation117_spill] sm:$0xff] }
 0x6dc   : > { %v5124_v5 = vadd.f32 %v5116_v17, %v5097_v48  ;;  %v5141_v34 = vmul.f32 %v12119_v6, %v10630_v16  ;;  %v5048_v54 = vadd.f32 %v5040_v23, %v5023_v12  ;;  %v4986_v29 = vmul.f32 %v10422_v7, %v4977_v51  ;;  %v12153_v33 = vld [vmem:[#allocation359_spill] sm:$0xff]  ;;  %v12154_v51 = vld [vmem:[#allocation181_spill] sm:$0xff] }
 0x6dd   : > { %v4607_v47 = vadd.f32 %v12150_v3, %v4580_v45  ;;  %v4969_v21 = vadd.f32 %v4961_v52, %v4942_v44  ;;  %v4787_v61 = vadd.f32 %v4779_v37, %v4762_v42  ;;  %v4833_v41 = vmul.f32 %v10393_v27, %v4824_v18  ;;  %v4903_v42 = vld [vmem:[#allocation3 + $0x127] sm:$0xff]  ;;  %v5081_v45 = vld [vmem:[#allocation4 + $0xe2] sm:$0xff]  ;;  %v10704_v3 = vld [vmem:[#allocation4 + $0x12b] sm:$0xff] }
 0x6de   : > { %v5149_v9 = vadd.f32 %v5141_v34, %v5124_v5  ;;  %v5013_v14 = vmul.f32 %v12107_v22, %v5004_v50  ;;  %v5092_v17 = vmul.f32 %v10451_v13, %v5083_v15  ;;  %v5075_v16 = vadd.f32 %v5067_v39, %v5048_v54  ;;  %v4928_v50 = vld [vmem:[#allocation4 + $0x127] sm:$0xff]  ;;  %v10701_v39 = vld [vmem:[#allocation3 + $0x12b] sm:$0xff] }
 0x6df   : > { %v4632_v0 = vadd.f32 %v12151_v40, %v4607_v47  ;;  %v4994_v32 = vadd.f32 %v4986_v29, %v4969_v21  ;;  %v4815_v28 = vadd.f32 %v4807_v20, %v4787_v61  ;;  %v4860_v57 = vmul.f32 %v12059_v36, %v4851_v49  ;;  %v4955_v34 = vld [vmem:[#allocation3 + $0x128] sm:$0xff]  ;;  %v12155_v54 = vld [vmem:[#allocation120_spill] sm:$0xff] }
 0x6e0   : > { %v5504_v23 = vmul.f32 -1.442695, %v5149_v9  ;;  %v5038_v31 = vmul.f32 %v10443_v43, %v5029_v63  ;;  %v5126_v59 = vadd.f32 %v12153_v33, %v10649_v55  ;;  %v5065_v4 = vmul.f32 %v12109_v10, %v5056_v11  ;;  %v5133_v29 = vld [vmem:[#allocation4 + $0xe3] sm:$0xff]  ;;  %v4799_v40 = vld [vmem:[#allocation3 + $0x13d] sm:$0xff]  ;;  %v12156_v9 = vld [vmem:[#allocation298_spill] sm:$0xff] }
 0x6e1   : > { %v4659_v1 = vadd.f32 %v12152_v53, %v4632_v0  ;;  %v5021_v8 = vadd.f32 %v5013_v14, %v4994_v32  ;;  %v4841_v48 = vadd.f32 %v4833_v41, %v4815_v28  ;;  %v4885_v52 = vmul.f32 %v10412_v25, %v4876_v35 }
 0x6e2   : > { %v6406_v38 = vpop.eup %6405  ;;  %6409 = vpow2.f32 %v5504_v23  ;;  %v5119_v44 = vmul.f32 %v12111_v24, %v5110_v30  ;;  %v5100_v55 = vadd.f32 %v5092_v17, %v5075_v16  ;;  %v4912_v20 = vmul.f32 %v12061_v58, %v4903_v42  ;;  %v12157_v17 = vld [vmem:[#allocation141_spill] sm:$0xff] }
 0x6e3   : > { %v4684_v12 = vadd.f32 %v12154_v51, %v4659_v1  ;;  %v5180_v18 = vadd.f32 1.0, %v6406_v38  ;;  %v5046_v15 = vadd.f32 %v5038_v31, %v5021_v8  ;;  %v4868_v37 = vadd.f32 %v4860_v57, %v4841_v48  ;;  %v4825_v57 = vld [vmem:[#allocation4 + $0x13d] sm:$0xff]  ;;  %v4852_v38 = vld [vmem:[#allocation3 + $0x13e] sm:$0xff] }
 0x6e4   : > { %v5090_v47 = vmul.f32 %v10451_v13, %v5081_v45  ;;  %v5151_v5 = vadd.f32 %v10611_v62, %v5126_v59  ;;  %v4937_v61 = vmul.f32 %v10419_v2, %v4928_v50  ;;  %v4755_v41 = vmul.f32 %v10701_v39, %v12043_v19  ;;  %v4980_v62 = vld [vmem:[#allocation4 + $0x128] sm:$0xff]  ;;  %v5007_v1 = vld [vmem:[#allocation3 + $0x129] sm:$0xff] }
 0x6e5   : > { %6411 = vrcp.f32 %v5180_v18  ;;  %v4711_v49 = vadd.f32 %v12155_v54, %v4684_v12  ;;  %v5073_v21 = vadd.f32 %v5065_v4, %v5046_v15  ;;  %v4893_v63 = vadd.f32 %v4885_v52, %v4868_v37  ;;  %v4877_v12 = vld [vmem:[#allocation4 + $0x13e] sm:$0xff]  ;;  %v4904_v37 = vld [vmem:[#allocation3 + $0x13f] sm:$0xff] }
 0x6e6   : > { %v6408_v0 = vpop.eup %6407  ;;  %v5117_v14 = vmul.f32 %v12111_v24, %v12156_v9  ;;  %v5144_v11 = vmul.f32 %v12119_v6, %v10674_v60  ;;  %v4780_v32 = vmul.f32 %v10704_v3, %v10355_v56  ;;  %v5127_v30 = vadd.f32 %v5119_v44, %v5100_v55  ;;  %v5032_v56 = vld [vmem:[#allocation4 + $0x129] sm:$0xff]  ;;  %v5059_v18 = vld [vmem:[#allocation3 + $0x12a] sm:$0xff] }
 0x6e7   : > { %v4736_v35 = vadd.f32 %v12157_v17, %v4711_v49  ;;  %5205 = vperm.xlu0 %6397, %v6408_v0   ;;  %v5098_v16 = vadd.f32 %v5090_v47, %v5073_v21  ;;  %v4920_v28 = vadd.f32 %v4912_v20, %v4893_v63  ;;  %v4964_v19 = vmul.f32 %v12101_v46, %v4955_v34  ;;  %v4929_v49 = vld [vmem:[#allocation4 + $0x13f] sm:$0xff]  ;;  %v4956_v0 = vld [vmem:[#allocation3 + $0x140] sm:$0xff] }
 0x6e8   : > { %v5142_v53 = vmul.f32 %v12119_v6, %v5133_v29  ;;  %v4808_v31 = vmul.f32 %v12056_v26, %v4799_v40  ;;  %v5506_v33 = vmul.f32 -1.442695, %v5151_v5  ;;  %v4989_v42 = vmul.f32 %v10422_v7, %v4980_v62  ;;  %v4981_v62 = vld [vmem:[#allocation4 + $0x140] sm:$0xff] }
 0x6e9   : > { %v4763_v23 = vadd.f32 %v4755_v41, %v4736_v35  ;;  %v5125_v60 = vadd.f32 %v5117_v14, %v5098_v16  ;;  %v4945_v59 = vadd.f32 %v4937_v61, %v4920_v28  ;;  %v4834_v4 = vmul.f32 %v10393_v27, %v4825_v57  ;;  %v12158_v41 = vld [vmem:[#allocation307_spill] sm:$0xff]  ;;  %v5008_v16 = vld [vmem:[#allocation3 + $0x141] sm:$0xff] }
 0x6ea   : > { %v5152_v48 = vadd.f32 %v5144_v11, %v5127_v30  ;;  %v5016_v51 = vmul.f32 %v12107_v22, %v5007_v1  ;;  %v4861_v26 = vmul.f32 %v12059_v36, %v4852_v38  ;;  %6413 = vpow2.f32 %v5506_v33  ;;  %v5033_v57 = vld [vmem:[#allocation4 + $0x141] sm:$0xff] }
 0x6eb   : > { %v4788_v8 = vadd.f32 %v4780_v32, %v4763_v23  ;;  %v5150_v45 = vadd.f32 %v5142_v53, %v5125_v60  ;;  %v4972_v52 = vadd.f32 %v4964_v19, %v4945_v59  ;;  %v5041_v55 = vmul.f32 %v10443_v43, %v5032_v56  ;;  %v5060_v23 = vld [vmem:[#allocation3 + $0x142] sm:$0xff]  ;;  %v5085_v33 = vld [vmem:[#allocation4 + $0x142] sm:$0xff] }
 0x6ec   : > { %v4886_v47 = vmul.f32 %v10412_v25, %v4877_v12  ;;  %v5507_v5 = vmul.f32 -1.442695, %v5152_v48  ;;  %v5068_v54 = vmul.f32 %v12109_v10, %v5059_v18  ;;  %v4913_v36 = vmul.f32 %v12061_v58, %v4904_v37 }
 0x6ed   : > { %v4816_v44 = vadd.f32 %v4808_v31, %v4788_v8  ;;  %v5505_v50 = vmul.f32 -1.442695, %v5150_v45  ;;  %v4997_v15 = vadd.f32 %v4989_v42, %v4972_v52  ;;  %v5093_v40 = vmul.f32 %v10451_v13, %v12158_v41  ;;  %v5137_v45 = vld [vmem:[#allocation4 + $0x143] sm:$0xff] }
 0x6ee   : > { %v4938_v9 = vmul.f32 %v10419_v2, %v4929_v49  ;;  %v5120_v11 = vmul.f32 %v12111_v24, %v10701_v39  ;;  %v4965_v58 = vmul.f32 %v12101_v46, %v4956_v0  ;;  %v5145_v32 = vmul.f32 %v12119_v6, %v10704_v3 }
 0x6ef   : > { %v4842_v20 = vadd.f32 %v4834_v4, %v4816_v44  ;;  %v6410_v27 = vpop.eup %6409  ;;  %6415 = vpow2.f32 %v5505_v50  ;;  %v5024_v34 = vadd.f32 %v5016_v51, %v4997_v15  ;;  %v4990_v28 = vmul.f32 %v10422_v7, %v4981_v62  ;;  %v5112_v7 = vld [vmem:[#allocation3 + $0x143] sm:$0xff] }
 0x6f0   : > { %v5181_v21 = vadd.f32 1.0, %v6410_v27  ;;  %v5017_v53 = vmul.f32 %v12107_v22, %v5008_v16  ;;  %v5042_v60 = vmul.f32 %v10443_v43, %v5033_v57  ;;  %v5069_v3 = vmul.f32 %v12109_v10, %v5060_v23 }
 0x6f1   : > { %v4869_v29 = vadd.f32 %v4861_v26, %v4842_v20  ;;  %v5049_v61 = vadd.f32 %v5041_v55, %v5024_v34  ;;  %v5094_v4 = vmul.f32 %v10451_v13, %v5085_v33  ;;  %v5121_v43 = vmul.f32 %v12111_v24, %v5112_v7 }
 0x6f2   : > { %v6412_v63 = vpop.eup %6411  ;;  %6417 = vrcp.f32 %v5181_v21  ;;  %v5146_v12 = vmul.f32 %v12119_v6, %v5137_v45  ;;  %v12177_v45 = vld [vmem:[#allocation33_spill] sm:$0xff] }
 0x6f3   : > { %5210 = vperm.xlu1 %6398, %v6412_v63   ;;  %v4894_v25 = vadd.f32 %v4886_v47, %v4869_v29  ;;  %6419 = vpow2.f32 %v5507_v5  ;;  %v5076_v14 = vadd.f32 %v5068_v54, %v5049_v61  ;;  %v12160_v5 = vld [vmem:[#allocation40_spill] sm:$0xff]  ;;  %v12161_v54 = vld [vmem:[#allocation26_spill] sm:$0xff]  ;;  %v12163_v61 = vld [vmem:[#allocation27_spill] sm:$0xff] }
 0x6f5   : > { %v4921_v17 = vadd.f32 %v4913_v36, %v4894_v25  ;;  %v5101_v35 = vadd.f32 %v5093_v40, %v5076_v14  ;;  %v12162_v36 = vld [vmem:[#allocation43_spill] sm:$0xff]  ;;  %v12165_v14 = vld [vmem:[#allocation28_spill] sm:$0xff] }
 0x6f6   : > { %v12164_v25 = vld [vmem:[#allocation39_spill] sm:$0xff] }
 0x6f7   : > { %v4946_v30 = vadd.f32 %v4938_v9, %v4921_v17  ;;  %v5128_v19 = vadd.f32 %v5120_v11, %v5101_v35  ;;  %v6414_v39 = vpop.eup %6413 }
 0x6f8   : > { %v5183_v56 = vadd.f32 1.0, %v6414_v39  ;;  %v12171_v39 = vld [vmem:[#allocation48_spill] sm:$0xff] }
 0x6f9   : > { %v4973_v2 = vadd.f32 %v4965_v58, %v4946_v30  ;;  %v5153_v1 = vadd.f32 %v5145_v32, %v5128_v19  ;;  %v12166_v58 = vld [vmem:[#allocation42_spill] sm:$0xff]  ;;  %v12167_v32 = vld [vmem:[#allocation29_spill] sm:$0xff] }
 0x6fa   : > { %v12168_v19 = vld [vmem:[#allocation45_spill] sm:$0xff] }
 0x6fb   : > { %v4998_v31 = vadd.f32 %v4990_v28, %v4973_v2  ;;  %v5508_v46 = vmul.f32 -1.442695, %v5153_v1  ;;  %v12169_v2 = vld [vmem:[#allocation30_spill] sm:$0xff] }
 0x6fc   : > { %v6416_v59 = vpop.eup %6415 }
 0x6fd   : > { %v5025_v42 = vadd.f32 %v5017_v53, %v4998_v31  ;;  %v5182_v38 = vadd.f32 1.0, %v6416_v59  ;;  %6421 = vpow2.f32 %v5508_v46 }
 0x6ff   : > { %v5050_v8 = vadd.f32 %v5042_v60, %v5025_v42  ;;  %v6418_v22 = vpop.eup %6417  ;;  %6423 = vrcp.f32 %v5182_v38  ;;  %v12172_v60 = vld [vmem:[#allocation31_spill] sm:$0xff]  ;;  %v12173_v42 = vld [vmem:[#allocation50_spill] sm:$0xff]  ;;  %v12174_v38 = vld [vmem:[#allocation32_spill] sm:$0xff] }
 0x700   : > { %v6420_v48 = vpop.eup %6419  ;;  %5215 = vperm.xlu1 %6398, %v6418_v22   ;;  %6425 = vrcp.f32 %v5183_v56 }
 0x701   : > { %v5077_v52 = vadd.f32 %v5069_v3, %v5050_v8  ;;  %v5184_v10 = vadd.f32 1.0, %v6420_v48 }
 0x703   : > { %v5102_v51 = vadd.f32 %v5094_v4, %v5077_v52  ;;  %6427 = vrcp.f32 %v5184_v10  ;;  %v12176_v4 = vld [vmem:[#allocation52_spill] sm:$0xff] }
 0x705   : > { %v5129_v18 = vadd.f32 %v5121_v43, %v5102_v51 }
 0x707   : > { %v5154_v44 = vadd.f32 %v5146_v12, %v5129_v18 }
 0x709   : > { %v5509_v26 = vmul.f32 -1.442695, %v5154_v44 }
 0x70a   : > { %v6422_v50 = vpop.eup %6421 }
 0x70b   : > { %6429 = vpow2.f32 %v5509_v26  ;;  %v5185_v13 = vadd.f32 1.0, %v6422_v50 }
 0x70c   : > { %v6424_v15 = vpop.eup %6423 }
 0x70d   : > { %5220 = vperm.xlu1 %6398, %v6424_v15   ;;  %6431 = vrcp.f32 %v5185_v13  ;;  %v6426_v55 = vpop.eup %6425 }
 0x710   : > { %v6428_v24 = vpop.eup %6427 }
 0x711   : > { %5225 = vperm.xlu1 %6398, %v6426_v55  }
 0x715   : > { %5230 = vperm.xlu1 %6398, %v6428_v24  }
 0x718   : > { %v6430_v37 = vpop.eup %6429 }
 0x719   : > { %v5186_v20 = vadd.f32 1.0, %v6430_v37 }
 0x71a   : > { %v6432_v6 = vpop.eup %6431 }
 0x71b   : > { %6433 = vrcp.f32 %v5186_v20  ;;  %5235 = vperm.xlu1 %6398, %v6432_v6  }
 0x728   : > { %v6434_v47 = vpop.eup %6433 }
 0x729   : > { %5240 = vperm.xlu1 %6398, %v6434_v47  }
 0x762   : > { %v5206_v27 = vpop.permute.xlu0 %5205 }
 0x763   : > { %v5243_v34 = vmul.f32 %v5206_v27, %v12160_v5 }
 0x765   : > { %v5251_v49 = vadd.f32 %v5243_v34, %v12161_v54 }
 0x767   : > { %v5259_v21 = vmax.f32 %v5251_v49, 0.0 }
 0x769   : > { %5267 = vst.msk [vmem:[%s10750_s20] sm:$0xff] %vm526_vm0, %v5259_v21 }
 0x76e   : > { %v5211_v29 = vpop.permute.xlu1 %5210 }
 0x76f   : > { %v5244_v63 = vmul.f32 %v5211_v29, %v12162_v36 }
 0x771   : > { %v5252_v41 = vadd.f32 %v5244_v63, %v12163_v61 }
 0x773   : > { %v5260_v40 = vmax.f32 %v5252_v41, 0.0 }
 0x775   : > { %5268 = vst.msk [vmem:[%s10750_s20 + $0x8] sm:$0xff] %vm526_vm0, %v5260_v40 }
 0x77b   : > { %v5216_v0 = vpop.permute.xlu1 %5215 }
 0x77c   : > { %v5245_v9 = vmul.f32 %v5216_v0, %v12164_v25 }
 0x77e   : > { %v5253_v11 = vadd.f32 %v5245_v9, %v12165_v14 }
 0x780   : > { %v5261_v62 = vmax.f32 %v5253_v11, 0.0 }
 0x782   : > { %5269 = vst.msk [vmem:[%s10750_s20 + $0x10] sm:$0xff] %vm526_vm0, %v5261_v62 }
 0x788   : > { %v5221_v17 = vpop.permute.xlu1 %5220 }
 0x789   : > { %v5246_v35 = vmul.f32 %v5221_v17, %v12166_v58 }
 0x78b   : > { %v5254_v16 = vadd.f32 %v5246_v35, %v12167_v32 }
 0x78c   : > { %v5226_v30 = vpop.permute.xlu1 %5225 }
 0x78d   : > { %v5262_v28 = vmax.f32 %v5254_v16, 0.0  ;;  %v5247_v57 = vmul.f32 %v5226_v30, %v12168_v19 }
 0x78f   : > { %5270 = vst.msk [vmem:[%s10750_s20 + $0x18] sm:$0xff] %vm526_vm0, %v5262_v28  ;;  %v5255_v53 = vadd.f32 %v5247_v57, %v12169_v2 }
 0x790   : > { %v5231_v1 = vpop.permute.xlu1 %5230 }
 0x791   : > { %v5263_v23 = vmax.f32 %v5255_v53, 0.0  ;;  %v5248_v31 = vmul.f32 %v5231_v1, %v12171_v39 }
 0x793   : > { %5271 = vst.msk [vmem:[%s10750_s20 + $0x20] sm:$0xff] %vm526_vm0, %v5263_v23  ;;  %v5256_v46 = vadd.f32 %v5248_v31, %v12172_v60 }
 0x795   : > { %v5264_v33 = vmax.f32 %v5256_v46, 0.0 }
 0x796   : > { %v5236_v59 = vpop.permute.xlu1 %5235 }
 0x797   : > { %5272 = vst.msk [vmem:[%s10750_s20 + $0x28] sm:$0xff] %vm526_vm0, %v5264_v33  ;;  %v5249_v3 = vmul.f32 %v5236_v59, %v12173_v42 }
 0x799   : > { %v5257_v56 = vadd.f32 %v5249_v3, %v12174_v38 }
 0x79b   : > { %v5265_v7 = vmax.f32 %v5257_v56, 0.0 }
 0x79d   : > { %5273 = vst.msk [vmem:[%s10750_s20 + $0x30] sm:$0xff] %vm526_vm0, %v5265_v7 }
 0x7a4   : > { %v5241_v8 = vpop.permute.xlu1 %5240 }
 0x7a5   : > { %v5250_v22 = vmul.f32 %v5241_v8, %v12176_v4 }
 0x7a7   : > { %v5258_v48 = vadd.f32 %v5250_v22, %v12177_v45 }
 0x7a9   : > { %v5266_v52 = vmax.f32 %v5258_v48, 0.0 }
 0x7ab   : > { %5274 = vst.msk [vmem:[%s10750_s20 + $0x38] sm:$0xff] %vm526_vm0, %v5266_v52 }
 0x7ac   : > { %6516 = shalt.err (!%p6513_p1)
}
 0x7ad   : > { %s6517_s10 = scalar_lea.hbm %s10785_s3, 1024  ;;  %s6521_s15 = scalar_lea.hbm %s12178_s2, 2048 }
 0x7ae   : > { %p6518_p13 = scmp.ne.s32.totalorder %s10785_s3, %s6517_s10  ;;  %p6522_p4 = scmp.lt.s32.totalorder %s10785_s3, %s12178_s2 }
 0x7af   : > { %p6523_p12 = scmp.lt.s32.totalorder %s6521_s15, %s6517_s10 }
 0x7b0   : > { %p6519_p3 = pnand %p6518_p13, %p6681_p5 }
 0x7b1   : > { %p6524_p10 = por %p6523_p12, %p6522_p4 }
 0x7b2   : > { %p6520_p2 = pneg %p6519_p3 }
 0x7b4   : > { %p6525_p7 = pnand %p6524_p10, %p6520_p2 }
 0x7b6   : > { %6528 = shalt.err (!%p6525_p7)
}
 0x7b7   : > { %s6586_s19 = smov 128   ;;  %s6587_s22 = smov 8  }
 0x7b8   : > { %6332 = dma.vmem_to_hbm [thread:$0]  (%p6681_p5), %s10787_s30, 1024, %s10785_s3, %s10793_s4, %s6586_s19, %s6586_s19, %s6587_s22  }
 0x7b9 PF: > { %s12179_s23 = sld [smem:[#allocation20_spill]] }
 0x7ba   : > { %s12180_s24 = sld [smem:[#allocation17_spill]] }
 0x7bb   : > { %s12181_s26 = sld [smem:[#allocation25_spill]] }
 0x7bf   : > { %p6354_p8 = scmp.ge.s32.totalorder %s12179_s23, 2 }
 0x7c0   : > { %s5304_s11 = sand.u32 1, %s12180_s24  }
 0x7c1   : > { %p12182_p6 = scmp.ne.s32.totalorder %s12181_s26, 0  ;;  %s5305_s12 = scalar_lea.sflag [#allocation7], %s5304_s11 }
 0x7c3   : > { %p6345_p9 = pnand %p6354_p8, %p12182_p6 }
 0x7c5   : > { %p6346_p11 = pneg %p6345_p9 }
 0x7c7   : > { %6558 = dma.done.wait (%p6346_p11), %s5305_s12, 1024  }
 0x7c8   : > { %6560 = vsyncadd (%p6346_p11), %s5305_s12, 4294966272  ;;  %s12183_s16 = sld [smem:[#allocation22_spill]] }
 0x7c9   : > { %s12184_s13 = sld [smem:[#allocation18_spill]] }
 0x7ca   : > { %s12185_s14 = sld [smem:[#allocation19_spill]] }
 0x7cb   : > { %s12186_s15 = sld [smem:[#allocation23_spill]] }
 0x7ce   : > { %p23_p0 = scmp.ge.s32.totalorder %s12183_s16, 4  }
 0x7d0   :  { %25 = sbr.rel (!%p23_p0) target bundleno = 18 (0x12), region = 127 }
 0x7d5   :  { %5310 = vsyncpa [#allocation6], 1 }
 0x7d6   :  { %5312 = vsyncpa [#allocation6 + $0x1], 1 }
 0x7d7   :  { %5313 = vsyncpa [#allocation10], 1 }
 0x7d8   :  { %5314 = vsyncpa [#allocation7], 1 }
 0x7d9   :  { %5316 = vsyncpa [#allocation7 + $0x1], 1 }
 0x7da   :  { %5317 = vsyncpa [#allocation8], 1 }
 0x7db   :  { %5319 = vsyncpa [#allocation8 + $0x1], 1 }

</bundles_post_ra>
